<compile_context>
chip_gen: v6e
topology: v6e:2x2x1
jax: 0.10.0
libtpu: 0.0.40
codegen_flags: <defaults>
</compile_context>

<pallas_src>
import numpy as np
import jax
import jax.numpy as jnp
from jax.experimental import pallas as pl
from jax.experimental.pallas import tpu as pltpu

H = W = 14            # spatial size implied by fc1 = Linear(64*7*7, 128) + one 2x2 pool
PH = PW = 16          # zero-padded grid (conv 'same' padding ring included)
C1, C2 = 32, 64
FC1_IN = C2 * 7 * 7   # 3136
FC1_OUT, NCLASS = 128, 10
L1 = PW * C1          # 512  h1 lanes   : (jp, ci)
K2 = 3 * L1           # 1536 conv2 GEMM K : (ky, jp_in, ci)
N2 = H * C2           # 896  conv2 out lanes : (pj, parity, co), jp_out = 2*pj+1+parity
LP = N2 - C2          # 832  column-pooled lanes : value for pj at lane pj*128 + co


# ---------------------------------------------------------------------------
# Fused Pallas kernel: whole forward pass for one batch tile, all in VMEM.
# Row index r = ip*tb + b  (ip = padded-grid row, b = sample within the tile).
# ---------------------------------------------------------------------------
def _fused_cnn_kernel(x_ref, w1_ref, b1_ref, w2_ref, b2_ref,
                      wf1_ref, bf1_ref, wf2_ref, bf2_ref,
                      out_ref, lhs2_ref):
    # x_ref   : (nr, 16)        f32   zero-padded image, rows = (ip, b)
    # w1_ref  : (48, 512)       f32   conv1 banded weight (ky, jj) x (jp, c); ring cols zero
    # b1_ref  : (1, 512)        f32
    # w2_ref  : (1536, 896)     bf16  conv2 banded weight (ky, jj, ci) x (pj, parity, co)
    # b2_ref  : (1, 896)        f32
    # wf1_ref : (7, 832, 128)   bf16  fc1 weight per pooled row pi, lanes (pj*128 + co)
    # bf1_ref : (1, 128)  f32        wf2_ref: (128, 10) bf16    bf2_ref: (1, 10) f32
    # out_ref : (tb, 10)        f32
    # lhs2_ref: (nr, 1536)      bf16  scratch: banded-im2col lhs for conv2
    nr = x_ref.shape[0]
    tb = nr // PH
    f32 = jnp.float32
    bf16 = jnp.bfloat16

    # ---- conv1 : single banded MXU GEMM -------------------------------------------
    # lhs lanes = (ky, jj): x at rows ip-1, ip, ip+1 (row shifts of +-tb, zeros shifted in).
    x = x_ref[...]
    z16 = jnp.zeros((tb, PW), f32)
    x_up = jnp.concatenate([z16, x[:nr - tb, :]], axis=0)      # x(ip-1, :)
    x_dn = jnp.concatenate([x[tb:, :], z16], axis=0)           # x(ip+1, :)
    lhs1 = jnp.concatenate([x_up, x, x_dn], axis=1)            # (nr, 48)
    h1 = jnp.dot(lhs1, w1_ref[...], preferred_element_type=f32) + b1_ref[...]
    h1 = jnp.maximum(h1, 0.0)
    # ring columns (jp=0,15) are already exactly zero (zero weight columns + zero bias);
    # zero the ring rows (ip=0,15) so conv2 sees proper 'same' zero padding.
    ring = jnp.concatenate([jnp.zeros((tb, 1), f32),
                            jnp.ones((nr - 2 * tb, 1), f32),
                            jnp.zeros((tb, 1), f32)], axis=0)
    h1 = (h1 * ring).astype(bf16)                              # (nr, 512)

    # ---- conv2 : build banded-im2col lhs with 3 aligned slab stores, ONE GEMM ------
    zl1 = jnp.zeros((tb, L1), bf16)
    lhs2_ref[:, 0:L1] = jnp.concatenate([zl1, h1[:nr - tb, :]], axis=0)   # ky=0 (ip-1)
    lhs2_ref[:, L1:2 * L1] = h1                                           # ky=1 (ip)
    lhs2_ref[:, 2 * L1:K2] = jnp.concatenate([h1[tb:, :], zl1], axis=0)   # ky=2 (ip+1)
    h2 = jnp.dot(lhs2_ref[...], w2_ref[...], preferred_element_type=f32) + b2_ref[...]
    h2 = jnp.maximum(h2, 0.0)                                  # (nr, 896) lanes=(pj,parity,co)

    # ---- 2x2 max-pool fused with fc1 ------------------------------------------------
    # column (jp) pool: lanes pj*128+co of m hold max over parity; other lanes = finite
    # garbage that is zero-weighted in wf1.
    m = jnp.maximum(h2[:, 0:LP], h2[:, C2:N2])                 # (nr, 832)
    acc = jnp.zeros((tb, FC1_OUT), f32)
    for pi in range(7):                                        # row (ip) pool + fc1, per pi
        r0 = (2 * pi + 1) * tb
        pooled = jnp.maximum(m[r0:r0 + tb, :], m[r0 + tb:r0 + 2 * tb, :])  # (tb, 832)
        acc = acc + jnp.dot(pooled.astype(bf16), wf1_ref[pi],
                            preferred_element_type=f32)
    hid = jnp.maximum(acc + bf1_ref[...], 0.0)
    # TODO(synk): training-mode dropout (p=0.25 random mask + 1/0.75 scaling) not implemented.
    out_ref[...] = (jnp.dot(hid.astype(bf16), wf2_ref[...],
                            preferred_element_type=f32) + bf2_ref[...])


# ---------------------------------------------------------------------------
# One-time parameter preparation (torch layouts -> banded kernel layouts)
# ---------------------------------------------------------------------------
def prepare_kernel_params(params):
    w1 = np.asarray(params["conv1_w"], np.float32)     # (32, 1, 3, 3)  OIHW
    b1 = np.asarray(params["conv1_b"], np.float32)
    w2 = np.asarray(params["conv2_w"], np.float32)     # (64, 32, 3, 3) OIHW
    b2 = np.asarray(params["conv2_b"], np.float32)
    wf1 = np.asarray(params["fc1_w"], np.float32)      # (128, 3136), feat = co*49+pi*7+pj
    bf1 = np.asarray(params["fc1_b"], np.float32)
    wf2 = np.asarray(params["fc2_w"], np.float32)      # (10, 128)
    bf2 = np.asarray(params["fc2_b"], np.float32)

    # conv1 banded weight: (ky, jj) x (jp, c); ring output columns jp=0,15 stay zero.
    w1b = np.zeros((3, PW, PW, C1), np.float32)
    for jp in range(1, PW - 1):
        for kx in range(3):
            w1b[:, jp - 1 + kx, jp, :] = w1[:, 0, :, kx].T      # (ky, c)
    w1b = w1b.reshape(3 * PW, L1)
    b1w = np.zeros((PW, C1), np.float32)
    b1w[1:PW - 1, :] = b1
    b1w = b1w.reshape(1, L1)

    # conv2 banded weight: (ky, jj, ci) x (pj, parity, co); only valid jp_out=1..14 emitted.
    w2b = np.zeros((3, PW, C1, 7, 2, C2), np.float32)
    for pj in range(7):
        for parity in range(2):
            jp = 2 * pj + 1 + parity
            for kx in range(3):
                w2b[:, jp - 1 + kx, :, pj, parity, :] = np.transpose(w2[:, :, :, kx],
                                                                     (2, 1, 0))
    w2b = w2b.reshape(K2, N2)
    b2w = np.tile(b2, H).reshape(1, N2)

    # fc1 weight per pooled row pi: rows = lanes of the column-pooled tensor
    # (pj*128 + co valid, upper-half lanes zero), matching torch's (co, pi, pj) flatten.
    wf1b = np.zeros((7, 7, 2 * C2, FC1_OUT), np.float32)
    for pi in range(7):
        for pj in range(7):
            feat = np.arange(C2) * 49 + pi * 7 + pj
            wf1b[pi, pj, :C2, :] = wf1[:, feat].T               # (co, out)
    wf1b = wf1b.reshape(7, 7 * 2 * C2, FC1_OUT)[:, :LP, :]

    return dict(
        w1b=jnp.asarray(w1b, jnp.float32),
        b1w=jnp.asarray(b1w, jnp.float32),
        w2b=jnp.asarray(w2b, jnp.bfloat16),
        b2w=jnp.asarray(b2w, jnp.float32),
        wf1b=jnp.asarray(wf1b, jnp.bfloat16),
        bf1w=jnp.asarray(bf1.reshape(1, FC1_OUT), jnp.float32),
        wf2t=jnp.asarray(wf2.T, jnp.bfloat16),
        bf2w=jnp.asarray(bf2.reshape(1, NCLASS), jnp.float32),
    )


def _pick_tb(B):
    # Largest tile <= 64 that still gives >= 2 grid steps (megacore on v7x); tb=64 keeps
    # the per-step working set ~25 MiB, safe on v7x's 64 MiB VMEM and good for v5e/v6e.
    for tb in (64, 32, 16, 8):
        if B >= 2 * tb:
            return tb
    return 8


# ---------------------------------------------------------------------------
# Wrapper: layout plumbing + pallas_call
# ---------------------------------------------------------------------------
@jax.jit
def cnn_forward(x_nchw, kp):
    B = x_nchw.shape[0]
    tb = _pick_tb(B)
    Bp = ((B + tb - 1) // tb) * tb          # pad batch to a tile multiple (no tb=B fallback)
    nt = Bp // tb
    nr = tb * PH

    # raw zero-padded image, rows reordered to (tile, ip, sample): compact (1x) HBM input
    x = x_nchw.reshape(B, H, W)
    x = jnp.pad(x, ((0, Bp - B), (1, 1), (1, 1)))                       # (Bp, 16, 16)
    xr = x.reshape(nt, tb, PH, PW).transpose(0, 2, 1, 3).reshape(nt * nr, PW)

    flops = 2 * B * (H * W * 9 * C1 + H * W * 9 * C1 * C2
                     + FC1_IN * FC1_OUT + FC1_OUT * NCLASS)
    bytes_accessed = (int(xr.size) * 4 + Bp * NCLASS * 4
                      + sum(int(v.size) * v.dtype.itemsize for v in kp.values()))

    def wspec(shape):
        zero = (0,) * len(shape)
        return pl.BlockSpec(shape, lambda i, _z=zero: _z)     # resident weights

    out = pl.pallas_call(
        _fused_cnn_kernel,
        out_shape=jax.ShapeDtypeStruct((Bp, NCLASS), jnp.float32),
        grid=(nt,),
        in_specs=[
            pl.BlockSpec((nr, PW), lambda i: (i, 0)),          # image: batch-tiled
            wspec((3 * PW, L1)), wspec((1, L1)),               # conv1 banded weight/bias
            wspec((K2, N2)), wspec((1, N2)),                   # conv2 banded weight/bias
            wspec((7, LP, FC1_OUT)), wspec((1, FC1_OUT)),      # fc1 weight/bias
            wspec((FC1_OUT, NCLASS)), wspec((1, NCLASS)),      # fc2 weight/bias
        ],
        out_specs=pl.BlockSpec((tb, NCLASS), lambda i: (i, 0)),
        scratch_shapes=[pltpu.VMEM((nr, K2), jnp.bfloat16)],   # conv2 banded-im2col lhs
        compiler_params=pltpu.CompilerParams(
            dimension_semantics=("parallel",),                 # batch tiles: megacore-shardable
            vmem_limit_bytes=48 * 1024 * 1024,
        ),
        cost_estimate=pl.CostEstimate(flops=flops, transcendentals=0,
                                      bytes_accessed=bytes_accessed),
    )(xr, kp["w1b"], kp["b1w"], kp["w2b"], kp["b2w"],
      kp["wf1b"], kp["bf1w"], kp["wf2t"], kp["bf2w"])
    return out[:B]


# ---------------------------------------------------------------------------
# Deterministic parameters (PyTorch layouts) and pure-JAX references
# ---------------------------------------------------------------------------
def init_params(key):
    ks = jax.random.split(key, 8)
    return {
        "conv1_w": jax.random.normal(ks[0], (C1, 1, 3, 3), jnp.float32) * 0.10,   # OIHW
        "conv1_b": jax.random.normal(ks[1], (C1,), jnp.float32) * 0.10,
        "conv2_w": jax.random.normal(ks[2], (C2, C1, 3, 3), jnp.float32) * 0.05,  # OIHW
        "conv2_b": jax.random.normal(ks[3], (C2,), jnp.float32) * 0.05,
        "fc1_w": jax.random.normal(ks[4], (FC1_OUT, FC1_IN), jnp.float32) * 0.02,  # (out, in)
        "fc1_b": jax.random.normal(ks[5], (FC1_OUT,), jnp.float32) * 0.02,
        "fc2_w": jax.random.normal(ks[6], (NCLASS, FC1_OUT), jnp.float32) * 0.10,
        "fc2_b": jax.random.normal(ks[7], (NCLASS,), jnp.float32) * 0.10,
    }


def _im2col_same3x3(x_bhwc):
    b, hh, ww, _ = x_bhwc.shape
    xp = jnp.pad(x_bhwc, ((0, 0), (1, 1), (1, 1), (0, 0)))
    taps = [xp[:, dy:dy + hh, dx:dx + ww, :] for dy in range(3) for dx in range(3)]
    return jnp.concatenate(taps, axis=-1)


def reference_forward(x_nchw, params, use_bf16):
    """Pure-JAX reference; use_bf16=True mirrors the kernel's mixed-precision recipe."""
    B = x_nchw.shape[0]
    hp = jax.lax.Precision.HIGHEST
    x = jnp.transpose(x_nchw, (0, 2, 3, 1))                                   # (B,14,14,1)

    w1 = params["conv1_w"].transpose(2, 3, 1, 0).reshape(9, C1)
    p1 = _im2col_same3x3(x).reshape(B * H * W, 9)
    h1 = jnp.maximum(jnp.dot(p1, w1, precision=hp) + params["conv1_b"], 0.0)
    h1 = h1.reshape(B, H, W, C1)

    w2 = params["conv2_w"].transpose(2, 3, 1, 0).reshape(9 * C1, C2)
    if use_bf16:
        p2 = _im2col_same3x3(h1.astype(jnp.bfloat16)).reshape(B * H * W, 9 * C1)
        h2 = jnp.dot(p2, w2.astype(jnp.bfloat16), preferred_element_type=jnp.float32)
    else:
        h2 = jnp.dot(_im2col_same3x3(h1).reshape(B * H * W, 9 * C1), w2, precision=hp)
    h2 = jnp.maximum(h2 + params["conv2_b"], 0.0).reshape(B, H, W, C2)

    pooled = jnp.max(h2.reshape(B, 7, 2, 7, 2, C2), axis=(2, 4))              # (B,7,7,64)
    flat = pooled.transpose(0, 3, 1, 2).reshape(B, FC1_IN)                    # torch .view order

    wf1, wf2 = params["fc1_w"].T, params["fc2_w"].T
    if use_bf16:
        hid = jnp.dot(flat.astype(jnp.bfloat16), wf1.astype(jnp.bfloat16),
                      preferred_element_type=jnp.float32) + params["fc1_b"]
        hid = jnp.maximum(hid, 0.0)
        out = jnp.dot(hid.astype(jnp.bfloat16), wf2.astype(jnp.bfloat16),
                      preferred_element_type=jnp.float32) + params["fc2_b"]
    else:
        hid = jnp.maximum(jnp.dot(flat, wf1, precision=hp) + params["fc1_b"], 0.0)
        out = jnp.dot(hid, wf2, precision=hp) + params["fc2_b"]
    return out


def _check(out, x, params):
    ref_mixed = reference_forward(x, params, use_bf16=True)
    ref_f32 = reference_forward(x, params, use_bf16=False)
    err_mixed = float(jnp.max(jnp.abs(out - ref_mixed)))
    err_f32 = float(jnp.max(jnp.abs(out - ref_f32)))
    scale = float(jnp.max(jnp.abs(ref_f32)))
    assert err_mixed < 1e-2, f"mixed-precision reference mismatch: {err_mixed}"
    assert err_f32 < 0.05 * scale + 1e-2, f"f32 reference mismatch: {err_f32} (scale {scale})"


if __name__ == "__main__":
    key = jax.random.PRNGKey(0)
    kx, kparam = jax.random.split(key)
    params = init_params(kparam)
    kp = prepare_kernel_params(params)

    # small example batch
    x = jax.random.normal(kx, (2, 1, H, W), jnp.float32)          # NCHW, like PyTorch
    out = jax.block_until_ready(cnn_forward(x, kp))
    assert out.shape == (2, NCLASS), out.shape
    _check(out, x, params)

    # awkward (non-multiple-of-8) batch exercising batch padding + multiple grid steps
    x2 = jax.random.normal(jax.random.PRNGKey(1), (20, 1, H, W), jnp.float32)
    out2 = jax.block_until_ready(cnn_forward(x2, kp))
    assert out2.shape == (20, NCLASS), out2.shape
    _check(out2, x2, params)

    print("KERNEL_OK")
</pallas_src>

<mosaic_0001>
module attributes {stable_mosaic.version = 11 : i64} {
  func.func @_fused_cnn_kernel(%arg0: i32, %arg1: memref<128x16xf32, #tpu.memory_space<vmem>>, %arg2: memref<48x512xf32, #tpu.memory_space<vmem>>, %arg3: memref<1x512xf32, #tpu.memory_space<vmem>>, %arg4: memref<1536x896xbf16, #tpu.memory_space<vmem>>, %arg5: memref<1x896xf32, #tpu.memory_space<vmem>>, %arg6: memref<7x832x128xbf16, #tpu.memory_space<vmem>>, %arg7: memref<1x128xf32, #tpu.memory_space<vmem>>, %arg8: memref<128x10xbf16, #tpu.memory_space<vmem>>, %arg9: memref<1x10xf32, #tpu.memory_space<vmem>>, %arg10: memref<8x10xf32, #tpu.memory_space<vmem>>, %arg11: memref<128x1536xbf16, #tpu.memory_space<vmem>>) attributes {dimension_semantics = [#tpu.dimension_semantics<parallel>], iteration_bounds = array<i64: 1>, scalar_prefetch = 0 : i64, scratch_operands = 1 : i64, tpu.core_type = #tpu.core_type<tc>, window_params = [{transform_indices = @transform_0, window_bounds = array<i64: 128, 16>}, {pipeline_mode = #tpu.pipeline_mode<synchronous>, transform_indices = @transform_1, window_bounds = array<i64: 48, 512>}, {pipeline_mode = #tpu.pipeline_mode<synchronous>, transform_indices = @transform_2, window_bounds = array<i64: 1, 512>}, {pipeline_mode = #tpu.pipeline_mode<synchronous>, transform_indices = @transform_3, window_bounds = array<i64: 1536, 896>}, {pipeline_mode = #tpu.pipeline_mode<synchronous>, transform_indices = @transform_4, window_bounds = array<i64: 1, 896>}, {pipeline_mode = #tpu.pipeline_mode<synchronous>, transform_indices = @transform_5, window_bounds = array<i64: 7, 832, 128>}, {pipeline_mode = #tpu.pipeline_mode<synchronous>, transform_indices = @transform_6, window_bounds = array<i64: 1, 128>}, {pipeline_mode = #tpu.pipeline_mode<synchronous>, transform_indices = @transform_7, window_bounds = array<i64: 128, 10>}, {pipeline_mode = #tpu.pipeline_mode<synchronous>, transform_indices = @transform_8, window_bounds = array<i64: 1, 10>}, {transform_indices = @transform_9, window_bounds = array<i64: 8, 10>}]} {
    %c0 = arith.constant 0 : index
    %c0_0 = arith.constant 0 : index
    %0 = vector.load %arg1[%c0, %c0_0] : memref<128x16xf32, #tpu.memory_space<vmem>>, vector<128x16xf32>
    %cst = arith.constant 0.000000e+00 : f32
    %1 = vector.broadcast %cst : f32 to vector<8x16xf32>
    %2 = vector.extract_strided_slice %0 {offsets = [0, 0], sizes = [120, 16], strides = [1, 1]} : vector<128x16xf32> to vector<120x16xf32>
    %3 = tpu.concatenate %1, %2 in 0 : vector<8x16xf32>, vector<120x16xf32> -> vector<128x16xf32>
    %4 = vector.extract_strided_slice %0 {offsets = [8, 0], sizes = [120, 16], strides = [1, 1]} : vector<128x16xf32> to vector<120x16xf32>
    %5 = tpu.concatenate %4, %1 in 0 : vector<120x16xf32>, vector<8x16xf32> -> vector<128x16xf32>
    %6 = tpu.concatenate %3, %0, %5 in 1 : vector<128x16xf32>, vector<128x16xf32>, vector<128x16xf32> -> vector<128x48xf32>
    %c0_1 = arith.constant 0 : index
    %c0_2 = arith.constant 0 : index
    %7 = vector.load %arg2[%c0_1, %c0_2] : memref<48x512xf32, #tpu.memory_space<vmem>>, vector<48x512xf32>
    %cst_3 = arith.constant dense<0.000000e+00> : vector<128x512xf32>
    %8 = tpu.matmul %6, %7, %cst_3 {dimension_numbers = #tpu.dot_dimension_numbers<[1], [0], [0], [1], [0, 0, 1, 1], [], []>} : vector<128x48xf32>, vector<48x512xf32>, vector<128x512xf32> -> vector<128x512xf32>
    %c0_4 = arith.constant 0 : index
    %c0_5 = arith.constant 0 : index
    %9 = vector.load %arg3[%c0_4, %c0_5] : memref<1x512xf32, #tpu.memory_space<vmem>>, vector<1x512xf32>
    %10 = vector.broadcast %9 : vector<1x512xf32> to vector<128x512xf32>
    %11 = arith.addf %8, %10 : vector<128x512xf32>
    %cst_6 = arith.constant 0.000000e+00 : f32
    %12 = vector.broadcast %cst_6 : f32 to vector<128x512xf32>
    %13 = arith.maximumf %11, %12 : vector<128x512xf32>
    %cst_7 = arith.constant 0.000000e+00 : f32
    %14 = vector.broadcast %cst_7 : f32 to vector<8x1xf32>
    %cst_8 = arith.constant 1.000000e+00 : f32
    %15 = vector.broadcast %cst_8 : f32 to vector<112x1xf32>
    %cst_9 = arith.constant 0.000000e+00 : f32
    %16 = vector.broadcast %cst_9 : f32 to vector<8x1xf32>
    %17 = tpu.concatenate %14, %15, %16 in 0 : vector<8x1xf32>, vector<112x1xf32>, vector<8x1xf32> -> vector<128x1xf32>
    %18 = vector.broadcast %17 : vector<128x1xf32> to vector<128x512xf32>
    %19 = arith.mulf %13, %18 : vector<128x512xf32>
    %20 = arith.truncf %19 : vector<128x512xf32> to vector<128x512xbf16>
    %cst_10 = arith.constant 0.000000e+00 : bf16
    %21 = vector.broadcast %cst_10 : bf16 to vector<8x512xbf16>
    %22 = vector.extract_strided_slice %20 {offsets = [0, 0], sizes = [120, 512], strides = [1, 1]} : vector<128x512xbf16> to vector<120x512xbf16>
    %23 = tpu.concatenate %21, %22 in 0 : vector<8x512xbf16>, vector<120x512xbf16> -> vector<128x512xbf16>
    %c0_11 = arith.constant 0 : index
    %c0_12 = arith.constant 0 : index
    %24 = vector.load %arg11[%c0_11, %c0_12] : memref<128x1536xbf16, #tpu.memory_space<vmem>>, vector<128x512xbf16>
    tpu.vector_store %arg11[%c0_11, %c0_12], %23 {strides = array<i32>} : memref<128x1536xbf16, #tpu.memory_space<vmem>>, vector<128x512xbf16>,
    %c0_13 = arith.constant 0 : index
    %c512 = arith.constant 512 : index
    %25 = vector.load %arg11[%c0_13, %c512] : memref<128x1536xbf16, #tpu.memory_space<vmem>>, vector<128x512xbf16>
    tpu.vector_store %arg11[%c0_13, %c512], %20 {strides = array<i32>} : memref<128x1536xbf16, #tpu.memory_space<vmem>>, vector<128x512xbf16>,
    %26 = vector.extract_strided_slice %20 {offsets = [8, 0], sizes = [120, 512], strides = [1, 1]} : vector<128x512xbf16> to vector<120x512xbf16>
    %27 = tpu.concatenate %26, %21 in 0 : vector<120x512xbf16>, vector<8x512xbf16> -> vector<128x512xbf16>
    %c0_14 = arith.constant 0 : index
    %c1024 = arith.constant 1024 : index
    %28 = vector.load %arg11[%c0_14, %c1024] : memref<128x1536xbf16, #tpu.memory_space<vmem>>, vector<128x512xbf16>
    tpu.vector_store %arg11[%c0_14, %c1024], %27 {strides = array<i32>} : memref<128x1536xbf16, #tpu.memory_space<vmem>>, vector<128x512xbf16>,
    %c0_15 = arith.constant 0 : index
    %c0_16 = arith.constant 0 : index
    %29 = vector.load %arg11[%c0_15, %c0_16] : memref<128x1536xbf16, #tpu.memory_space<vmem>>, vector<128x1536xbf16>
    %c0_17 = arith.constant 0 : index
    %c0_18 = arith.constant 0 : index
    %30 = vector.load %arg4[%c0_17, %c0_18] : memref<1536x896xbf16, #tpu.memory_space<vmem>>, vector<1536x896xbf16>
    %cst_19 = arith.constant dense<0.000000e+00> : vector<128x896xf32>
    %31 = tpu.matmul %29, %30, %cst_19 {dimension_numbers = #tpu.dot_dimension_numbers<[1], [0], [0], [1], [0, 0, 1, 1], [], []>} : vector<128x1536xbf16>, vector<1536x896xbf16>, vector<128x896xf32> -> vector<128x896xf32>
    %c0_20 = arith.constant 0 : index
    %c0_21 = arith.constant 0 : index
    %32 = vector.load %arg5[%c0_20, %c0_21] : memref<1x896xf32, #tpu.memory_space<vmem>>, vector<1x896xf32>
    %33 = vector.broadcast %32 : vector<1x896xf32> to vector<128x896xf32>
    %34 = arith.addf %31, %33 : vector<128x896xf32>
    %cst_22 = arith.constant 0.000000e+00 : f32
    %35 = vector.broadcast %cst_22 : f32 to vector<128x896xf32>
    %36 = arith.maximumf %34, %35 : vector<128x896xf32>
    %37 = vector.extract_strided_slice %36 {offsets = [0, 0], sizes = [128, 832], strides = [1, 1]} : vector<128x896xf32> to vector<128x832xf32>
    %38 = vector.extract_strided_slice %36 {offsets = [0, 64], sizes = [128, 832], strides = [1, 1]} : vector<128x896xf32> to vector<128x832xf32>
    %39 = arith.maximumf %37, %38 : vector<128x832xf32>
    %cst_23 = arith.constant 0.000000e+00 : f32
    %40 = vector.broadcast %cst_23 : f32 to vector<8x128xf32>
    %41 = vector.extract_strided_slice %39 {offsets = [8, 0], sizes = [8, 832], strides = [1, 1]} : vector<128x832xf32> to vector<8x832xf32>
    %42 = vector.extract_strided_slice %39 {offsets = [16, 0], sizes = [8, 832], strides = [1, 1]} : vector<128x832xf32> to vector<8x832xf32>
    %43 = arith.maximumf %41, %42 : vector<8x832xf32>
    %44 = arith.truncf %43 : vector<8x832xf32> to vector<8x832xbf16>
    %c0_24 = arith.constant 0 : index
    %c0_25 = arith.constant 0 : index
    %c0_26 = arith.constant 0 : index
    %45 = vector.load %arg6[%c0_24, %c0_25, %c0_26] : memref<7x832x128xbf16, #tpu.memory_space<vmem>>, vector<1x832x128xbf16>
    %46 = vector.shape_cast %45 : vector<1x832x128xbf16> to vector<832x128xbf16>
    %cst_27 = arith.constant dense<0.000000e+00> : vector<8x128xf32>
    %47 = tpu.matmul %44, %46, %cst_27 {dimension_numbers = #tpu.dot_dimension_numbers<[1], [0], [0], [1], [0, 0, 1, 1], [], []>} : vector<8x832xbf16>, vector<832x128xbf16>, vector<8x128xf32> -> vector<8x128xf32>
    %48 = arith.addf %40, %47 : vector<8x128xf32>
    %49 = vector.extract_strided_slice %39 {offsets = [24, 0], sizes = [8, 832], strides = [1, 1]} : vector<128x832xf32> to vector<8x832xf32>
    %50 = vector.extract_strided_slice %39 {offsets = [32, 0], sizes = [8, 832], strides = [1, 1]} : vector<128x832xf32> to vector<8x832xf32>
    %51 = arith.maximumf %49, %50 : vector<8x832xf32>
    %52 = arith.truncf %51 : vector<8x832xf32> to vector<8x832xbf16>
    %c1 = arith.constant 1 : index
    %c0_28 = arith.constant 0 : index
    %c0_29 = arith.constant 0 : index
    %53 = vector.load %arg6[%c1, %c0_28, %c0_29] : memref<7x832x128xbf16, #tpu.memory_space<vmem>>, vector<1x832x128xbf16>
    %54 = vector.shape_cast %53 : vector<1x832x128xbf16> to vector<832x128xbf16>
    %cst_30 = arith.constant dense<0.000000e+00> : vector<8x128xf32>
    %55 = tpu.matmul %52, %54, %cst_30 {dimension_numbers = #tpu.dot_dimension_numbers<[1], [0], [0], [1], [0, 0, 1, 1], [], []>} : vector<8x832xbf16>, vector<832x128xbf16>, vector<8x128xf32> -> vector<8x128xf32>
    %56 = arith.addf %48, %55 : vector<8x128xf32>
    %57 = vector.extract_strided_slice %39 {offsets = [40, 0], sizes = [8, 832], strides = [1, 1]} : vector<128x832xf32> to vector<8x832xf32>
    %58 = vector.extract_strided_slice %39 {offsets = [48, 0], sizes = [8, 832], strides = [1, 1]} : vector<128x832xf32> to vector<8x832xf32>
    %59 = arith.maximumf %57, %58 : vector<8x832xf32>
    %60 = arith.truncf %59 : vector<8x832xf32> to vector<8x832xbf16>
    %c2 = arith.constant 2 : index
    %c0_31 = arith.constant 0 : index
    %c0_32 = arith.constant 0 : index
    %61 = vector.load %arg6[%c2, %c0_31, %c0_32] : memref<7x832x128xbf16, #tpu.memory_space<vmem>>, vector<1x832x128xbf16>
    %62 = vector.shape_cast %61 : vector<1x832x128xbf16> to vector<832x128xbf16>
    %cst_33 = arith.constant dense<0.000000e+00> : vector<8x128xf32>
    %63 = tpu.matmul %60, %62, %cst_33 {dimension_numbers = #tpu.dot_dimension_numbers<[1], [0], [0], [1], [0, 0, 1, 1], [], []>} : vector<8x832xbf16>, vector<832x128xbf16>, vector<8x128xf32> -> vector<8x128xf32>
    %64 = arith.addf %56, %63 : vector<8x128xf32>
    %65 = vector.extract_strided_slice %39 {offsets = [56, 0], sizes = [8, 832], strides = [1, 1]} : vector<128x832xf32> to vector<8x832xf32>
    %66 = vector.extract_strided_slice %39 {offsets = [64, 0], sizes = [8, 832], strides = [1, 1]} : vector<128x832xf32> to vector<8x832xf32>
    %67 = arith.maximumf %65, %66 : vector<8x832xf32>
    %68 = arith.truncf %67 : vector<8x832xf32> to vector<8x832xbf16>
    %c3 = arith.constant 3 : index
    %c0_34 = arith.constant 0 : index
    %c0_35 = arith.constant 0 : index
    %69 = vector.load %arg6[%c3, %c0_34, %c0_35] : memref<7x832x128xbf16, #tpu.memory_space<vmem>>, vector<1x832x128xbf16>
    %70 = vector.shape_cast %69 : vector<1x832x128xbf16> to vector<832x128xbf16>
    %cst_36 = arith.constant dense<0.000000e+00> : vector<8x128xf32>
    %71 = tpu.matmul %68, %70, %cst_36 {dimension_numbers = #tpu.dot_dimension_numbers<[1], [0], [0], [1], [0, 0, 1, 1], [], []>} : vector<8x832xbf16>, vector<832x128xbf16>, vector<8x128xf32> -> vector<8x128xf32>
    %72 = arith.addf %64, %71 : vector<8x128xf32>
    %73 = vector.extract_strided_slice %39 {offsets = [72, 0], sizes = [8, 832], strides = [1, 1]} : vector<128x832xf32> to vector<8x832xf32>
    %74 = vector.extract_strided_slice %39 {offsets = [80, 0], sizes = [8, 832], strides = [1, 1]} : vector<128x832xf32> to vector<8x832xf32>
    %75 = arith.maximumf %73, %74 : vector<8x832xf32>
    %76 = arith.truncf %75 : vector<8x832xf32> to vector<8x832xbf16>
    %c4 = arith.constant 4 : index
    %c0_37 = arith.constant 0 : index
    %c0_38 = arith.constant 0 : index
    %77 = vector.load %arg6[%c4, %c0_37, %c0_38] : memref<7x832x128xbf16, #tpu.memory_space<vmem>>, vector<1x832x128xbf16>
    %78 = vector.shape_cast %77 : vector<1x832x128xbf16> to vector<832x128xbf16>
    %cst_39 = arith.constant dense<0.000000e+00> : vector<8x128xf32>
    %79 = tpu.matmul %76, %78, %cst_39 {dimension_numbers = #tpu.dot_dimension_numbers<[1], [0], [0], [1], [0, 0, 1, 1], [], []>} : vector<8x832xbf16>, vector<832x128xbf16>, vector<8x128xf32> -> vector<8x128xf32>
    %80 = arith.addf %72, %79 : vector<8x128xf32>
    %81 = vector.extract_strided_slice %39 {offsets = [88, 0], sizes = [8, 832], strides = [1, 1]} : vector<128x832xf32> to vector<8x832xf32>
    %82 = vector.extract_strided_slice %39 {offsets = [96, 0], sizes = [8, 832], strides = [1, 1]} : vector<128x832xf32> to vector<8x832xf32>
    %83 = arith.maximumf %81, %82 : vector<8x832xf32>
    %84 = arith.truncf %83 : vector<8x832xf32> to vector<8x832xbf16>
    %c5 = arith.constant 5 : index
    %c0_40 = arith.constant 0 : index
    %c0_41 = arith.constant 0 : index
    %85 = vector.load %arg6[%c5, %c0_40, %c0_41] : memref<7x832x128xbf16, #tpu.memory_space<vmem>>, vector<1x832x128xbf16>
    %86 = vector.shape_cast %85 : vector<1x832x128xbf16> to vector<832x128xbf16>
    %cst_42 = arith.constant dense<0.000000e+00> : vector<8x128xf32>
    %87 = tpu.matmul %84, %86, %cst_42 {dimension_numbers = #tpu.dot_dimension_numbers<[1], [0], [0], [1], [0, 0, 1, 1], [], []>} : vector<8x832xbf16>, vector<832x128xbf16>, vector<8x128xf32> -> vector<8x128xf32>
    %88 = arith.addf %80, %87 : vector<8x128xf32>
    %89 = vector.extract_strided_slice %39 {offsets = [104, 0], sizes = [8, 832], strides = [1, 1]} : vector<128x832xf32> to vector<8x832xf32>
    %90 = vector.extract_strided_slice %39 {offsets = [112, 0], sizes = [8, 832], strides = [1, 1]} : vector<128x832xf32> to vector<8x832xf32>
    %91 = arith.maximumf %89, %90 : vector<8x832xf32>
    %92 = arith.truncf %91 : vector<8x832xf32> to vector<8x832xbf16>
    %c6 = arith.constant 6 : index
    %c0_43 = arith.constant 0 : index
    %c0_44 = arith.constant 0 : index
    %93 = vector.load %arg6[%c6, %c0_43, %c0_44] : memref<7x832x128xbf16, #tpu.memory_space<vmem>>, vector<1x832x128xbf16>
    %94 = vector.shape_cast %93 : vector<1x832x128xbf16> to vector<832x128xbf16>
    %cst_45 = arith.constant dense<0.000000e+00> : vector<8x128xf32>
    %95 = tpu.matmul %92, %94, %cst_45 {dimension_numbers = #tpu.dot_dimension_numbers<[1], [0], [0], [1], [0, 0, 1, 1], [], []>} : vector<8x832xbf16>, vector<832x128xbf16>, vector<8x128xf32> -> vector<8x128xf32>
    %96 = arith.addf %88, %95 : vector<8x128xf32>
    %c0_46 = arith.constant 0 : index
    %c0_47 = arith.constant 0 : index
    %97 = vector.load %arg7[%c0_46, %c0_47] : memref<1x128xf32, #tpu.memory_space<vmem>>, vector<1x128xf32>
    %98 = vector.broadcast %97 : vector<1x128xf32> to vector<8x128xf32>
    %99 = arith.addf %96, %98 : vector<8x128xf32>
    %cst_48 = arith.constant 0.000000e+00 : f32
    %100 = vector.broadcast %cst_48 : f32 to vector<8x128xf32>
    %101 = arith.maximumf %99, %100 : vector<8x128xf32>
    %102 = arith.truncf %101 : vector<8x128xf32> to vector<8x128xbf16>
    %c0_49 = arith.constant 0 : index
    %c0_50 = arith.constant 0 : index
    %103 = vector.load %arg8[%c0_49, %c0_50] : memref<128x10xbf16, #tpu.memory_space<vmem>>, vector<128x10xbf16>
    %cst_51 = arith.constant dense<0.000000e+00> : vector<8x10xf32>
    %104 = tpu.matmul %102, %103, %cst_51 {dimension_numbers = #tpu.dot_dimension_numbers<[1], [0], [0], [1], [0, 0, 1, 1], [], []>} : vector<8x128xbf16>, vector<128x10xbf16>, vector<8x10xf32> -> vector<8x10xf32>
    %c0_52 = arith.constant 0 : index
    %c0_53 = arith.constant 0 : index
    %105 = vector.load %arg9[%c0_52, %c0_53] : memref<1x10xf32, #tpu.memory_space<vmem>>, vector<1x10xf32>
    %106 = vector.broadcast %105 : vector<1x10xf32> to vector<8x10xf32>
    %107 = arith.addf %104, %106 : vector<8x10xf32>
    %c0_54 = arith.constant 0 : index
    %c0_55 = arith.constant 0 : index
    %108 = vector.load %arg10[%c0_54, %c0_55] : memref<8x10xf32, #tpu.memory_space<vmem>>, vector<8x10xf32>
    tpu.vector_store %arg10[%c0_54, %c0_55], %107 {strides = array<i32>} : memref<8x10xf32, #tpu.memory_space<vmem>>, vector<8x10xf32>,
    return
  }
  func.func @transform_0(%arg0: i32) -> (i32, i32) {
    %c0_i32 = arith.constant 0 : i32
    %c0_i32_0 = arith.constant 0 : i32
    return %arg0, %c0_i32 : i32, i32
  }
  func.func @transform_1(%arg0: i32) -> (i32, i32) {
    %c0_i32 = arith.constant 0 : i32
    %c0_i32_0 = arith.constant 0 : i32
    %c0_i32_1 = arith.constant 0 : i32
    return %c0_i32, %c0_i32_0 : i32, i32
  }
  func.func @transform_2(%arg0: i32) -> (i32, i32) {
    %c0_i32 = arith.constant 0 : i32
    %c0_i32_0 = arith.constant 0 : i32
    %c0_i32_1 = arith.constant 0 : i32
    return %c0_i32, %c0_i32_0 : i32, i32
  }
  func.func @transform_3(%arg0: i32) -> (i32, i32) {
    %c0_i32 = arith.constant 0 : i32
    %c0_i32_0 = arith.constant 0 : i32
    %c0_i32_1 = arith.constant 0 : i32
    return %c0_i32, %c0_i32_0 : i32, i32
  }
  func.func @transform_4(%arg0: i32) -> (i32, i32) {
    %c0_i32 = arith.constant 0 : i32
    %c0_i32_0 = arith.constant 0 : i32
    %c0_i32_1 = arith.constant 0 : i32
    return %c0_i32, %c0_i32_0 : i32, i32
  }
  func.func @transform_5(%arg0: i32) -> (i32, i32, i32) {
    %c0_i32 = arith.constant 0 : i32
    %c0_i32_0 = arith.constant 0 : i32
    %c0_i32_1 = arith.constant 0 : i32
    %c0_i32_2 = arith.constant 0 : i32
    return %c0_i32, %c0_i32_0, %c0_i32_1 : i32, i32, i32
  }
  func.func @transform_6(%arg0: i32) -> (i32, i32) {
    %c0_i32 = arith.constant 0 : i32
    %c0_i32_0 = arith.constant 0 : i32
    %c0_i32_1 = arith.constant 0 : i32
    return %c0_i32, %c0_i32_0 : i32, i32
  }
  func.func @transform_7(%arg0: i32) -> (i32, i32) {
    %c0_i32 = arith.constant 0 : i32
    %c0_i32_0 = arith.constant 0 : i32
    %c0_i32_1 = arith.constant 0 : i32
    return %c0_i32, %c0_i32_0 : i32, i32
  }
  func.func @transform_8(%arg0: i32) -> (i32, i32) {
    %c0_i32 = arith.constant 0 : i32
    %c0_i32_0 = arith.constant 0 : i32
    %c0_i32_1 = arith.constant 0 : i32
    return %c0_i32, %c0_i32_0 : i32, i32
  }
  func.func @transform_9(%arg0: i32) -> (i32, i32) {
    %c0_i32 = arith.constant 0 : i32
    %c0_i32_0 = arith.constant 0 : i32
    return %arg0, %c0_i32 : i32, i32
  }
}

</mosaic_0001>

<bundles_post_ra>
// kernel: cnn_forward.1
= control target key start
LH: loop header
LB: loop body
LE: loop exit
PB: predicated region body
PF: predicated region fallthrough
CT: control target
= control target key end

     0   :  { %14 = vsyncpa [#allocation4], 0  ;;  %s21229_s0 = inlined_call_operand.vmem [shape: f32[128,16], index: 0, kind: input, shape index: {}]   ;;  %s21230_s1 = inlined_call_operand.hbm [shape: f32[48,512], index: 1, kind: input, shape index: {}]   ;;  %s21231_s2 = inlined_call_operand.hbm [shape: f32[1,512], index: 2, kind: input, shape index: {}]   ;;  %s21232_s3 = inlined_call_operand.hbm [shape: bf16[1536,896], index: 3, kind: input, shape index: {}]   ;;  %s21233_s4 = inlined_call_operand.hbm [shape: f32[1,896], index: 4, kind: input, shape index: {}]   ;;  %s21234_s5 = inlined_call_operand.hbm [shape: bf16[7,832,128], index: 5, kind: input, shape index: {}]   ;;  %s21235_s6 = inlined_call_operand.hbm [shape: f32[1,128], index: 6, kind: input, shape index: {}]   ;;  %s21236_s7 = inlined_call_operand.vmem [shape: bf16[128,10], index: 7, kind: input, shape index: {}]   ;;  %s21237_s8 = inlined_call_operand.hbm [shape: f32[1,10], index: 8, kind: input, shape index: {}]   ;;  %s21238_s9 = inlined_call_operand.vmem [shape: f32[8,10], index: 9, kind: output, shape index: {}]  }
   0x1   :  { %15 = vsyncpa [#allocation6], 0 }
   0x2   :  { %16 = vsyncpa [#allocation9], 0 }
   0x3   :  { %17 = vsyncpa [#allocation12], 0  ;;  %s17798_s30 = smov [#allocation5]   ;;  %s17799_s11 = smov [#allocation8]  }
   0x4   :  { %s38_s10 = sshll.u32 %s17798_s30, 4  ;;  %s60_s12 = sshll.u32 %s17799_s11, 4  ;;  %s39_s10 = int_to_ptr.vmem [resolvable:$true] %s38_s10  ;;  %s61_s12 = int_to_ptr.vmem [resolvable:$true] %s60_s12 }
   0x5   :  { %s17658_s13 = scalar_lea.vmem %s39_s10, 64  ;;  %p17663_p1 = scmp.lt.s32.totalorder %s39_s10, %s39_s10 }
   0x6   :  { %p17659_p0 = scmp.ne.s32.totalorder %s39_s10, %s17658_s13  ;;  %p17664_p2 = scmp.lt.s32.totalorder %s17658_s13, %s17658_s13 }
   0x8   :  { %p17665_p3 = por %p17664_p2, %p17663_p1 }
   0xa   :  { %p17666_p4 = pnand %p17665_p3, %p17659_p0 }
   0xc   :  { %17669 = shalt.err (!%p17666_p4)
}
   0xd   :  { %41 = dma.hbm_to_vmem [thread:$0]  %s21231_s2, 64, %s39_s10, [#allocation6]  }
   0xe   :  { %s17678_s16 = scalar_lea.vmem %s61_s12, 112  ;;  %s17682_s17 = scalar_lea.vmem %s61_s12, 128 }
   0xf   :  { %p17679_p5 = scmp.ne.s32.totalorder %s61_s12, %s17678_s16  ;;  %p17683_p6 = scmp.lt.s32.totalorder %s61_s12, %s61_s12 }
  0x10   :  { %p17684_p7 = scmp.lt.s32.totalorder %s17682_s17, %s17678_s16 }
  0x12   :  { %p17685_p8 = por %p17684_p7, %p17683_p6 }
  0x14   :  { %p17686_p9 = pnand %p17685_p8, %p17679_p5 }
  0x16   :  { %17689 = shalt.err (!%p17686_p9)
}
  0x17   :  { %63 = dma.hbm_to_vmem [thread:$0]  %s21233_s4, 112, %s61_s12, [#allocation9]  }
  0x18   :  { %s17800_s20 = smov [#allocation11]   ;;  %s17801_s22 = smov [#allocation3]  }
  0x19   :  { %s82_s21 = sshll.u32 %s17800_s20, 4  ;;  %s25_s23 = sshll.u32 %s17801_s22, 4  ;;  %s83_s21 = int_to_ptr.vmem [resolvable:$true] %s82_s21  ;;  %s26_s23 = int_to_ptr.vmem [resolvable:$true] %s25_s23 }
  0x1a   :  { %s17698_s24 = scalar_lea.vmem %s83_s21, 16  ;;  %s17702_s2 = scalar_lea.vmem %s83_s21, 32 }
  0x1b   :  { %p17699_p10 = scmp.ne.s32.totalorder %s83_s21, %s17698_s24  ;;  %p17703_p11 = scmp.lt.s32.totalorder %s83_s21, %s83_s21 }
  0x1c   :  { %p17704_p12 = scmp.lt.s32.totalorder %s17702_s2, %s17698_s24 }
  0x1e   :  { %p17705_p13 = por %p17704_p12, %p17703_p11 }
  0x20   :  { %p17706_p0 = pnand %p17705_p13, %p17699_p10 }
  0x22   :  { %17709 = shalt.err (!%p17706_p0)
}
  0x23   :  { %85 = dma.hbm_to_vmem [thread:$0]  %s21235_s6, 16, %s83_s21, [#allocation12]  }
  0x24   :  { %s17718_s27 = scalar_lea.vmem %s26_s23, 3072  ;;  %p17723_p2 = scmp.lt.s32.totalorder %s26_s23, %s26_s23 }
  0x25   :  { %p17719_p1 = scmp.ne.s32.totalorder %s26_s23, %s17718_s27  ;;  %p17724_p3 = scmp.lt.s32.totalorder %s17718_s27, %s17718_s27 }
  0x27   :  { %p17725_p4 = por %p17724_p3, %p17723_p2 }
  0x29   :  { %p17726_p5 = pnand %p17725_p4, %p17719_p1 }
  0x2b   :  { %17729 = shalt.err (!%p17726_p5)
}
  0x2c   :  { %s17802_s4 = smov 512   ;;  %s17803_s28 = smov 32  }
  0x2d   :  { %31 = dma.hbm_to_vmem [thread:$0]  %s21230_s1, 3072, %s26_s23, [#allocation4], %s17802_s4, %s17802_s4, %s17803_s28  }
  0x2e   :  { %s17804_s10 = smov [#allocation7]  }
  0x2f   :  { %s47_s11 = sshll.u32 %s17804_s10, 4  ;;  %s48_s11 = int_to_ptr.vmem [resolvable:$true] %s47_s11 }
  0x30   :  { %s17738_s12 = scalar_lea.vmem %s48_s11, 86016  ;;  %p17743_p7 = scmp.lt.s32.totalorder %s48_s11, %s48_s11 }
  0x31   :  { %p17739_p6 = scmp.ne.s32.totalorder %s48_s11, %s17738_s12  ;;  %p17744_p8 = scmp.lt.s32.totalorder %s17738_s12, %s17738_s12 }
  0x33   :  { %p17745_p9 = por %p17744_p8, %p17743_p7 }
  0x35   :  { %p17746_p10 = pnand %p17745_p9, %p17739_p6 }
  0x37   :  { %17749 = shalt.err (!%p17746_p10)
}
  0x38   :  { %s17805_s6 = smov 448   ;;  %s17806_s13 = smov 28  }
  0x39   :  { %53 = dma.hbm_to_vmem [thread:$0]  %s21232_s3, 86016, %s48_s11, [#allocation6], %s17805_s6, %s17805_s6, %s17806_s13  }
  0x3a   :  { %s17807_s16 = smov [#allocation10]  }
  0x3b   :  { %s69_s17 = sshll.u32 %s17807_s16, 4  ;;  %s70_s17 = int_to_ptr.vmem [resolvable:$true] %s69_s17 }
  0x3c   :  { %s17758_s1 = scalar_lea.vmem %s70_s17, 46592  ;;  %p17763_p12 = scmp.lt.s32.totalorder %s70_s17, %s70_s17 }
  0x3d   :  { %p17759_p11 = scmp.ne.s32.totalorder %s70_s17, %s17758_s1  ;;  %p17764_p13 = scmp.lt.s32.totalorder %s17758_s1, %s17758_s1 }
  0x3f   :  { %p17765_p0 = por %p17764_p13, %p17763_p12 }
  0x41   :  { %p17766_p1 = pnand %p17765_p0, %p17759_p11 }
  0x43   :  { %17769 = shalt.err (!%p17766_p1)
}
  0x44   :  { %s17808_s18 = smov 64   ;;  %s17809_s19 = smov 4  }
  0x45   :  { %75 = dma.hbm_to_vmem [thread:$0]  %s21234_s5, 46592, %s70_s17, [#allocation9], %s17808_s18, %s17808_s18, %s17809_s19  }
  0x46   :  { %s17810_s22 = smov [#allocation13]  }
  0x47   :  { %s94_s3 = sshll.u32 %s17810_s22, 4  ;;  %s95_s3 = int_to_ptr.vmem [resolvable:$true] %s94_s3 }
  0x48   :  { %s17778_s23 = scalar_lea.vmem %s95_s3, 16  ;;  %s17782_s24 = scalar_lea.vmem %s95_s3, 32 }
  0x49   :  { %p17779_p2 = scmp.ne.s32.totalorder %s95_s3, %s17778_s23  ;;  %p17783_p3 = scmp.lt.s32.totalorder %s95_s3, %s95_s3 }
  0x4a   :  { %p17784_p4 = scmp.lt.s32.totalorder %s17782_s24, %s17778_s23 }
  0x4c   :  { %p17785_p5 = por %p17784_p4, %p17783_p3 }
  0x4e   :  { %p17786_p6 = pnand %p17785_p5, %p17779_p2 }
  0x50   :  { %17789 = shalt.err (!%p17786_p6)
}
  0x51   :  { %97 = dma.hbm_to_vmem [thread:$0]  %s21237_s8, 16, %s95_s3, [#allocation12]  }
  0x52   :  { %17790 = dma.done.wait [#allocation4], 3072  }
  0x53   :  { %17791 = vsyncadd [#allocation4], 4294964224 }
  0x54   :  { %17792 = dma.done.wait [#allocation6], 86080  }
  0x55   :  { %17793 = vsyncadd [#allocation6], 4294881216 }
  0x56   :  { %17794 = dma.done.wait [#allocation9], 46704  }
  0x57   :  { %17795 = vsyncadd [#allocation9], 4294920592 }
  0x58   :  { %17796 = dma.done.wait [#allocation12], 32  }
  0x59   :  { %17797 = vsyncadd [#allocation12], 4294967264  ;;  %v21239_v0 = vmov 0.0   ;;  %v17894_v1 = vld [vmem:[%s21229_s0] sm:$0xff]  ;;  %v17899_v2 = vld [vmem:[%s21229_s0 + $0x8] sm:$0xff]  ;;  %s17812_s4 = smov 16  }
  0x5a   :  { %442 = vmatprep.mubr.f32.mxu0 %v21239_v0  ;;  %603 = vmatprep.mubr.f32.mxu1 %v21239_v0  ;;  %v304_v3 = vld [vmem:[#allocation3 + $0xa8] sm:$0xff]  ;;  %v17908_v4 = vld [vmem:[%s21229_s0 + $0x10] sm:$0xff]  ;;  %v17917_v5 = vld [vmem:[%s21229_s0 + $0x18] sm:$0xff]  ;;  %vm249_vm0 = vcmask 130048   ;;  %vm266_vm1 = vcmask 261120   ;;  %vm329_vm2 = vcmask 392192  }
  0x5b   :  { %152 = vrot.lane.b32.xlu0 %v17894_v1, %s17812_s4  ;;  %154 = vrot.lane.b32.xlu1 %v17899_v2, %s17812_s4  ;;  %v306_v6 = vld [vmem:[#allocation3 + $0xb8] sm:$0xff]  ;;  %v303_v7 = vld [vmem:[#allocation3 + $0xa0] sm:$0xff]  ;;  %v305_v8 = vld [vmem:[#allocation3 + $0xb0] sm:$0xff]  ;;  %vm901_vm3 = vcmask 1043456   ;;  %vm9117_vm5 = vcmask 523264   ;;  %vm17813_vm6 = vmmov 0  }
  0x5c   :  { %398 = vmatprep.subr.mxu0 %v304_v3  ;;  %559 = vmatprep.subr.mxu1 %v306_v6  ;;  %v300_v9 = vld [vmem:[#allocation3 + $0x88] sm:$0xff]  ;;  %v302_v10 = vld [vmem:[#allocation3 + $0x98] sm:$0xff]  ;;  %v299_v11 = vld [vmem:[#allocation3 + $0x80] sm:$0xff]  ;;  %vm13681_vm7 = vcmask 80896  }
  0x5d   :  { %399 = vmatpush1.msra.mxu0 %v303_v7  ;;  %560 = vmatpush1.msra.mxu1 %v305_v8  ;;  %v301_v12 = vld [vmem:[#allocation3 + $0x90] sm:$0xff]  ;;  %v296_v13 = vld [vmem:[#allocation3 + $0x68] sm:$0xff]  ;;  %v298_v14 = vld [vmem:[#allocation3 + $0x78] sm:$0xff] }
  0x5e   :  { %400 = vmatprep.subr.mxu0 %v300_v9  ;;  %561 = vmatprep.subr.mxu1 %v302_v10  ;;  %v295_v15 = vld [vmem:[#allocation3 + $0x60] sm:$0xff]  ;;  %v297_v16 = vld [vmem:[#allocation3 + $0x70] sm:$0xff]  ;;  %v292_v18 = vld [vmem:[#allocation3 + $0x48] sm:$0xff] }
  0x5f   :  { %201 = vrot.lane.b32.xlu0 %v17899_v2, %s17803_s28  ;;  %203 = vrot.lane.b32.xlu1 %v17908_v4, %s17803_s28  ;;  %v17926_v17 = vld [vmem:[%s21229_s0 + $0x20] sm:$0xff]  ;;  %v294_v19 = vld [vmem:[#allocation3 + $0x58] sm:$0xff]  ;;  %v17931_v21 = vld [vmem:[%s21229_s0 + $0x28] sm:$0xff] }
  0x60   :  { %401 = vmatpush1.msra.mxu0 %v299_v11  ;;  %562 = vmatpush1.msra.mxu1 %v301_v12  ;;  %v291_v20 = vld [vmem:[#allocation3 + $0x40] sm:$0xff]  ;;  %v293_v22 = vld [vmem:[#allocation3 + $0x50] sm:$0xff]  ;;  %v288_v23 = vld [vmem:[#allocation3 + $0x28] sm:$0xff] }
  0x61   :  { %402 = vmatprep.subr.mxu0 %v296_v13  ;;  %563 = vmatprep.subr.mxu1 %v298_v14  ;;  %v290_v24 = vld [vmem:[#allocation3 + $0x38] sm:$0xff]  ;;  %v287_v25 = vld [vmem:[#allocation3 + $0x20] sm:$0xff]  ;;  %v289_v26 = vld [vmem:[#allocation3 + $0x30] sm:$0xff] }
  0x62   :  { %403 = vmatpush1.msra.mxu0 %v295_v15  ;;  %564 = vmatpush1.msra.mxu1 %v297_v16  ;;  %v284_v27 = vld [vmem:[#allocation3 + $0x8] sm:$0xff]  ;;  %v286_v28 = vld [vmem:[#allocation3 + $0x18] sm:$0xff]  ;;  %v283_v29 = vld [vmem:[#allocation3] sm:$0xff] }
  0x63   :  { %156 = vrot.lane.b32.xlu0 %v17908_v4, %s17812_s4  ;;  %205 = vrot.lane.b32.xlu1 %v17917_v5, %s17803_s28  ;;  %v285_v30 = vld [vmem:[#allocation3 + $0x10] sm:$0xff]  ;;  %v17949_v32 = vld [vmem:[%s21229_s0 + $0x38] sm:$0xff]  ;;  %v17958_v33 = vld [vmem:[%s21229_s0 + $0x40] sm:$0xff] }
  0x64   :  { %404 = vmatprep.subr.mxu0 %v292_v18  ;;  %565 = vmatprep.subr.mxu1 %v294_v19  ;;  %v17940_v31 = vld [vmem:[%s21229_s0 + $0x30] sm:$0xff]  ;;  %v129_v34 = vld [vmem:[%s21229_s0 + $0x48] sm:$0xff]  ;;  %v131_v36 = vld [vmem:[%s21229_s0 + $0x58] sm:$0xff] }
  0x65   :  { %405 = vmatpush1.msra.mxu0 %v291_v20  ;;  %566 = vmatpush1.msra.mxu1 %v293_v22  ;;  %v130_v35 = vld [vmem:[%s21229_s0 + $0x50] sm:$0xff]  ;;  %v132_v37 = vld [vmem:[%s21229_s0 + $0x60] sm:$0xff]  ;;  %v133_v38 = vld [vmem:[%s21229_s0 + $0x68] sm:$0xff] }
  0x66   :  { %406 = vmatprep.subr.mxu0 %v288_v23  ;;  %567 = vmatprep.subr.mxu1 %v290_v24  ;;  %v134_v39 = vld [vmem:[%s21229_s0 + $0x70] sm:$0xff]  ;;  %v135_v41 = vld [vmem:[%s21229_s0 + $0x78] sm:$0xff]  ;;  %v16309_v45 = vld [vmem:[#allocation7 + $0x188] ss:$28 sps:$4 sm:$0xff]  }
  0x67   :  { %158 = vrot.lane.b32.xlu0 %v17917_v5, %s17812_s4  ;;  %207 = vrot.lane.b32.xlu1 %v17926_v17, %s17803_s28  ;;  %v16311_v40 = vld [vmem:[#allocation7 + $0x18c] ss:$28 sps:$4 sm:$0xff]   ;;  %v16317_v47 = vld [vmem:[#allocation7 + $0x154] ss:$28 sps:$4 sm:$0xff]   ;;  %v16323_v56 = vld [vmem:[#allocation7 + $0x11c] ss:$28 sps:$4 sm:$0xff]  }
  0x68   :  { %407 = vmatpush1.msra.mxu0 %v287_v25  ;;  %568 = vmatpush1.msra.mxu1 %v289_v26  ;;  %v16314_v42 = vld [vmem:[#allocation7 + $0x50c] ss:$28 sps:$4 sm:$0xff]   ;;  %v16320_v48 = vld [vmem:[#allocation7 + $0x4d4] ss:$28 sps:$4 sm:$0xff]   ;;  %v16326_v57 = vld [vmem:[#allocation7 + $0x49c] ss:$28 sps:$4 sm:$0xff]  }
  0x69   :  { %408 = vmatprep.subr.mxu0 %v284_v27  ;;  %569 = vmatprep.subr.mxu1 %v286_v28  ;;  %v16312_v46 = vld [vmem:[#allocation7 + $0x508] ss:$28 sps:$4 sm:$0xff]   ;;  %v16315_v54 = vld [vmem:[#allocation7 + $0x150] ss:$28 sps:$4 sm:$0xff]   ;;  %v16321_v62 = vld [vmem:[#allocation7 + $0x118] ss:$28 sps:$4 sm:$0xff]  }
  0x6a   :  { %409 = vmatpush1.msra.mxu0 %v283_v29  ;;  %570 = vmatpush1.msra.mxu1 %v285_v30  ;;  %v16318_v55 = vld [vmem:[#allocation7 + $0x4d0] ss:$28 sps:$4 sm:$0xff]   ;;  %v16324_v63 = vld [vmem:[#allocation7 + $0x498] ss:$28 sps:$4 sm:$0xff]   ;;  %v16329_v3 = vld [vmem:[#allocation7 + $0xe4] ss:$28 sps:$4 sm:$0xff]  }
  0x6b   :  { %160 = vrot.lane.b32.xlu0 %v17926_v17, %s17812_s4  ;;  %209 = vrot.lane.b32.xlu1 %v17931_v21, %s17803_s28  ;;  %v16332_v6 = vld [vmem:[#allocation7 + $0x464] ss:$28 sps:$4 sm:$0xff]   ;;  %v16335_v12 = vld [vmem:[#allocation7 + $0xac] ss:$28 sps:$4 sm:$0xff]   ;;  %v16341_v20 = vld [vmem:[#allocation7 + $0x74] ss:$28 sps:$4 sm:$0xff]  }
  0x6c   :  { %6193 = vmatprep.subr.bf16.mxu0 %v16311_v40  ;;  %6302 = vmatprep.subr.bf16.mxu1 %v16314_v42  ;;  %v16327_v9 = vld [vmem:[#allocation7 + $0xe0] ss:$28 sps:$4 sm:$0xff]   ;;  %v16338_v13 = vld [vmem:[#allocation7 + $0x42c] ss:$28 sps:$4 sm:$0xff]   ;;  %v16344_v22 = vld [vmem:[#allocation7 + $0x3f4] ss:$28 sps:$4 sm:$0xff]  }
  0x6d   :  { %v16330_v10 = vld [vmem:[#allocation7 + $0x460] ss:$28 sps:$4 sm:$0xff]   ;;  %v16333_v16 = vld [vmem:[#allocation7 + $0xa8] ss:$28 sps:$4 sm:$0xff]   ;;  %v16339_v25 = vld [vmem:[#allocation7 + $0x70] ss:$28 sps:$4 sm:$0xff]  }
  0x6e   :  { %v16336_v18 = vld [vmem:[#allocation7 + $0x428] ss:$28 sps:$4 sm:$0xff]   ;;  %v16342_v26 = vld [vmem:[#allocation7 + $0x3f0] ss:$28 sps:$4 sm:$0xff]   ;;  %v16347_v28 = vld [vmem:[#allocation7 + $0x3c] ss:$28 sps:$4 sm:$0xff]  }
  0x6f   :  { %162 = vrot.lane.b32.xlu0 %v17931_v21, %s17812_s4  ;;  %211 = vrot.lane.b32.xlu1 %v17940_v31, %s17803_s28  ;;  %v16350_v29 = vld [vmem:[#allocation7 + $0x3bc] ss:$28 sps:$4 sm:$0xff]   ;;  %vm18169_vm4 = vmneg %vm901_vm3 }
  0x70   :  { %v16351_v42 = vld [vmem:[#allocation7] ss:$28 sps:$4 sm:$0xff]  }
  0x73   :  { %164 = vrot.lane.b32.xlu0 %v17940_v31, %s17812_s4  ;;  %213 = vrot.lane.b32.xlu1 %v17949_v32, %s17803_s28 }
  0x77   :  { %166 = vrot.lane.b32.xlu0 %v17949_v32, %s17812_s4  ;;  %215 = vrot.lane.b32.xlu1 %v17958_v33, %s17803_s28 }
  0x7b   :  { %168 = vrot.lane.b32.xlu0 %v17958_v33, %s17812_s4  ;;  %217 = vrot.lane.b32.xlu1 %v129_v34, %s17803_s28 }
  0x7f   :  { %170 = vrot.lane.b32.xlu0 %v129_v34, %s17812_s4  ;;  %219 = vrot.lane.b32.xlu1 %v130_v35, %s17803_s28 }
  0x83   :  { %172 = vrot.lane.b32.xlu0 %v130_v35, %s17812_s4  ;;  %221 = vrot.lane.b32.xlu1 %v131_v36, %s17803_s28  ;;  %v16345_v35 = vld [vmem:[#allocation7 + $0x38] ss:$28 sps:$4 sm:$0xff]  }
  0x87   :  { %174 = vrot.lane.b32.xlu0 %v131_v36, %s17812_s4  ;;  %223 = vrot.lane.b32.xlu1 %v132_v37, %s17803_s28  ;;  %v16348_v36 = vld [vmem:[#allocation7 + $0x3b8] ss:$28 sps:$4 sm:$0xff]  }
  0x8b   :  { %176 = vrot.lane.b32.xlu0 %v132_v37, %s17812_s4  ;;  %225 = vrot.lane.b32.xlu1 %v133_v38, %s17803_s28 }
  0x8f   :  { %178 = vrot.lane.b32.xlu0 %v133_v38, %s17812_s4  ;;  %227 = vrot.lane.b32.xlu1 %v134_v39, %s17803_s28  ;;  %v16353_v38 = vld [vmem:[#allocation7 + $0x4] ss:$28 sps:$4 sm:$0xff]  }
  0x93   :  { %180 = vrot.lane.b32.xlu0 %v134_v39, %s17812_s4  ;;  %229 = vrot.lane.b32.xlu1 %v135_v41, %s17803_s28  ;;  %v16356_v39 = vld [vmem:[#allocation7 + $0x384] ss:$28 sps:$4 sm:$0xff]  }
  0x97   :  { %182 = vrot.lane.b32.xlu0 %v135_v41, %s17812_s4  ;;  %231 = vrot.lane.b32.xlu1 %v21239_v0, %s17803_s28 }
  0xcd   :  { %v153_v43 = vpop.permute.xlu0 %152  ;;  %v155_v44 = vpop.permute.xlu1 %154 }
  0xce   :  { %v250_v49 = vsel %vm249_vm0, 0.0, %v153_v43  ;;  %v251_v53 = vsel %vm249_vm0, %v17894_v1, %v155_v44  ;;  %v16354_v43 = vld [vmem:[#allocation7 + $0x380] ss:$28 sps:$4 sm:$0xff]  }
  0xd1   :  { %v202_v50 = vpop.permute.xlu0 %201  ;;  %v204_v51 = vpop.permute.xlu1 %203 }
  0xd2   :  { %v267_v52 = vsel %vm266_vm1, %v250_v49, %v202_v50  ;;  %v268_v60 = vsel %vm266_vm1, %v251_v53, %v204_v51  ;;  %v16357_v49 = vld [vmem:[#allocation7 + $0x348] ss:$28 sps:$4 sm:$0xff]   ;;  %v16368_v53 = vld [vmem:[#allocation7 + $0x694] ss:$28 sps:$4 sm:$0xff]  }
  0xd3   :  { %13691 = vmatmul.mubr.msk.f32.vlgmr.msra.gmra.mxu0 %vm329_vm2, %v267_v52  ;;  %13707 = vmatmul.mubr.msk.f32.vlgmr.msra.gmra.mxu1 %vm329_vm2, %v267_v52  ;;  %v16360_v50 = vld [vmem:[#allocation7 + $0x6c8] ss:$28 sps:$4 sm:$0xff]   ;;  %v16365_v52 = vld [vmem:[#allocation7 + $0x314] ss:$28 sps:$4 sm:$0xff]  }
  0xd4   :  { %448 = vmatprep.mubr.f32.mxu0 %v21239_v0  ;;  %609 = vmatprep.mubr.f32.mxu1 %v21239_v0 }
  0xd5   :  { %v157_v58 = vpop.permute.xlu0 %156  ;;  %v206_v59 = vpop.permute.xlu1 %205  ;;  %6194 = vmatpush1.bf16.msra.mxu0 %v16309_v45  ;;  %6303 = vmatpush1.bf16.msra.mxu1 %v16312_v46  ;;  %v16359_v45 = vld [vmem:[#allocation7 + $0x34c] ss:$28 sps:$4 sm:$0xff]  }
  0xd6   :  { %v252_v61 = vsel %vm249_vm0, %v17899_v2, %v157_v58  ;;  %6195 = vmatprep.subr.bf16.mxu0 %v16317_v47  ;;  %6304 = vmatprep.subr.bf16.mxu1 %v16320_v48  ;;  %v16362_v46 = vld [vmem:[#allocation7 + $0x6cc] ss:$28 sps:$4 sm:$0xff]  }
  0xd7   :  { %13692 = vmatmul.mubr.msk.f32.gmra.mxu0 %vm329_vm2, %v268_v60  ;;  %13708 = vmatmul.mubr.msk.f32.gmra.mxu1 %vm329_vm2, %v268_v60  ;;  %v269_v1 = vsel %vm266_vm1, %v252_v61, %v206_v59  ;;  %v16371_v59 = vld [vmem:[#allocation7 + $0x2dc] ss:$28 sps:$4 sm:$0xff]  }
  0xd8   :  { %454 = vmatprep.mubr.f32.mxu0 %v21239_v0  ;;  %615 = vmatprep.mubr.f32.mxu1 %v21239_v0  ;;  %v16374_v60 = vld [vmem:[#allocation7 + $0x65c] ss:$28 sps:$4 sm:$0xff]  }
  0xd9   :  { %v159_v7 = vpop.permute.xlu0 %158  ;;  %v208_v8 = vpop.permute.xlu1 %207  ;;  %6196 = vmatpush1.bf16.msra.mxu0 %v16315_v54  ;;  %6305 = vmatpush1.bf16.msra.mxu1 %v16318_v55 }
  0xda   :  { %v253_v2 = vsel %vm249_vm0, %v17908_v4, %v159_v7  ;;  %6197 = vmatprep.subr.bf16.mxu0 %v16323_v56  ;;  %6306 = vmatprep.subr.bf16.mxu1 %v16326_v57  ;;  %v16363_v56 = vld [vmem:[#allocation7 + $0x310] ss:$28 sps:$4 sm:$0xff]   ;;  %v16377_v7 = vld [vmem:[#allocation7 + $0x2a4] ss:$28 sps:$4 sm:$0xff]  }
  0xdb   :  { %13693 = vmatmul.mubr.msk.f32.gmra.mxu0 %vm329_vm2, %v269_v1  ;;  %13709 = vmatmul.mubr.msk.f32.gmra.mxu1 %vm329_vm2, %v269_v1  ;;  %v270_v11 = vsel %vm266_vm1, %v253_v2, %v208_v8  ;;  %v16366_v57 = vld [vmem:[#allocation7 + $0x690] ss:$28 sps:$4 sm:$0xff]   ;;  %v16369_v1 = vld [vmem:[#allocation7 + $0x2d8] ss:$28 sps:$4 sm:$0xff]   ;;  %v16380_v8 = vld [vmem:[#allocation7 + $0x624] ss:$28 sps:$4 sm:$0xff]  }
  0xdc   :  { %460 = vmatprep.mubr.f32.mxu0 %v21239_v0  ;;  %621 = vmatprep.mubr.f32.mxu1 %v21239_v0 }
  0xdd   :  { %v161_v14 = vpop.permute.xlu0 %160  ;;  %v210_v15 = vpop.permute.xlu1 %209  ;;  %6198 = vmatpush1.bf16.msra.mxu0 %v16321_v62  ;;  %6307 = vmatpush1.bf16.msra.mxu1 %v16324_v63 }
  0xde   :  { %v254_v4 = vsel %vm249_vm0, %v17917_v5, %v161_v14  ;;  %6199 = vmatprep.subr.bf16.mxu0 %v16329_v3  ;;  %6308 = vmatprep.subr.bf16.mxu1 %v16332_v6  ;;  %v16372_v3 = vld [vmem:[#allocation7 + $0x658] ss:$28 sps:$4 sm:$0xff]  }
  0xdf   :  { %13694 = vmatmul.mubr.msk.f32.gmra.mxu0 %vm329_vm2, %v270_v11  ;;  %13710 = vmatmul.mubr.msk.f32.gmra.mxu1 %vm329_vm2, %v270_v11  ;;  %v271_v19 = vsel %vm266_vm1, %v254_v4, %v210_v15 }
  0xe0   :  { %466 = vmatprep.mubr.f32.mxu0 %v21239_v0  ;;  %627 = vmatprep.mubr.f32.mxu1 %v21239_v0 }
  0xe1   :  { %v163_v23 = vpop.permute.xlu0 %162  ;;  %v212_v24 = vpop.permute.xlu1 %211  ;;  %6200 = vmatpush1.bf16.msra.mxu0 %v16327_v9  ;;  %6309 = vmatpush1.bf16.msra.mxu1 %v16330_v10  ;;  %v17642_v10 = vld [vmem:[%s21229_s0 + $0x50] sm:$0xff] }
  0xe2   :  { %v255_v5 = vsel %vm249_vm0, %v17926_v17, %v163_v23  ;;  %6201 = vmatprep.subr.bf16.mxu0 %v16335_v12  ;;  %6310 = vmatprep.subr.bf16.mxu1 %v16338_v13  ;;  %v16375_v12 = vld [vmem:[#allocation7 + $0x2a0] ss:$28 sps:$4 sm:$0xff]  }
  0xe3   :  { %13695 = vmatmul.mubr.msk.f32.gmra.mxu0 %vm329_vm2, %v271_v19  ;;  %13711 = vmatmul.mubr.msk.f32.gmra.mxu1 %vm329_vm2, %v271_v19  ;;  %v272_v27 = vsel %vm266_vm1, %v255_v5, %v212_v24  ;;  %v16378_v13 = vld [vmem:[#allocation7 + $0x620] ss:$28 sps:$4 sm:$0xff]  }
  0xe4   :  { %472 = vmatprep.mubr.f32.mxu0 %v21239_v0  ;;  %633 = vmatprep.mubr.f32.mxu1 %v21239_v0  ;;  %v17644_v23 = vld [vmem:[%s21229_s0 + $0x60] sm:$0xff] }
  0xe5   :  { %v165_v30 = vpop.permute.xlu0 %164  ;;  %v214_v34 = vpop.permute.xlu1 %213  ;;  %6202 = vmatpush1.bf16.msra.mxu0 %v16333_v16  ;;  %6311 = vmatpush1.bf16.msra.mxu1 %v16336_v18  ;;  %v17643_v16 = vld [vmem:[%s21229_s0 + $0x58] sm:$0xff] }
  0xe6   :  { %v256_v17 = vsel %vm249_vm0, %v17931_v21, %v165_v30  ;;  %6203 = vmatprep.subr.bf16.mxu0 %v16341_v20  ;;  %6312 = vmatprep.subr.bf16.mxu1 %v16344_v22 }
  0xe7   :  { %13696 = vmatmul.mubr.msk.f32.gmra.mxu0 %vm329_vm2, %v272_v27  ;;  %13712 = vmatmul.mubr.msk.f32.gmra.mxu1 %vm329_vm2, %v272_v27  ;;  %v273_v37 = vsel %vm266_vm1, %v256_v17, %v214_v34  ;;  %v17645_v27 = vld [vmem:[%s21229_s0 + $0x68] sm:$0xff]  ;;  %v17646_v17 = vld [vmem:[%s21229_s0 + $0x70] sm:$0xff] }
  0xe8   :  { %478 = vmatprep.mubr.f32.mxu0 %v21239_v0  ;;  %639 = vmatprep.mubr.f32.mxu1 %v21239_v0 }
  0xe9   :  { %v167_v40 = vpop.permute.xlu0 %166  ;;  %v216_v41 = vpop.permute.xlu1 %215  ;;  %6204 = vmatpush1.bf16.msra.mxu0 %v16339_v25  ;;  %6313 = vmatpush1.bf16.msra.mxu1 %v16342_v26 }
  0xea   :  { %v257_v21 = vsel %vm249_vm0, %v17940_v31, %v167_v40  ;;  %6205 = vmatprep.subr.bf16.mxu0 %v16347_v28  ;;  %6314 = vmatprep.subr.bf16.mxu1 %v16350_v29  ;;  %v16384_v40 = vld [vmem:[#allocation7 + $0x5e8] ss:$28 sps:$4 sm:$0xff]  }
  0xeb   :  { %13697 = vmatmul.mubr.msk.f32.gmra.mxu0 %vm329_vm2, %v273_v37  ;;  %13713 = vmatmul.mubr.msk.f32.gmra.mxu1 %vm329_vm2, %v273_v37  ;;  %v274_v44 = vsel %vm266_vm1, %v257_v21, %v216_v41  ;;  %v16383_v37 = vld [vmem:[#allocation7 + $0x26c] ss:$28 sps:$4 sm:$0xff]   ;;  %v16389_v41 = vld [vmem:[#allocation7 + $0x234] ss:$28 sps:$4 sm:$0xff]  }
  0xec   :  { %484 = vmatprep.mubr.f32.mxu0 %v21239_v0  ;;  %645 = vmatprep.mubr.f32.mxu1 %v21239_v0  ;;  %v16392_v21 = vld [vmem:[#allocation7 + $0x5b4] ss:$28 sps:$4 sm:$0xff]  }
  0xed   :  { %v169_v47 = vpop.permute.xlu0 %168  ;;  %v218_v48 = vpop.permute.xlu1 %217  ;;  %6206 = vmatpush1.bf16.msra.mxu0 %v16345_v35  ;;  %6315 = vmatpush1.bf16.msra.mxu1 %v16348_v36 }
  0xee   :  { %v258_v31 = vsel %vm249_vm0, %v17949_v32, %v169_v47  ;;  %6207 = vmatprep.subr.bf16.mxu0 %v16353_v38  ;;  %6316 = vmatprep.subr.bf16.mxu1 %v16356_v39  ;;  %v16386_v38 = vld [vmem:[#allocation7 + $0x5ec] ss:$28 sps:$4 sm:$0xff]   ;;  %v16396_v47 = vld [vmem:[#allocation7 + $0x578] ss:$28 sps:$4 sm:$0xff]  }
  0xef   :  { %13698 = vmatmul.mubr.msk.f32.gmra.mxu0 %vm329_vm2, %v274_v44  ;;  %13714 = vmatmul.mubr.msk.f32.gmra.mxu1 %vm329_vm2, %v274_v44  ;;  %v275_v51 = vsel %vm266_vm1, %v258_v31, %v218_v48  ;;  %v16381_v39 = vld [vmem:[#allocation7 + $0x268] ss:$28 sps:$4 sm:$0xff]   ;;  %v16395_v44 = vld [vmem:[#allocation7 + $0x1fc] ss:$28 sps:$4 sm:$0xff]  }
  0xf0   :  { %490 = vmatprep.mubr.f32.mxu0 %v21239_v0  ;;  %651 = vmatprep.mubr.f32.mxu1 %v21239_v0  ;;  %v16401_v48 = vld [vmem:[#allocation7 + $0x1c4] ss:$28 sps:$4 sm:$0xff]  }
  0xf1   :  { %v171_v54 = vpop.permute.xlu0 %170  ;;  %v220_v55 = vpop.permute.xlu1 %219  ;;  %6208 = vmatpush1.bf16.msra.mxu0 %v16351_v42  ;;  %6317 = vmatpush1.bf16.msra.mxu1 %v16354_v43  ;;  %v16387_v42 = vld [vmem:[#allocation7 + $0x230] ss:$28 sps:$4 sm:$0xff]   ;;  %v16404_v31 = vld [vmem:[#allocation7 + $0x544] ss:$28 sps:$4 sm:$0xff]  }
  0xf2   :  { %v259_v32 = vsel %vm249_vm0, %v17958_v33, %v171_v54  ;;  %6209 = vmatprep.subr.bf16.mxu0 %v16359_v45  ;;  %6318 = vmatprep.subr.bf16.mxu1 %v16362_v46  ;;  %v17641_v33 = vld [vmem:[%s21229_s0 + $0x48] sm:$0xff]  ;;  %v16390_v43 = vld [vmem:[#allocation7 + $0x5b0] ss:$28 sps:$4 sm:$0xff]   ;;  %v16398_v45 = vld [vmem:[#allocation7 + $0x57c] ss:$28 sps:$4 sm:$0xff]  }
  0xf3   :  { %13699 = vmatmul.mubr.msk.f32.gmra.mxu0 %vm329_vm2, %v275_v51  ;;  %13715 = vmatmul.mubr.msk.f32.gmra.mxu1 %vm329_vm2, %v275_v51  ;;  %v276_v58 = vsel %vm266_vm1, %v259_v32, %v220_v55  ;;  %v16393_v46 = vld [vmem:[#allocation7 + $0x1f8] ss:$28 sps:$4 sm:$0xff]   ;;  %v16407_v51 = vld [vmem:[#allocation7 + $0x88c] ss:$28 sps:$4 sm:$0xff]  }
  0xf4   :  { %496 = vmatprep.mubr.f32.mxu0 %v21239_v0  ;;  %657 = vmatprep.mubr.f32.mxu1 %v21239_v0 }
  0xf5   :  { %v173_v61 = vpop.permute.xlu0 %172  ;;  %v222_v62 = vpop.permute.xlu1 %221  ;;  %6210 = vmatpush2.bf16.msra.mxu0 %v16357_v49  ;;  %6319 = vmatpush2.bf16.msra.mxu1 %v16360_v50  ;;  %v16399_v49 = vld [vmem:[#allocation7 + $0x1c0] ss:$28 sps:$4 sm:$0xff]  }
  0xf6   :  { %v260_v63 = vsel %vm249_vm0, %v17641_v33, %v173_v61  ;;  %6211 = vmatprep.subr.bf16.mxu0 %v16365_v52  ;;  %6320 = vmatprep.subr.bf16.mxu1 %v16368_v53  ;;  %v16402_v50 = vld [vmem:[#allocation7 + $0x540] ss:$28 sps:$4 sm:$0xff]   ;;  %v16410_v52 = vld [vmem:[#allocation7 + $0xc0c] ss:$28 sps:$4 sm:$0xff]   ;;  %v309_v53 = vlaneseq }
  0xf7   :  { %13700 = vmatmul.mubr.msk.f32.gmra.mxu0 %vm329_vm2, %v276_v58  ;;  %13716 = vmatmul.mubr.msk.f32.gmra.mxu1 %vm329_vm2, %v276_v58  ;;  %v277_v6 = vsel %vm266_vm1, %v260_v63, %v222_v62 }
  0xf8   :  { %502 = vmatprep.mubr.f32.mxu0 %v21239_v0  ;;  %663 = vmatprep.mubr.f32.mxu1 %v21239_v0  ;;  %v18128_v54 = vshrl.u32 %v309_v53, 7 }
  0xf9   :  { %v175_v2 = vpop.permute.xlu0 %174  ;;  %v224_v9 = vpop.permute.xlu1 %223  ;;  %6212 = vmatpush2.bf16.msra.mxu0 %v16363_v56  ;;  %6321 = vmatpush2.bf16.msra.mxu1 %v16366_v57  ;;  %v307_v56 = vld [vmem:[#allocation5] sm:$0xf] }
  0xfa   :  { %v261_v11 = vsel %vm249_vm0, %v17642_v10, %v175_v2  ;;  %6213 = vmatprep.subr.bf16.mxu0 %v16371_v59  ;;  %6322 = vmatprep.subr.bf16.mxu1 %v16374_v60  ;;  %21636 = vst [vmem:[#allocation18_spill] sm:$0xff] %v18128_v54  ;;  %v21244_v55 = vsub.s32 0, %v18128_v54  ;;  %v21242_v32 = vsub.s32 2, %v18128_v54  ;;  %v21243_v57 = vsub.s32 1, %v18128_v54 }
  0xfb   :  { %13701 = vmatmul.mubr.msk.f32.gmra.mxu0 %vm329_vm2, %v277_v6  ;;  %13717 = vmatmul.mubr.msk.f32.gmra.mxu1 %vm329_vm2, %v277_v6  ;;  %v278_v14 = vsel %vm266_vm1, %v261_v11, %v224_v9  ;;  %v21241_v58 = vsub.s32 3, %v18128_v54 }
  0xfc   :  { %508 = vmatprep.mubr.f32.mxu0 %v21239_v0  ;;  %669 = vmatprep.mubr.f32.mxu1 %v21239_v0  ;;  %v18136_v59 = vrot.slane %v307_v56, %v21244_v55  ;;  %v18140_v60 = vrot.slane %v307_v56, %v21242_v32  ;;  %v18144_v61 = vrot.slane %v307_v56, %v21243_v57 }
  0xfd   :  { %v177_v15 = vpop.permute.xlu0 %176  ;;  %v226_v4 = vpop.permute.xlu1 %225  ;;  %6214 = vmatpush2.bf16.msra.mxu0 %v16369_v1  ;;  %6323 = vmatpush2.bf16.msra.mxu1 %v16372_v3  ;;  %v18148_v62 = vrot.slane %v307_v56, %v21241_v58 }
  0xfe   :  { %v262_v18 = vsel %vm249_vm0, %v17643_v16, %v177_v15  ;;  %6215 = vmatprep.subr.bf16.mxu0 %v16377_v7  ;;  %6324 = vmatprep.subr.bf16.mxu1 %v16380_v8 }
  0xff   :  { %13702 = vmatmul.mubr.msk.f32.gmra.mxu0 %vm329_vm2, %v278_v14  ;;  %13718 = vmatmul.mubr.msk.f32.gmra.mxu1 %vm329_vm2, %v278_v14  ;;  %v279_v19 = vsel %vm266_vm1, %v262_v18, %v226_v4 }
 0x100   :  { %514 = vmatprep.mubr.f32.mxu0 %v21239_v0  ;;  %675 = vmatprep.mubr.f32.mxu1 %v21239_v0 }
 0x101   :  { %v179_v20 = vpop.permute.xlu0 %178  ;;  %v228_v22 = vpop.permute.xlu1 %227  ;;  %6216 = vmatpush2.bf16.msra.mxu0 %v16375_v12  ;;  %6325 = vmatpush2.bf16.msra.mxu1 %v16378_v13 }
 0x102   :  { %v263_v24 = vsel %vm249_vm0, %v17644_v23, %v179_v20  ;;  %6217 = vmatprep.subr.bf16.mxu0 %v16383_v37  ;;  %6326 = vmatprep.subr.bf16.mxu1 %v16386_v38 }
 0x103   :  { %13703 = vmatmul.mubr.msk.f32.gmra.mxu0 %vm329_vm2, %v279_v19  ;;  %13719 = vmatmul.mubr.msk.f32.gmra.mxu1 %vm329_vm2, %v279_v19  ;;  %v280_v5 = vsel %vm266_vm1, %v263_v24, %v228_v22 }
 0x104   :  { %520 = vmatprep.mubr.f32.mxu0 %v21239_v0  ;;  %681 = vmatprep.mubr.f32.mxu1 %v21239_v0 }
 0x105   :  { %v181_v25 = vpop.permute.xlu0 %180  ;;  %v230_v26 = vpop.permute.xlu1 %229  ;;  %6218 = vmatpush2.bf16.msra.mxu0 %v16381_v39  ;;  %6327 = vmatpush2.bf16.msra.mxu1 %v16384_v40 }
 0x106   :  { %v264_v28 = vsel %vm249_vm0, %v17645_v27, %v181_v25  ;;  %6219 = vmatprep.subr.bf16.mxu0 %v16389_v41  ;;  %6328 = vmatprep.subr.bf16.mxu1 %v16392_v21  ;;  %v21638_v41 = vmov 0  ;;  %v16405_v21 = vld [vmem:[#allocation7 + $0x888] ss:$28 sps:$4 sm:$0xff]  }
 0x107   :  { %13704 = vmatmul.mubr.msk.f32.gmra.mxu0 %vm329_vm2, %v280_v5  ;;  %13720 = vmatmul.mubr.msk.f32.gmra.mxu1 %vm329_vm2, %v280_v5  ;;  %v281_v29 = vsel %vm266_vm1, %v264_v28, %v230_v26  ;;  %v21639_v41 = vsel %vm18169_vm4, 4294967295, %v21638_v41 }
 0x108   :  { %526 = vmatprep.mubr.f32.mxu0 %v21239_v0  ;;  %687 = vmatprep.mubr.f32.mxu1 %v21239_v0  ;;  %21640 = vst [vmem:[#allocation20_spill] sm:$0xff] %v21639_v41 }
 0x109   :  { %v183_v30 = vpop.permute.xlu0 %182  ;;  %v232_v34 = vpop.permute.xlu1 %231  ;;  %6220 = vmatpush2.bf16.msra.mxu0 %v16387_v42  ;;  %6329 = vmatpush2.bf16.msra.mxu1 %v16390_v43 }
 0x10a   :  { %v265_v35 = vsel %vm249_vm0, %v17646_v17, %v183_v30  ;;  %6221 = vmatprep.subr.bf16.mxu0 %v16395_v44  ;;  %6330 = vmatprep.subr.bf16.mxu1 %v16398_v45 }
 0x10b   :  { %13705 = vmatmul.mubr.msk.f32.gmra.mxu0 %vm329_vm2, %v281_v29  ;;  %13721 = vmatmul.mubr.msk.f32.gmra.mxu1 %vm329_vm2, %v281_v29  ;;  %v282_v36 = vsel %vm266_vm1, %v265_v35, %v232_v34 }
 0x10c   :  { %532 = vmatprep.mubr.f32.mxu0 %v21239_v0  ;;  %693 = vmatprep.mubr.f32.mxu1 %v21239_v0  ;;  %v16446_v0 = vld [vmem:[#allocation7 + $0xabc] ss:$28 sps:$4 sm:$0xff]  }
 0x10d   :  { %6222 = vmatpush2.bf16.msra.mxu0 %v16393_v46  ;;  %6331 = vmatpush2.bf16.msra.mxu1 %v16396_v47  ;;  %v16408_v46 = vld [vmem:[#allocation7 + $0xc08] ss:$28 sps:$4 sm:$0xff]   ;;  %v16413_v47 = vld [vmem:[#allocation7 + $0x854] ss:$28 sps:$4 sm:$0xff]  }
 0x10e   :  { %6223 = vmatprep.subr.bf16.mxu0 %v16401_v48  ;;  %6332 = vmatprep.subr.bf16.mxu1 %v16404_v31 }
 0x10f   :  { %13706 = vmatmul.mubr.msk.f32.gmra.mxu0 %vm329_vm2, %v282_v36  ;;  %13722 = vmatmul.mubr.msk.f32.gmra.mxu1 %vm329_vm2, %v282_v36 }
 0x111   :  { %6224 = vmatpush2.bf16.msra.mxu0 %v16399_v49  ;;  %6333 = vmatpush2.bf16.msra.mxu1 %v16402_v50 }
 0x112   :  { %6411 = vmatprep.subr.bf16.mxu0 %v16407_v51  ;;  %6520 = vmatprep.subr.bf16.mxu1 %v16410_v52 }
 0x193   :  { %v444_v33 = vpop.f32.mrf.mxu0  ;;  %v605_v63 = vpop.f32.mrf.mxu1 }
 0x194   :  { %v445_v1 = vadd.f32 %v444_v33, %v18136_v59  ;;  %v606_v3 = vadd.f32 %v605_v63, %v18140_v60 }
 0x195   :  { %v446_v6 = vpop.f32.mrf.mxu0  ;;  %v607_v7 = vpop.f32.mrf.mxu1 }
 0x196   :  { %v700_v8 = vmax.f32 %v445_v1, 0.0  ;;  %v702_v2 = vmax.f32 %v606_v3, 0.0  ;;  %v447_v9 = vadd.f32 %v446_v6, %v18144_v61  ;;  %v608_v10 = vadd.f32 %v607_v7, %v18148_v62  ;;  %v16416_v1 = vld [vmem:[#allocation7 + $0xbd4] ss:$28 sps:$4 sm:$0xff]  }
 0x197   :  { %v450_v11 = vpop.f32.mrf.mxu0  ;;  %v611_v12 = vpop.f32.mrf.mxu1 }
 0x198   :  { %v701_v13 = vmax.f32 %v447_v9, 0.0  ;;  %v703_v14 = vmax.f32 %v608_v10, 0.0  ;;  %v451_v15 = vadd.f32 %v450_v11, %v18136_v59  ;;  %v612_v4 = vadd.f32 %v611_v12, %v18140_v60  ;;  %v16414_v9 = vld [vmem:[#allocation7 + $0xbd0] ss:$28 sps:$4 sm:$0xff]  }
 0x199   :  { %v452_v16 = vpop.f32.mrf.mxu0  ;;  %v613_v18 = vpop.f32.mrf.mxu1  ;;  %v773_v19 = vmul.f32 0.0, %v700_v8  ;;  %v775_v20 = vmul.f32 0.0, %v702_v2  ;;  %v16411_v2 = vld [vmem:[#allocation7 + $0x850] ss:$28 sps:$4 sm:$0xff]  }
 0x19a   :  { %v453_v22 = vadd.f32 %v452_v16, %v18144_v61  ;;  %v614_v23 = vadd.f32 %v613_v18, %v18148_v62  ;;  %v774_v24 = vmul.f32 0.0, %v701_v13  ;;  %v776_v5 = vmul.f32 0.0, %v703_v14 }
 0x19b   :  { %v704_v25 = vmax.f32 %v451_v15, 0.0  ;;  %v706_v26 = vmax.f32 %v612_v4, 0.0  ;;  %v456_v27 = vpop.f32.mrf.mxu0  ;;  %v617_v28 = vpop.f32.mrf.mxu1 }
 0x19c   :  { %v705_v29 = vmax.f32 %v453_v22, 0.0  ;;  %v707_v30 = vmax.f32 %v614_v23, 0.0  ;;  %v457_v35 = vadd.f32 %v456_v27, %v18136_v59  ;;  %v618_v36 = vadd.f32 %v617_v28, %v18140_v60  ;;  %v16419_v23 = vld [vmem:[#allocation7 + $0x81c] ss:$28 sps:$4 sm:$0xff]  }
 0x19d   :  { %v18158_v34 = vpack.c.bf16 %v704_v25, %v773_v19  ;;  %v18160_v17 = vpack.c.bf16 %v706_v26, %v775_v20  ;;  %v458_v37 = vpop.f32.mrf.mxu0  ;;  %v619_v38 = vpop.f32.mrf.mxu1 }
 0x19e   :  { %v18164_v39 = vpack.c.bf16 %v705_v29, %v774_v24  ;;  %v18166_v40 = vpack.c.bf16 %v707_v30, %v776_v5  ;;  %v459_v42 = vadd.f32 %v458_v37, %v18144_v61  ;;  %v620_v43 = vadd.f32 %v619_v38, %v18148_v62  ;;  %v16422_v24 = vld [vmem:[#allocation7 + $0xb9c] ss:$28 sps:$4 sm:$0xff]  }
 0x19f   :  { %v462_v44 = vpop.f32.mrf.mxu0  ;;  %v623_v45 = vpop.f32.mrf.mxu1  ;;  %v18184_v51 = vrot.slane %v18158_v34, 4  ;;  %v18187_v52 = vrot.slane %v18160_v17, 4  ;;  %v708_v53 = vmax.f32 %v457_v35, 0.0  ;;  %v710_v56 = vmax.f32 %v618_v36, 0.0 }
 0x1a0   :  { %21637 = vst [vmem:[#allocation19_spill] sm:$0xff] %v18164_v39  ;;  %v463_v48 = vadd.f32 %v462_v44, %v18136_v59  ;;  %v624_v31 = vadd.f32 %v623_v45, %v18140_v60  ;;  %v18178_v49 = vrot.slane %v18164_v39, 4  ;;  %v18181_v50 = vrot.slane %v18166_v40, 4 }
 0x1a1   :  { %21643 = vst [vmem:[#allocation23_spill] sm:$0xff] %v18184_v51  ;;  %21644 = vst [vmem:[#allocation24_spill] sm:$0xff] %v18187_v52  ;;  %v464_v33 = vpop.f32.mrf.mxu0  ;;  %v625_v63 = vpop.f32.mrf.mxu1  ;;  %v709_v10 = vmax.f32 %v459_v42, 0.0  ;;  %v711_v11 = vmax.f32 %v620_v43, 0.0  ;;  %v16417_v42 = vld [vmem:[#allocation7 + $0x818] ss:$28 sps:$4 sm:$0xff]  }
 0x1a2   :  { %21641 = vst [vmem:[#allocation21_spill] sm:$0xff] %v18178_v49  ;;  %21642 = vst [vmem:[#allocation22_spill] sm:$0xff] %v18181_v50  ;;  %v712_v3 = vmax.f32 %v463_v48, 0.0  ;;  %v714_v6 = vmax.f32 %v624_v31, 0.0  ;;  %v465_v7 = vadd.f32 %v464_v33, %v18144_v61  ;;  %v626_v8 = vadd.f32 %v625_v63, %v18148_v62  ;;  %15005 = vmatprep.mubr.msk.bf16.mxu0 %vm18169_vm4, %v18178_v49  ;;  %v16420_v31 = vld [vmem:[#allocation7 + $0xb98] ss:$28 sps:$4 sm:$0xff]  }
 0x1a3   :  { %15009 = vmatprep.mubr.msk.bf16.mxu1 %vm18169_vm4, %v18181_v50  ;;  %v468_v12 = vpop.f32.mrf.mxu0  ;;  %v629_v13 = vpop.f32.mrf.mxu1  ;;  %15007 = vmatmul.mubr.msk.bf16.vlgmr.msra.gmra.mxu0 %vm18169_vm4, %v18184_v51 }
 0x1a4   :  { %15011 = vmatmul.mubr.msk.bf16.vlgmr.msra.gmra.mxu1 %vm18169_vm4, %v18187_v52  ;;  %v18203_v14 = vpack.c.bf16 %v712_v3, %v708_v53  ;;  %v18205_v15 = vpack.c.bf16 %v714_v6, %v710_v56  ;;  %v713_v4 = vmax.f32 %v465_v7, 0.0  ;;  %v715_v16 = vmax.f32 %v626_v8, 0.0  ;;  %6412 = vmatpush1.bf16.msra.mxu0 %v16405_v21 }
 0x1a5   :  { %6521 = vmatpush1.bf16.msra.mxu1 %v16408_v46  ;;  %v469_v18 = vadd.f32 %v468_v12, %v18136_v59  ;;  %v630_v19 = vadd.f32 %v629_v13, %v18140_v60  ;;  %v470_v20 = vpop.f32.mrf.mxu0  ;;  %v631_v22 = vpop.f32.mrf.mxu1  ;;  %6413 = vmatprep.subr.bf16.mxu0 %v16413_v47 }
 0x1a6   :  { %21645 = vst [vmem:[#allocation25_spill] sm:$0xff] %v18203_v14  ;;  %21646 = vst [vmem:[#allocation26_spill] sm:$0xff] %v18205_v15  ;;  %6522 = vmatprep.subr.bf16.mxu1 %v16416_v1  ;;  %v18209_v5 = vpack.c.bf16 %v713_v4, %v709_v10  ;;  %v18211_v25 = vpack.c.bf16 %v715_v16, %v711_v11  ;;  %v906_v26 = vrot.slane %v18203_v14, 4  ;;  %v910_v27 = vrot.slane %v18205_v15, 4  ;;  %v16425_v1 = vld [vmem:[#allocation7 + $0x7e4] ss:$28 sps:$4 sm:$0xff]  }
 0x1a7   :  { %v471_v28 = vadd.f32 %v470_v20, %v18144_v61  ;;  %v632_v29 = vadd.f32 %v631_v22, %v18148_v62  ;;  %v474_v30 = vpop.f32.mrf.mxu0  ;;  %v635_v35 = vpop.f32.mrf.mxu1  ;;  %v716_v43 = vmax.f32 %v469_v18, 0.0  ;;  %v718_v44 = vmax.f32 %v630_v19, 0.0  ;;  %v16428_v10 = vld [vmem:[#allocation7 + $0xb64] ss:$28 sps:$4 sm:$0xff]  }
 0x1a8   :  { %v908_v36 = vrot.slane %v18209_v5, 4  ;;  %v912_v37 = vrot.slane %v18211_v25, 4  ;;  %v475_v38 = vadd.f32 %v474_v30, %v18136_v59  ;;  %v636_v21 = vadd.f32 %v635_v35, %v18140_v60  ;;  %6414 = vmatpush1.bf16.msra.mxu0 %v16411_v2  ;;  %v16423_v22 = vld [vmem:[#allocation7 + $0x7e0] ss:$28 sps:$4 sm:$0xff]   ;;  %v16431_v30 = vld [vmem:[#allocation7 + $0x7ac] ss:$28 sps:$4 sm:$0xff]  }
 0x1a9   :  { %6523 = vmatpush1.bf16.msra.mxu1 %v16414_v9  ;;  %v717_v45 = vmax.f32 %v471_v28, 0.0  ;;  %v719_v46 = vmax.f32 %v632_v29, 0.0  ;;  %v476_v47 = vpop.f32.mrf.mxu0  ;;  %v637_v48 = vpop.f32.mrf.mxu1  ;;  %6415 = vmatprep.subr.bf16.mxu0 %v16419_v23  ;;  %v18239_v2 = vsel %vm901_vm3, %v18184_v51, %v906_v26  ;;  %v18245_v9 = vsel %vm901_vm3, %v18187_v52, %v910_v27  ;;  %v16426_v23 = vld [vmem:[#allocation7 + $0xb60] ss:$28 sps:$4 sm:$0xff]  }
 0x1aa   :  { %6524 = vmatprep.subr.bf16.mxu1 %v16422_v24  ;;  %v720_v53 = vmax.f32 %v475_v38, 0.0  ;;  %v722_v56 = vmax.f32 %v636_v21, 0.0  ;;  %v477_v33 = vadd.f32 %v476_v47, %v18144_v61  ;;  %v638_v63 = vadd.f32 %v637_v48, %v18148_v62  ;;  %21649 = vst [vmem:[#allocation29_spill] sm:$0xff] %v18239_v2  ;;  %21650 = vst [vmem:[#allocation30_spill] sm:$0xff] %v18245_v9  ;;  %v16434_v47 = vld [vmem:[#allocation7 + $0xb2c] ss:$28 sps:$4 sm:$0xff]  }
 0x1ab   :  { %v480_v3 = vpop.f32.mrf.mxu0  ;;  %v641_v6 = vpop.f32.mrf.mxu1  ;;  %v18227_v7 = vsel %vm901_vm3, %v18178_v49, %v908_v36  ;;  %v18233_v8 = vsel %vm901_vm3, %v18181_v50, %v912_v37 }
 0x1ac   :  { %21647 = vst [vmem:[#allocation27_spill] sm:$0xff] %v18227_v7  ;;  %21648 = vst [vmem:[#allocation28_spill] sm:$0xff] %v18233_v8  ;;  %v18247_v11 = vpack.c.bf16 %v720_v53, %v716_v43  ;;  %v18249_v12 = vpack.c.bf16 %v722_v56, %v718_v44  ;;  %v721_v13 = vmax.f32 %v477_v33, 0.0  ;;  %v723_v4 = vmax.f32 %v638_v63, 0.0  ;;  %6233 = vmatprep.mubr.bf16.mxu0 %v18227_v7  ;;  %v16432_v53 = vld [vmem:[#allocation7 + $0xb28] ss:$28 sps:$4 sm:$0xff]  }
 0x1ad   :  { %6342 = vmatprep.mubr.bf16.mxu1 %v18233_v8  ;;  %v481_v16 = vadd.f32 %v480_v3, %v18136_v59  ;;  %v642_v18 = vadd.f32 %v641_v6, %v18140_v60  ;;  %6234 = vmatmul.mubr.bf16.gmra.mxu0 %v18239_v2  ;;  %v482_v19 = vpop.f32.mrf.mxu0  ;;  %v643_v20 = vpop.f32.mrf.mxu1 }
 0x1ae   :  { %21651 = vst [vmem:[#allocation31_spill] sm:$0xff] %v18247_v11  ;;  %21652 = vst [vmem:[#allocation32_spill] sm:$0xff] %v18249_v12  ;;  %6343 = vmatmul.mubr.bf16.gmra.mxu1 %v18245_v9  ;;  %v914_v24 = vrot.slane %v18247_v11, 4  ;;  %v18258_v28 = vpack.c.bf16 %v721_v13, %v717_v45  ;;  %v18260_v29 = vpack.c.bf16 %v723_v4, %v719_v46  ;;  %6416 = vmatpush1.bf16.msra.mxu0 %v16417_v42 }
 0x1af   :  { %6525 = vmatpush1.bf16.msra.mxu1 %v16420_v31  ;;  %v21245_v35 = vrot.slane %v18249_v12, 4  ;;  %v483_v38 = vadd.f32 %v482_v19, %v18144_v61  ;;  %v644_v21 = vadd.f32 %v643_v20, %v18148_v62  ;;  %v486_v43 = vpop.f32.mrf.mxu0  ;;  %v647_v44 = vpop.f32.mrf.mxu1  ;;  %6417 = vmatprep.subr.bf16.mxu0 %v16425_v1  ;;  %v16429_v31 = vld [vmem:[#allocation7 + $0x7a8] ss:$28 sps:$4 sm:$0xff]   ;;  %v724_v56 = vmax.f32 %v481_v16, 0.0  ;;  %v16440_v16 = vld [vmem:[#allocation7 + $0xaf4] ss:$28 sps:$4 sm:$0xff]  }
 0x1b0   :  { %21653 = vst [vmem:[#allocation33_spill] sm:$0xff] %v18258_v28  ;;  %21654 = vst [vmem:[#allocation34_spill] sm:$0xff] %v18260_v29  ;;  %6526 = vmatprep.subr.bf16.mxu1 %v16428_v10  ;;  %v916_v48 = vrot.slane %v18258_v28, 4  ;;  %v920_v45 = vrot.slane %v18260_v29, 4  ;;  %v487_v46 = vadd.f32 %v486_v43, %v18136_v59  ;;  %v648_v42 = vadd.f32 %v647_v44, %v18140_v60  ;;  %v16437_v10 = vld [vmem:[#allocation7 + $0x774] ss:$28 sps:$4 sm:$0xff]  }
 0x1b1   :  { %v726_v33 = vmax.f32 %v642_v18, 0.0  ;;  %v725_v63 = vmax.f32 %v483_v38, 0.0  ;;  %v488_v3 = vpop.f32.mrf.mxu0  ;;  %v649_v6 = vpop.f32.mrf.mxu1  ;;  %v18274_v1 = vsel %vm901_vm3, %v906_v26, %v914_v24  ;;  %v727_v18 = vmax.f32 %v644_v21, 0.0 }
 0x1b2   :  { %21655 = vst [vmem:[#allocation35_spill] sm:$0xff] %v18274_v1  ;;  %v728_v13 = vmax.f32 %v487_v46, 0.0  ;;  %v730_v4 = vmax.f32 %v648_v42, 0.0  ;;  %v489_v19 = vadd.f32 %v488_v3, %v18144_v61  ;;  %v650_v20 = vadd.f32 %v649_v6, %v18148_v62  ;;  %6418 = vmatpush1.bf16.msra.mxu0 %v16423_v22 }
 0x1b3   :  { %6527 = vmatpush1.bf16.msra.mxu1 %v16426_v23  ;;  %v492_v38 = vpop.f32.mrf.mxu0  ;;  %v653_v43 = vpop.f32.mrf.mxu1  ;;  %v18283_v26 = vsel %vm901_vm3, %v908_v36, %v916_v48  ;;  %v18290_v44 = vsel %vm901_vm3, %v912_v37, %v920_v45  ;;  %v18297_v22 = vsel %vm901_vm3, %v910_v27, %v21245_v35  ;;  %6419 = vmatprep.subr.bf16.mxu0 %v16431_v30 }
 0x1b4   :  { %21656 = vst [vmem:[#allocation36_spill] sm:$0xff] %v18283_v26  ;;  %21657 = vst [vmem:[#allocation37_spill] sm:$0xff] %v18290_v44  ;;  %6528 = vmatprep.subr.bf16.mxu1 %v16434_v47  ;;  %v18299_v23 = vpack.c.bf16 %v728_v13, %v724_v56  ;;  %v18301_v36 = vpack.c.bf16 %v730_v4, %v726_v33  ;;  %v729_v21 = vmax.f32 %v489_v19, 0.0  ;;  %v731_v46 = vmax.f32 %v650_v20, 0.0  ;;  %v16435_v47 = vld [vmem:[#allocation7 + $0x770] ss:$28 sps:$4 sm:$0xff]  }
 0x1b5   :  { %21658 = vst [vmem:[#allocation38_spill] sm:$0xff] %v18297_v22  ;;  %6243 = vmatprep.mubr.bf16.mxu0 %v18283_v26  ;;  %6352 = vmatprep.mubr.bf16.mxu1 %v18290_v44  ;;  %v493_v37 = vadd.f32 %v492_v38, %v18136_v59  ;;  %v654_v42 = vadd.f32 %v653_v43, %v18140_v60  ;;  %v494_v27 = vpop.f32.mrf.mxu0  ;;  %v655_v30 = vpop.f32.mrf.mxu1  ;;  %v16438_v56 = vld [vmem:[#allocation7 + $0xaf0] ss:$28 sps:$4 sm:$0xff]   ;;  %v16443_v13 = vld [vmem:[#allocation7 + $0x73c] ss:$28 sps:$4 sm:$0xff]  }
 0x1b6   :  { %21659 = vst [vmem:[#allocation39_spill] sm:$0xff] %v18299_v23  ;;  %21660 = vst [vmem:[#allocation40_spill] sm:$0xff] %v18301_v36  ;;  %6244 = vmatmul.mubr.bf16.gmra.mxu0 %v18274_v1  ;;  %6353 = vmatmul.mubr.bf16.gmra.mxu1 %v18297_v22  ;;  %v21248_v33 = vrot.slane %v18299_v23, 4  ;;  %v18310_v3 = vpack.c.bf16 %v729_v21, %v725_v63  ;;  %v18312_v6 = vpack.c.bf16 %v731_v46, %v727_v18  ;;  %v16444_v21 = vld [vmem:[#allocation7 + $0xab8] ss:$28 sps:$4 sm:$0xff]  }
 0x1b7   :  { %6420 = vmatpush1.bf16.msra.mxu0 %v16429_v31  ;;  %6529 = vmatpush1.bf16.msra.mxu1 %v16432_v53  ;;  %v495_v19 = vadd.f32 %v494_v27, %v18144_v61  ;;  %v656_v20 = vadd.f32 %v655_v30, %v18148_v62  ;;  %v498_v38 = vpop.f32.mrf.mxu0  ;;  %v659_v43 = vpop.f32.mrf.mxu1  ;;  %v16441_v53 = vld [vmem:[#allocation7 + $0x738] ss:$28 sps:$4 sm:$0xff]   ;;  %v732_v46 = vmax.f32 %v493_v37, 0.0  ;;  %v734_v32 = vmax.f32 %v654_v42, 0.0  ;;  %v16452_v37 = vld [vmem:[#allocation7 + $0xa84] ss:$28 sps:$4 sm:$0xff]  }
 0x1b8   :  { %21661 = vst [vmem:[#allocation41_spill] sm:$0xff] %v18310_v3  ;;  %21662 = vst [vmem:[#allocation42_spill] sm:$0xff] %v18312_v6  ;;  %6421 = vmatprep.subr.bf16.mxu0 %v16437_v10  ;;  %6530 = vmatprep.subr.bf16.mxu1 %v16440_v16  ;;  %v21247_v58 = vrot.slane %v18310_v3, 4  ;;  %v21246_v63 = vrot.slane %v18312_v6, 4  ;;  %v499_v18 = vadd.f32 %v498_v38, %v18136_v59  ;;  %v16449_v16 = vld [vmem:[#allocation7 + $0x704] ss:$28 sps:$4 sm:$0xff]  }
 0x1b9   :  { %v660_v31 = vadd.f32 %v659_v43, %v18140_v60  ;;  %v733_v27 = vmax.f32 %v495_v19, 0.0  ;;  %v500_v57 = vpop.f32.mrf.mxu0  ;;  %v661_v30 = vpop.f32.mrf.mxu1  ;;  %v18326_v10 = vsel %vm901_vm3, %v914_v24, %v21248_v33  ;;  %v735_v42 = vmax.f32 %v656_v20, 0.0  ;;  %v16458_v33 = vld [vmem:[#allocation7 + $0xdcc] ss:$28 sps:$4 sm:$0xff]  }
 0x1ba   :  { %21663 = vst [vmem:[#allocation43_spill] sm:$0xff] %v18326_v10  ;;  %v736_v55 = vmax.f32 %v499_v18, 0.0  ;;  %v501_v38 = vadd.f32 %v500_v57, %v18144_v61  ;;  %v662_v43 = vadd.f32 %v661_v30, %v18148_v62  ;;  %v18335_v24 = vsel %vm901_vm3, %v916_v48, %v21247_v58 }
 0x1bb   :  { %v738_v35 = vmax.f32 %v660_v31, 0.0  ;;  %6422 = vmatpush1.bf16.msra.mxu0 %v16435_v47  ;;  %6531 = vmatpush1.bf16.msra.mxu1 %v16438_v56  ;;  %v504_v19 = vpop.f32.mrf.mxu0  ;;  %v665_v4 = vpop.f32.mrf.mxu1  ;;  %21664 = vst [vmem:[#allocation44_spill] sm:$0xff] %v18335_v24  ;;  %v18342_v57 = vsel %vm901_vm3, %v920_v45, %v21246_v63  ;;  %v21666_v47 = vrot.slane %v18301_v36, 4  ;;  %v21667_v56 = vrot.slane %v18249_v12, 4 }
 0x1bc   :  { %21665 = vst [vmem:[#allocation45_spill] sm:$0xff] %v18342_v57  ;;  %6423 = vmatprep.subr.bf16.mxu0 %v16443_v13  ;;  %6532 = vmatprep.subr.bf16.mxu1 %v16446_v0  ;;  %v18351_v18 = vpack.c.bf16 %v736_v55, %v732_v46  ;;  %v737_v31 = vmax.f32 %v501_v38, 0.0  ;;  %v739_v30 = vmax.f32 %v662_v43, 0.0  ;;  %v505_v45 = vadd.f32 %v504_v19, %v18136_v59  ;;  %v16447_v55 = vld [vmem:[#allocation7 + $0x700] ss:$28 sps:$4 sm:$0xff]  }
 0x1bd   :  { %v18349_v20 = vsel %vm901_vm3, %v21667_v56, %v21666_v47  ;;  %v18353_v48 = vpack.c.bf16 %v738_v35, %v734_v32  ;;  %6253 = vmatprep.mubr.bf16.mxu0 %v18335_v24  ;;  %6362 = vmatprep.mubr.bf16.mxu1 %v18342_v57  ;;  %v666_v63 = vadd.f32 %v665_v4, %v18140_v60  ;;  %v506_v13 = vpop.f32.mrf.mxu0  ;;  %v667_v0 = vpop.f32.mrf.mxu1  ;;  %v16450_v46 = vld [vmem:[#allocation7 + $0xa80] ss:$28 sps:$4 sm:$0xff]   ;;  %v16455_v43 = vld [vmem:[#allocation7 + $0xa4c] ss:$28 sps:$4 sm:$0xff]   ;;  %v16461_v32 = vld [vmem:[#allocation7 + $0xa14] ss:$28 sps:$4 sm:$0xff]  }
 0x1be   :  { %21668 = vst [vmem:[#allocation46_spill] sm:$0xff] %v18349_v20  ;;  %21669 = vst [vmem:[#allocation47_spill] sm:$0xff] %v18351_v18  ;;  %6254 = vmatmul.mubr.bf16.gmra.mxu0 %v18326_v10  ;;  %6363 = vmatmul.mubr.bf16.gmra.mxu1 %v18349_v20  ;;  %v18362_v35 = vpack.c.bf16 %v737_v31, %v733_v27  ;;  %v18364_v38 = vpack.c.bf16 %v739_v30, %v735_v42  ;;  %v16456_v31 = vld [vmem:[#allocation7 + $0xdc8] ss:$28 sps:$4 sm:$0xff]   ;;  %v740_v30 = vmax.f32 %v505_v45, 0.0 }
 0x1bf   :  { %21670 = vst [vmem:[#allocation48_spill] sm:$0xff] %v18353_v48  ;;  %6424 = vmatpush1.bf16.msra.mxu0 %v16441_v53  ;;  %6533 = vmatpush1.bf16.msra.mxu1 %v16444_v21  ;;  %v507_v4 = vadd.f32 %v506_v13, %v18144_v61  ;;  %v668_v47 = vadd.f32 %v667_v0, %v18148_v62  ;;  %v510_v56 = vpop.f32.mrf.mxu0  ;;  %v671_v58 = vpop.f32.mrf.mxu1  ;;  %v16453_v21 = vld [vmem:[#allocation7 + $0xa48] ss:$28 sps:$4 sm:$0xff]   ;;  %v742_v19 = vmax.f32 %v666_v63, 0.0  ;;  %v21673_v51 = vrot.slane %v18351_v18, 4 }
 0x1c0   :  { %21671 = vst [vmem:[#allocation49_spill] sm:$0xff] %v18362_v35  ;;  %21672 = vst [vmem:[#allocation50_spill] sm:$0xff] %v18364_v38  ;;  %6425 = vmatprep.subr.bf16.mxu0 %v16449_v16  ;;  %6534 = vmatprep.subr.bf16.mxu1 %v16452_v37  ;;  %v511_v42 = vadd.f32 %v510_v56, %v18136_v59  ;;  %v672_v53 = vadd.f32 %v671_v58, %v18140_v60  ;;  %v21674_v16 = vrot.slane %v18299_v23, 4  ;;  %v16464_v63 = vld [vmem:[#allocation7 + $0xd94] ss:$28 sps:$4 sm:$0xff]  }
 0x1c1   :  { %v741_v13 = vmax.f32 %v507_v4, 0.0  ;;  %v512_v52 = vpop.f32.mrf.mxu0  ;;  %v673_v0 = vpop.f32.mrf.mxu1  ;;  %v743_v45 = vmax.f32 %v668_v47, 0.0  ;;  %v21676_v41 = vrot.slane %v18362_v35, 4  ;;  %v21677_v49 = vrot.slane %v18310_v3, 4  ;;  %v16485_v24 = vld [vmem:[#allocation7 + $0x934] ss:$28 sps:$4 sm:$0xff]  }
 0x1c2   :  { %v18378_v37 = vsel %vm901_vm3, %v21674_v16, %v21673_v51  ;;  %v744_v27 = vmax.f32 %v511_v42, 0.0  ;;  %v746_v54 = vmax.f32 %v672_v53, 0.0  ;;  %v513_v56 = vadd.f32 %v512_v52, %v18144_v61 }
 0x1c3   :  { %21675 = vst [vmem:[#allocation51_spill] sm:$0xff] %v18378_v37  ;;  %v674_v58 = vadd.f32 %v673_v0, %v18148_v62  ;;  %6426 = vmatpush1.bf16.msra.mxu0 %v16447_v55  ;;  %6535 = vmatpush1.bf16.msra.mxu1 %v16450_v46  ;;  %v516_v4 = vpop.f32.mrf.mxu0  ;;  %v677_v50 = vpop.f32.mrf.mxu1  ;;  %v18387_v51 = vsel %vm901_vm3, %v21677_v49, %v21676_v41  ;;  %v21679_v42 = vrot.slane %v18364_v38, 4  ;;  %v21680_v53 = vrot.slane %v18312_v6, 4 }
 0x1c4   :  { %21678 = vst [vmem:[#allocation52_spill] sm:$0xff] %v18387_v51  ;;  %v21682_v55 = vrot.slane %v18353_v48, 4  ;;  %v21683_v46 = vrot.slane %v18301_v36, 4  ;;  %6427 = vmatprep.subr.bf16.mxu0 %v16455_v43  ;;  %6536 = vmatprep.subr.bf16.mxu1 %v16458_v33  ;;  %v18403_v0 = vpack.c.bf16 %v744_v27, %v740_v30  ;;  %v18405_v41 = vpack.c.bf16 %v746_v54, %v742_v19  ;;  %v16459_v27 = vld [vmem:[#allocation7 + $0xa10] ss:$28 sps:$4 sm:$0xff]  }
 0x1c5   :  { %v18394_v52 = vsel %vm901_vm3, %v21680_v53, %v21679_v42  ;;  %v745_v49 = vmax.f32 %v513_v56, 0.0  ;;  %v747_v16 = vmax.f32 %v674_v58, 0.0  ;;  %6263 = vmatprep.mubr.bf16.mxu0 %v18387_v51  ;;  %v517_v42 = vadd.f32 %v516_v4, %v18136_v59  ;;  %v518_v43 = vpop.f32.mrf.mxu0  ;;  %v679_v33 = vpop.f32.mrf.mxu1  ;;  %v16462_v30 = vld [vmem:[#allocation7 + $0xd90] ss:$28 sps:$4 sm:$0xff]   ;;  %v16467_v58 = vld [vmem:[#allocation7 + $0x9dc] ss:$28 sps:$4 sm:$0xff]  }
 0x1c6   :  { %21681 = vst [vmem:[#allocation53_spill] sm:$0xff] %v18394_v52  ;;  %v18401_v47 = vsel %vm901_vm3, %v21683_v46, %v21682_v55  ;;  %21685 = vst [vmem:[#allocation55_spill] sm:$0xff] %v18403_v0  ;;  %6372 = vmatprep.mubr.bf16.mxu1 %v18394_v52  ;;  %v678_v53 = vadd.f32 %v677_v50, %v18140_v60  ;;  %6264 = vmatmul.mubr.bf16.gmra.mxu0 %v18378_v37  ;;  %v16470_v37 = vld [vmem:[#allocation7 + $0xd5c] ss:$28 sps:$4 sm:$0xff]   ;;  %v21689_v20 = vrot.slane %v18403_v0, 4 }
 0x1c7   :  { %21684 = vst [vmem:[#allocation54_spill] sm:$0xff] %v18401_v47  ;;  %21686 = vst [vmem:[#allocation56_spill] sm:$0xff] %v18405_v41  ;;  %6373 = vmatmul.mubr.bf16.gmra.mxu1 %v18401_v47  ;;  %v18414_v19 = vpack.c.bf16 %v745_v49, %v741_v13  ;;  %v18416_v56 = vpack.c.bf16 %v747_v16, %v743_v45  ;;  %6428 = vmatpush2.bf16.msra.mxu0 %v16453_v21  ;;  %v522_v46 = vpop.f32.mrf.mxu0  ;;  %v683_v47 = vpop.f32.mrf.mxu1  ;;  %v16468_v49 = vld [vmem:[#allocation7 + $0xd58] ss:$28 sps:$4 sm:$0xff]   ;;  %v748_v16 = vmax.f32 %v517_v42, 0.0 }
 0x1c8   :  { %6537 = vmatpush2.bf16.msra.mxu1 %v16456_v31  ;;  %v519_v50 = vadd.f32 %v518_v43, %v18144_v61  ;;  %v680_v55 = vadd.f32 %v679_v33, %v18148_v62  ;;  %6429 = vmatprep.subr.bf16.mxu0 %v16461_v32  ;;  %v523_v45 = vadd.f32 %v522_v46, %v18136_v59  ;;  %v16465_v31 = vld [vmem:[#allocation7 + $0x9d8] ss:$28 sps:$4 sm:$0xff]   ;;  %v750_v4 = vmax.f32 %v678_v53, 0.0  ;;  %v16473_v54 = vld [vmem:[#allocation7 + $0x9a4] ss:$28 sps:$4 sm:$0xff]  }
 0x1c9   :  { %21687 = vst [vmem:[#allocation57_spill] sm:$0xff] %v18414_v19  ;;  %21688 = vst [vmem:[#allocation58_spill] sm:$0xff] %v18416_v56  ;;  %6538 = vmatprep.subr.bf16.mxu1 %v16464_v63  ;;  %v684_v21 = vadd.f32 %v683_v47, %v18140_v60  ;;  %v524_v52 = vpop.f32.mrf.mxu0  ;;  %v685_v33 = vpop.f32.mrf.mxu1  ;;  %v21690_v32 = vrot.slane %v18351_v18, 4  ;;  %v16476_v42 = vld [vmem:[#allocation7 + $0xd24] ss:$28 sps:$4 sm:$0xff]   ;;  %v21692_v57 = vrot.slane %v18414_v19, 4 }
 0x1ca   :  { %v749_v43 = vmax.f32 %v519_v50, 0.0  ;;  %v752_v13 = vmax.f32 %v523_v45, 0.0  ;;  %v525_v46 = vadd.f32 %v524_v52, %v18144_v61  ;;  %v686_v47 = vadd.f32 %v685_v33, %v18148_v62 }
 0x1cb   :  { %v18430_v63 = vsel %vm901_vm3, %v21690_v32, %v21689_v20  ;;  %v754_v51 = vmax.f32 %v684_v21, 0.0  ;;  %6430 = vmatpush2.bf16.msra.mxu0 %v16459_v27  ;;  %v751_v53 = vmax.f32 %v680_v55, 0.0  ;;  %v528_v50 = vpop.f32.mrf.mxu0  ;;  %v689_v10 = vpop.f32.mrf.mxu1  ;;  %v21693_v22 = vrot.slane %v18362_v35, 4 }
 0x1cc   :  { %21691 = vst [vmem:[#allocation59_spill] sm:$0xff] %v18430_v63  ;;  %6539 = vmatpush2.bf16.msra.mxu1 %v16462_v30  ;;  %v21695_v45 = vrot.slane %v18416_v56, 4  ;;  %v21696_v21 = vrot.slane %v18364_v38, 4  ;;  %v21698_v27 = vrot.slane %v18405_v41, 4  ;;  %v21699_v30 = vrot.slane %v18353_v48, 4  ;;  %6431 = vmatprep.subr.bf16.mxu0 %v16467_v58 }
 0x1cd   :  { %v18439_v20 = vsel %vm901_vm3, %v21693_v22, %v21692_v57  ;;  %6540 = vmatprep.subr.bf16.mxu1 %v16470_v37  ;;  %v18455_v33 = vpack.c.bf16 %v752_v13, %v748_v16  ;;  %v18457_v22 = vpack.c.bf16 %v754_v51, %v750_v4  ;;  %v753_v57 = vmax.f32 %v525_v46, 0.0  ;;  %v16471_v58 = vld [vmem:[#allocation7 + $0x9a0] ss:$28 sps:$4 sm:$0xff]   ;;  %v16479_v16 = vld [vmem:[#allocation7 + $0x96c] ss:$28 sps:$4 sm:$0xff]  }
 0x1ce   :  { %21694 = vst [vmem:[#allocation60_spill] sm:$0xff] %v18439_v20  ;;  %v18446_v52 = vsel %vm901_vm3, %v21696_v21, %v21695_v45  ;;  %v18453_v55 = vsel %vm901_vm3, %v21699_v30, %v21698_v27  ;;  %v755_v32 = vmax.f32 %v686_v47, 0.0  ;;  %6273 = vmatprep.mubr.bf16.mxu0 %v18439_v20  ;;  %v529_v45 = vadd.f32 %v528_v50, %v18136_v59  ;;  %v530_v21 = vpop.f32.mrf.mxu0  ;;  %v691_v27 = vpop.f32.mrf.mxu1  ;;  %v16474_v37 = vld [vmem:[#allocation7 + $0xd20] ss:$28 sps:$4 sm:$0xff]   ;;  %v16480_v20 = vld [vmem:[#allocation7 + $0xce8] ss:$28 sps:$4 sm:$0xff]  }
 0x1cf   :  { %21697 = vst [vmem:[#allocation61_spill] sm:$0xff] %v18446_v52  ;;  %21700 = vst [vmem:[#allocation62_spill] sm:$0xff] %v18453_v55  ;;  %6382 = vmatprep.mubr.bf16.mxu1 %v18446_v52  ;;  %6274 = vmatmul.mubr.bf16.gmra.mxu0 %v18430_v63  ;;  %v18465_v51 = vpack.c.bf16 %v753_v57, %v749_v43  ;;  %v690_v47 = vadd.f32 %v689_v10, %v18140_v60 }
 0x1d0   :  { %21701 = vst [vmem:[#allocation63_spill] sm:$0xff] %v18455_v33  ;;  %21702 = vst [vmem:[#allocation64_spill] sm:$0xff] %v18457_v22  ;;  %6383 = vmatmul.mubr.bf16.gmra.mxu1 %v18453_v55  ;;  %v18467_v4 = vpack.c.bf16 %v755_v32, %v751_v53  ;;  %6432 = vmatpush2.bf16.msra.mxu0 %v16465_v31  ;;  %v534_v50 = vpop.f32.mrf.mxu0  ;;  %v695_v30 = vpop.f32.mrf.mxu1  ;;  %v16482_v55 = vld [vmem:[#allocation7 + $0xcec] ss:$28 sps:$4 sm:$0xff]   ;;  %v531_v57 = vadd.f32 %v530_v21, %v18144_v61  ;;  %v16488_v21 = vld [vmem:[#allocation7 + $0xcb4] ss:$28 sps:$4 sm:$0xff]  }
 0x1d1   :  { %21703 = vst [vmem:[#allocation65_spill] sm:$0xff] %v18465_v51  ;;  %6541 = vmatpush2.bf16.msra.mxu1 %v16468_v49  ;;  %6433 = vmatprep.subr.bf16.mxu0 %v16473_v54  ;;  %v948_v63 = vrot.slane %v18465_v51, 4  ;;  %v535_v43 = vadd.f32 %v534_v50, %v18136_v59  ;;  %v696_v53 = vadd.f32 %v695_v30, %v18140_v60  ;;  %v16477_v31 = vld [vmem:[#allocation7 + $0x968] ss:$28 sps:$4 sm:$0xff]   ;;  %v756_v49 = vmax.f32 %v529_v45, 0.0 }
 0x1d2   :  { %21704 = vst [vmem:[#allocation66_spill] sm:$0xff] %v18467_v4  ;;  %6542 = vmatprep.subr.bf16.mxu1 %v16476_v42  ;;  %v952_v13 = vrot.slane %v18467_v4, 4  ;;  %v692_v32 = vadd.f32 %v691_v27, %v18148_v62  ;;  %v536_v10 = vpop.f32.mrf.mxu0  ;;  %v697_v46 = vpop.f32.mrf.mxu1  ;;  %v21705_v54 = vrot.slane %v18455_v33, 4  ;;  %v21706_v42 = vrot.slane %v18403_v0, 4 }
 0x1d3   :  { %v760_v59 = vmax.f32 %v535_v43, 0.0  ;;  %v762_v50 = vmax.f32 %v696_v53, 0.0  ;;  %v537_v60 = vadd.f32 %v536_v10, %v18144_v61  ;;  %v698_v45 = vadd.f32 %v697_v46, %v18148_v62  ;;  %v16483_v53 = vld [vmem:[#allocation7 + $0x930] ss:$28 sps:$4 sm:$0xff]  }
 0x1d4   :  { %v18482_v52 = vsel %vm901_vm3, %v21706_v42, %v21705_v54  ;;  %6434 = vmatpush2.bf16.msra.mxu0 %v16471_v58  ;;  %v758_v27 = vmax.f32 %v690_v47, 0.0  ;;  %v21708_v30 = vrot.slane %v18414_v19, 4  ;;  %v21710_v54 = vrot.slane %v18416_v56, 4 }
 0x1d5   :  { %21707 = vst [vmem:[#allocation67_spill] sm:$0xff] %v18482_v52  ;;  %6543 = vmatpush2.bf16.msra.mxu1 %v16474_v37  ;;  %v21712_v43 = vrot.slane %v18457_v22, 4  ;;  %v21713_v61 = vrot.slane %v18405_v41, 4  ;;  %6435 = vmatprep.subr.bf16.mxu0 %v16479_v16  ;;  %v833_v58 = vmul.f32 0.0, %v760_v59  ;;  %v835_v37 = vmul.f32 0.0, %v762_v50 }
 0x1d6   :  { %v18489_v1 = vsel %vm901_vm3, %v21708_v30, %v948_v63  ;;  %v18494_v42 = vsel %vm901_vm3, %v21710_v54, %v952_v13  ;;  %6544 = vmatprep.subr.bf16.mxu1 %v16482_v55  ;;  %v761_v46 = vmax.f32 %v537_v60, 0.0  ;;  %v763_v47 = vmax.f32 %v698_v45, 0.0  ;;  %v16486_v54 = vld [vmem:[#allocation7 + $0xcb0] ss:$28 sps:$4 sm:$0xff]   ;;  %v16491_v50 = vld [vmem:[#allocation7 + $0x8fc] ss:$28 sps:$4 sm:$0xff]  }
 0x1d7   :  { %21709 = vst [vmem:[#allocation68_spill] sm:$0xff] %v18489_v1  ;;  %21711 = vst [vmem:[#allocation69_spill] sm:$0xff] %v18494_v42  ;;  %v18501_v62 = vsel %vm901_vm3, %v21713_v61, %v21712_v43  ;;  %6283 = vmatprep.mubr.bf16.mxu0 %v18489_v1  ;;  %6392 = vmatprep.mubr.bf16.mxu1 %v18494_v42  ;;  %v757_v10 = vmax.f32 %v531_v57, 0.0  ;;  %v759_v30 = vmax.f32 %v692_v32, 0.0  ;;  %v16494_v60 = vld [vmem:[#allocation7 + $0xc7c] ss:$28 sps:$4 sm:$0xff]  }
 0x1d8   :  { %21714 = vst [vmem:[#allocation70_spill] sm:$0xff] %v18501_v62  ;;  %6284 = vmatmul.mubr.bf16.gmra.mxu0 %v18482_v52  ;;  %6393 = vmatmul.mubr.bf16.gmra.mxu1 %v18501_v62  ;;  %v18507_v43 = vpack.c.bf16 %v833_v58, %v756_v49  ;;  %v18509_v16 = vpack.c.bf16 %v835_v37, %v758_v27  ;;  %v834_v55 = vmul.f32 0.0, %v761_v46  ;;  %v836_v59 = vmul.f32 0.0, %v763_v47  ;;  %v16495_v47 = vld [vmem:[#allocation7 + $0x8c0] ss:$28 sps:$4 sm:$0xff]  }
 0x1d9   :  { %6436 = vmatpush2.bf16.msra.mxu0 %v16477_v31  ;;  %6545 = vmatpush2.bf16.msra.mxu1 %v16480_v20  ;;  %v16492_v20 = vld [vmem:[#allocation7 + $0xc78] ss:$28 sps:$4 sm:$0xff]   ;;  %v21725_v58 = vrot.slane %v18455_v33, 4  ;;  %v21727_v46 = vrot.slane %v18457_v22, 4 }
 0x1da   :  { %21715 = vst [vmem:[#allocation71_spill] sm:$0xff] %v18507_v43  ;;  %21716 = vst [vmem:[#allocation72_spill] sm:$0xff] %v18509_v16  ;;  %6437 = vmatprep.subr.bf16.mxu0 %v16485_v24  ;;  %6546 = vmatprep.subr.bf16.mxu1 %v16488_v21  ;;  %v18511_v45 = vpack.c.bf16 %v834_v55, %v757_v10  ;;  %v18513_v57 = vpack.c.bf16 %v836_v59, %v759_v30  ;;  %v18516_v32 = vrot.slane %v18507_v43, 4  ;;  %v16489_v24 = vld [vmem:[#allocation7 + $0x8f8] ss:$28 sps:$4 sm:$0xff]  }
 0x1db   :  { %v18519_v49 = vrot.slane %v18509_v16, 4  ;;  %v16498_v10 = vld [vmem:[#allocation7 + $0xc40] ss:$28 sps:$4 sm:$0xff]   ;;  %v16503_v30 = vld [vmem:[#allocation7 + $0xf8c] ss:$28 sps:$4 sm:$0xff]  }
 0x1dc   :  { %21717 = vst [vmem:[#allocation73_spill] sm:$0xff] %v18511_v45  ;;  %21718 = vst [vmem:[#allocation74_spill] sm:$0xff] %v18513_v57  ;;  %v18522_v27 = vrot.slane %v18511_v45, 4  ;;  %v18525_v31 = vrot.slane %v18513_v57, 4  ;;  %v18541_v37 = vsel %vm901_vm3, %v21725_v58, %v18516_v32  ;;  %v16501_v55 = vld [vmem:[#allocation7 + $0xf88] ss:$28 sps:$4 sm:$0xff]  }
 0x1dd   :  { %21719 = vst [vmem:[#allocation75_spill] sm:$0xff] %v18516_v32  ;;  %21720 = vst [vmem:[#allocation76_spill] sm:$0xff] %v18519_v49  ;;  %6438 = vmatpush2.bf16.msra.mxu0 %v16483_v53  ;;  %6547 = vmatpush2.bf16.msra.mxu1 %v16486_v54  ;;  %v16497_v53 = vld [vmem:[#allocation7 + $0x8c4] ss:$28 sps:$4 sm:$0xff]   ;;  %v16506_v54 = vld [vmem:[#allocation7 + $0x130c] ss:$28 sps:$4 sm:$0xff]  }
 0x1de   :  { %21721 = vst [vmem:[#allocation77_spill] sm:$0xff] %v18522_v27  ;;  %21722 = vst [vmem:[#allocation78_spill] sm:$0xff] %v18525_v31  ;;  %6439 = vmatprep.subr.bf16.mxu0 %v16491_v50  ;;  %6548 = vmatprep.subr.bf16.mxu1 %v16494_v60  ;;  %v18529_v21 = vsel %vm901_vm3, %v948_v63, %v18522_v27  ;;  %v18533_v61 = vsel %vm901_vm3, %v952_v13, %v18525_v31  ;;  %v16500_v13 = vld [vmem:[#allocation7 + $0xc44] ss:$28 sps:$4 sm:$0xff]   ;;  %v16507_v50 = vld [vmem:[#allocation7 + $0xf50] ss:$28 sps:$4 sm:$0xff]  }
 0x1df   :  { %21723 = vst [vmem:[#allocation79_spill] sm:$0xff] %v18529_v21  ;;  %21724 = vst [vmem:[#allocation80_spill] sm:$0xff] %v18533_v61  ;;  %6293 = vmatprep.mubr.bf16.mxu0 %v18529_v21  ;;  %6402 = vmatprep.mubr.bf16.mxu1 %v18533_v61  ;;  %v18547_v63 = vsel %vm901_vm3, %v21727_v46, %v18519_v49  ;;  %v16504_v59 = vld [vmem:[#allocation7 + $0x1308] ss:$28 sps:$4 sm:$0xff]   ;;  %v16509_v60 = vld [vmem:[#allocation7 + $0xf54] ss:$28 sps:$4 sm:$0xff]  }
 0x1e0   :  { %21726 = vst [vmem:[#allocation81_spill] sm:$0xff] %v18541_v37  ;;  %21728 = vst [vmem:[#allocation82_spill] sm:$0xff] %v18547_v63  ;;  %6294 = vmatmul.mubr.bf16.gmra.mxu0 %v18541_v37  ;;  %6403 = vmatmul.mubr.bf16.gmra.mxu1 %v18547_v63  ;;  %v16515_v58 = vld [vmem:[#allocation7 + $0xf1c] ss:$28 sps:$4 sm:$0xff]  }
 0x1e1   :  { %6440 = vmatpush2.bf16.msra.mxu0 %v16489_v24  ;;  %6443 = vmatprep.mubr.bf16.mxu0 %v18164_v39  ;;  %v16512_v24 = vld [vmem:[#allocation7 + $0x12d4] ss:$28 sps:$4 sm:$0xff]  }
 0x1e2   :  { %6549 = vmatpush2.bf16.msra.mxu1 %v16492_v20  ;;  %6552 = vmatprep.mubr.bf16.mxu1 %v18166_v40  ;;  %v16510_v20 = vld [vmem:[#allocation7 + $0x12d0] ss:$28 sps:$4 sm:$0xff]   ;;  %v16513_v46 = vld [vmem:[#allocation7 + $0xf18] ss:$28 sps:$4 sm:$0xff]  }
 0x1e3   :  { %6441 = vmatprep.subr.bf16.mxu0 %v16497_v53  ;;  %6550 = vmatprep.subr.bf16.mxu1 %v16500_v13  ;;  %v16516_v53 = vld [vmem:[#allocation7 + $0x1298] ss:$28 sps:$4 sm:$0xff]   ;;  %v16521_v13 = vld [vmem:[#allocation7 + $0xee4] ss:$28 sps:$4 sm:$0xff]  }
 0x1e5   :  { %6442 = vmatpush2.bf16.msra.mxu0 %v16495_v47  ;;  %v16518_v47 = vld [vmem:[#allocation7 + $0x129c] ss:$28 sps:$4 sm:$0xff]  }
 0x1e6   :  { %6551 = vmatpush2.bf16.msra.mxu1 %v16498_v10  ;;  %6629 = vmatprep.subr.bf16.mxu0 %v16503_v30  ;;  %v16519_v10 = vld [vmem:[#allocation7 + $0xee0] ss:$28 sps:$4 sm:$0xff]  }
 0x1e7   :  { %6738 = vmatprep.subr.bf16.mxu1 %v16506_v54  ;;  %v16524_v30 = vld [vmem:[#allocation7 + $0x1264] ss:$28 sps:$4 sm:$0xff]  }
 0x1e8   :  { %6444 = vmatmul.mubr.bf16.vlgmr.msra.gmra.mxu0 %v18158_v34  ;;  %v16522_v54 = vld [vmem:[#allocation7 + $0x1260] ss:$28 sps:$4 sm:$0xff]  }
 0x1e9   :  { %6553 = vmatmul.mubr.bf16.vlgmr.msra.gmra.mxu1 %v18160_v17  ;;  %6630 = vmatpush1.bf16.msra.mxu0 %v16501_v55  ;;  %v16527_v55 = vld [vmem:[#allocation7 + $0xeac] ss:$28 sps:$4 sm:$0xff]  }
 0x1ea   :  { %6451 = vmatprep.mubr.bf16.mxu0 %v18209_v5  ;;  %6560 = vmatprep.mubr.bf16.mxu1 %v18211_v25 }
 0x1eb   :  { %6739 = vmatpush1.bf16.msra.mxu1 %v16504_v59  ;;  %6631 = vmatprep.subr.bf16.mxu0 %v16509_v60  ;;  %v16525_v59 = vld [vmem:[#allocation7 + $0xea8] ss:$28 sps:$4 sm:$0xff]  }
 0x1ec   :  { %6740 = vmatprep.subr.bf16.mxu1 %v16512_v24  ;;  %v16528_v60 = vld [vmem:[#allocation7 + $0x1228] ss:$28 sps:$4 sm:$0xff]   ;;  %v16533_v24 = vld [vmem:[#allocation7 + $0xe74] ss:$28 sps:$4 sm:$0xff]  }
 0x1ed   :  { %6632 = vmatpush1.bf16.msra.mxu0 %v16507_v50  ;;  %v16530_v50 = vld [vmem:[#allocation7 + $0x122c] ss:$28 sps:$4 sm:$0xff]  }
 0x1ee   :  { %6633 = vmatprep.subr.bf16.mxu0 %v16515_v58  ;;  %v16536_v58 = vld [vmem:[#allocation7 + $0x11f4] ss:$28 sps:$4 sm:$0xff]  }
 0x1ef   :  { %6741 = vmatpush1.bf16.msra.mxu1 %v16510_v20  ;;  %v16531_v20 = vld [vmem:[#allocation7 + $0xe70] ss:$28 sps:$4 sm:$0xff]  }
 0x1f0   :  { %6452 = vmatmul.mubr.bf16.gmra.mxu0 %v18203_v14  ;;  %6742 = vmatprep.subr.bf16.mxu1 %v16518_v47  ;;  %v16539_v47 = vld [vmem:[#allocation7 + $0xe3c] ss:$28 sps:$4 sm:$0xff]  }
 0x1f1   :  { %6561 = vmatmul.mubr.bf16.gmra.mxu1 %v18205_v15  ;;  %6634 = vmatpush1.bf16.msra.mxu0 %v16513_v46  ;;  %v16534_v46 = vld [vmem:[#allocation7 + $0x11f0] ss:$28 sps:$4 sm:$0xff]  }
 0x1f2   :  { %6461 = vmatprep.mubr.bf16.mxu0 %v18258_v28  ;;  %6570 = vmatprep.mubr.bf16.mxu1 %v18260_v29 }
 0x1f3   :  { %6743 = vmatpush1.bf16.msra.mxu1 %v16516_v53  ;;  %6635 = vmatprep.subr.bf16.mxu0 %v16521_v13  ;;  %v16537_v53 = vld [vmem:[#allocation7 + $0xe38] ss:$28 sps:$4 sm:$0xff]  }
 0x1f4   :  { %6744 = vmatprep.subr.bf16.mxu1 %v16524_v30  ;;  %v16542_v13 = vld [vmem:[#allocation7 + $0x11bc] ss:$28 sps:$4 sm:$0xff]   ;;  %v16545_v30 = vld [vmem:[#allocation7 + $0xe04] ss:$28 sps:$4 sm:$0xff]  }
 0x1f5   :  { %6636 = vmatpush1.bf16.msra.mxu0 %v16519_v10  ;;  %v16540_v10 = vld [vmem:[#allocation7 + $0x11b8] ss:$28 sps:$4 sm:$0xff]  }
 0x1f6   :  { %6637 = vmatprep.subr.bf16.mxu0 %v16527_v55  ;;  %v16548_v55 = vld [vmem:[#allocation7 + $0x1184] ss:$28 sps:$4 sm:$0xff]  }
 0x1f7   :  { %6745 = vmatpush1.bf16.msra.mxu1 %v16522_v54  ;;  %v16543_v54 = vld [vmem:[#allocation7 + $0xe00] ss:$28 sps:$4 sm:$0xff]  }
 0x1f8   :  { %6462 = vmatmul.mubr.bf16.gmra.mxu0 %v18247_v11  ;;  %6746 = vmatprep.subr.bf16.mxu1 %v16530_v50  ;;  %v16551_v50 = vld [vmem:[#allocation7 + $0x114c] ss:$28 sps:$4 sm:$0xff]  }
 0x1f9   :  { %6571 = vmatmul.mubr.bf16.gmra.mxu1 %v18249_v12  ;;  %6638 = vmatpush1.bf16.msra.mxu0 %v16525_v59  ;;  %v16546_v59 = vld [vmem:[#allocation7 + $0x1180] ss:$28 sps:$4 sm:$0xff]  }
 0x1fa   :  { %6471 = vmatprep.mubr.bf16.mxu0 %v18310_v3  ;;  %6580 = vmatprep.mubr.bf16.mxu1 %v18312_v6 }
 0x1fb   :  { %6747 = vmatpush1.bf16.msra.mxu1 %v16528_v60  ;;  %6639 = vmatprep.subr.bf16.mxu0 %v16533_v24  ;;  %v16549_v60 = vld [vmem:[#allocation7 + $0x1148] ss:$28 sps:$4 sm:$0xff]  }
 0x1fc   :  { %6748 = vmatprep.subr.bf16.mxu1 %v16536_v58  ;;  %v16554_v24 = vld [vmem:[#allocation7 + $0x14cc] ss:$28 sps:$4 sm:$0xff]   ;;  %v16557_v58 = vld [vmem:[#allocation7 + $0x1114] ss:$28 sps:$4 sm:$0xff]  }
 0x1fd   :  { %6640 = vmatpush1.bf16.msra.mxu0 %v16531_v20  ;;  %v16552_v20 = vld [vmem:[#allocation7 + $0x14c8] ss:$28 sps:$4 sm:$0xff]  }
 0x1fe   :  { %6641 = vmatprep.subr.bf16.mxu0 %v16539_v47  ;;  %v16560_v47 = vld [vmem:[#allocation7 + $0x1494] ss:$28 sps:$4 sm:$0xff]  }
 0x1ff   :  { %6749 = vmatpush1.bf16.msra.mxu1 %v16534_v46  ;;  %v16555_v46 = vld [vmem:[#allocation7 + $0x1110] ss:$28 sps:$4 sm:$0xff]  }
 0x200   :  { %6472 = vmatmul.mubr.bf16.gmra.mxu0 %v18299_v23  ;;  %6750 = vmatprep.subr.bf16.mxu1 %v16542_v13  ;;  %v16563_v13 = vld [vmem:[#allocation7 + $0x10dc] ss:$28 sps:$4 sm:$0xff]  }
 0x201   :  { %6581 = vmatmul.mubr.bf16.gmra.mxu1 %v18301_v36  ;;  %6642 = vmatpush1.bf16.msra.mxu0 %v16537_v53  ;;  %v16558_v53 = vld [vmem:[#allocation7 + $0x1490] ss:$28 sps:$4 sm:$0xff]   ;;  %v21748_v36 = vld [vmem:[#allocation23_spill] sm:$0xff] }
 0x202   :  { %6481 = vmatprep.mubr.bf16.mxu0 %v18362_v35  ;;  %6590 = vmatprep.mubr.bf16.mxu1 %v18364_v38  ;;  %v16704_v38 = vld [vmem:[#allocation7 + $0xbdc] ss:$28 sps:$4 sm:$0xff]  }
 0x203   :  { %6751 = vmatpush1.bf16.msra.mxu1 %v16540_v10  ;;  %6643 = vmatprep.subr.bf16.mxu0 %v16545_v30  ;;  %v16561_v10 = vld [vmem:[#allocation7 + $0x10d8] ss:$28 sps:$4 sm:$0xff]  }
 0x204   :  { %6752 = vmatprep.subr.bf16.mxu1 %v16548_v55  ;;  %v16566_v30 = vld [vmem:[#allocation7 + $0x145c] ss:$28 sps:$4 sm:$0xff]   ;;  %v16569_v55 = vld [vmem:[#allocation7 + $0x10a4] ss:$28 sps:$4 sm:$0xff]  }
 0x205   :  { %6644 = vmatpush1.bf16.msra.mxu0 %v16543_v54  ;;  %v16564_v54 = vld [vmem:[#allocation7 + $0x1458] ss:$28 sps:$4 sm:$0xff]  }
 0x206   :  { %6645 = vmatprep.subr.bf16.mxu0 %v16551_v50  ;;  %v16572_v50 = vld [vmem:[#allocation7 + $0x1424] ss:$28 sps:$4 sm:$0xff]  }
 0x207   :  { %6753 = vmatpush1.bf16.msra.mxu1 %v16546_v59  ;;  %v16567_v59 = vld [vmem:[#allocation7 + $0x10a0] ss:$28 sps:$4 sm:$0xff]  }
 0x208   :  { %6482 = vmatmul.mubr.bf16.gmra.mxu0 %v18351_v18  ;;  %6754 = vmatprep.subr.bf16.mxu1 %v16554_v24  ;;  %v16575_v24 = vld [vmem:[#allocation7 + $0x106c] ss:$28 sps:$4 sm:$0xff]  }
 0x209   :  { %6591 = vmatmul.mubr.bf16.gmra.mxu1 %v18353_v48  ;;  %6646 = vmatpush2.bf16.msra.mxu0 %v16549_v60  ;;  %v16570_v60 = vld [vmem:[#allocation7 + $0x1420] ss:$28 sps:$4 sm:$0xff]  }
 0x20a   :  { %6491 = vmatprep.mubr.bf16.mxu0 %v18414_v19  ;;  %6600 = vmatprep.mubr.bf16.mxu1 %v18416_v56  ;;  %v16656_v56 = vld [vmem:[#allocation7 + $0x69c] ss:$28 sps:$4 sm:$0xff]   ;;  %v16659_v48 = vld [vmem:[#allocation7 + $0x2e4] ss:$28 sps:$4 sm:$0xff]   ;;  %v21742_v19 = vld [vmem:[#allocation62_spill] sm:$0xff] }
 0x20b   :  { %6755 = vmatpush2.bf16.msra.mxu1 %v16552_v20  ;;  %6647 = vmatprep.subr.bf16.mxu0 %v16557_v58  ;;  %v16573_v20 = vld [vmem:[#allocation7 + $0x1068] ss:$28 sps:$4 sm:$0xff]  }
 0x20c   :  { %6756 = vmatprep.subr.bf16.mxu1 %v16560_v47  ;;  %v16578_v58 = vld [vmem:[#allocation7 + $0x13ec] ss:$28 sps:$4 sm:$0xff]   ;;  %v16581_v47 = vld [vmem:[#allocation7 + $0x1034] ss:$28 sps:$4 sm:$0xff]  }
 0x20d   :  { %6648 = vmatpush2.bf16.msra.mxu0 %v16555_v46  ;;  %v16576_v46 = vld [vmem:[#allocation7 + $0x13e8] ss:$28 sps:$4 sm:$0xff]  }
 0x20e   :  { %6649 = vmatprep.subr.bf16.mxu0 %v16563_v13  ;;  %v16584_v13 = vld [vmem:[#allocation7 + $0x13b4] ss:$28 sps:$4 sm:$0xff]  }
 0x20f   :  { %6757 = vmatpush2.bf16.msra.mxu1 %v16558_v53  ;;  %v16579_v53 = vld [vmem:[#allocation7 + $0x1030] ss:$28 sps:$4 sm:$0xff]  }
 0x210   :  { %6492 = vmatmul.mubr.bf16.gmra.mxu0 %v18403_v0  ;;  %6758 = vmatprep.subr.bf16.mxu1 %v16566_v30  ;;  %v16587_v30 = vld [vmem:[#allocation7 + $0xffc] ss:$28 sps:$4 sm:$0xff]   ;;  %v21739_v0 = vld [vmem:[#allocation54_spill] sm:$0xff] }
 0x211   :  { %6601 = vmatmul.mubr.bf16.gmra.mxu1 %v18405_v41  ;;  %6650 = vmatpush2.bf16.msra.mxu0 %v16561_v10  ;;  %v16582_v10 = vld [vmem:[#allocation7 + $0x13b0] ss:$28 sps:$4 sm:$0xff]   ;;  %v21738_v41 = vld [vmem:[#allocation60_spill] sm:$0xff] }
 0x212   :  { %6501 = vmatprep.mubr.bf16.mxu0 %v18465_v51  ;;  %6610 = vmatprep.mubr.bf16.mxu1 %v18467_v4  ;;  %v16644_v4 = vld [vmem:[#allocation7 + $0x38c] ss:$28 sps:$4 sm:$0xff]   ;;  %v16647_v51 = vld [vmem:[#allocation7 + $0x354] ss:$28 sps:$4 sm:$0xff]  }
 0x213   :  { %6759 = vmatpush2.bf16.msra.mxu1 %v16564_v54  ;;  %6651 = vmatprep.subr.bf16.mxu0 %v16569_v55  ;;  %v16585_v54 = vld [vmem:[#allocation7 + $0xff8] ss:$28 sps:$4 sm:$0xff]  }
 0x214   :  { %6760 = vmatprep.subr.bf16.mxu1 %v16572_v50  ;;  %v16590_v55 = vld [vmem:[#allocation7 + $0x137c] ss:$28 sps:$4 sm:$0xff]   ;;  %v16593_v50 = vld [vmem:[#allocation7 + $0xfc4] ss:$28 sps:$4 sm:$0xff]  }
 0x215   :  { %6652 = vmatpush2.bf16.msra.mxu0 %v16567_v59  ;;  %v16588_v59 = vld [vmem:[#allocation7 + $0x1378] ss:$28 sps:$4 sm:$0xff]  }
 0x216   :  { %6653 = vmatprep.subr.bf16.mxu0 %v16575_v24  ;;  %v16596_v24 = vld [vmem:[#allocation7 + $0x1344] ss:$28 sps:$4 sm:$0xff]  }
 0x217   :  { %6761 = vmatpush2.bf16.msra.mxu1 %v16570_v60  ;;  %v16591_v60 = vld [vmem:[#allocation7 + $0xfc0] ss:$28 sps:$4 sm:$0xff]  }
 0x218   :  { %6502 = vmatmul.mubr.bf16.gmra.mxu0 %v18455_v33  ;;  %6762 = vmatprep.subr.bf16.mxu1 %v16578_v58  ;;  %v16599_v58 = vld [vmem:[#allocation7 + $0x194] ss:$28 sps:$4 sm:$0xff]  }
 0x219   :  { %6611 = vmatmul.mubr.bf16.gmra.mxu1 %v18457_v22  ;;  %6654 = vmatpush2.bf16.msra.mxu0 %v16573_v20  ;;  %v16594_v20 = vld [vmem:[#allocation7 + $0x1340] ss:$28 sps:$4 sm:$0xff]   ;;  %v21735_v33 = vld [vmem:[#allocation46_spill] sm:$0xff] }
 0x21a   :  { %6511 = vmatprep.mubr.bf16.mxu0 %v18511_v45  ;;  %6620 = vmatprep.mubr.bf16.mxu1 %v18513_v57  ;;  %v16632_v57 = vld [vmem:[#allocation7 + $0x3fc] ss:$28 sps:$4 sm:$0xff]   ;;  %v16635_v45 = vld [vmem:[#allocation7 + $0x44] ss:$28 sps:$4 sm:$0xff]  }
 0x21b   :  { %6763 = vmatpush2.bf16.msra.mxu1 %v16576_v46  ;;  %6655 = vmatprep.subr.bf16.mxu0 %v16581_v47  ;;  %v16602_v46 = vld [vmem:[#allocation7 + $0x514] ss:$28 sps:$4 sm:$0xff]   ;;  %v21734_v22 = vld [vmem:[#allocation52_spill] sm:$0xff] }
 0x21c   :  { %6764 = vmatprep.subr.bf16.mxu1 %v16584_v13  ;;  %v16597_v47 = vld [vmem:[#allocation7 + $0x190] ss:$28 sps:$4 sm:$0xff]  }
 0x21d   :  { %6656 = vmatpush2.bf16.msra.mxu0 %v16579_v53  ;;  %v16605_v53 = vld [vmem:[#allocation7 + $0x15c] ss:$28 sps:$4 sm:$0xff]   ;;  %v16600_v13 = vld [vmem:[#allocation7 + $0x510] ss:$28 sps:$4 sm:$0xff]  }
 0x21e   :  { %6657 = vmatprep.subr.bf16.mxu0 %v16587_v30  ;;  %v16608_v30 = vld [vmem:[#allocation7 + $0x4dc] ss:$28 sps:$4 sm:$0xff]  }
 0x21f   :  { %6765 = vmatpush2.bf16.msra.mxu1 %v16582_v10  ;;  %v16603_v10 = vld [vmem:[#allocation7 + $0x158] ss:$28 sps:$4 sm:$0xff]  }
 0x220   :  { %6512 = vmatmul.mubr.bf16.gmra.mxu0 %v18507_v43  ;;  %6766 = vmatprep.subr.bf16.mxu1 %v16590_v55  ;;  %v16606_v55 = vld [vmem:[#allocation7 + $0x4d8] ss:$28 sps:$4 sm:$0xff]  }
 0x221   :  { %6621 = vmatmul.mubr.bf16.gmra.mxu1 %v18509_v16  ;;  %6658 = vmatpush2.bf16.msra.mxu0 %v16585_v54  ;;  %v16611_v54 = vld [vmem:[#allocation7 + $0x124] ss:$28 sps:$4 sm:$0xff]   ;;  %v16623_v16 = vld [vmem:[#allocation7 + $0xb4] ss:$28 sps:$4 sm:$0xff]   ;;  %v16629_v43 = vld [vmem:[#allocation7 + $0x7c] ss:$28 sps:$4 sm:$0xff]  }
 0x222   :  { %6661 = vmatprep.mubr.bf16.mxu0 %v18227_v7  ;;  %6770 = vmatprep.mubr.bf16.mxu1 %v18233_v8 }
 0x223   :  { %6767 = vmatpush2.bf16.msra.mxu1 %v16588_v59  ;;  %6659 = vmatprep.subr.bf16.mxu0 %v16593_v50  ;;  %v16609_v59 = vld [vmem:[#allocation7 + $0x120] ss:$28 sps:$4 sm:$0xff]  }
 0x224   :  { %6768 = vmatprep.subr.bf16.mxu1 %v16596_v24  ;;  %v16614_v50 = vld [vmem:[#allocation7 + $0x4a4] ss:$28 sps:$4 sm:$0xff]   ;;  %v16617_v24 = vld [vmem:[#allocation7 + $0xec] ss:$28 sps:$4 sm:$0xff]  }
 0x225   :  { %6660 = vmatpush2.bf16.msra.mxu0 %v16591_v60  ;;  %v16612_v60 = vld [vmem:[#allocation7 + $0x4a0] ss:$28 sps:$4 sm:$0xff]  }
 0x226   :  { %6847 = vmatprep.subr.bf16.mxu0 %v16599_v58  ;;  %v16615_v58 = vld [vmem:[#allocation7 + $0xe8] ss:$28 sps:$4 sm:$0xff]  }
 0x227   :  { %6769 = vmatpush2.bf16.msra.mxu1 %v16594_v20  ;;  %v21729_v20 = vld [vmem:[#allocation35_spill] sm:$0xff] }
 0x228   :  { %6662 = vmatmul.mubr.bf16.vlgmr.msra.gmra.mxu0 %v18239_v2  ;;  %6956 = vmatprep.subr.bf16.mxu1 %v16602_v46  ;;  %v16620_v46 = vld [vmem:[#allocation7 + $0x46c] ss:$28 sps:$4 sm:$0xff]  }
 0x229   :  { %6848 = vmatpush1.bf16.msra.mxu0 %v16597_v47  ;;  %6669 = vmatprep.mubr.bf16.mxu0 %v18283_v26  ;;  %v21730_v47 = vld [vmem:[#allocation44_spill] sm:$0xff] }
 0x22a   :  { %6771 = vmatmul.mubr.bf16.vlgmr.msra.gmra.mxu1 %v18245_v9  ;;  %6849 = vmatprep.subr.bf16.mxu0 %v16605_v53  ;;  %v16618_v53 = vld [vmem:[#allocation7 + $0x468] ss:$28 sps:$4 sm:$0xff]  }
 0x22b   :  { %6778 = vmatprep.mubr.bf16.mxu1 %v18290_v44  ;;  %6957 = vmatpush1.bf16.msra.mxu1 %v16600_v13  ;;  %v21731_v13 = vld [vmem:[#allocation38_spill] sm:$0xff] }
 0x22c   :  { %6958 = vmatprep.subr.bf16.mxu1 %v16608_v30  ;;  %v21732_v30 = vld [vmem:[#allocation45_spill] sm:$0xff] }
 0x22d   :  { %6850 = vmatpush1.bf16.msra.mxu0 %v16603_v10  ;;  %v16621_v10 = vld [vmem:[#allocation7 + $0xb0] ss:$28 sps:$4 sm:$0xff]  }
 0x22e   :  { %6851 = vmatprep.subr.bf16.mxu0 %v16611_v54  ;;  %v16626_v54 = vld [vmem:[#allocation7 + $0x434] ss:$28 sps:$4 sm:$0xff]  }
 0x22f   :  { %6959 = vmatpush1.bf16.msra.mxu1 %v16606_v55  ;;  %v16624_v55 = vld [vmem:[#allocation7 + $0x430] ss:$28 sps:$4 sm:$0xff]  }
 0x230   :  { %6670 = vmatmul.mubr.bf16.gmra.mxu0 %v21729_v20  ;;  %6960 = vmatprep.subr.bf16.mxu1 %v16614_v50  ;;  %v21733_v50 = vld [vmem:[#allocation43_spill] sm:$0xff] }
 0x231   :  { %6852 = vmatpush1.bf16.msra.mxu0 %v16609_v59  ;;  %6679 = vmatprep.mubr.bf16.mxu0 %v21730_v47  ;;  %v16627_v59 = vld [vmem:[#allocation7 + $0x78] ss:$28 sps:$4 sm:$0xff]  }
 0x232   :  { %6779 = vmatmul.mubr.bf16.gmra.mxu1 %v21731_v13  ;;  %6853 = vmatprep.subr.bf16.mxu0 %v16617_v24  ;;  %v16630_v24 = vld [vmem:[#allocation7 + $0x3f8] ss:$28 sps:$4 sm:$0xff]  }
 0x233   :  { %6788 = vmatprep.mubr.bf16.mxu1 %v21732_v30  ;;  %6961 = vmatpush1.bf16.msra.mxu1 %v16612_v60  ;;  %v21736_v60 = vld [vmem:[#allocation53_spill] sm:$0xff] }
 0x234   :  { %6962 = vmatprep.subr.bf16.mxu1 %v16620_v46  ;;  %v16636_v46 = vld [vmem:[#allocation7 + $0x3c0] ss:$28 sps:$4 sm:$0xff]  }
 0x235   :  { %6854 = vmatpush1.bf16.msra.mxu0 %v16615_v58  ;;  %v16633_v58 = vld [vmem:[#allocation7 + $0x40] ss:$28 sps:$4 sm:$0xff]  }
 0x236   :  { %6855 = vmatprep.subr.bf16.mxu0 %v16623_v16  ;;  %v16638_v16 = vld [vmem:[#allocation7 + $0x3c4] ss:$28 sps:$4 sm:$0xff]  }
 0x237   :  { %6963 = vmatpush1.bf16.msra.mxu1 %v16618_v53  ;;  %v16641_v53 = vld [vmem:[#allocation7 + $0xc] ss:$28 sps:$4 sm:$0xff]  }
 0x238   :  { %6680 = vmatmul.mubr.bf16.gmra.mxu0 %v21733_v50  ;;  %6964 = vmatprep.subr.bf16.mxu1 %v16626_v54  ;;  %v21737_v54 = vld [vmem:[#allocation51_spill] sm:$0xff] }
 0x239   :  { %6856 = vmatpush1.bf16.msra.mxu0 %v16621_v10  ;;  %6689 = vmatprep.mubr.bf16.mxu0 %v21734_v22  ;;  %v16639_v10 = vld [vmem:[#allocation7 + $0x8] ss:$28 sps:$4 sm:$0xff]  }
 0x23a   :  { %6789 = vmatmul.mubr.bf16.gmra.mxu1 %v21735_v33  ;;  %6857 = vmatprep.subr.bf16.mxu0 %v16629_v43  ;;  %v16642_v43 = vld [vmem:[#allocation7 + $0x388] ss:$28 sps:$4 sm:$0xff]  }
 0x23b   :  { %6798 = vmatprep.mubr.bf16.mxu1 %v21736_v60  ;;  %6965 = vmatpush1.bf16.msra.mxu1 %v16624_v55  ;;  %v16645_v55 = vld [vmem:[#allocation7 + $0x350] ss:$28 sps:$4 sm:$0xff]  }
 0x23c   :  { %6966 = vmatprep.subr.bf16.mxu1 %v16632_v57  ;;  %v21740_v57 = vld [vmem:[#allocation61_spill] sm:$0xff] }
 0x23d   :  { %6858 = vmatpush1.bf16.msra.mxu0 %v16627_v59  ;;  %v16648_v59 = vld [vmem:[#allocation7 + $0x6d0] ss:$28 sps:$4 sm:$0xff]  }
 0x23e   :  { %6859 = vmatprep.subr.bf16.mxu0 %v16635_v45  ;;  %v16650_v45 = vld [vmem:[#allocation7 + $0x6d4] ss:$28 sps:$4 sm:$0xff]  }
 0x23f   :  { %6967 = vmatpush1.bf16.msra.mxu1 %v16630_v24  ;;  %v16653_v24 = vld [vmem:[#allocation7 + $0x31c] ss:$28 sps:$4 sm:$0xff]  }
 0x240   :  { %6690 = vmatmul.mubr.bf16.gmra.mxu0 %v21737_v54  ;;  %6968 = vmatprep.subr.bf16.mxu1 %v16638_v16  ;;  %v21741_v16 = vld [vmem:[#allocation59_spill] sm:$0xff] }
 0x241   :  { %6860 = vmatpush1.bf16.msra.mxu0 %v16633_v58  ;;  %6699 = vmatprep.mubr.bf16.mxu0 %v21738_v41  ;;  %v16651_v58 = vld [vmem:[#allocation7 + $0x318] ss:$28 sps:$4 sm:$0xff]  }
 0x242   :  { %6799 = vmatmul.mubr.bf16.gmra.mxu1 %v21739_v0  ;;  %6861 = vmatprep.subr.bf16.mxu0 %v16641_v53  ;;  %v16654_v53 = vld [vmem:[#allocation7 + $0x698] ss:$28 sps:$4 sm:$0xff]  }
 0x243   :  { %6808 = vmatprep.mubr.bf16.mxu1 %v21740_v57  ;;  %6969 = vmatpush1.bf16.msra.mxu1 %v16636_v46  ;;  %v16660_v46 = vld [vmem:[#allocation7 + $0x660] ss:$28 sps:$4 sm:$0xff]  }
 0x244   :  { %6970 = vmatprep.subr.bf16.mxu1 %v16644_v4  ;;  %v16657_v4 = vld [vmem:[#allocation7 + $0x2e0] ss:$28 sps:$4 sm:$0xff]  }
 0x245   :  { %6862 = vmatpush1.bf16.msra.mxu0 %v16639_v10  ;;  %v16665_v10 = vld [vmem:[#allocation7 + $0x2ac] ss:$28 sps:$4 sm:$0xff]  }
 0x246   :  { %6863 = vmatprep.subr.bf16.mxu0 %v16647_v51  ;;  %v16662_v51 = vld [vmem:[#allocation7 + $0x664] ss:$28 sps:$4 sm:$0xff]  }
 0x247   :  { %6971 = vmatpush1.bf16.msra.mxu1 %v16642_v43  ;;  %v16663_v43 = vld [vmem:[#allocation7 + $0x2a8] ss:$28 sps:$4 sm:$0xff]  }
 0x248   :  { %6700 = vmatmul.mubr.bf16.gmra.mxu0 %v21741_v16  ;;  %6972 = vmatprep.subr.bf16.mxu1 %v16650_v45  ;;  %v16666_v45 = vld [vmem:[#allocation7 + $0x628] ss:$28 sps:$4 sm:$0xff]  }
 0x249   :  { %6864 = vmatpush2.bf16.msra.mxu0 %v16645_v55  ;;  %6709 = vmatprep.mubr.bf16.mxu0 %v18489_v1  ;;  %v16668_v55 = vld [vmem:[#allocation7 + $0x62c] ss:$28 sps:$4 sm:$0xff]  }
 0x24a   :  { %6809 = vmatmul.mubr.bf16.gmra.mxu1 %v21742_v19  ;;  %6865 = vmatprep.subr.bf16.mxu0 %v16653_v24  ;;  %v16671_v24 = vld [vmem:[#allocation7 + $0x274] ss:$28 sps:$4 sm:$0xff]  }
 0x24b   :  { %6818 = vmatprep.mubr.bf16.mxu1 %v18494_v42  ;;  %6973 = vmatpush2.bf16.msra.mxu1 %v16648_v59  ;;  %v16672_v59 = vld [vmem:[#allocation7 + $0x5f0] ss:$28 sps:$4 sm:$0xff]  }
 0x24c   :  { %6974 = vmatprep.subr.bf16.mxu1 %v16656_v56  ;;  %v16669_v56 = vld [vmem:[#allocation7 + $0x270] ss:$28 sps:$4 sm:$0xff]  }
 0x24d   :  { %6866 = vmatpush2.bf16.msra.mxu0 %v16651_v58  ;;  %v16677_v58 = vld [vmem:[#allocation7 + $0x23c] ss:$28 sps:$4 sm:$0xff]  }
 0x24e   :  { %6867 = vmatprep.subr.bf16.mxu0 %v16659_v48  ;;  %v16674_v48 = vld [vmem:[#allocation7 + $0x5f4] ss:$28 sps:$4 sm:$0xff]  }
 0x24f   :  { %6975 = vmatpush2.bf16.msra.mxu1 %v16654_v53  ;;  %v16675_v53 = vld [vmem:[#allocation7 + $0x238] ss:$28 sps:$4 sm:$0xff]  }
 0x250   :  { %6710 = vmatmul.mubr.bf16.gmra.mxu0 %v18482_v52  ;;  %6976 = vmatprep.subr.bf16.mxu1 %v16662_v51  ;;  %v16678_v51 = vld [vmem:[#allocation7 + $0x5b8] ss:$28 sps:$4 sm:$0xff]  }
 0x251   :  { %6868 = vmatpush2.bf16.msra.mxu0 %v16657_v4  ;;  %6719 = vmatprep.mubr.bf16.mxu0 %v18529_v21  ;;  %v16680_v4 = vld [vmem:[#allocation7 + $0x5bc] ss:$28 sps:$4 sm:$0xff]  }
 0x252   :  { %6819 = vmatmul.mubr.bf16.gmra.mxu1 %v18501_v62  ;;  %6869 = vmatprep.subr.bf16.mxu0 %v16665_v10  ;;  %v16683_v10 = vld [vmem:[#allocation7 + $0x204] ss:$28 sps:$4 sm:$0xff]  }
 0x253   :  { %6828 = vmatprep.mubr.bf16.mxu1 %v18533_v61  ;;  %6977 = vmatpush2.bf16.msra.mxu1 %v16660_v46  ;;  %v16681_v46 = vld [vmem:[#allocation7 + $0x200] ss:$28 sps:$4 sm:$0xff]  }
 0x254   :  { %6978 = vmatprep.subr.bf16.mxu1 %v16668_v55  ;;  %v16684_v55 = vld [vmem:[#allocation7 + $0x580] ss:$28 sps:$4 sm:$0xff]  }
 0x255   :  { %6870 = vmatpush2.bf16.msra.mxu0 %v16663_v43  ;;  %v16686_v43 = vld [vmem:[#allocation7 + $0x584] ss:$28 sps:$4 sm:$0xff]  }
 0x256   :  { %6871 = vmatprep.subr.bf16.mxu0 %v16671_v24  ;;  %v16687_v24 = vld [vmem:[#allocation7 + $0x1c8] ss:$28 sps:$4 sm:$0xff]  }
 0x257   :  { %6979 = vmatpush2.bf16.msra.mxu1 %v16666_v45  ;;  %v16689_v45 = vld [vmem:[#allocation7 + $0x1cc] ss:$28 sps:$4 sm:$0xff]  }
 0x258   :  { %6720 = vmatmul.mubr.bf16.gmra.mxu0 %v18541_v37  ;;  %6980 = vmatprep.subr.bf16.mxu1 %v16674_v48  ;;  %v21743_v48 = vld [vmem:[#allocation21_spill] sm:$0xff] }
 0x259   :  { %6872 = vmatpush2.bf16.msra.mxu0 %v16669_v56  ;;  %15012 = vmatprep.mubr.msk.bf16.mxu0 %vm901_vm3, %v18522_v27  ;;  %v16692_v56 = vld [vmem:[#allocation7 + $0x54c] ss:$28 sps:$4 sm:$0xff]  }
 0x25a   :  { %6829 = vmatmul.mubr.bf16.gmra.mxu1 %v18547_v63  ;;  %6873 = vmatprep.subr.bf16.mxu0 %v16677_v58 }
 0x25b   :  { %15014 = vmatprep.mubr.msk.bf16.mxu1 %vm901_vm3, %v18525_v31  ;;  %6981 = vmatpush2.bf16.msra.mxu1 %v16672_v59  ;;  %v16690_v59 = vld [vmem:[#allocation7 + $0x548] ss:$28 sps:$4 sm:$0xff]  }
 0x25c   :  { %6982 = vmatprep.subr.bf16.mxu1 %v16680_v4  ;;  %v16695_v4 = vld [vmem:[#allocation7 + $0x894] ss:$28 sps:$4 sm:$0xff]   ;;  %v2220_v31 = vld [vmem:[#allocation8] sm:$0xff] }
 0x25d   :  { %6874 = vmatpush2.bf16.msra.mxu0 %v16675_v53  ;;  %v21745_v53 = vld [vmem:[#allocation22_spill] sm:$0xff] }
 0x25e   :  { %6875 = vmatprep.subr.bf16.mxu0 %v16683_v10 }
 0x25f   :  { %6983 = vmatpush2.bf16.msra.mxu1 %v16678_v51  ;;  %v16698_v51 = vld [vmem:[#allocation7 + $0xc14] ss:$28 sps:$4 sm:$0xff]  }
 0x260   :  { %15013 = vmatmul.mubr.msk.bf16.gmra.mxu0 %vm901_vm3, %v18516_v32  ;;  %6984 = vmatprep.subr.bf16.mxu1 %v16686_v43  ;;  %v16693_v43 = vld [vmem:[#allocation7 + $0x890] ss:$28 sps:$4 sm:$0xff]   ;;  %v16701_v32 = vld [vmem:[#allocation7 + $0x85c] ss:$28 sps:$4 sm:$0xff]  }
 0x261   :  { %6876 = vmatpush2.bf16.msra.mxu0 %v16681_v46  ;;  %15017 = vmatprep.mubr.msk.bf16.mxu0 %vm18169_vm4, %v21743_v48  ;;  %v21746_v48 = vld [vmem:[#allocation18_spill] sm:$0xff] }
 0x262   :  { %15015 = vmatmul.mubr.msk.bf16.gmra.mxu1 %vm901_vm3, %v18519_v49  ;;  %6877 = vmatprep.subr.bf16.mxu0 %v16689_v45  ;;  %v21747_v27 = vsub.s32 0, %v21746_v48 }
 0x263   :  { %6985 = vmatpush2.bf16.msra.mxu1 %v16684_v55  ;;  %15021 = vmatprep.mubr.msk.bf16.mxu1 %vm18169_vm4, %v21745_v53  ;;  %v6227_v10 = vpop.f32.mrf.mxu0  ;;  %v16696_v55 = vld [vmem:[#allocation7 + $0xc10] ss:$28 sps:$4 sm:$0xff]   ;;  %v16708_v53 = vld [vmem:[#allocation7 + $0xba0] ss:$28 sps:$4 sm:$0xff]  }
 0x264   :  { %6986 = vmatprep.subr.bf16.mxu1 %v16692_v56  ;;  %v6336_v46 = vpop.f32.mrf.mxu1  ;;  %v18627_v18 = vrot.slane %v2220_v31, %v21747_v27  ;;  %v16699_v10 = vld [vmem:[#allocation7 + $0x858] ss:$28 sps:$4 sm:$0xff]  }
 0x265   :  { %6878 = vmatpush2.bf16.msra.mxu0 %v16687_v24  ;;  %v6228_v49 = vpop.f32.mrf.mxu0  ;;  %v21749_v24 = vsub.s32 1, %v21746_v48  ;;  %v16702_v27 = vld [vmem:[#allocation7 + $0xbd8] ss:$28 sps:$4 sm:$0xff]   ;;  %v16705_v48 = vld [vmem:[#allocation7 + $0x820] ss:$28 sps:$4 sm:$0xff]  }
 0x266   :  { %7065 = vmatprep.subr.bf16.mxu0 %v16695_v4  ;;  %v6337_v45 = vpop.f32.mrf.mxu1  ;;  %v16707_v49 = vld [vmem:[#allocation7 + $0x824] ss:$28 sps:$4 sm:$0xff]  }
 0x267   :  { %6987 = vmatpush2.bf16.msra.mxu1 %v16690_v59  ;;  %v18634_v56 = vrot.slane %v2220_v31, %v21749_v24  ;;  %v6229_v4 = vpop.f32.mrf.mxu0  ;;  %v21750_v59 = vld [vmem:[#allocation24_spill] sm:$0xff] }
 0x268   :  { %15019 = vmatmul.mubr.msk.bf16.vlgmr.msra.gmra.mxu0 %vm18169_vm4, %v21748_v36  ;;  %7174 = vmatprep.subr.bf16.mxu1 %v16698_v51  ;;  %v6338_v46 = vpop.f32.mrf.mxu1  ;;  %v6230_v45 = vadd.f32 %v6229_v4, %v18627_v18  ;;  %v16710_v36 = vld [vmem:[#allocation7 + $0xba4] ss:$28 sps:$4 sm:$0xff]  }
 0x269   :  { %7066 = vmatpush1.bf16.msra.mxu0 %v16693_v43  ;;  %6887 = vmatprep.mubr.bf16.mxu0 %v18227_v7  ;;  %v6231_v31 = vpop.f32.mrf.mxu0  ;;  %v16713_v7 = vld [vmem:[#allocation7 + $0x7ec] ss:$28 sps:$4 sm:$0xff]  }
 0x26a   :  { %15023 = vmatmul.mubr.msk.bf16.vlgmr.msra.gmra.mxu1 %vm18169_vm4, %v21750_v59  ;;  %7067 = vmatprep.subr.bf16.mxu0 %v16701_v32  ;;  %v6340_v51 = vpop.f32.mrf.mxu1  ;;  %v18642_v24 = vadd.f32 %v6338_v46, %v6230_v45  ;;  %v6232_v43 = vadd.f32 %v6231_v31, %v18634_v56  ;;  %v16711_v46 = vld [vmem:[#allocation7 + $0x7e8] ss:$28 sps:$4 sm:$0xff]   ;;  %v16719_v59 = vld [vmem:[#allocation7 + $0x7b4] ss:$28 sps:$4 sm:$0xff]  }
 0x26b   :  { %6996 = vmatprep.mubr.bf16.mxu1 %v18233_v8  ;;  %7175 = vmatpush1.bf16.msra.mxu1 %v16696_v55  ;;  %v16716_v45 = vld [vmem:[#allocation7 + $0xb6c] ss:$28 sps:$4 sm:$0xff]  }
 0x26c   :  { %7176 = vmatprep.subr.bf16.mxu1 %v16704_v38  ;;  %v18645_v58 = vadd.f32 %v6340_v51, %v6232_v43 }
 0x26d   :  { %7068 = vmatpush1.bf16.msra.mxu0 %v16699_v10  ;;  %v6235_v32 = vpop.f32.mrf.mxu0  ;;  %v16714_v10 = vld [vmem:[#allocation7 + $0xb68] ss:$28 sps:$4 sm:$0xff]  }
 0x26e   :  { %7069 = vmatprep.subr.bf16.mxu0 %v16707_v49  ;;  %v6344_v4 = vpop.f32.mrf.mxu1  ;;  %v6236_v55 = vadd.f32 %v6235_v32, %v18627_v18  ;;  %v16717_v32 = vld [vmem:[#allocation7 + $0x7b0] ss:$28 sps:$4 sm:$0xff]  }
 0x26f   :  { %7177 = vmatpush1.bf16.msra.mxu1 %v16702_v27  ;;  %v6237_v31 = vpop.f32.mrf.mxu0 }
 0x270   :  { %6888 = vmatmul.mubr.bf16.gmra.mxu0 %v18239_v2  ;;  %7178 = vmatprep.subr.bf16.mxu1 %v16710_v36  ;;  %v6346_v38 = vpop.f32.mrf.mxu1  ;;  %v18650_v51 = vadd.f32 %v6344_v4, %v6236_v55  ;;  %v6238_v27 = vadd.f32 %v6237_v31, %v18634_v56  ;;  %v16720_v55 = vld [vmem:[#allocation7 + $0xb30] ss:$28 sps:$4 sm:$0xff]   ;;  %v16725_v31 = vld [vmem:[#allocation7 + $0x77c] ss:$28 sps:$4 sm:$0xff]  }
 0x271   :  { %7070 = vmatpush1.bf16.msra.mxu0 %v16705_v48  ;;  %6897 = vmatprep.mubr.bf16.mxu0 %v18283_v26  ;;  %v6239_v36 = vpop.f32.mrf.mxu0  ;;  %v16722_v26 = vld [vmem:[#allocation7 + $0xb34] ss:$28 sps:$4 sm:$0xff]  }
 0x272   :  { %6997 = vmatmul.mubr.bf16.gmra.mxu1 %v18245_v9  ;;  %7071 = vmatprep.subr.bf16.mxu0 %v16713_v7  ;;  %v6348_v49 = vpop.f32.mrf.mxu1  ;;  %v18655_v43 = vadd.f32 %v6346_v38, %v6238_v27  ;;  %v6240_v48 = vadd.f32 %v6239_v36, %v18627_v18  ;;  %v16728_v36 = vld [vmem:[#allocation7 + $0xafc] ss:$28 sps:$4 sm:$0xff]  }
 0x273   :  { %7006 = vmatprep.mubr.bf16.mxu1 %v18290_v44  ;;  %7179 = vmatpush1.bf16.msra.mxu1 %v16708_v53  ;;  %v6241_v2 = vpop.f32.mrf.mxu0 }
 0x274   :  { %7180 = vmatprep.subr.bf16.mxu1 %v16716_v45  ;;  %v6350_v4 = vpop.f32.mrf.mxu1  ;;  %v18658_v8 = vadd.f32 %v6348_v49, %v6240_v48  ;;  %v6242_v7 = vadd.f32 %v6241_v2, %v18634_v56  ;;  %v16723_v45 = vld [vmem:[#allocation7 + $0x778] ss:$28 sps:$4 sm:$0xff]   ;;  %v16731_v2 = vld [vmem:[#allocation7 + $0x744] ss:$28 sps:$4 sm:$0xff]  }
 0x275   :  { %7072 = vmatpush1.bf16.msra.mxu0 %v16711_v46  ;;  %v16726_v49 = vld [vmem:[#allocation7 + $0xaf8] ss:$28 sps:$4 sm:$0xff]  }
 0x276   :  { %7073 = vmatprep.subr.bf16.mxu0 %v16719_v59  ;;  %v6245_v53 = vpop.f32.mrf.mxu0  ;;  %v6354_v44 = vpop.f32.mrf.mxu1  ;;  %v18661_v38 = vadd.f32 %v6350_v4, %v6242_v7  ;;  %v16729_v7 = vld [vmem:[#allocation7 + $0x740] ss:$28 sps:$4 sm:$0xff]  }
 0x277   :  { %7181 = vmatpush1.bf16.msra.mxu1 %v16714_v10  ;;  %v6246_v27 = vadd.f32 %v6245_v53, %v18627_v18  ;;  %v16734_v53 = vld [vmem:[#allocation7 + $0xac4] ss:$28 sps:$4 sm:$0xff]  }
 0x278   :  { %6898 = vmatmul.mubr.bf16.gmra.mxu0 %v21729_v20  ;;  %7182 = vmatprep.subr.bf16.mxu1 %v16722_v26  ;;  %v6247_v46 = vpop.f32.mrf.mxu0  ;;  %v6356_v9 = vpop.f32.mrf.mxu1 }
 0x279   :  { %7074 = vmatpush1.bf16.msra.mxu0 %v16717_v32  ;;  %6907 = vmatprep.mubr.bf16.mxu0 %v21730_v47  ;;  %v18666_v59 = vadd.f32 %v6354_v44, %v6246_v27  ;;  %v6248_v10 = vadd.f32 %v6247_v46, %v18634_v56  ;;  %v16732_v27 = vld [vmem:[#allocation7 + $0xac0] ss:$28 sps:$4 sm:$0xff]   ;;  %v16737_v46 = vld [vmem:[#allocation7 + $0x70c] ss:$28 sps:$4 sm:$0xff]  }
 0x27a   :  { %7007 = vmatmul.mubr.bf16.gmra.mxu1 %v21731_v13  ;;  %7075 = vmatprep.subr.bf16.mxu0 %v16725_v31  ;;  %v6249_v26 = vpop.f32.mrf.mxu0  ;;  %v6358_v48 = vpop.f32.mrf.mxu1 }
 0x27b   :  { %7016 = vmatprep.mubr.bf16.mxu1 %v21732_v30  ;;  %7183 = vmatpush1.bf16.msra.mxu1 %v16720_v55  ;;  %v18671_v4 = vadd.f32 %v6356_v9, %v6248_v10  ;;  %v6250_v32 = vadd.f32 %v6249_v26, %v18627_v18  ;;  %v16740_v26 = vld [vmem:[#allocation7 + $0xa8c] ss:$28 sps:$4 sm:$0xff]  }
 0x27c   :  { %7184 = vmatprep.subr.bf16.mxu1 %v16728_v36  ;;  %v6251_v47 = vpop.f32.mrf.mxu0  ;;  %v6360_v44 = vpop.f32.mrf.mxu1  ;;  %v16735_v36 = vld [vmem:[#allocation7 + $0x708] ss:$28 sps:$4 sm:$0xff]  }
 0x27d   :  { %7076 = vmatpush1.bf16.msra.mxu0 %v16723_v45  ;;  %v18674_v20 = vadd.f32 %v6358_v48, %v6250_v32  ;;  %v6252_v31 = vadd.f32 %v6251_v47, %v18634_v56  ;;  %v16738_v48 = vld [vmem:[#allocation7 + $0xa88] ss:$28 sps:$4 sm:$0xff]   ;;  %v16743_v47 = vld [vmem:[#allocation7 + $0xa54] ss:$28 sps:$4 sm:$0xff]  }
 0x27e   :  { %7077 = vmatprep.subr.bf16.mxu0 %v16731_v2  ;;  %v6255_v55 = vpop.f32.mrf.mxu0  ;;  %v6364_v30 = vpop.f32.mrf.mxu1 }
 0x27f   :  { %7185 = vmatpush1.bf16.msra.mxu1 %v16726_v49  ;;  %v18677_v9 = vadd.f32 %v6360_v44, %v6252_v31  ;;  %v6256_v10 = vadd.f32 %v6255_v55, %v18627_v18  ;;  %v16741_v31 = vld [vmem:[#allocation7 + $0xa50] ss:$28 sps:$4 sm:$0xff]  }
 0x280   :  { %6908 = vmatmul.mubr.bf16.gmra.mxu0 %v21733_v50  ;;  %7186 = vmatprep.subr.bf16.mxu1 %v16734_v53  ;;  %v6257_v45 = vpop.f32.mrf.mxu0  ;;  %v6366_v13 = vpop.f32.mrf.mxu1  ;;  %v16746_v55 = vld [vmem:[#allocation7 + $0xdd4] ss:$28 sps:$4 sm:$0xff]  }
 0x281   :  { %7078 = vmatpush1.bf16.msra.mxu0 %v16729_v7  ;;  %6917 = vmatprep.mubr.bf16.mxu0 %v21734_v22  ;;  %v18682_v2 = vadd.f32 %v6364_v30, %v6256_v10  ;;  %v6258_v49 = vadd.f32 %v6257_v45, %v18634_v56  ;;  %v16744_v10 = vld [vmem:[#allocation7 + $0xdd0] ss:$28 sps:$4 sm:$0xff]   ;;  %v16749_v45 = vld [vmem:[#allocation7 + $0xa1c] ss:$28 sps:$4 sm:$0xff]  }
 0x282   :  { %7017 = vmatmul.mubr.bf16.gmra.mxu1 %v21735_v33  ;;  %7079 = vmatprep.subr.bf16.mxu0 %v16737_v46  ;;  %v6259_v32 = vpop.f32.mrf.mxu0  ;;  %v6368_v53 = vpop.f32.mrf.mxu1 }
 0x283   :  { %7026 = vmatprep.mubr.bf16.mxu1 %v21736_v60  ;;  %7187 = vmatpush1.bf16.msra.mxu1 %v16732_v27  ;;  %v18687_v44 = vadd.f32 %v6366_v13, %v6258_v49  ;;  %v6260_v7 = vadd.f32 %v6259_v32, %v18627_v18  ;;  %v16752_v32 = vld [vmem:[#allocation7 + $0xd9c] ss:$28 sps:$4 sm:$0xff]  }
 0x284   :  { %7188 = vmatprep.subr.bf16.mxu1 %v16740_v26  ;;  %v6261_v22 = vpop.f32.mrf.mxu0  ;;  %v6370_v30 = vpop.f32.mrf.mxu1  ;;  %v16747_v26 = vld [vmem:[#allocation7 + $0xa18] ss:$28 sps:$4 sm:$0xff]  }
 0x285   :  { %7080 = vmatpush1.bf16.msra.mxu0 %v16735_v36  ;;  %v18690_v50 = vadd.f32 %v6368_v53, %v6260_v7  ;;  %v6262_v46 = vadd.f32 %v6261_v22, %v18634_v56  ;;  %v16750_v53 = vld [vmem:[#allocation7 + $0xd98] ss:$28 sps:$4 sm:$0xff]   ;;  %v16755_v22 = vld [vmem:[#allocation7 + $0x9e4] ss:$28 sps:$4 sm:$0xff]  }
 0x286   :  { %7081 = vmatprep.subr.bf16.mxu0 %v16743_v47  ;;  %v6265_v27 = vpop.f32.mrf.mxu0 }
 0x287   :  { %7189 = vmatpush1.bf16.msra.mxu1 %v16738_v48  ;;  %v6374_v60 = vpop.f32.mrf.mxu1  ;;  %v18693_v13 = vadd.f32 %v6370_v30, %v6262_v46  ;;  %v6266_v49 = vadd.f32 %v6265_v27, %v18627_v18  ;;  %v16753_v46 = vld [vmem:[#allocation7 + $0x9e0] ss:$28 sps:$4 sm:$0xff]  }
 0x288   :  { %6918 = vmatmul.mubr.bf16.gmra.mxu0 %v21737_v54  ;;  %7190 = vmatprep.subr.bf16.mxu1 %v16746_v55  ;;  %v6267_v36 = vpop.f32.mrf.mxu0  ;;  %v16758_v27 = vld [vmem:[#allocation7 + $0xd64] ss:$28 sps:$4 sm:$0xff]  }
 0x289   :  { %v6376_v33 = vpop.f32.mrf.mxu1  ;;  %7082 = vmatpush2.bf16.msra.mxu0 %v16741_v31  ;;  %6927 = vmatprep.mubr.bf16.mxu0 %v21738_v41  ;;  %v18698_v47 = vadd.f32 %v6374_v60, %v6266_v49  ;;  %v6268_v48 = vadd.f32 %v6267_v36, %v18634_v56  ;;  %v16756_v49 = vld [vmem:[#allocation7 + $0xd60] ss:$28 sps:$4 sm:$0xff]   ;;  %v16761_v36 = vld [vmem:[#allocation7 + $0x9ac] ss:$28 sps:$4 sm:$0xff]  }
 0x28a   :  { %7027 = vmatmul.mubr.bf16.gmra.mxu1 %v21739_v0  ;;  %7083 = vmatprep.subr.bf16.mxu0 %v16749_v45  ;;  %v6269_v7 = vpop.f32.mrf.mxu0 }
 0x28b   :  { %7036 = vmatprep.mubr.bf16.mxu1 %v21740_v57  ;;  %7191 = vmatpush2.bf16.msra.mxu1 %v16744_v10  ;;  %v6378_v55 = vpop.f32.mrf.mxu1  ;;  %v18703_v30 = vadd.f32 %v6376_v33, %v6268_v48  ;;  %v6270_v31 = vadd.f32 %v6269_v7, %v18627_v18  ;;  %v16764_v7 = vld [vmem:[#allocation7 + $0xd2c] ss:$28 sps:$4 sm:$0xff]  }
 0x28c   :  { %7192 = vmatprep.subr.bf16.mxu1 %v16752_v32  ;;  %v6271_v41 = vpop.f32.mrf.mxu0  ;;  %v16759_v32 = vld [vmem:[#allocation7 + $0x9a8] ss:$28 sps:$4 sm:$0xff]  }
 0x28d   :  { %v6380_v60 = vpop.f32.mrf.mxu1  ;;  %7084 = vmatpush2.bf16.msra.mxu0 %v16747_v26  ;;  %v18706_v54 = vadd.f32 %v6378_v55, %v6270_v31  ;;  %v6272_v45 = vadd.f32 %v6271_v41, %v18634_v56  ;;  %v16762_v55 = vld [vmem:[#allocation7 + $0xd28] ss:$28 sps:$4 sm:$0xff]   ;;  %v16767_v41 = vld [vmem:[#allocation7 + $0x974] ss:$28 sps:$4 sm:$0xff]  }
 0x28e   :  { %7085 = vmatprep.subr.bf16.mxu0 %v16755_v22 }
 0x28f   :  { %7193 = vmatpush2.bf16.msra.mxu1 %v16750_v53  ;;  %v6275_v10 = vpop.f32.mrf.mxu0  ;;  %v18709_v33 = vadd.f32 %v6380_v60, %v6272_v45  ;;  %v16765_v45 = vld [vmem:[#allocation7 + $0x970] ss:$28 sps:$4 sm:$0xff]  }
 0x290   :  { %v6384_v57 = vpop.f32.mrf.mxu1  ;;  %v6276_v48 = vadd.f32 %v6275_v10, %v18627_v18  ;;  %6928 = vmatmul.mubr.bf16.gmra.mxu0 %v21741_v16  ;;  %7194 = vmatprep.subr.bf16.mxu1 %v16758_v27  ;;  %v16770_v10 = vld [vmem:[#allocation7 + $0xcf4] ss:$28 sps:$4 sm:$0xff]  }
 0x291   :  { %v6277_v26 = vpop.f32.mrf.mxu0  ;;  %7086 = vmatpush2.bf16.msra.mxu0 %v16753_v46  ;;  %6937 = vmatprep.mubr.bf16.mxu0 %v18489_v1 }
 0x292   :  { %v6386_v0 = vpop.f32.mrf.mxu1  ;;  %v18714_v22 = vadd.f32 %v6384_v57, %v6276_v48  ;;  %v6278_v53 = vadd.f32 %v6277_v26, %v18634_v56  ;;  %7037 = vmatmul.mubr.bf16.gmra.mxu1 %v21742_v19  ;;  %7087 = vmatprep.subr.bf16.mxu0 %v16761_v36  ;;  %v16768_v48 = vld [vmem:[#allocation7 + $0xcf0] ss:$28 sps:$4 sm:$0xff]   ;;  %v16773_v26 = vld [vmem:[#allocation7 + $0x93c] ss:$28 sps:$4 sm:$0xff]  }
 0x293   :  { %7046 = vmatprep.mubr.bf16.mxu1 %v18494_v42  ;;  %7195 = vmatpush2.bf16.msra.mxu1 %v16756_v49  ;;  %v6279_v31 = vpop.f32.mrf.mxu0 }
 0x294   :  { %v6388_v27 = vpop.f32.mrf.mxu1  ;;  %v18719_v60 = vadd.f32 %v6386_v0, %v6278_v53  ;;  %v6280_v46 = vadd.f32 %v6279_v31, %v18627_v18  ;;  %7196 = vmatprep.subr.bf16.mxu1 %v16764_v7  ;;  %v16771_v7 = vld [vmem:[#allocation7 + $0x938] ss:$28 sps:$4 sm:$0xff]  }
 0x295   :  { %v6281_v1 = vpop.f32.mrf.mxu0  ;;  %7088 = vmatpush2.bf16.msra.mxu0 %v16759_v32  ;;  %v16776_v31 = vld [vmem:[#allocation7 + $0xcbc] ss:$28 sps:$4 sm:$0xff]  }
 0x296   :  { %v6390_v57 = vpop.f32.mrf.mxu1  ;;  %v18722_v16 = vadd.f32 %v6388_v27, %v6280_v46  ;;  %v6282_v36 = vadd.f32 %v6281_v1, %v18634_v56  ;;  %7089 = vmatprep.subr.bf16.mxu0 %v16767_v41  ;;  %v16774_v27 = vld [vmem:[#allocation7 + $0xcb8] ss:$28 sps:$4 sm:$0xff]   ;;  %v16779_v1 = vld [vmem:[#allocation7 + $0x904] ss:$28 sps:$4 sm:$0xff]  }
 0x297   :  { %7197 = vmatpush2.bf16.msra.mxu1 %v16762_v55 }
 0x298   :  { %v6285_v49 = vpop.f32.mrf.mxu0  ;;  %v6394_v42 = vpop.f32.mrf.mxu1  ;;  %v18725_v0 = vadd.f32 %v6390_v57, %v6282_v36  ;;  %6938 = vmatmul.mubr.bf16.gmra.mxu0 %v18482_v52  ;;  %7198 = vmatprep.subr.bf16.mxu1 %v16770_v10  ;;  %v16777_v36 = vld [vmem:[#allocation7 + $0x900] ss:$28 sps:$4 sm:$0xff]  }
 0x299   :  { %v6286_v53 = vadd.f32 %v6285_v49, %v18627_v18  ;;  %7090 = vmatpush2.bf16.msra.mxu0 %v16765_v45  ;;  %6947 = vmatprep.mubr.bf16.mxu0 %v18529_v21  ;;  %v16782_v49 = vld [vmem:[#allocation7 + $0xc84] ss:$28 sps:$4 sm:$0xff]  }
 0x29a   :  { %v6287_v32 = vpop.f32.mrf.mxu0  ;;  %v6396_v19 = vpop.f32.mrf.mxu1  ;;  %7047 = vmatmul.mubr.bf16.gmra.mxu1 %v18501_v62  ;;  %7091 = vmatprep.subr.bf16.mxu0 %v16773_v26 }
 0x29b   :  { %v18730_v41 = vadd.f32 %v6394_v42, %v6286_v53  ;;  %v6288_v55 = vadd.f32 %v6287_v32, %v18634_v56  ;;  %7056 = vmatprep.mubr.bf16.mxu1 %v18533_v61  ;;  %7199 = vmatpush2.bf16.msra.mxu1 %v16768_v48  ;;  %v16780_v42 = vld [vmem:[#allocation7 + $0xc80] ss:$28 sps:$4 sm:$0xff]   ;;  %v16785_v53 = vld [vmem:[#allocation7 + $0x8cc] ss:$28 sps:$4 sm:$0xff]  }
 0x29c   :  { %v6289_v46 = vpop.f32.mrf.mxu0  ;;  %v6398_v10 = vpop.f32.mrf.mxu1  ;;  %7200 = vmatprep.subr.bf16.mxu1 %v16776_v31  ;;  %v16783_v31 = vld [vmem:[#allocation7 + $0x8c8] ss:$28 sps:$4 sm:$0xff]  }
 0x29d   :  { %v18735_v57 = vadd.f32 %v6396_v19, %v6288_v55  ;;  %v6290_v45 = vadd.f32 %v6289_v46, %v18627_v18  ;;  %7092 = vmatpush2.bf16.msra.mxu0 %v16771_v7  ;;  %v16788_v46 = vld [vmem:[#allocation7 + $0xc4c] ss:$28 sps:$4 sm:$0xff]  }
 0x29e   :  { %v6291_v21 = vpop.f32.mrf.mxu0  ;;  %v6400_v62 = vpop.f32.mrf.mxu1  ;;  %7093 = vmatprep.subr.bf16.mxu0 %v16779_v1 }
 0x29f   :  { %v18738_v32 = vadd.f32 %v6398_v10, %v6290_v45  ;;  %v6292_v26 = vadd.f32 %v6291_v21, %v18634_v56  ;;  %7201 = vmatpush2.bf16.msra.mxu1 %v16774_v27  ;;  %v16786_v10 = vld [vmem:[#allocation7 + $0xc48] ss:$28 sps:$4 sm:$0xff]   ;;  %v16791_v45 = vld [vmem:[#allocation7 + $0xf94] ss:$28 sps:$4 sm:$0xff]  }
 0x2a0   :  { %v6295_v19 = vpop.f32.mrf.mxu0  ;;  %v6404_v55 = vpop.f32.mrf.mxu1  ;;  %6948 = vmatmul.mubr.bf16.gmra.mxu0 %v18541_v37  ;;  %7202 = vmatprep.subr.bf16.mxu1 %v16782_v49 }
 0x2a1   :  { %v18741_v48 = vadd.f32 %v6400_v62, %v6292_v26  ;;  %v6296_v7 = vadd.f32 %v6295_v19, %v18627_v18  ;;  %7094 = vmatpush2.bf16.msra.mxu0 %v16777_v36  ;;  %7097 = vmatprep.mubr.bf16.mxu0 %v18164_v39  ;;  %v16789_v18 = vld [vmem:[#allocation7 + $0xf90] ss:$28 sps:$4 sm:$0xff]  }
 0x2a2   :  { %7057 = vmatmul.mubr.bf16.gmra.mxu1 %v18547_v63  ;;  %v6297_v21 = vpop.f32.mrf.mxu0  ;;  %v6406_v27 = vpop.f32.mrf.mxu1  ;;  %7095 = vmatprep.subr.bf16.mxu0 %v16785_v53  ;;  %v16794_v36 = vld [vmem:[#allocation7 + $0x1314] ss:$28 sps:$4 sm:$0xff]   ;;  %v16797_v63 = vld [vmem:[#allocation7 + $0xf5c] ss:$28 sps:$4 sm:$0xff]  }
 0x2a3   :  { %v18747_v62 = vadd.f32 %v6404_v55, %v6296_v7  ;;  %7203 = vmatpush2.bf16.msra.mxu1 %v16780_v42  ;;  %7206 = vmatprep.mubr.bf16.mxu1 %v18166_v40  ;;  %v6298_v1 = vadd.f32 %v6297_v21, %v18634_v56  ;;  %v16792_v39 = vld [vmem:[#allocation7 + $0x1310] ss:$28 sps:$4 sm:$0xff]   ;;  %v16795_v42 = vld [vmem:[#allocation7 + $0xf58] ss:$28 sps:$4 sm:$0xff]   ;;  %v16803_v7 = vld [vmem:[#allocation7 + $0xf24] ss:$28 sps:$4 sm:$0xff]  }
 0x2a4   :  { %v6299_v49 = vpop.f32.mrf.mxu0  ;;  %v6408_v26 = vpop.f32.mrf.mxu1  ;;  %7204 = vmatprep.subr.bf16.mxu1 %v16788_v46  ;;  %v16800_v56 = vld [vmem:[#allocation7 + $0x12dc] ss:$28 sps:$4 sm:$0xff]  }
 0x2a5   :  { %v18751_v19 = vadd.f32 %v6406_v27, %v6298_v1  ;;  %7096 = vmatpush2.bf16.msra.mxu0 %v16783_v31  ;;  %v16798_v46 = vld [vmem:[#allocation7 + $0x12d8] ss:$28 sps:$4 sm:$0xff]   ;;  %v16804_v1 = vld [vmem:[#allocation7 + $0x12a0] ss:$28 sps:$4 sm:$0xff]   ;;  %v16809_v49 = vld [vmem:[#allocation7 + $0xeec] ss:$28 sps:$4 sm:$0xff]  }
 0x2a6   :  { %v6300_v37 = vpop.f32.mrf.mxu0  ;;  %v6409_v61 = vpop.f32.mrf.mxu1  ;;  %7283 = vmatprep.subr.bf16.mxu0 %v16791_v45  ;;  %v16806_v45 = vld [vmem:[#allocation7 + $0x12a4] ss:$28 sps:$4 sm:$0xff]  }
 0x2a7   :  { %7205 = vmatpush2.bf16.msra.mxu1 %v16786_v10  ;;  %v16801_v10 = vld [vmem:[#allocation7 + $0xf20] ss:$28 sps:$4 sm:$0xff]  }
 0x2a8   :  { %v6445_v53 = vpop.f32.mrf.mxu0  ;;  %7098 = vmatmul.mubr.bf16.vlgmr.msra.gmra.mxu0 %v18158_v34  ;;  %7392 = vmatprep.subr.bf16.mxu1 %v16794_v36 }
 0x2a9   :  { %v6554_v55 = vpop.f32.mrf.mxu1  ;;  %7284 = vmatpush1.bf16.msra.mxu0 %v16789_v18  ;;  %7105 = vmatprep.mubr.bf16.mxu0 %v18209_v5  ;;  %v16807_v53 = vld [vmem:[#allocation7 + $0xee8] ss:$28 sps:$4 sm:$0xff]  }
 0x2aa   :  { %7207 = vmatmul.mubr.bf16.vlgmr.msra.gmra.mxu1 %v18160_v17  ;;  %v6446_v31 = vpop.f32.mrf.mxu0  ;;  %7285 = vmatprep.subr.bf16.mxu0 %v16797_v63 }
 0x2ab   :  { %7214 = vmatprep.mubr.bf16.mxu1 %v18211_v25  ;;  %7393 = vmatpush1.bf16.msra.mxu1 %v16792_v39  ;;  %v6555_v61 = vpop.f32.mrf.mxu1  ;;  %v16815_v31 = vld [vmem:[#allocation7 + $0xeb4] ss:$28 sps:$4 sm:$0xff]  }
 0x2ac   :  { %v6447_v37 = vpop.f32.mrf.mxu0  ;;  %7394 = vmatprep.subr.bf16.mxu1 %v16800_v56  ;;  %v16812_v56 = vld [vmem:[#allocation7 + $0x126c] ss:$28 sps:$4 sm:$0xff]  }
 0x2ad   :  { %v6448_v21 = vadd.f32 %v6447_v37, %v18642_v24  ;;  %v6556_v27 = vpop.f32.mrf.mxu1  ;;  %7286 = vmatpush1.bf16.msra.mxu0 %v16795_v42 }
 0x2ae   :  { %v6449_v26 = vpop.f32.mrf.mxu0  ;;  %7287 = vmatprep.subr.bf16.mxu0 %v16803_v7  ;;  %v16810_v7 = vld [vmem:[#allocation7 + $0x1268] ss:$28 sps:$4 sm:$0xff]  }
 0x2af   :  { %v18758_v18 = vadd.f32 %v6556_v27, %v6448_v21  ;;  %7395 = vmatpush1.bf16.msra.mxu1 %v16798_v46  ;;  %v6450_v63 = vadd.f32 %v6449_v26, %v18645_v58  ;;  %v6558_v36 = vpop.f32.mrf.mxu1 }
 0x2b0   :  { %v6453_v39 = vpop.f32.mrf.mxu0  ;;  %7106 = vmatmul.mubr.bf16.gmra.mxu0 %v18203_v14  ;;  %7396 = vmatprep.subr.bf16.mxu1 %v16806_v45 }
 0x2b1   :  { %v18762_v55 = vadd.f32 %v6558_v36, %v6450_v63  ;;  %v6454_v24 = vadd.f32 %v6453_v39, %v18650_v51  ;;  %v6562_v42 = vpop.f32.mrf.mxu1  ;;  %7288 = vmatpush1.bf16.msra.mxu0 %v16801_v10  ;;  %7115 = vmatprep.mubr.bf16.mxu0 %v18258_v28  ;;  %v16813_v51 = vld [vmem:[#allocation7 + $0xeb0] ss:$28 sps:$4 sm:$0xff]  }
 0x2b2   :  { %7215 = vmatmul.mubr.bf16.gmra.mxu1 %v18205_v15  ;;  %v6455_v58 = vpop.f32.mrf.mxu0  ;;  %7289 = vmatprep.subr.bf16.mxu0 %v16809_v49  ;;  %v16818_v10 = vld [vmem:[#allocation7 + $0x1234] ss:$28 sps:$4 sm:$0xff]   ;;  %v16821_v49 = vld [vmem:[#allocation7 + $0xe7c] ss:$28 sps:$4 sm:$0xff]  }
 0x2b3   :  { %v18767_v46 = vadd.f32 %v6562_v42, %v6454_v24  ;;  %7224 = vmatprep.mubr.bf16.mxu1 %v18260_v29  ;;  %7397 = vmatpush1.bf16.msra.mxu1 %v16804_v1  ;;  %v6456_v61 = vadd.f32 %v6455_v58, %v18655_v43  ;;  %v6564_v37 = vpop.f32.mrf.mxu1  ;;  %v16816_v63 = vld [vmem:[#allocation7 + $0x1230] ss:$28 sps:$4 sm:$0xff]   ;;  %v16824_v42 = vld [vmem:[#allocation7 + $0x11fc] ss:$28 sps:$4 sm:$0xff]  }
 0x2b4   :  { %v6457_v45 = vpop.f32.mrf.mxu0  ;;  %7398 = vmatprep.subr.bf16.mxu1 %v16812_v56  ;;  %v16819_v56 = vld [vmem:[#allocation7 + $0xe78] ss:$28 sps:$4 sm:$0xff]  }
 0x2b5   :  { %v18771_v21 = vadd.f32 %v6564_v37, %v6456_v61  ;;  %v6458_v27 = vadd.f32 %v6457_v45, %v18658_v8  ;;  %v6566_v26 = vpop.f32.mrf.mxu1  ;;  %7290 = vmatpush1.bf16.msra.mxu0 %v16807_v53  ;;  %v16827_v61 = vld [vmem:[#allocation7 + $0xe44] ss:$28 sps:$4 sm:$0xff]  }
 0x2b6   :  { %v6459_v36 = vpop.f32.mrf.mxu0  ;;  %7291 = vmatprep.subr.bf16.mxu0 %v16815_v31  ;;  %v16822_v31 = vld [vmem:[#allocation7 + $0x11f8] ss:$28 sps:$4 sm:$0xff]  }
 0x2b7   :  { %v18774_v39 = vadd.f32 %v6566_v26, %v6458_v27  ;;  %7399 = vmatpush1.bf16.msra.mxu1 %v16810_v7  ;;  %v6460_v43 = vadd.f32 %v6459_v36, %v18661_v38  ;;  %v6568_v1 = vpop.f32.mrf.mxu1 }
 0x2b8   :  { %v6463_v24 = vpop.f32.mrf.mxu0  ;;  %7116 = vmatmul.mubr.bf16.gmra.mxu0 %v18247_v11  ;;  %7400 = vmatprep.subr.bf16.mxu1 %v16818_v10 }
 0x2b9   :  { %v18778_v58 = vadd.f32 %v6568_v1, %v6460_v43  ;;  %v6464_v8 = vadd.f32 %v6463_v24, %v18666_v59  ;;  %v6572_v53 = vpop.f32.mrf.mxu1  ;;  %7292 = vmatpush1.bf16.msra.mxu0 %v16813_v51  ;;  %7125 = vmatprep.mubr.bf16.mxu0 %v18310_v3  ;;  %v16825_v59 = vld [vmem:[#allocation7 + $0xe40] ss:$28 sps:$4 sm:$0xff]  }
 0x2ba   :  { %7225 = vmatmul.mubr.bf16.gmra.mxu1 %v18249_v12  ;;  %v6465_v38 = vpop.f32.mrf.mxu0  ;;  %7293 = vmatprep.subr.bf16.mxu0 %v16821_v49  ;;  %v16830_v51 = vld [vmem:[#allocation7 + $0x11c4] ss:$28 sps:$4 sm:$0xff]   ;;  %v16833_v49 = vld [vmem:[#allocation7 + $0xe0c] ss:$28 sps:$4 sm:$0xff]  }
 0x2bb   :  { %v18783_v7 = vadd.f32 %v6572_v53, %v6464_v8  ;;  %7234 = vmatprep.mubr.bf16.mxu1 %v18312_v6  ;;  %7401 = vmatpush1.bf16.msra.mxu1 %v16816_v63  ;;  %v6466_v37 = vadd.f32 %v6465_v38, %v18671_v4  ;;  %v6574_v45 = vpop.f32.mrf.mxu1  ;;  %v16828_v43 = vld [vmem:[#allocation7 + $0x11c0] ss:$28 sps:$4 sm:$0xff]   ;;  %v16836_v53 = vld [vmem:[#allocation7 + $0x118c] ss:$28 sps:$4 sm:$0xff]  }
 0x2bc   :  { %v6467_v10 = vpop.f32.mrf.mxu0  ;;  %7402 = vmatprep.subr.bf16.mxu1 %v16824_v42  ;;  %v16831_v42 = vld [vmem:[#allocation7 + $0xe08] ss:$28 sps:$4 sm:$0xff]  }
 0x2bd   :  { %v18787_v27 = vadd.f32 %v6574_v45, %v6466_v37  ;;  %v6468_v26 = vadd.f32 %v6467_v10, %v18674_v20  ;;  %v6576_v36 = vpop.f32.mrf.mxu1  ;;  %7294 = vmatpush1.bf16.msra.mxu0 %v16819_v56  ;;  %v16839_v37 = vld [vmem:[#allocation7 + $0x1154] ss:$28 sps:$4 sm:$0xff]   ;;  %v16917_v3 = vld [vmem:[#allocation7 + $0x84] ss:$28 sps:$4 sm:$0xff]  }
 0x2be   :  { %v6469_v1 = vpop.f32.mrf.mxu0  ;;  %7295 = vmatprep.subr.bf16.mxu0 %v16827_v61  ;;  %v16834_v61 = vld [vmem:[#allocation7 + $0x1188] ss:$28 sps:$4 sm:$0xff]   ;;  %v21752_v10 = vld [vmem:[#allocation50_spill] sm:$0xff] }
 0x2bf   :  { %v18790_v24 = vadd.f32 %v6576_v36, %v6468_v26  ;;  %7403 = vmatpush1.bf16.msra.mxu1 %v16822_v31  ;;  %v6470_v4 = vadd.f32 %v6469_v1, %v18677_v9  ;;  %v6578_v63 = vpop.f32.mrf.mxu1  ;;  %v21751_v31 = vld [vmem:[#allocation40_spill] sm:$0xff] }
 0x2c0   :  { %v6473_v8 = vpop.f32.mrf.mxu0  ;;  %7126 = vmatmul.mubr.bf16.gmra.mxu0 %v18299_v23  ;;  %7404 = vmatprep.subr.bf16.mxu1 %v16830_v51 }
 0x2c1   :  { %v18794_v38 = vadd.f32 %v6578_v63, %v6470_v4  ;;  %v6474_v20 = vadd.f32 %v6473_v8, %v18682_v2  ;;  %v6582_v56 = vpop.f32.mrf.mxu1  ;;  %7296 = vmatpush1.bf16.msra.mxu0 %v16825_v59  ;;  %7135 = vmatprep.mubr.bf16.mxu0 %v18362_v35  ;;  %v16837_v2 = vld [vmem:[#allocation7 + $0x1150] ss:$28 sps:$4 sm:$0xff]  }
 0x2c2   :  { %7235 = vmatmul.mubr.bf16.gmra.mxu1 %v21751_v31  ;;  %v6475_v9 = vpop.f32.mrf.mxu0  ;;  %7297 = vmatprep.subr.bf16.mxu0 %v16833_v49  ;;  %v16842_v59 = vld [vmem:[#allocation7 + $0x14d4] ss:$28 sps:$4 sm:$0xff]   ;;  %v16845_v49 = vld [vmem:[#allocation7 + $0x111c] ss:$28 sps:$4 sm:$0xff]  }
 0x2c3   :  { %v18799_v45 = vadd.f32 %v6582_v56, %v6474_v20  ;;  %7244 = vmatprep.mubr.bf16.mxu1 %v21752_v10  ;;  %7405 = vmatpush1.bf16.msra.mxu1 %v16828_v43  ;;  %v6476_v51 = vadd.f32 %v6475_v9, %v18687_v44  ;;  %v6584_v26 = vpop.f32.mrf.mxu1  ;;  %v16840_v8 = vld [vmem:[#allocation7 + $0x14d0] ss:$28 sps:$4 sm:$0xff]   ;;  %v16888_v31 = vld [vmem:[#allocation7 + $0x518] ss:$28 sps:$4 sm:$0xff]  }
 0x2c4   :  { %v6477_v36 = vpop.f32.mrf.mxu0  ;;  %7406 = vmatprep.subr.bf16.mxu1 %v16836_v53  ;;  %v21753_v53 = vld [vmem:[#allocation47_spill] sm:$0xff] }
 0x2c5   :  { %v18803_v1 = vadd.f32 %v6584_v26, %v6476_v51  ;;  %v6478_v4 = vadd.f32 %v6477_v36, %v18690_v50  ;;  %v6586_v63 = vpop.f32.mrf.mxu1  ;;  %7298 = vmatpush1.bf16.msra.mxu0 %v16831_v42  ;;  %v16843_v51 = vld [vmem:[#allocation7 + $0x1118] ss:$28 sps:$4 sm:$0xff]   ;;  %v21754_v36 = vld [vmem:[#allocation57_spill] sm:$0xff] }
 0x2c6   :  { %v6479_v20 = vpop.f32.mrf.mxu0  ;;  %7299 = vmatprep.subr.bf16.mxu0 %v16839_v37  ;;  %v16848_v26 = vld [vmem:[#allocation7 + $0x149c] ss:$28 sps:$4 sm:$0xff]  }
 0x2c7   :  { %v18806_v56 = vadd.f32 %v6586_v63, %v6478_v4  ;;  %7407 = vmatpush1.bf16.msra.mxu1 %v16834_v61  ;;  %v6480_v44 = vadd.f32 %v6479_v20, %v18693_v13  ;;  %v6588_v43 = vpop.f32.mrf.mxu1  ;;  %v16846_v37 = vld [vmem:[#allocation7 + $0x1498] ss:$28 sps:$4 sm:$0xff]   ;;  %v16851_v4 = vld [vmem:[#allocation7 + $0x10e4] ss:$28 sps:$4 sm:$0xff]   ;;  %v21756_v20 = vld [vmem:[#allocation58_spill] sm:$0xff] }
 0x2c8   :  { %v6483_v9 = vpop.f32.mrf.mxu0  ;;  %7136 = vmatmul.mubr.bf16.gmra.mxu0 %v21753_v53  ;;  %7408 = vmatprep.subr.bf16.mxu1 %v16842_v59  ;;  %v21755_v61 = vld [vmem:[#allocation48_spill] sm:$0xff] }
 0x2c9   :  { %v18810_v10 = vadd.f32 %v6588_v43, %v6480_v44  ;;  %v6484_v50 = vadd.f32 %v6483_v9, %v18698_v47  ;;  %v6592_v42 = vpop.f32.mrf.mxu1  ;;  %7300 = vmatpush2.bf16.msra.mxu0 %v16837_v2  ;;  %7145 = vmatprep.mubr.bf16.mxu0 %v21754_v36  ;;  %v16849_v47 = vld [vmem:[#allocation7 + $0x10e0] ss:$28 sps:$4 sm:$0xff]  }
 0x2ca   :  { %7245 = vmatmul.mubr.bf16.gmra.mxu1 %v21755_v61  ;;  %v6485_v13 = vpop.f32.mrf.mxu0  ;;  %7301 = vmatprep.subr.bf16.mxu0 %v16845_v49  ;;  %v16854_v2 = vld [vmem:[#allocation7 + $0x1464] ss:$28 sps:$4 sm:$0xff]   ;;  %v16857_v49 = vld [vmem:[#allocation7 + $0x10ac] ss:$28 sps:$4 sm:$0xff]  }
 0x2cb   :  { %v18815_v63 = vadd.f32 %v6592_v42, %v6484_v50  ;;  %7254 = vmatprep.mubr.bf16.mxu1 %v21756_v20  ;;  %7409 = vmatpush2.bf16.msra.mxu1 %v16840_v8  ;;  %v6486_v59 = vadd.f32 %v6485_v13, %v18703_v30  ;;  %v6594_v44 = vpop.f32.mrf.mxu1  ;;  %v16852_v61 = vld [vmem:[#allocation7 + $0x1460] ss:$28 sps:$4 sm:$0xff]  }
 0x2cc   :  { %v6487_v43 = vpop.f32.mrf.mxu0  ;;  %7410 = vmatprep.subr.bf16.mxu1 %v16848_v26  ;;  %v21757_v26 = vld [vmem:[#allocation55_spill] sm:$0xff] }
 0x2cd   :  { %v18819_v9 = vadd.f32 %v6594_v44, %v6486_v59  ;;  %v6488_v36 = vadd.f32 %v6487_v43, %v18706_v54  ;;  %v6596_v53 = vpop.f32.mrf.mxu1  ;;  %7302 = vmatpush2.bf16.msra.mxu0 %v16843_v51  ;;  %v16855_v59 = vld [vmem:[#allocation7 + $0x10a8] ss:$28 sps:$4 sm:$0xff]  }
 0x2ce   :  { %v6489_v50 = vpop.f32.mrf.mxu0  ;;  %7303 = vmatprep.subr.bf16.mxu0 %v16851_v4  ;;  %v16860_v44 = vld [vmem:[#allocation7 + $0x142c] ss:$28 sps:$4 sm:$0xff]  }
 0x2cf   :  { %v18822_v42 = vadd.f32 %v6596_v53, %v6488_v36  ;;  %7411 = vmatpush2.bf16.msra.mxu1 %v16846_v37  ;;  %v6490_v30 = vadd.f32 %v6489_v50, %v18709_v33  ;;  %v6598_v8 = vpop.f32.mrf.mxu1  ;;  %v21758_v43 = vld [vmem:[#allocation65_spill] sm:$0xff]  ;;  %v16863_v36 = vld [vmem:[#allocation7 + $0x1074] ss:$28 sps:$4 sm:$0xff]   ;;  %v21759_v37 = vld [vmem:[#allocation56_spill] sm:$0xff] }
 0x2d0   :  { %v6493_v13 = vpop.f32.mrf.mxu0  ;;  %7146 = vmatmul.mubr.bf16.gmra.mxu0 %v21757_v26  ;;  %7412 = vmatprep.subr.bf16.mxu1 %v16854_v2  ;;  %v16858_v53 = vld [vmem:[#allocation7 + $0x1428] ss:$28 sps:$4 sm:$0xff]   ;;  %v21760_v50 = vld [vmem:[#allocation66_spill] sm:$0xff] }
 0x2d1   :  { %v18826_v20 = vadd.f32 %v6598_v8, %v6490_v30  ;;  %v6494_v54 = vadd.f32 %v6493_v13, %v18714_v22  ;;  %v6602_v51 = vpop.f32.mrf.mxu1  ;;  %7304 = vmatpush2.bf16.msra.mxu0 %v16849_v47  ;;  %7155 = vmatprep.mubr.bf16.mxu0 %v21758_v43  ;;  %v16861_v22 = vld [vmem:[#allocation7 + $0x1070] ss:$28 sps:$4 sm:$0xff]  }
 0x2d2   :  { %7255 = vmatmul.mubr.bf16.gmra.mxu1 %v21759_v37  ;;  %v6495_v33 = vpop.f32.mrf.mxu0  ;;  %7305 = vmatprep.subr.bf16.mxu0 %v16857_v49  ;;  %v16866_v47 = vld [vmem:[#allocation7 + $0x13f4] ss:$28 sps:$4 sm:$0xff]   ;;  %v16869_v49 = vld [vmem:[#allocation7 + $0x103c] ss:$28 sps:$4 sm:$0xff]  }
 0x2d3   :  { %v18831_v4 = vadd.f32 %v6602_v51, %v6494_v54  ;;  %7264 = vmatprep.mubr.bf16.mxu1 %v21760_v50  ;;  %7413 = vmatpush2.bf16.msra.mxu1 %v16852_v61  ;;  %v6496_v2 = vadd.f32 %v6495_v33, %v18719_v60  ;;  %v6604_v30 = vpop.f32.mrf.mxu1  ;;  %v16864_v37 = vld [vmem:[#allocation7 + $0x13f0] ss:$28 sps:$4 sm:$0xff]  }
 0x2d4   :  { %v6497_v8 = vpop.f32.mrf.mxu0  ;;  %7414 = vmatprep.subr.bf16.mxu1 %v16860_v44  ;;  %v21761_v44 = vld [vmem:[#allocation63_spill] sm:$0xff] }
 0x2d5   :  { %v18835_v13 = vadd.f32 %v6604_v30, %v6496_v2  ;;  %v6498_v43 = vadd.f32 %v6497_v8, %v18722_v16  ;;  %v6606_v26 = vpop.f32.mrf.mxu1  ;;  %7306 = vmatpush2.bf16.msra.mxu0 %v16855_v59  ;;  %v16867_v2 = vld [vmem:[#allocation7 + $0x1038] ss:$28 sps:$4 sm:$0xff]   ;;  %v21762_v8 = vld [vmem:[#allocation73_spill] sm:$0xff] }
 0x2d6   :  { %v6499_v54 = vpop.f32.mrf.mxu0  ;;  %7307 = vmatprep.subr.bf16.mxu0 %v16863_v36  ;;  %v16872_v30 = vld [vmem:[#allocation7 + $0x13bc] ss:$28 sps:$4 sm:$0xff]  }
 0x2d7   :  { %v18838_v51 = vadd.f32 %v6606_v26, %v6498_v43  ;;  %7415 = vmatpush2.bf16.msra.mxu1 %v16858_v53  ;;  %v6500_v60 = vadd.f32 %v6499_v54, %v18725_v0  ;;  %v6608_v61 = vpop.f32.mrf.mxu1  ;;  %v16870_v26 = vld [vmem:[#allocation7 + $0x13b8] ss:$28 sps:$4 sm:$0xff]   ;;  %v16875_v43 = vld [vmem:[#allocation7 + $0x1004] ss:$28 sps:$4 sm:$0xff]   ;;  %v21764_v54 = vld [vmem:[#allocation74_spill] sm:$0xff] }
 0x2d8   :  { %v6503_v33 = vpop.f32.mrf.mxu0  ;;  %7156 = vmatmul.mubr.bf16.gmra.mxu0 %v21761_v44  ;;  %7416 = vmatprep.subr.bf16.mxu1 %v16866_v47  ;;  %v21763_v53 = vld [vmem:[#allocation64_spill] sm:$0xff] }
 0x2d9   :  { %v18842_v50 = vadd.f32 %v6608_v61, %v6500_v60  ;;  %v6504_v16 = vadd.f32 %v6503_v33, %v18730_v41  ;;  %v6612_v59 = vpop.f32.mrf.mxu1  ;;  %7308 = vmatpush2.bf16.msra.mxu0 %v16861_v22  ;;  %7165 = vmatprep.mubr.bf16.mxu0 %v21762_v8  ;;  %v16873_v41 = vld [vmem:[#allocation7 + $0x1000] ss:$28 sps:$4 sm:$0xff]  }
 0x2da   :  { %7265 = vmatmul.mubr.bf16.gmra.mxu1 %v21763_v53  ;;  %v6505_v0 = vpop.f32.mrf.mxu0  ;;  %7309 = vmatprep.subr.bf16.mxu0 %v16869_v49  ;;  %v16878_v22 = vld [vmem:[#allocation7 + $0x1384] ss:$28 sps:$4 sm:$0xff]   ;;  %v16881_v49 = vld [vmem:[#allocation7 + $0xfcc] ss:$28 sps:$4 sm:$0xff]  }
 0x2db   :  { %v18847_v36 = vadd.f32 %v6612_v59, %v6504_v16  ;;  %7274 = vmatprep.mubr.bf16.mxu1 %v21764_v54  ;;  %7417 = vmatpush2.bf16.msra.mxu1 %v16864_v37  ;;  %v6506_v47 = vadd.f32 %v6505_v0, %v18735_v57  ;;  %v6614_v60 = vpop.f32.mrf.mxu1  ;;  %v16876_v53 = vld [vmem:[#allocation7 + $0x1380] ss:$28 sps:$4 sm:$0xff]  }
 0x2dc   :  { %v6507_v61 = vpop.f32.mrf.mxu0  ;;  %7418 = vmatprep.subr.bf16.mxu1 %v16872_v30  ;;  %v21765_v30 = vld [vmem:[#allocation71_spill] sm:$0xff] }
 0x2dd   :  { %v18851_v33 = vadd.f32 %v6614_v60, %v6506_v47  ;;  %v6508_v8 = vadd.f32 %v6507_v61, %v18738_v32  ;;  %v6616_v44 = vpop.f32.mrf.mxu1  ;;  %7310 = vmatpush2.bf16.msra.mxu0 %v16867_v2  ;;  %v16879_v47 = vld [vmem:[#allocation7 + $0xfc8] ss:$28 sps:$4 sm:$0xff]   ;;  %v21766_v61 = vld [vmem:[#allocation27_spill] sm:$0xff] }
 0x2de   :  { %v6509_v16 = vpop.f32.mrf.mxu0  ;;  %7311 = vmatprep.subr.bf16.mxu0 %v16875_v43  ;;  %v16884_v60 = vld [vmem:[#allocation7 + $0x134c] ss:$28 sps:$4 sm:$0xff]  }
 0x2df   :  { %v18854_v59 = vadd.f32 %v6616_v44, %v6508_v8  ;;  %7419 = vmatpush2.bf16.msra.mxu1 %v16870_v26  ;;  %v6510_v57 = vadd.f32 %v6509_v16, %v18741_v48  ;;  %v6618_v37 = vpop.f32.mrf.mxu1  ;;  %v16882_v44 = vld [vmem:[#allocation7 + $0x1348] ss:$28 sps:$4 sm:$0xff]   ;;  %v16887_v8 = vld [vmem:[#allocation7 + $0x19c] ss:$28 sps:$4 sm:$0xff]  }
 0x2e0   :  { %v6513_v0 = vpop.f32.mrf.mxu0  ;;  %7166 = vmatmul.mubr.bf16.gmra.mxu0 %v21765_v30  ;;  %7420 = vmatprep.subr.bf16.mxu1 %v16878_v22  ;;  %v21767_v26 = vld [vmem:[#allocation72_spill] sm:$0xff] }
 0x2e1   :  { %v18858_v54 = vadd.f32 %v6618_v37, %v6510_v57  ;;  %v6514_v32 = vadd.f32 %v6513_v0, %v18747_v62  ;;  %v6622_v2 = vpop.f32.mrf.mxu1  ;;  %7312 = vmatpush2.bf16.msra.mxu0 %v16873_v41  ;;  %7315 = vmatprep.mubr.bf16.mxu0 %v21766_v61  ;;  %v21768_v22 = vld [vmem:[#allocation28_spill] sm:$0xff]  ;;  %v16885_v62 = vld [vmem:[#allocation7 + $0x198] ss:$28 sps:$4 sm:$0xff]  }
 0x2e2   :  { %7275 = vmatmul.mubr.bf16.gmra.mxu1 %v21767_v26  ;;  %v6515_v48 = vpop.f32.mrf.mxu0  ;;  %7313 = vmatprep.subr.bf16.mxu0 %v16881_v49  ;;  %v16890_v41 = vld [vmem:[#allocation7 + $0x51c] ss:$28 sps:$4 sm:$0xff]   ;;  %v16893_v26 = vld [vmem:[#allocation7 + $0x164] ss:$28 sps:$4 sm:$0xff]  }
 0x2e3   :  { %v18863_v43 = vadd.f32 %v6622_v2, %v6514_v32  ;;  %7421 = vmatpush2.bf16.msra.mxu1 %v16876_v53  ;;  %7424 = vmatprep.mubr.bf16.mxu1 %v21768_v22  ;;  %v6516_v16 = vadd.f32 %v6515_v48, %v18751_v19  ;;  %v6624_v57 = vpop.f32.mrf.mxu1  ;;  %v21769_v32 = vld [vmem:[#allocation29_spill] sm:$0xff]  ;;  %v16891_v19 = vld [vmem:[#allocation7 + $0x160] ss:$28 sps:$4 sm:$0xff]  }
 0x2e4   :  { %v6517_v37 = vpop.f32.mrf.mxu0  ;;  %7422 = vmatprep.subr.bf16.mxu1 %v16884_v60  ;;  %v16896_v2 = vld [vmem:[#allocation7 + $0x4e4] ss:$28 sps:$4 sm:$0xff]  }
 0x2e5   :  { %v18867_v0 = vadd.f32 %v6624_v57, %v6516_v16  ;;  %v6626_v30 = vpop.f32.mrf.mxu1  ;;  %7314 = vmatpush2.bf16.msra.mxu0 %v16879_v47  ;;  %v21770_v60 = vld [vmem:[#allocation36_spill] sm:$0xff]  ;;  %v16899_v16 = vld [vmem:[#allocation7 + $0x12c] ss:$28 sps:$4 sm:$0xff]  }
 0x2e6   :  { %v6518_v35 = vpop.f32.mrf.mxu0  ;;  %7501 = vmatprep.subr.bf16.mxu0 %v16887_v8  ;;  %v16894_v48 = vld [vmem:[#allocation7 + $0x4e0] ss:$28 sps:$4 sm:$0xff]   ;;  %v21771_v30 = vld [vmem:[#allocation30_spill] sm:$0xff]  ;;  %v16897_v37 = vld [vmem:[#allocation7 + $0x128] ss:$28 sps:$4 sm:$0xff]  }
 0x2e7   :  { %7423 = vmatpush2.bf16.msra.mxu1 %v16882_v44  ;;  %v6627_v49 = vpop.f32.mrf.mxu1  ;;  %v21772_v35 = vld [vmem:[#allocation37_spill] sm:$0xff] }
 0x2e8   :  { %v6663_v53 = vpop.f32.mrf.mxu0  ;;  %7316 = vmatmul.mubr.bf16.vlgmr.msra.gmra.mxu0 %v21769_v32  ;;  %7610 = vmatprep.subr.bf16.mxu1 %v16890_v41  ;;  %v16902_v41 = vld [vmem:[#allocation7 + $0x4ac] ss:$28 sps:$4 sm:$0xff]  }
 0x2e9   :  { %7502 = vmatpush1.bf16.msra.mxu0 %v16885_v62  ;;  %7323 = vmatprep.mubr.bf16.mxu0 %v21770_v60  ;;  %v16900_v62 = vld [vmem:[#allocation7 + $0x4a8] ss:$28 sps:$4 sm:$0xff]   ;;  %v16905_v53 = vld [vmem:[#allocation7 + $0xf4] ss:$28 sps:$4 sm:$0xff]  }
 0x2ea   :  { %v6772_v57 = vpop.f32.mrf.mxu1  ;;  %7425 = vmatmul.mubr.bf16.vlgmr.msra.gmra.mxu1 %v21771_v30  ;;  %v6664_v47 = vpop.f32.mrf.mxu0  ;;  %7503 = vmatprep.subr.bf16.mxu0 %v16893_v26 }
 0x2eb   :  { %7432 = vmatprep.mubr.bf16.mxu1 %v21772_v35  ;;  %7611 = vmatpush1.bf16.msra.mxu1 %v16888_v31 }
 0x2ec   :  { %v6773_v44 = vpop.f32.mrf.mxu1  ;;  %v6665_v8 = vpop.f32.mrf.mxu0  ;;  %7612 = vmatprep.subr.bf16.mxu1 %v16896_v2  ;;  %v16908_v2 = vld [vmem:[#allocation7 + $0x474] ss:$28 sps:$4 sm:$0xff]  }
 0x2ed   :  { %v6666_v49 = vadd.f32 %v6665_v8, %v18758_v18  ;;  %7504 = vmatpush1.bf16.msra.mxu0 %v16891_v19  ;;  %v21774_v44 = vld [vmem:[#allocation35_spill] sm:$0xff]  ;;  %v21776_v19 = vld [vmem:[#allocation44_spill] sm:$0xff]  ;;  %v16903_v8 = vld [vmem:[#allocation7 + $0xf0] ss:$28 sps:$4 sm:$0xff]  }
 0x2ee   :  { %v6774_v23 = vpop.f32.mrf.mxu1  ;;  %v6667_v6 = vpop.f32.mrf.mxu0  ;;  %7505 = vmatprep.subr.bf16.mxu0 %v16899_v16  ;;  %v16911_v16 = vld [vmem:[#allocation7 + $0xbc] ss:$28 sps:$4 sm:$0xff]  }
 0x2ef   :  { %v18874_v57 = vadd.f32 %v6774_v23, %v6666_v49  ;;  %7613 = vmatpush1.bf16.msra.mxu1 %v16894_v48  ;;  %v6668_v26 = vadd.f32 %v6667_v6, %v18762_v55  ;;  %v21777_v49 = vld [vmem:[#allocation38_spill] sm:$0xff]  ;;  %v21779_v55 = vld [vmem:[#allocation45_spill] sm:$0xff] }
 0x2f0   :  { %v6776_v47 = vpop.f32.mrf.mxu1  ;;  %v6671_v31 = vpop.f32.mrf.mxu0  ;;  %7324 = vmatmul.mubr.bf16.gmra.mxu0 %v21774_v44  ;;  %7614 = vmatprep.subr.bf16.mxu1 %v16902_v41 }
 0x2f1   :  { %21773 = vst [vmem:[#allocation27_spill] sm:$0xff] %v18874_v57  ;;  %v18878_v12 = vadd.f32 %v6776_v47, %v6668_v26  ;;  %v6672_v18 = vadd.f32 %v6671_v31, %v18767_v46  ;;  %7506 = vmatpush1.bf16.msra.mxu0 %v16897_v37  ;;  %7333 = vmatprep.mubr.bf16.mxu0 %v21776_v19  ;;  %v16906_v26 = vld [vmem:[#allocation7 + $0x470] ss:$28 sps:$4 sm:$0xff]   ;;  %v16914_v37 = vld [vmem:[#allocation7 + $0x43c] ss:$28 sps:$4 sm:$0xff]  }
 0x2f2   :  { %v6780_v23 = vpop.f32.mrf.mxu1  ;;  %7433 = vmatmul.mubr.bf16.gmra.mxu1 %v21777_v49  ;;  %v6673_v48 = vpop.f32.mrf.mxu0  ;;  %7507 = vmatprep.subr.bf16.mxu0 %v16905_v53  ;;  %v16909_v57 = vld [vmem:[#allocation7 + $0xb8] ss:$28 sps:$4 sm:$0xff]  }
 0x2f3   :  { %21775 = vst [vmem:[#allocation28_spill] sm:$0xff] %v18878_v12  ;;  %v18883_v6 = vadd.f32 %v6780_v23, %v6672_v18  ;;  %7442 = vmatprep.mubr.bf16.mxu1 %v21779_v55  ;;  %7615 = vmatpush1.bf16.msra.mxu1 %v16900_v62  ;;  %v6674_v41 = vadd.f32 %v6673_v48, %v18771_v21  ;;  %v16912_v62 = vld [vmem:[#allocation7 + $0x438] ss:$28 sps:$4 sm:$0xff]  }
 0x2f4   :  { %v6782_v47 = vpop.f32.mrf.mxu1  ;;  %v6675_v46 = vpop.f32.mrf.mxu0  ;;  %7616 = vmatprep.subr.bf16.mxu1 %v16908_v2  ;;  %v21782_v2 = vld [vmem:[#allocation43_spill] sm:$0xff] }
 0x2f5   :  { %21778 = vst [vmem:[#allocation29_spill] sm:$0xff] %v18883_v6  ;;  %v18887_v31 = vadd.f32 %v6782_v47, %v6674_v41  ;;  %v6676_v12 = vadd.f32 %v6675_v46, %v18774_v39  ;;  %7508 = vmatpush1.bf16.msra.mxu0 %v16903_v8  ;;  %v16920_v41 = vld [vmem:[#allocation7 + $0x404] ss:$28 sps:$4 sm:$0xff]  }
 0x2f6   :  { %v6784_v53 = vpop.f32.mrf.mxu1  ;;  %v6677_v18 = vpop.f32.mrf.mxu0  ;;  %7509 = vmatprep.subr.bf16.mxu0 %v16911_v16  ;;  %v21784_v8 = vld [vmem:[#allocation52_spill] sm:$0xff] }
 0x2f7   :  { %21780 = vst [vmem:[#allocation36_spill] sm:$0xff] %v18887_v31  ;;  %v18890_v23 = vadd.f32 %v6784_v53, %v6676_v12  ;;  %7617 = vmatpush1.bf16.msra.mxu1 %v16906_v26  ;;  %v6678_v21 = vadd.f32 %v6677_v18, %v18778_v58  ;;  %v16915_v16 = vld [vmem:[#allocation7 + $0x80] ss:$28 sps:$4 sm:$0xff]   ;;  %v16923_v12 = vld [vmem:[#allocation7 + $0x4c] ss:$28 sps:$4 sm:$0xff]  }
 0x2f8   :  { %v6786_v48 = vpop.f32.mrf.mxu1  ;;  %v6681_v6 = vpop.f32.mrf.mxu0  ;;  %7334 = vmatmul.mubr.bf16.gmra.mxu0 %v21782_v2  ;;  %7618 = vmatprep.subr.bf16.mxu1 %v16914_v37  ;;  %v21785_v26 = vld [vmem:[#allocation46_spill] sm:$0xff]  ;;  %v21787_v18 = vld [vmem:[#allocation53_spill] sm:$0xff] }
 0x2f9   :  { %21781 = vst [vmem:[#allocation30_spill] sm:$0xff] %v18890_v23  ;;  %v18894_v47 = vadd.f32 %v6786_v48, %v6678_v21  ;;  %v6682_v39 = vadd.f32 %v6681_v6, %v18783_v7  ;;  %7510 = vmatpush1.bf16.msra.mxu0 %v16909_v57  ;;  %7343 = vmatprep.mubr.bf16.mxu0 %v21784_v8  ;;  %v16918_v21 = vld [vmem:[#allocation7 + $0x400] ss:$28 sps:$4 sm:$0xff]   ;;  %v16926_v57 = vld [vmem:[#allocation7 + $0x3cc] ss:$28 sps:$4 sm:$0xff]  }
 0x2fa   :  { %v6790_v46 = vpop.f32.mrf.mxu1  ;;  %7443 = vmatmul.mubr.bf16.gmra.mxu1 %v21785_v26  ;;  %v6683_v58 = vpop.f32.mrf.mxu0  ;;  %7511 = vmatprep.subr.bf16.mxu0 %v16917_v3  ;;  %v16921_v23 = vld [vmem:[#allocation7 + $0x48] ss:$28 sps:$4 sm:$0xff]  }
 0x2fb   :  { %21783 = vst [vmem:[#allocation37_spill] sm:$0xff] %v18894_v47  ;;  %v18899_v53 = vadd.f32 %v6790_v46, %v6682_v39  ;;  %7452 = vmatprep.mubr.bf16.mxu1 %v21787_v18  ;;  %7619 = vmatpush1.bf16.msra.mxu1 %v16912_v62  ;;  %v6684_v37 = vadd.f32 %v6683_v58, %v18787_v27  ;;  %v16929_v47 = vld [vmem:[#allocation7 + $0x14] ss:$28 sps:$4 sm:$0xff]   ;;  %v16924_v62 = vld [vmem:[#allocation7 + $0x3c8] ss:$28 sps:$4 sm:$0xff]  }
 0x2fc   :  { %v6792_v48 = vpop.f32.mrf.mxu1  ;;  %v6685_v7 = vpop.f32.mrf.mxu0  ;;  %7620 = vmatprep.subr.bf16.mxu1 %v16920_v41  ;;  %v21790_v41 = vld [vmem:[#allocation51_spill] sm:$0xff] }
 0x2fd   :  { %21786 = vst [vmem:[#allocation35_spill] sm:$0xff] %v18899_v53  ;;  %v18903_v6 = vadd.f32 %v6792_v48, %v6684_v37  ;;  %v6686_v31 = vadd.f32 %v6685_v7, %v18790_v24  ;;  %7512 = vmatpush1.bf16.msra.mxu0 %v16915_v16  ;;  %v16932_v37 = vld [vmem:[#allocation7 + $0x394] ss:$28 sps:$4 sm:$0xff]   ;;  %v21792_v16 = vld [vmem:[#allocation60_spill] sm:$0xff] }
 0x2fe   :  { %v6794_v3 = vpop.f32.mrf.mxu1  ;;  %v6687_v39 = vpop.f32.mrf.mxu0  ;;  %7513 = vmatprep.subr.bf16.mxu0 %v16923_v12  ;;  %v16927_v12 = vld [vmem:[#allocation7 + $0x10] ss:$28 sps:$4 sm:$0xff]  }
 0x2ff   :  { %21788 = vst [vmem:[#allocation43_spill] sm:$0xff] %v18903_v6  ;;  %v18906_v46 = vadd.f32 %v6794_v3, %v6686_v31  ;;  %7621 = vmatpush1.bf16.msra.mxu1 %v16918_v21  ;;  %v6688_v27 = vadd.f32 %v6687_v39, %v18794_v38  ;;  %v16935_v31 = vld [vmem:[#allocation7 + $0x35c] ss:$28 sps:$4 sm:$0xff]   ;;  %v21793_v21 = vld [vmem:[#allocation54_spill] sm:$0xff]  ;;  %v21795_v39 = vld [vmem:[#allocation61_spill] sm:$0xff] }
 0x300   :  { %v6796_v58 = vpop.f32.mrf.mxu1  ;;  %v6691_v53 = vpop.f32.mrf.mxu0  ;;  %7344 = vmatmul.mubr.bf16.gmra.mxu0 %v21790_v41  ;;  %7622 = vmatprep.subr.bf16.mxu1 %v16926_v57  ;;  %v16941_v6 = vld [vmem:[#allocation7 + $0x324] ss:$28 sps:$4 sm:$0xff]  }
 0x301   :  { %21789 = vst [vmem:[#allocation83_spill] sm:$0xff] %v18906_v46  ;;  %v18910_v48 = vadd.f32 %v6796_v58, %v6688_v27  ;;  %v6692_v24 = vadd.f32 %v6691_v53, %v18799_v45  ;;  %7514 = vmatpush1.bf16.msra.mxu0 %v16921_v23  ;;  %7353 = vmatprep.mubr.bf16.mxu0 %v21792_v16  ;;  %v16930_v27 = vld [vmem:[#allocation7 + $0x390] ss:$28 sps:$4 sm:$0xff]   ;;  %v16938_v23 = vld [vmem:[#allocation7 + $0x6dc] ss:$28 sps:$4 sm:$0xff]  }
 0x302   :  { %v6800_v7 = vpop.f32.mrf.mxu1  ;;  %7453 = vmatmul.mubr.bf16.gmra.mxu1 %v21793_v21  ;;  %v6693_v38 = vpop.f32.mrf.mxu0  ;;  %7515 = vmatprep.subr.bf16.mxu0 %v16929_v47 }
 0x303   :  { %21791 = vst [vmem:[#allocation84_spill] sm:$0xff] %v18910_v48  ;;  %v18915_v3 = vadd.f32 %v6800_v7, %v6692_v24  ;;  %7462 = vmatprep.mubr.bf16.mxu1 %v21795_v39  ;;  %7623 = vmatpush1.bf16.msra.mxu1 %v16924_v62  ;;  %v6694_v57 = vadd.f32 %v6693_v38, %v18803_v1  ;;  %v16933_v48 = vld [vmem:[#allocation7 + $0x358] ss:$28 sps:$4 sm:$0xff]  }
 0x304   :  { %v6802_v58 = vpop.f32.mrf.mxu1  ;;  %v6695_v45 = vpop.f32.mrf.mxu0  ;;  %7624 = vmatprep.subr.bf16.mxu1 %v16932_v37  ;;  %v16936_v62 = vld [vmem:[#allocation7 + $0x6d8] ss:$28 sps:$4 sm:$0xff]  }
 0x305   :  { %21794 = vst [vmem:[#allocation85_spill] sm:$0xff] %v18915_v3  ;;  %v18919_v53 = vadd.f32 %v6802_v58, %v6694_v57  ;;  %v6696_v46 = vadd.f32 %v6695_v45, %v18806_v56  ;;  %7516 = vmatpush1.bf16.msra.mxu0 %v16927_v12  ;;  %v21798_v37 = vld [vmem:[#allocation59_spill] sm:$0xff]  ;;  %v16944_v57 = vld [vmem:[#allocation7 + $0x6a4] ss:$28 sps:$4 sm:$0xff]  }
 0x306   :  { %v6804_v47 = vpop.f32.mrf.mxu1  ;;  %v6697_v24 = vpop.f32.mrf.mxu0  ;;  %7517 = vmatprep.subr.bf16.mxu0 %v16935_v31  ;;  %v21800_v12 = vld [vmem:[#allocation68_spill] sm:$0xff] }
 0x307   :  { %21796 = vst [vmem:[#allocation86_spill] sm:$0xff] %v18919_v53  ;;  %v18922_v7 = vadd.f32 %v6804_v47, %v6696_v46  ;;  %7625 = vmatpush1.bf16.msra.mxu1 %v16930_v27  ;;  %v6698_v1 = vadd.f32 %v6697_v24, %v18810_v10  ;;  %v16939_v31 = vld [vmem:[#allocation7 + $0x320] ss:$28 sps:$4 sm:$0xff]   ;;  %v16947_v46 = vld [vmem:[#allocation7 + $0x2ec] ss:$28 sps:$4 sm:$0xff]  }
 0x308   :  { %v6806_v38 = vpop.f32.mrf.mxu1  ;;  %v6701_v3 = vpop.f32.mrf.mxu0  ;;  %7354 = vmatmul.mubr.bf16.gmra.mxu0 %v21798_v37  ;;  %7626 = vmatprep.subr.bf16.mxu1 %v16938_v23  ;;  %v21801_v27 = vld [vmem:[#allocation62_spill] sm:$0xff]  ;;  %v21803_v24 = vld [vmem:[#allocation69_spill] sm:$0xff] }
 0x309   :  { %21797 = vst [vmem:[#allocation87_spill] sm:$0xff] %v18922_v7  ;;  %v18926_v58 = vadd.f32 %v6806_v38, %v6698_v1  ;;  %v6702_v56 = vadd.f32 %v6701_v3, %v18815_v63  ;;  %7518 = vmatpush2.bf16.msra.mxu0 %v16933_v48  ;;  %7363 = vmatprep.mubr.bf16.mxu0 %v21800_v12  ;;  %v16942_v1 = vld [vmem:[#allocation7 + $0x6a0] ss:$28 sps:$4 sm:$0xff]   ;;  %v16950_v48 = vld [vmem:[#allocation7 + $0x66c] ss:$28 sps:$4 sm:$0xff]  }
 0x30a   :  { %v6810_v45 = vpop.f32.mrf.mxu1  ;;  %7463 = vmatmul.mubr.bf16.gmra.mxu1 %v21801_v27  ;;  %v6703_v10 = vpop.f32.mrf.mxu0  ;;  %7519 = vmatprep.subr.bf16.mxu0 %v16941_v6  ;;  %v16945_v7 = vld [vmem:[#allocation7 + $0x2e8] ss:$28 sps:$4 sm:$0xff]   ;;  %v16953_v53 = vld [vmem:[#allocation7 + $0x2b4] ss:$28 sps:$4 sm:$0xff]  }
 0x30b   :  { %21799 = vst [vmem:[#allocation88_spill] sm:$0xff] %v18926_v58  ;;  %v18931_v47 = vadd.f32 %v6810_v45, %v6702_v56  ;;  %7472 = vmatprep.mubr.bf16.mxu1 %v21803_v24  ;;  %7627 = vmatpush2.bf16.msra.mxu1 %v16936_v62  ;;  %v6704_v23 = vadd.f32 %v6703_v10, %v18819_v9  ;;  %v16948_v62 = vld [vmem:[#allocation7 + $0x668] ss:$28 sps:$4 sm:$0xff]  }
 0x30c   :  { %v6812_v38 = vpop.f32.mrf.mxu1  ;;  %v6705_v63 = vpop.f32.mrf.mxu0  ;;  %7628 = vmatprep.subr.bf16.mxu1 %v16944_v57  ;;  %v16956_v57 = vld [vmem:[#allocation7 + $0x634] ss:$28 sps:$4 sm:$0xff]  }
 0x30d   :  { %21802 = vst [vmem:[#allocation89_spill] sm:$0xff] %v18931_v47  ;;  %v18935_v3 = vadd.f32 %v6812_v38, %v6704_v23  ;;  %v6706_v58 = vadd.f32 %v6705_v63, %v18822_v42  ;;  %7520 = vmatpush2.bf16.msra.mxu0 %v16939_v31  ;;  %v21807_v31 = vld [vmem:[#allocation79_spill] sm:$0xff] }
 0x30e   :  { %v6814_v6 = vpop.f32.mrf.mxu1  ;;  %v6707_v56 = vpop.f32.mrf.mxu0  ;;  %7521 = vmatprep.subr.bf16.mxu0 %v16947_v46  ;;  %v16951_v46 = vld [vmem:[#allocation7 + $0x2b0] ss:$28 sps:$4 sm:$0xff]  }
 0x30f   :  { %21804 = vst [vmem:[#allocation90_spill] sm:$0xff] %v18935_v3  ;;  %v18938_v45 = vadd.f32 %v6814_v6, %v6706_v58  ;;  %7629 = vmatpush2.bf16.msra.mxu1 %v16942_v1  ;;  %v6708_v9 = vadd.f32 %v6707_v56, %v18826_v20  ;;  %v16959_v58 = vld [vmem:[#allocation7 + $0x27c] ss:$28 sps:$4 sm:$0xff]   ;;  %v21808_v1 = vld [vmem:[#allocation70_spill] sm:$0xff] }
 0x310   :  { %v6816_v10 = vpop.f32.mrf.mxu1  ;;  %v6711_v47 = vpop.f32.mrf.mxu0  ;;  %7364 = vmatmul.mubr.bf16.gmra.mxu0 %v18482_v52  ;;  %7630 = vmatprep.subr.bf16.mxu1 %v16950_v48  ;;  %v21810_v6 = vld [vmem:[#allocation80_spill] sm:$0xff]  ;;  %v16954_v56 = vld [vmem:[#allocation7 + $0x630] ss:$28 sps:$4 sm:$0xff]  }
 0x311   :  { %21805 = vst [vmem:[#allocation91_spill] sm:$0xff] %v18938_v45  ;;  %v18942_v23 = vadd.f32 %v6816_v10, %v6708_v9  ;;  %v6712_v42 = vadd.f32 %v6711_v47, %v18831_v4  ;;  %7522 = vmatpush2.bf16.msra.mxu0 %v16945_v7  ;;  %7373 = vmatprep.mubr.bf16.mxu0 %v21807_v31  ;;  %v16962_v7 = vld [vmem:[#allocation7 + $0x5fc] ss:$28 sps:$4 sm:$0xff]  }
 0x312   :  { %v6820_v38 = vpop.f32.mrf.mxu1  ;;  %7473 = vmatmul.mubr.bf16.gmra.mxu1 %v21808_v1  ;;  %v6713_v20 = vpop.f32.mrf.mxu0  ;;  %7523 = vmatprep.subr.bf16.mxu0 %v16953_v53  ;;  %v16957_v45 = vld [vmem:[#allocation7 + $0x278] ss:$28 sps:$4 sm:$0xff]  }
 0x313   :  { %21806 = vst [vmem:[#allocation92_spill] sm:$0xff] %v18942_v23  ;;  %v18947_v63 = vadd.f32 %v6820_v38, %v6712_v42  ;;  %7482 = vmatprep.mubr.bf16.mxu1 %v21810_v6  ;;  %7631 = vmatpush2.bf16.msra.mxu1 %v16948_v62  ;;  %v6714_v48 = vadd.f32 %v6713_v20, %v18835_v13  ;;  %v16965_v23 = vld [vmem:[#allocation7 + $0x244] ss:$28 sps:$4 sm:$0xff]   ;;  %v16960_v62 = vld [vmem:[#allocation7 + $0x5f8] ss:$28 sps:$4 sm:$0xff]  }
 0x314   :  { %v6822_v9 = vpop.f32.mrf.mxu1  ;;  %v6715_v4 = vpop.f32.mrf.mxu0  ;;  %7632 = vmatprep.subr.bf16.mxu1 %v16956_v57  ;;  %v21813_v57 = vld [vmem:[#allocation81_spill] sm:$0xff] }
 0x315   :  { %21809 = vst [vmem:[#allocation93_spill] sm:$0xff] %v18947_v63  ;;  %v18951_v47 = vadd.f32 %v6822_v9, %v6714_v48  ;;  %v6716_v10 = vadd.f32 %v6715_v4, %v18838_v51  ;;  %7524 = vmatpush2.bf16.msra.mxu0 %v16951_v46  ;;  %v16968_v48 = vld [vmem:[#allocation7 + $0x5c4] ss:$28 sps:$4 sm:$0xff]   ;;  %v16971_v4 = vld [vmem:[#allocation7 + $0x20c] ss:$28 sps:$4 sm:$0xff]  }
 0x316   :  { %v6824_v53 = vpop.f32.mrf.mxu1  ;;  %v6717_v42 = vpop.f32.mrf.mxu0  ;;  %7525 = vmatprep.subr.bf16.mxu0 %v16959_v58  ;;  %v21815_v46 = vld [vmem:[#allocation77_spill] sm:$0xff]  ;;  %v16963_v58 = vld [vmem:[#allocation7 + $0x240] ss:$28 sps:$4 sm:$0xff]  }
 0x317   :  { %21811 = vst [vmem:[#allocation94_spill] sm:$0xff] %v18951_v47  ;;  %v18954_v38 = vadd.f32 %v6824_v53, %v6716_v10  ;;  %7633 = vmatpush2.bf16.msra.mxu1 %v16954_v56  ;;  %v6718_v13 = vadd.f32 %v6717_v42, %v18842_v50  ;;  %v21816_v10 = vld [vmem:[#allocation82_spill] sm:$0xff] }
 0x318   :  { %v6826_v20 = vpop.f32.mrf.mxu1  ;;  %v6721_v63 = vpop.f32.mrf.mxu0  ;;  %7374 = vmatmul.mubr.bf16.gmra.mxu0 %v21813_v57  ;;  %7634 = vmatprep.subr.bf16.mxu1 %v16962_v7  ;;  %v21818_v42 = vld [vmem:[#allocation78_spill] sm:$0xff] }
 0x319   :  { %21812 = vst [vmem:[#allocation95_spill] sm:$0xff] %v18954_v38  ;;  %v18958_v9 = vadd.f32 %v6826_v20, %v6718_v13  ;;  %v6722_v51 = vadd.f32 %v6721_v63, %v18847_v36  ;;  %7526 = vmatpush2.bf16.msra.mxu0 %v16957_v45  ;;  %15024 = vmatprep.mubr.msk.bf16.mxu0 %vm901_vm3, %v21815_v46  ;;  %v16966_v36 = vld [vmem:[#allocation7 + $0x5c0] ss:$28 sps:$4 sm:$0xff]   ;;  %v16974_v13 = vld [vmem:[#allocation7 + $0x58c] ss:$28 sps:$4 sm:$0xff]  }
 0x31a   :  { %v6830_v56 = vpop.f32.mrf.mxu1  ;;  %7483 = vmatmul.mubr.bf16.gmra.mxu1 %v21816_v10  ;;  %v6723_v50 = vpop.f32.mrf.mxu0  ;;  %7527 = vmatprep.subr.bf16.mxu0 %v16965_v23  ;;  %v16969_v38 = vld [vmem:[#allocation7 + $0x208] ss:$28 sps:$4 sm:$0xff]   ;;  %v16977_v23 = vld [vmem:[#allocation7 + $0x1d4] ss:$28 sps:$4 sm:$0xff]  }
 0x31b   :  { %21814 = vst [vmem:[#allocation96_spill] sm:$0xff] %v18958_v9  ;;  %v18964_v53 = vadd.f32 %v6830_v56, %v6722_v51  ;;  %15026 = vmatprep.mubr.msk.bf16.mxu1 %vm901_vm3, %v21818_v42  ;;  %7635 = vmatpush2.bf16.msra.mxu1 %v16960_v62  ;;  %v6724_v7 = vadd.f32 %v6723_v50, %v18851_v33  ;;  %v16972_v62 = vld [vmem:[#allocation7 + $0x588] ss:$28 sps:$4 sm:$0xff]  }
 0x31c   :  { %v6832_v45 = vpop.f32.mrf.mxu1  ;;  %v6725_v63 = vpop.f32.mrf.mxu0  ;;  %7636 = vmatprep.subr.bf16.mxu1 %v16968_v48  ;;  %v21821_v48 = vld [vmem:[#allocation75_spill] sm:$0xff] }
 0x31d   :  { %21817 = vst [vmem:[#allocation97_spill] sm:$0xff] %v18964_v53  ;;  %v18969_v20 = vadd.f32 %v6832_v45, %v6724_v7  ;;  %v6726_v9 = vadd.f32 %v6725_v63, %v18854_v59  ;;  %7528 = vmatpush2.bf16.msra.mxu0 %v16963_v58  ;;  %v16980_v7 = vld [vmem:[#allocation7 + $0x554] ss:$28 sps:$4 sm:$0xff]   ;;  %v21823_v45 = vld [vmem:[#allocation21_spill] sm:$0xff]  ;;  %v21825_v63 = vld [vmem:[#allocation76_spill] sm:$0xff] }
 0x31e   :  { %v6834_v51 = vpop.f32.mrf.mxu1  ;;  %v6727_v56 = vpop.f32.mrf.mxu0  ;;  %7529 = vmatprep.subr.bf16.mxu0 %v16971_v4  ;;  %v17008_v4 = vld [vmem:[#allocation7 + $0xb38] ss:$28 sps:$4 sm:$0xff]  }
 0x31f   :  { %21819 = vst [vmem:[#allocation98_spill] sm:$0xff] %v18969_v20  ;;  %v18972_v53 = vadd.f32 %v6834_v51, %v6726_v9  ;;  %7637 = vmatpush2.bf16.msra.mxu1 %v16966_v36  ;;  %v6728_v33 = vadd.f32 %v6727_v56, %v18858_v54  ;;  %v16975_v9 = vld [vmem:[#allocation7 + $0x1d0] ss:$28 sps:$4 sm:$0xff]   ;;  %v16983_v36 = vld [vmem:[#allocation7 + $0x89c] ss:$28 sps:$4 sm:$0xff]  }
 0x320   :  { %v6836_v50 = vpop.f32.mrf.mxu1  ;;  %v6731_v47 = vpop.f32.mrf.mxu0  ;;  %15025 = vmatmul.mubr.msk.bf16.gmra.mxu0 %vm901_vm3, %v21821_v48  ;;  %7638 = vmatprep.subr.bf16.mxu1 %v16974_v13  ;;  %v21827_v13 = vld [vmem:[#allocation22_spill] sm:$0xff]  ;;  %v16984_v20 = vld [vmem:[#allocation7 + $0xc18] ss:$28 sps:$4 sm:$0xff]  }
 0x321   :  { %21820 = vst [vmem:[#allocation99_spill] sm:$0xff] %v18972_v53  ;;  %v18977_v59 = vadd.f32 %v6836_v50, %v6728_v33  ;;  %v6732_v58 = vadd.f32 %v6731_v47, %v18863_v43  ;;  %7530 = vmatpush2.bf16.msra.mxu0 %v16969_v38  ;;  %15029 = vmatprep.mubr.msk.bf16.mxu0 %vm18169_vm4, %v21823_v45  ;;  %v16978_v47 = vld [vmem:[#allocation7 + $0x550] ss:$28 sps:$4 sm:$0xff]   ;;  %v16986_v50 = vld [vmem:[#allocation7 + $0xc1c] ss:$28 sps:$4 sm:$0xff]  }
 0x322   :  { %v6840_v54 = vpop.f32.mrf.mxu1  ;;  %15027 = vmatmul.mubr.msk.bf16.gmra.mxu1 %vm901_vm3, %v21825_v63  ;;  %v6733_v51 = vpop.f32.mrf.mxu0  ;;  %7531 = vmatprep.subr.bf16.mxu0 %v16977_v23  ;;  %v16989_v23 = vld [vmem:[#allocation7 + $0x864] ss:$28 sps:$4 sm:$0xff]  }
 0x323   :  { %21822 = vst [vmem:[#allocation100_spill] sm:$0xff] %v18977_v59  ;;  %v18985_v56 = vadd.f32 %v6840_v54, %v6732_v58  ;;  %7639 = vmatpush2.bf16.msra.mxu1 %v16972_v62  ;;  %15033 = vmatprep.mubr.msk.bf16.mxu1 %vm18169_vm4, %v21827_v13  ;;  %v6734_v43 = vadd.f32 %v6733_v51, %v18867_v0  ;;  %v16981_v59 = vld [vmem:[#allocation7 + $0x898] ss:$28 sps:$4 sm:$0xff]   ;;  %v16987_v62 = vld [vmem:[#allocation7 + $0x860] ss:$28 sps:$4 sm:$0xff]   ;;  %v21830_v51 = vld [vmem:[#allocation18_spill] sm:$0xff] }
 0x324   :  { %v6842_v38 = vpop.f32.mrf.mxu1  ;;  %v6735_v33 = vpop.f32.mrf.mxu0  ;;  %7640 = vmatprep.subr.bf16.mxu1 %v16980_v7  ;;  %v21829_v0 = vld [vmem:[#allocation23_spill] sm:$0xff]  ;;  %v16995_v7 = vld [vmem:[#allocation7 + $0x82c] ss:$28 sps:$4 sm:$0xff]   ;;  %v17013_v45 = vld [vmem:[#allocation7 + $0x784] ss:$28 sps:$4 sm:$0xff]  }
 0x325   :  { %21826 = vst [vmem:[#allocation101_spill] sm:$0xff] %v18985_v56  ;;  %v18991_v53 = vadd.f32 %v6842_v38, %v6734_v43  ;;  %7532 = vmatpush2.bf16.msra.mxu0 %v16975_v9  ;;  %v16992_v56 = vld [vmem:[#allocation7 + $0xbe4] ss:$28 sps:$4 sm:$0xff]   ;;  %v21831_v43 = vsub.s32 2, %v21830_v51 }
 0x326   :  { %v6844_v58 = vpop.f32.mrf.mxu1  ;;  %v6736_v54 = vpop.f32.mrf.mxu0  ;;  %7719 = vmatprep.subr.bf16.mxu0 %v16983_v36  ;;  %v17647_v9 = vld [vmem:[#allocation8] sm:$0xff] }
 0x327   :  { %21828 = vst [vmem:[#allocation102_spill] sm:$0xff] %v18991_v53  ;;  %7641 = vmatpush2.bf16.msra.mxu1 %v16978_v47  ;;  %v18999_v38 = vrot.slane %v17647_v9, %v21831_v43  ;;  %v16990_v36 = vld [vmem:[#allocation7 + $0xbe0] ss:$28 sps:$4 sm:$0xff]   ;;  %v16993_v58 = vld [vmem:[#allocation7 + $0x828] ss:$28 sps:$4 sm:$0xff]  }
 0x328   :  { %v6845_v3 = vpop.f32.mrf.mxu1  ;;  %v6881_v13 = vpop.f32.mrf.mxu0  ;;  %15031 = vmatmul.mubr.msk.bf16.vlgmr.msra.gmra.mxu0 %vm18169_vm4, %v21829_v0  ;;  %7828 = vmatprep.subr.bf16.mxu1 %v16986_v50  ;;  %v21832_v33 = vld [vmem:[#allocation24_spill] sm:$0xff]  ;;  %v17001_v53 = vld [vmem:[#allocation7 + $0x7f4] ss:$28 sps:$4 sm:$0xff]   ;;  %v16996_v0 = vld [vmem:[#allocation7 + $0xba8] ss:$28 sps:$4 sm:$0xff]  }
 0x329   :  { %7720 = vmatpush1.bf16.msra.mxu0 %v16981_v59  ;;  %7541 = vmatprep.mubr.bf16.mxu0 %v21766_v61  ;;  %v16998_v13 = vld [vmem:[#allocation7 + $0xbac] ss:$28 sps:$4 sm:$0xff]   ;;  %v21833_v59 = vsub.s32 3, %v21830_v51 }
 0x32a   :  { %v6990_v47 = vpop.f32.mrf.mxu1  ;;  %15035 = vmatmul.mubr.msk.bf16.vlgmr.msra.gmra.mxu1 %vm18169_vm4, %v21832_v33  ;;  %v6882_v3 = vpop.f32.mrf.mxu0  ;;  %7721 = vmatprep.subr.bf16.mxu0 %v16989_v23  ;;  %v17004_v23 = vld [vmem:[#allocation7 + $0xb74] ss:$28 sps:$4 sm:$0xff]  }
 0x32b   :  { %7650 = vmatprep.mubr.bf16.mxu1 %v21768_v22  ;;  %7829 = vmatpush1.bf16.msra.mxu1 %v16984_v20  ;;  %v19007_v50 = vrot.slane %v17647_v9, %v21833_v59  ;;  %v16999_v9 = vld [vmem:[#allocation7 + $0x7f0] ss:$28 sps:$4 sm:$0xff]  }
 0x32c   :  { %v6991_v54 = vpop.f32.mrf.mxu1  ;;  %v6883_v43 = vpop.f32.mrf.mxu0  ;;  %7830 = vmatprep.subr.bf16.mxu1 %v16992_v56  ;;  %v17007_v56 = vld [vmem:[#allocation7 + $0x7bc] ss:$28 sps:$4 sm:$0xff]  }
 0x32d   :  { %v6884_v47 = vadd.f32 %v6883_v43, %v18999_v38  ;;  %7722 = vmatpush1.bf16.msra.mxu0 %v16987_v62  ;;  %v17010_v43 = vld [vmem:[#allocation7 + $0xb3c] ss:$28 sps:$4 sm:$0xff]  }
 0x32e   :  { %v6992_v33 = vpop.f32.mrf.mxu1  ;;  %v6885_v3 = vpop.f32.mrf.mxu0  ;;  %7723 = vmatprep.subr.bf16.mxu0 %v16995_v7  ;;  %v17002_v7 = vld [vmem:[#allocation7 + $0xb70] ss:$28 sps:$4 sm:$0xff]  }
 0x32f   :  { %v19010_v63 = vadd.f32 %v6992_v33, %v6884_v47  ;;  %7831 = vmatpush1.bf16.msra.mxu1 %v16990_v36  ;;  %v6886_v20 = vadd.f32 %v6885_v3, %v19007_v50  ;;  %v17005_v3 = vld [vmem:[#allocation7 + $0x7b8] ss:$28 sps:$4 sm:$0xff]  }
 0x330   :  { %v6994_v59 = vpop.f32.mrf.mxu1  ;;  %v6889_v51 = vpop.f32.mrf.mxu0  ;;  %7542 = vmatmul.mubr.bf16.gmra.mxu0 %v21769_v32  ;;  %7832 = vmatprep.subr.bf16.mxu1 %v16998_v13 }
 0x331   :  { %v19014_v54 = vadd.f32 %v6994_v59, %v6886_v20  ;;  %v6890_v62 = vadd.f32 %v6889_v51, %v18999_v38  ;;  %7724 = vmatpush1.bf16.msra.mxu0 %v16993_v58  ;;  %7551 = vmatprep.mubr.bf16.mxu0 %v21770_v60 }
 0x332   :  { %v6998_v33 = vpop.f32.mrf.mxu1  ;;  %7651 = vmatmul.mubr.bf16.gmra.mxu1 %v21771_v30  ;;  %v6891_v36 = vpop.f32.mrf.mxu0  ;;  %7725 = vmatprep.subr.bf16.mxu0 %v17001_v53 }
 0x333   :  { %v19019_v47 = vadd.f32 %v6998_v33, %v6890_v62  ;;  %7660 = vmatprep.mubr.bf16.mxu1 %v21772_v35  ;;  %7833 = vmatpush1.bf16.msra.mxu1 %v16996_v0  ;;  %v6892_v13 = vadd.f32 %v6891_v36, %v19007_v50  ;;  %v17016_v62 = vld [vmem:[#allocation7 + $0xb04] ss:$28 sps:$4 sm:$0xff]  }
 0x334   :  { %v7000_v20 = vpop.f32.mrf.mxu1  ;;  %v6893_v51 = vpop.f32.mrf.mxu0  ;;  %7834 = vmatprep.subr.bf16.mxu1 %v17004_v23  ;;  %v17011_v36 = vld [vmem:[#allocation7 + $0x780] ss:$28 sps:$4 sm:$0xff]   ;;  %v17019_v23 = vld [vmem:[#allocation7 + $0x74c] ss:$28 sps:$4 sm:$0xff]  }
 0x335   :  { %v19023_v58 = vadd.f32 %v7000_v20, %v6892_v13  ;;  %v6894_v59 = vadd.f32 %v6893_v51, %v18999_v38  ;;  %7726 = vmatpush1.bf16.msra.mxu0 %v16999_v9 }
 0x336   :  { %v7002_v53 = vpop.f32.mrf.mxu1  ;;  %v6895_v48 = vpop.f32.mrf.mxu0  ;;  %7727 = vmatprep.subr.bf16.mxu0 %v17007_v56  ;;  %v17014_v56 = vld [vmem:[#allocation7 + $0xb00] ss:$28 sps:$4 sm:$0xff]  }
 0x337   :  { %v19026_v33 = vadd.f32 %v7002_v53, %v6894_v59  ;;  %7835 = vmatpush1.bf16.msra.mxu1 %v17002_v7  ;;  %v6896_v0 = vadd.f32 %v6895_v48, %v19007_v50  ;;  %v17022_v48 = vld [vmem:[#allocation7 + $0xacc] ss:$28 sps:$4 sm:$0xff]  }
 0x338   :  { %v7004_v42 = vpop.f32.mrf.mxu1  ;;  %v6899_v46 = vpop.f32.mrf.mxu0  ;;  %7552 = vmatmul.mubr.bf16.gmra.mxu0 %v21774_v44  ;;  %7836 = vmatprep.subr.bf16.mxu1 %v17010_v43  ;;  %v17017_v43 = vld [vmem:[#allocation7 + $0x748] ss:$28 sps:$4 sm:$0xff]  }
 0x339   :  { %v19030_v13 = vadd.f32 %v7004_v42, %v6896_v0  ;;  %v6900_v9 = vadd.f32 %v6899_v46, %v18999_v38  ;;  %7728 = vmatpush1.bf16.msra.mxu0 %v17005_v3  ;;  %7561 = vmatprep.mubr.bf16.mxu0 %v21776_v19  ;;  %v17020_v0 = vld [vmem:[#allocation7 + $0xac8] ss:$28 sps:$4 sm:$0xff]  }
 0x33a   :  { %v7008_v20 = vpop.f32.mrf.mxu1  ;;  %7661 = vmatmul.mubr.bf16.gmra.mxu1 %v21777_v49  ;;  %v6901_v7 = vpop.f32.mrf.mxu0  ;;  %7729 = vmatprep.subr.bf16.mxu0 %v17013_v45  ;;  %v17025_v49 = vld [vmem:[#allocation7 + $0x714] ss:$28 sps:$4 sm:$0xff]  }
 0x33b   :  { %v19035_v51 = vadd.f32 %v7008_v20, %v6900_v9  ;;  %7670 = vmatprep.mubr.bf16.mxu1 %v21779_v55  ;;  %7837 = vmatpush1.bf16.msra.mxu1 %v17008_v4  ;;  %v6902_v42 = vadd.f32 %v6901_v7, %v19007_v50  ;;  %v17028_v20 = vld [vmem:[#allocation7 + $0xa94] ss:$28 sps:$4 sm:$0xff]  }
 0x33c   :  { %v7010_v59 = vpop.f32.mrf.mxu1  ;;  %v6903_v46 = vpop.f32.mrf.mxu0  ;;  %7838 = vmatprep.subr.bf16.mxu1 %v17016_v62 }
 0x33d   :  { %v19039_v3 = vadd.f32 %v7010_v59, %v6902_v42  ;;  %v6904_v53 = vadd.f32 %v6903_v46, %v18999_v38  ;;  %7730 = vmatpush1.bf16.msra.mxu0 %v17011_v36  ;;  %v17023_v42 = vld [vmem:[#allocation7 + $0x710] ss:$28 sps:$4 sm:$0xff]  }
 0x33e   :  { %v7012_v45 = vpop.f32.mrf.mxu1  ;;  %v6905_v19 = vpop.f32.mrf.mxu0  ;;  %7731 = vmatprep.subr.bf16.mxu0 %v17019_v23  ;;  %v17026_v46 = vld [vmem:[#allocation7 + $0xa90] ss:$28 sps:$4 sm:$0xff]  }
 0x33f   :  { %v19042_v9 = vadd.f32 %v7012_v45, %v6904_v53  ;;  %7839 = vmatpush1.bf16.msra.mxu1 %v17014_v56  ;;  %v6906_v4 = vadd.f32 %v6905_v19, %v19007_v50  ;;  %v17031_v19 = vld [vmem:[#allocation7 + $0xa5c] ss:$28 sps:$4 sm:$0xff]  }
 0x340   :  { %v7014_v7 = vpop.f32.mrf.mxu1  ;;  %v6909_v55 = vpop.f32.mrf.mxu0  ;;  %7562 = vmatmul.mubr.bf16.gmra.mxu0 %v21782_v2  ;;  %7840 = vmatprep.subr.bf16.mxu1 %v17022_v48 }
 0x341   :  { %v19046_v62 = vadd.f32 %v7014_v7, %v6906_v4  ;;  %v6910_v36 = vadd.f32 %v6909_v55, %v18999_v38  ;;  %7732 = vmatpush1.bf16.msra.mxu0 %v17017_v43  ;;  %7571 = vmatprep.mubr.bf16.mxu0 %v21784_v8  ;;  %v17034_v43 = vld [vmem:[#allocation7 + $0xddc] ss:$28 sps:$4 sm:$0xff]  }
 0x342   :  { %v7018_v23 = vpop.f32.mrf.mxu1  ;;  %7671 = vmatmul.mubr.bf16.gmra.mxu1 %v21785_v26  ;;  %v6911_v56 = vpop.f32.mrf.mxu0  ;;  %7733 = vmatprep.subr.bf16.mxu0 %v17025_v49  ;;  %v17029_v7 = vld [vmem:[#allocation7 + $0xa58] ss:$28 sps:$4 sm:$0xff]  }
 0x343   :  { %v19051_v59 = vadd.f32 %v7018_v23, %v6910_v36  ;;  %7680 = vmatprep.mubr.bf16.mxu1 %v21787_v18  ;;  %7841 = vmatpush1.bf16.msra.mxu1 %v17020_v0  ;;  %v6912_v48 = vadd.f32 %v6911_v56, %v19007_v50  ;;  %v17037_v36 = vld [vmem:[#allocation7 + $0xa24] ss:$28 sps:$4 sm:$0xff]   ;;  %v17032_v56 = vld [vmem:[#allocation7 + $0xdd8] ss:$28 sps:$4 sm:$0xff]  }
 0x344   :  { %v7020_v53 = vpop.f32.mrf.mxu1  ;;  %v6913_v55 = vpop.f32.mrf.mxu0  ;;  %7842 = vmatprep.subr.bf16.mxu1 %v17028_v20  ;;  %v17040_v20 = vld [vmem:[#allocation7 + $0xda4] ss:$28 sps:$4 sm:$0xff]  }
 0x345   :  { %v19055_v45 = vadd.f32 %v7020_v53, %v6912_v48  ;;  %v6914_v4 = vadd.f32 %v6913_v55, %v18999_v38  ;;  %7734 = vmatpush1.bf16.msra.mxu0 %v17023_v42 }
 0x346   :  { %v7022_v49 = vpop.f32.mrf.mxu1  ;;  %v6915_v26 = vpop.f32.mrf.mxu0  ;;  %7735 = vmatprep.subr.bf16.mxu0 %v17031_v19  ;;  %v17035_v19 = vld [vmem:[#allocation7 + $0xa20] ss:$28 sps:$4 sm:$0xff]  }
 0x347   :  { %v19058_v23 = vadd.f32 %v7022_v49, %v6914_v4  ;;  %7843 = vmatpush1.bf16.msra.mxu1 %v17026_v46  ;;  %v6916_v0 = vadd.f32 %v6915_v26, %v19007_v50  ;;  %v17043_v26 = vld [vmem:[#allocation7 + $0x9ec] ss:$28 sps:$4 sm:$0xff]  }
 0x348   :  { %v7024_v18 = vpop.f32.mrf.mxu1  ;;  %v6919_v8 = vpop.f32.mrf.mxu0  ;;  %7572 = vmatmul.mubr.bf16.gmra.mxu0 %v21790_v41  ;;  %7844 = vmatprep.subr.bf16.mxu1 %v17034_v43  ;;  %v17038_v43 = vld [vmem:[#allocation7 + $0xda0] ss:$28 sps:$4 sm:$0xff]  }
 0x349   :  { %v19062_v48 = vadd.f32 %v7024_v18, %v6916_v0  ;;  %v6920_v42 = vadd.f32 %v6919_v8, %v18999_v38  ;;  %7736 = vmatpush2.bf16.msra.mxu0 %v17029_v7  ;;  %7581 = vmatprep.mubr.bf16.mxu0 %v21792_v16  ;;  %v17046_v7 = vld [vmem:[#allocation7 + $0xd6c] ss:$28 sps:$4 sm:$0xff]  }
 0x34a   :  { %v7028_v53 = vpop.f32.mrf.mxu1  ;;  %7681 = vmatmul.mubr.bf16.gmra.mxu1 %v21793_v21  ;;  %v6921_v46 = vpop.f32.mrf.mxu0  ;;  %7737 = vmatprep.subr.bf16.mxu0 %v17037_v36  ;;  %v17041_v21 = vld [vmem:[#allocation7 + $0x9e8] ss:$28 sps:$4 sm:$0xff]  }
 0x34b   :  { %v19067_v55 = vadd.f32 %v7028_v53, %v6920_v42  ;;  %7690 = vmatprep.mubr.bf16.mxu1 %v21795_v39  ;;  %7845 = vmatpush2.bf16.msra.mxu1 %v17032_v56  ;;  %v6922_v18 = vadd.f32 %v6921_v46, %v19007_v50  ;;  %v17049_v42 = vld [vmem:[#allocation7 + $0x9b4] ss:$28 sps:$4 sm:$0xff]   ;;  %v17044_v46 = vld [vmem:[#allocation7 + $0xd68] ss:$28 sps:$4 sm:$0xff]  }
 0x34c   :  { %v7030_v4 = vpop.f32.mrf.mxu1  ;;  %v6923_v8 = vpop.f32.mrf.mxu0  ;;  %7846 = vmatprep.subr.bf16.mxu1 %v17040_v20  ;;  %v17052_v20 = vld [vmem:[#allocation7 + $0xd34] ss:$28 sps:$4 sm:$0xff]  }
 0x34d   :  { %v19071_v49 = vadd.f32 %v7030_v4, %v6922_v18  ;;  %v6924_v0 = vadd.f32 %v6923_v8, %v18999_v38  ;;  %7738 = vmatpush2.bf16.msra.mxu0 %v17035_v19 }
 0x34e   :  { %v7032_v36 = vpop.f32.mrf.mxu1  ;;  %v6925_v16 = vpop.f32.mrf.mxu0  ;;  %7739 = vmatprep.subr.bf16.mxu0 %v17043_v26  ;;  %v17047_v26 = vld [vmem:[#allocation7 + $0x9b0] ss:$28 sps:$4 sm:$0xff]  }
 0x34f   :  { %v19074_v53 = vadd.f32 %v7032_v36, %v6924_v0  ;;  %7847 = vmatpush2.bf16.msra.mxu1 %v17038_v43  ;;  %v6926_v56 = vadd.f32 %v6925_v16, %v19007_v50  ;;  %v17055_v16 = vld [vmem:[#allocation7 + $0x97c] ss:$28 sps:$4 sm:$0xff]  }
 0x350   :  { %v7034_v39 = vpop.f32.mrf.mxu1  ;;  %v6929_v41 = vpop.f32.mrf.mxu0  ;;  %7582 = vmatmul.mubr.bf16.gmra.mxu0 %v21798_v37  ;;  %7848 = vmatprep.subr.bf16.mxu1 %v17046_v7  ;;  %v17050_v7 = vld [vmem:[#allocation7 + $0xd30] ss:$28 sps:$4 sm:$0xff]  }
 0x351   :  { %v19078_v18 = vadd.f32 %v7034_v39, %v6926_v56  ;;  %v6930_v19 = vadd.f32 %v6929_v41, %v18999_v38  ;;  %7740 = vmatpush2.bf16.msra.mxu0 %v17041_v21  ;;  %7591 = vmatprep.mubr.bf16.mxu0 %v21800_v12  ;;  %v17058_v21 = vld [vmem:[#allocation7 + $0xcfc] ss:$28 sps:$4 sm:$0xff]  }
 0x352   :  { %v7038_v4 = vpop.f32.mrf.mxu1  ;;  %7691 = vmatmul.mubr.bf16.gmra.mxu1 %v21801_v27  ;;  %v6931_v43 = vpop.f32.mrf.mxu0  ;;  %7741 = vmatprep.subr.bf16.mxu0 %v17049_v42  ;;  %v17053_v27 = vld [vmem:[#allocation7 + $0x978] ss:$28 sps:$4 sm:$0xff]  }
 0x353   :  { %v19083_v8 = vadd.f32 %v7038_v4, %v6930_v19  ;;  %7700 = vmatprep.mubr.bf16.mxu1 %v21803_v24  ;;  %7849 = vmatpush2.bf16.msra.mxu1 %v17044_v46  ;;  %v6932_v39 = vadd.f32 %v6931_v43, %v19007_v50  ;;  %v17061_v19 = vld [vmem:[#allocation7 + $0x944] ss:$28 sps:$4 sm:$0xff]   ;;  %v17056_v43 = vld [vmem:[#allocation7 + $0xcf8] ss:$28 sps:$4 sm:$0xff]  }
 0x354   :  { %v7040_v0 = vpop.f32.mrf.mxu1  ;;  %v6933_v41 = vpop.f32.mrf.mxu0  ;;  %7850 = vmatprep.subr.bf16.mxu1 %v17052_v20  ;;  %v17064_v20 = vld [vmem:[#allocation7 + $0xcc4] ss:$28 sps:$4 sm:$0xff]  }
 0x355   :  { %v19087_v36 = vadd.f32 %v7040_v0, %v6932_v39  ;;  %v6934_v56 = vadd.f32 %v6933_v41, %v18999_v38  ;;  %7742 = vmatpush2.bf16.msra.mxu0 %v17047_v26 }
 0x356   :  { %v7042_v42 = vpop.f32.mrf.mxu1  ;;  %v6935_v12 = vpop.f32.mrf.mxu0  ;;  %7743 = vmatprep.subr.bf16.mxu0 %v17055_v16  ;;  %v17059_v16 = vld [vmem:[#allocation7 + $0x940] ss:$28 sps:$4 sm:$0xff]  }
 0x357   :  { %v19090_v4 = vadd.f32 %v7042_v42, %v6934_v56  ;;  %7851 = vmatpush2.bf16.msra.mxu1 %v17050_v7  ;;  %v6936_v46 = vadd.f32 %v6935_v12, %v19007_v50  ;;  %v17067_v12 = vld [vmem:[#allocation7 + $0x90c] ss:$28 sps:$4 sm:$0xff]  }
 0x358   :  { %v7044_v24 = vpop.f32.mrf.mxu1  ;;  %v6939_v37 = vpop.f32.mrf.mxu0  ;;  %7592 = vmatmul.mubr.bf16.gmra.mxu0 %v18482_v52  ;;  %7852 = vmatprep.subr.bf16.mxu1 %v17058_v21  ;;  %v17062_v21 = vld [vmem:[#allocation7 + $0xcc0] ss:$28 sps:$4 sm:$0xff]  }
 0x359   :  { %v19094_v39 = vadd.f32 %v7044_v24, %v6936_v46  ;;  %v6940_v26 = vadd.f32 %v6939_v37, %v18999_v38  ;;  %7744 = vmatpush2.bf16.msra.mxu0 %v17053_v27  ;;  %7601 = vmatprep.mubr.bf16.mxu0 %v21807_v31  ;;  %v17070_v27 = vld [vmem:[#allocation7 + $0xc8c] ss:$28 sps:$4 sm:$0xff]  }
 0x35a   :  { %v7048_v0 = vpop.f32.mrf.mxu1  ;;  %7701 = vmatmul.mubr.bf16.gmra.mxu1 %v21808_v1  ;;  %v6941_v7 = vpop.f32.mrf.mxu0  ;;  %7745 = vmatprep.subr.bf16.mxu0 %v17061_v19  ;;  %v17065_v1 = vld [vmem:[#allocation7 + $0x908] ss:$28 sps:$4 sm:$0xff]  }
 0x35b   :  { %v19099_v41 = vadd.f32 %v7048_v0, %v6940_v26  ;;  %7710 = vmatprep.mubr.bf16.mxu1 %v21810_v6  ;;  %7853 = vmatpush2.bf16.msra.mxu1 %v17056_v43  ;;  %v6942_v24 = vadd.f32 %v6941_v7, %v19007_v50  ;;  %v17073_v26 = vld [vmem:[#allocation7 + $0x8d4] ss:$28 sps:$4 sm:$0xff]   ;;  %v17068_v7 = vld [vmem:[#allocation7 + $0xc88] ss:$28 sps:$4 sm:$0xff]  }
 0x35c   :  { %v7050_v56 = vpop.f32.mrf.mxu1  ;;  %v6943_v37 = vpop.f32.mrf.mxu0  ;;  %7854 = vmatprep.subr.bf16.mxu1 %v17064_v20  ;;  %v17076_v20 = vld [vmem:[#allocation7 + $0xc54] ss:$28 sps:$4 sm:$0xff]  }
 0x35d   :  { %v19103_v42 = vadd.f32 %v7050_v56, %v6942_v24  ;;  %v6944_v46 = vadd.f32 %v6943_v37, %v18999_v38  ;;  %7746 = vmatpush2.bf16.msra.mxu0 %v17059_v16  ;;  %v21834_v56 = vld [vmem:[#allocation19_spill] sm:$0xff] }
 0x35e   :  { %v7052_v19 = vpop.f32.mrf.mxu1  ;;  %v6945_v31 = vpop.f32.mrf.mxu0  ;;  %7747 = vmatprep.subr.bf16.mxu0 %v17067_v12  ;;  %v17071_v12 = vld [vmem:[#allocation7 + $0x8d0] ss:$28 sps:$4 sm:$0xff]  }
 0x35f   :  { %v19106_v0 = vadd.f32 %v7052_v19, %v6944_v46  ;;  %7855 = vmatpush2.bf16.msra.mxu1 %v17062_v21  ;;  %v6946_v43 = vadd.f32 %v6945_v31, %v19007_v50  ;;  %v17079_v31 = vld [vmem:[#allocation7 + $0xf9c] ss:$28 sps:$4 sm:$0xff]  }
 0x360   :  { %v7054_v6 = vpop.f32.mrf.mxu1  ;;  %v6949_v52 = vpop.f32.mrf.mxu0  ;;  %7602 = vmatmul.mubr.bf16.gmra.mxu0 %v21813_v57  ;;  %7856 = vmatprep.subr.bf16.mxu1 %v17070_v27  ;;  %v17074_v27 = vld [vmem:[#allocation7 + $0xc50] ss:$28 sps:$4 sm:$0xff]  }
 0x361   :  { %v19110_v24 = vadd.f32 %v7054_v6, %v6946_v43  ;;  %v6950_v16 = vadd.f32 %v6949_v52, %v18999_v38  ;;  %7748 = vmatpush2.bf16.msra.mxu0 %v17065_v1  ;;  %7751 = vmatprep.mubr.bf16.mxu0 %v21834_v56  ;;  %v17082_v1 = vld [vmem:[#allocation7 + $0x131c] ss:$28 sps:$4 sm:$0xff]  }
 0x362   :  { %v7058_v37 = vpop.f32.mrf.mxu1  ;;  %7711 = vmatmul.mubr.bf16.gmra.mxu1 %v21816_v10  ;;  %v6951_v21 = vpop.f32.mrf.mxu0  ;;  %7749 = vmatprep.subr.bf16.mxu0 %v17073_v26  ;;  %v17077_v43 = vld [vmem:[#allocation7 + $0xf98] ss:$28 sps:$4 sm:$0xff]   ;;  %v17085_v26 = vld [vmem:[#allocation7 + $0xf64] ss:$28 sps:$4 sm:$0xff]  }
 0x363   :  { %v19115_v46 = vadd.f32 %v7058_v37, %v6950_v16  ;;  %7857 = vmatpush2.bf16.msra.mxu1 %v17068_v7  ;;  %7860 = vmatprep.mubr.bf16.mxu1 %v18166_v40  ;;  %v6952_v6 = vadd.f32 %v6951_v21, %v19007_v50  ;;  %v17080_v16 = vld [vmem:[#allocation7 + $0x1318] ss:$28 sps:$4 sm:$0xff]   ;;  %v17088_v50 = vld [vmem:[#allocation7 + $0x12e4] ss:$28 sps:$4 sm:$0xff]  }
 0x364   :  { %v7060_v19 = vpop.f32.mrf.mxu1  ;;  %v6953_v52 = vpop.f32.mrf.mxu0  ;;  %7858 = vmatprep.subr.bf16.mxu1 %v17076_v20  ;;  %v17083_v20 = vld [vmem:[#allocation7 + $0xf60] ss:$28 sps:$4 sm:$0xff]  }
 0x365   :  { %v19119_v38 = vadd.f32 %v7060_v19, %v6952_v6  ;;  %7750 = vmatpush2.bf16.msra.mxu0 %v17071_v12  ;;  %v17089_v52 = vld [vmem:[#allocation7 + $0xf28] ss:$28 sps:$4 sm:$0xff]  }
 0x366   :  { %v7062_v56 = vpop.f32.mrf.mxu1  ;;  %v6954_v10 = vpop.f32.mrf.mxu0  ;;  %7937 = vmatprep.subr.bf16.mxu0 %v17079_v31 }
 0x367   :  { %7859 = vmatpush2.bf16.msra.mxu1 %v17074_v27  ;;  %v17091_v10 = vld [vmem:[#allocation7 + $0xf2c] ss:$28 sps:$4 sm:$0xff]   ;;  %v17086_v56 = vld [vmem:[#allocation7 + $0x12e0] ss:$28 sps:$4 sm:$0xff]  }
 0x368   :  { %v7063_v7 = vpop.f32.mrf.mxu1  ;;  %v7099_v37 = vpop.f32.mrf.mxu0  ;;  %7752 = vmatmul.mubr.bf16.vlgmr.msra.gmra.mxu0 %v18158_v34  ;;  %8046 = vmatprep.subr.bf16.mxu1 %v17082_v1  ;;  %v17094_v27 = vld [vmem:[#allocation7 + $0x12ac] ss:$28 sps:$4 sm:$0xff]  }
 0x369   :  { %7938 = vmatpush1.bf16.msra.mxu0 %v17077_v43  ;;  %7759 = vmatprep.mubr.bf16.mxu0 %v18209_v5  ;;  %v17097_v7 = vld [vmem:[#allocation7 + $0xef4] ss:$28 sps:$4 sm:$0xff]  }
 0x36a   :  { %v7208_v21 = vpop.f32.mrf.mxu1  ;;  %7861 = vmatmul.mubr.bf16.vlgmr.msra.gmra.mxu1 %v18160_v17  ;;  %v7100_v12 = vpop.f32.mrf.mxu0  ;;  %7939 = vmatprep.subr.bf16.mxu0 %v17085_v26 }
 0x36b   :  { %7868 = vmatprep.mubr.bf16.mxu1 %v18211_v25  ;;  %8047 = vmatpush1.bf16.msra.mxu1 %v17080_v16  ;;  %v17092_v21 = vld [vmem:[#allocation7 + $0x12a8] ss:$28 sps:$4 sm:$0xff]  }
 0x36c   :  { %v7209_v31 = vpop.f32.mrf.mxu1  ;;  %v7101_v6 = vpop.f32.mrf.mxu0  ;;  %8048 = vmatprep.subr.bf16.mxu1 %v17088_v50  ;;  %v17100_v50 = vld [vmem:[#allocation7 + $0x1274] ss:$28 sps:$4 sm:$0xff]  }
 0x36d   :  { %v7102_v19 = vadd.f32 %v7101_v6, %v19010_v63  ;;  %7940 = vmatpush1.bf16.msra.mxu0 %v17083_v20  ;;  %v17095_v20 = vld [vmem:[#allocation7 + $0xef0] ss:$28 sps:$4 sm:$0xff]  }
 0x36e   :  { %v7210_v1 = vpop.f32.mrf.mxu1  ;;  %v7103_v43 = vpop.f32.mrf.mxu0  ;;  %7941 = vmatprep.subr.bf16.mxu0 %v17091_v10 }
 0x36f   :  { %v19126_v37 = vadd.f32 %v7210_v1, %v7102_v19  ;;  %8049 = vmatpush1.bf16.msra.mxu1 %v17086_v56  ;;  %v7104_v26 = vadd.f32 %v7103_v43, %v19014_v54  ;;  %v17103_v54 = vld [vmem:[#allocation7 + $0xebc] ss:$28 sps:$4 sm:$0xff]   ;;  %v17098_v19 = vld [vmem:[#allocation7 + $0x1270] ss:$28 sps:$4 sm:$0xff]  }
 0x370   :  { %v7212_v16 = vpop.f32.mrf.mxu1  ;;  %v7107_v12 = vpop.f32.mrf.mxu0  ;;  %7760 = vmatmul.mubr.bf16.gmra.mxu0 %v18203_v14  ;;  %8050 = vmatprep.subr.bf16.mxu1 %v17094_v27 }
 0x371   :  { %v19130_v31 = vadd.f32 %v7212_v16, %v7104_v26  ;;  %v7108_v63 = vadd.f32 %v7107_v12, %v19019_v47  ;;  %7942 = vmatpush1.bf16.msra.mxu0 %v17089_v52  ;;  %7769 = vmatprep.mubr.bf16.mxu0 %v18258_v28  ;;  %v17106_v52 = vld [vmem:[#allocation7 + $0x123c] ss:$28 sps:$4 sm:$0xff]   ;;  %v17109_v12 = vld [vmem:[#allocation7 + $0xe84] ss:$28 sps:$4 sm:$0xff]  }
 0x372   :  { %v7216_v10 = vpop.f32.mrf.mxu1  ;;  %7869 = vmatmul.mubr.bf16.gmra.mxu1 %v18205_v15  ;;  %v7109_v56 = vpop.f32.mrf.mxu0  ;;  %7943 = vmatprep.subr.bf16.mxu0 %v17097_v7  ;;  %v17101_v26 = vld [vmem:[#allocation7 + $0xeb8] ss:$28 sps:$4 sm:$0xff]   ;;  %v17113_v15 = vld [vmem:[#allocation7 + $0xe48] ss:$28 sps:$4 sm:$0xff]  }
 0x373   :  { %v19135_v6 = vadd.f32 %v7216_v10, %v7108_v63  ;;  %7878 = vmatprep.mubr.bf16.mxu1 %v18260_v29  ;;  %8051 = vmatpush1.bf16.msra.mxu1 %v17092_v21  ;;  %v7110_v27 = vadd.f32 %v7109_v56, %v19023_v58  ;;  %v17104_v63 = vld [vmem:[#allocation7 + $0x1238] ss:$28 sps:$4 sm:$0xff]  }
 0x374   :  { %v7218_v1 = vpop.f32.mrf.mxu1  ;;  %v19139_v47 = vpop.f32.mrf.mxu0  ;;  %8052 = vmatprep.subr.bf16.mxu1 %v17100_v50  ;;  %v17112_v50 = vld [vmem:[#allocation7 + $0x1204] ss:$28 sps:$4 sm:$0xff]  }
 0x375   :  { %v19141_v43 = vadd.f32 %v7218_v1, %v7110_v27  ;;  %7944 = vmatpush1.bf16.msra.mxu0 %v17095_v20  ;;  %v21835_v20 = vld [vmem:[#allocation41_spill] sm:$0xff]  ;;  %v17107_v27 = vld [vmem:[#allocation7 + $0xe80] ss:$28 sps:$4 sm:$0xff]  }
 0x376   :  { %v19143_v16 = vpop.f32.mrf.mxu1  ;;  %v7113_v7 = vpop.f32.mrf.mxu0  ;;  %7945 = vmatprep.subr.bf16.mxu0 %v17103_v54  ;;  %v21836_v54 = vld [vmem:[#allocation32_spill] sm:$0xff] }
 0x377   :  { %8053 = vmatpush1.bf16.msra.mxu1 %v17098_v19  ;;  %v7114_v21 = vadd.f32 %v7113_v7, %v19030_v13  ;;  %v17115_v13 = vld [vmem:[#allocation7 + $0xe4c] ss:$28 sps:$4 sm:$0xff]  }
 0x378   :  { %v7222_v58 = vpop.f32.mrf.mxu1  ;;  %v19146_v10 = vpop.f32.mrf.mxu0  ;;  %7770 = vmatmul.mubr.bf16.gmra.mxu0 %v18247_v11  ;;  %8054 = vmatprep.subr.bf16.mxu1 %v17106_v52  ;;  %v21837_v7 = vld [vmem:[#allocation42_spill] sm:$0xff]  ;;  %v17110_v52 = vld [vmem:[#allocation7 + $0x1200] ss:$28 sps:$4 sm:$0xff]  }
 0x379   :  { %v19149_v56 = vadd.f32 %v7222_v58, %v7114_v21  ;;  %7946 = vmatpush1.bf16.msra.mxu0 %v17101_v26  ;;  %7779 = vmatprep.mubr.bf16.mxu0 %v21835_v20  ;;  %v17118_v26 = vld [vmem:[#allocation7 + $0x11cc] ss:$28 sps:$4 sm:$0xff]  }
 0x37a   :  { %v19152_v1 = vpop.f32.mrf.mxu1  ;;  %7879 = vmatmul.mubr.bf16.gmra.mxu1 %v21836_v54  ;;  %v7119_v19 = vpop.f32.mrf.mxu0  ;;  %7947 = vmatprep.subr.bf16.mxu0 %v17109_v12  ;;  %v17121_v12 = vld [vmem:[#allocation7 + $0xe14] ss:$28 sps:$4 sm:$0xff]  }
 0x37b   :  { %7888 = vmatprep.mubr.bf16.mxu1 %v21837_v7  ;;  %8055 = vmatpush1.bf16.msra.mxu1 %v17104_v63  ;;  %v7120_v11 = vadd.f32 %v7119_v19, %v19039_v3  ;;  %v17116_v63 = vld [vmem:[#allocation7 + $0x11c8] ss:$28 sps:$4 sm:$0xff]  }
 0x37c   :  { %v7228_v29 = vpop.f32.mrf.mxu1  ;;  %v7121_v21 = vpop.f32.mrf.mxu0  ;;  %8056 = vmatprep.subr.bf16.mxu1 %v17112_v50  ;;  %v21838_v50 = vld [vmem:[#allocation39_spill] sm:$0xff] }
 0x37d   :  { %v19157_v58 = vadd.f32 %v7228_v29, %v7120_v11  ;;  %v7122_v20 = vadd.f32 %v7121_v21, %v19042_v9  ;;  %7948 = vmatpush1.bf16.msra.mxu0 %v17107_v27  ;;  %v17124_v11 = vld [vmem:[#allocation7 + $0x1194] ss:$28 sps:$4 sm:$0xff]   ;;  %v21839_v27 = vld [vmem:[#allocation49_spill] sm:$0xff] }
 0x37e   :  { %v7230_v54 = vpop.f32.mrf.mxu1  ;;  %v7123_v28 = vpop.f32.mrf.mxu0  ;;  %7949 = vmatprep.subr.bf16.mxu0 %v17115_v13  ;;  %v17119_v13 = vld [vmem:[#allocation7 + $0xe10] ss:$28 sps:$4 sm:$0xff]  }
 0x37f   :  { %v19160_v14 = vadd.f32 %v7230_v54, %v7122_v20  ;;  %8057 = vmatpush1.bf16.msra.mxu1 %v17110_v52  ;;  %v7124_v3 = vadd.f32 %v7123_v28, %v19046_v62  ;;  %v21840_v54 = vld [vmem:[#allocation40_spill] sm:$0xff]  ;;  %v21841_v21 = vld [vmem:[#allocation50_spill] sm:$0xff] }
 0x380   :  { %v7232_v19 = vpop.f32.mrf.mxu1  ;;  %v7127_v7 = vpop.f32.mrf.mxu0  ;;  %7780 = vmatmul.mubr.bf16.gmra.mxu0 %v21838_v50  ;;  %8058 = vmatprep.subr.bf16.mxu1 %v17118_v26  ;;  %v17127_v28 = vld [vmem:[#allocation7 + $0x115c] ss:$28 sps:$4 sm:$0xff]  }
 0x381   :  { %v19164_v29 = vadd.f32 %v7232_v19, %v7124_v3  ;;  %v7128_v9 = vadd.f32 %v7127_v7, %v19051_v59  ;;  %7950 = vmatpush1.bf16.msra.mxu0 %v17113_v15  ;;  %7789 = vmatprep.mubr.bf16.mxu0 %v21839_v27  ;;  %v17122_v3 = vld [vmem:[#allocation7 + $0x1190] ss:$28 sps:$4 sm:$0xff]   ;;  %v17130_v15 = vld [vmem:[#allocation7 + $0x14dc] ss:$28 sps:$4 sm:$0xff]  }
 0x382   :  { %v7236_v20 = vpop.f32.mrf.mxu1  ;;  %7889 = vmatmul.mubr.bf16.gmra.mxu1 %v21840_v54  ;;  %v7129_v52 = vpop.f32.mrf.mxu0  ;;  %7951 = vmatprep.subr.bf16.mxu0 %v17121_v12  ;;  %v17125_v54 = vld [vmem:[#allocation7 + $0x1158] ss:$28 sps:$4 sm:$0xff]  }
 0x383   :  { %v19169_v62 = vadd.f32 %v7236_v20, %v7128_v9  ;;  %7898 = vmatprep.mubr.bf16.mxu1 %v21841_v21  ;;  %8059 = vmatpush1.bf16.msra.mxu1 %v17116_v63  ;;  %v7130_v26 = vadd.f32 %v7129_v52, %v19055_v45  ;;  %v17133_v9 = vld [vmem:[#allocation7 + $0x1124] ss:$28 sps:$4 sm:$0xff]   ;;  %v17128_v63 = vld [vmem:[#allocation7 + $0x14d8] ss:$28 sps:$4 sm:$0xff]  }
 0x384   :  { %v7238_v19 = vpop.f32.mrf.mxu1  ;;  %v7131_v59 = vpop.f32.mrf.mxu0  ;;  %8060 = vmatprep.subr.bf16.mxu1 %v17124_v11  ;;  %v21842_v11 = vld [vmem:[#allocation47_spill] sm:$0xff] }
 0x385   :  { %v19173_v7 = vadd.f32 %v7238_v19, %v7130_v26  ;;  %v7132_v27 = vadd.f32 %v7131_v59, %v19058_v23  ;;  %7952 = vmatpush1.bf16.msra.mxu0 %v17119_v13  ;;  %v17136_v26 = vld [vmem:[#allocation7 + $0x14a4] ss:$28 sps:$4 sm:$0xff]  }
 0x386   :  { %v7240_v12 = vpop.f32.mrf.mxu1  ;;  %v7133_v50 = vpop.f32.mrf.mxu0  ;;  %7953 = vmatprep.subr.bf16.mxu0 %v17127_v28  ;;  %v21843_v13 = vld [vmem:[#allocation57_spill] sm:$0xff]  ;;  %v17131_v28 = vld [vmem:[#allocation7 + $0x1120] ss:$28 sps:$4 sm:$0xff]  }
 0x387   :  { %v19176_v20 = vadd.f32 %v7240_v12, %v7132_v27  ;;  %8061 = vmatpush1.bf16.msra.mxu1 %v17122_v3  ;;  %v7134_v45 = vadd.f32 %v7133_v50, %v19062_v48  ;;  %v21844_v59 = vld [vmem:[#allocation48_spill] sm:$0xff]  ;;  %v17139_v48 = vld [vmem:[#allocation7 + $0x10ec] ss:$28 sps:$4 sm:$0xff]  }
 0x388   :  { %v7242_v52 = vpop.f32.mrf.mxu1  ;;  %v7137_v21 = vpop.f32.mrf.mxu0  ;;  %7790 = vmatmul.mubr.bf16.gmra.mxu0 %v21842_v11  ;;  %8062 = vmatprep.subr.bf16.mxu1 %v17130_v15  ;;  %v21845_v12 = vld [vmem:[#allocation58_spill] sm:$0xff] }
 0x389   :  { %v19180_v19 = vadd.f32 %v7242_v52, %v7134_v45  ;;  %v7138_v23 = vadd.f32 %v7137_v21, %v19067_v55  ;;  %7954 = vmatpush2.bf16.msra.mxu0 %v17125_v54  ;;  %7799 = vmatprep.mubr.bf16.mxu0 %v21843_v13  ;;  %v17134_v45 = vld [vmem:[#allocation7 + $0x14a0] ss:$28 sps:$4 sm:$0xff]   ;;  %v17142_v54 = vld [vmem:[#allocation7 + $0x146c] ss:$28 sps:$4 sm:$0xff]  }
 0x38a   :  { %v7246_v27 = vpop.f32.mrf.mxu1  ;;  %7899 = vmatmul.mubr.bf16.gmra.mxu1 %v21844_v59  ;;  %v7139_v3 = vpop.f32.mrf.mxu0  ;;  %7955 = vmatprep.subr.bf16.mxu0 %v17133_v9  ;;  %v17137_v59 = vld [vmem:[#allocation7 + $0x10e8] ss:$28 sps:$4 sm:$0xff]  }
 0x38b   :  { %v19185_v50 = vadd.f32 %v7246_v27, %v7138_v23  ;;  %7908 = vmatprep.mubr.bf16.mxu1 %v21845_v12  ;;  %8063 = vmatpush2.bf16.msra.mxu1 %v17128_v63  ;;  %v7140_v15 = vadd.f32 %v7139_v3, %v19071_v49  ;;  %v17145_v23 = vld [vmem:[#allocation7 + $0x10b4] ss:$28 sps:$4 sm:$0xff]   ;;  %v17140_v63 = vld [vmem:[#allocation7 + $0x1468] ss:$28 sps:$4 sm:$0xff]  }
 0x38c   :  { %v7248_v52 = vpop.f32.mrf.mxu1  ;;  %v7141_v55 = vpop.f32.mrf.mxu0  ;;  %8064 = vmatprep.subr.bf16.mxu1 %v17136_v26  ;;  %v21846_v26 = vld [vmem:[#allocation55_spill] sm:$0xff] }
 0x38d   :  { %v19189_v21 = vadd.f32 %v7248_v52, %v7140_v15  ;;  %v7142_v13 = vadd.f32 %v7141_v55, %v19074_v53  ;;  %7956 = vmatpush2.bf16.msra.mxu0 %v17131_v28  ;;  %v17148_v15 = vld [vmem:[#allocation7 + $0x1434] ss:$28 sps:$4 sm:$0xff]   ;;  %v21847_v28 = vld [vmem:[#allocation65_spill] sm:$0xff]  ;;  %v21848_v55 = vld [vmem:[#allocation56_spill] sm:$0xff] }
 0x38e   :  { %v7250_v9 = vpop.f32.mrf.mxu1  ;;  %v7143_v11 = vpop.f32.mrf.mxu0  ;;  %7957 = vmatprep.subr.bf16.mxu0 %v17139_v48  ;;  %v17143_v48 = vld [vmem:[#allocation7 + $0x10b0] ss:$28 sps:$4 sm:$0xff]  }
 0x38f   :  { %v19192_v27 = vadd.f32 %v7250_v9, %v7142_v13  ;;  %8065 = vmatpush2.bf16.msra.mxu1 %v17134_v45  ;;  %v7144_v49 = vadd.f32 %v7143_v11, %v19078_v18  ;;  %v17151_v18 = vld [vmem:[#allocation7 + $0x107c] ss:$28 sps:$4 sm:$0xff]   ;;  %v21849_v9 = vld [vmem:[#allocation66_spill] sm:$0xff] }
 0x390   :  { %v7252_v3 = vpop.f32.mrf.mxu1  ;;  %v7147_v12 = vpop.f32.mrf.mxu0  ;;  %7800 = vmatmul.mubr.bf16.gmra.mxu0 %v21846_v26  ;;  %8066 = vmatprep.subr.bf16.mxu1 %v17142_v54 }
 0x391   :  { %v19196_v52 = vadd.f32 %v7252_v3, %v7144_v49  ;;  %v7148_v53 = vadd.f32 %v7147_v12, %v19083_v8  ;;  %7958 = vmatpush2.bf16.msra.mxu0 %v17137_v59  ;;  %7809 = vmatprep.mubr.bf16.mxu0 %v21847_v28  ;;  %v17146_v49 = vld [vmem:[#allocation7 + $0x1430] ss:$28 sps:$4 sm:$0xff]   ;;  %v17154_v59 = vld [vmem:[#allocation7 + $0x13fc] ss:$28 sps:$4 sm:$0xff]  }
 0x392   :  { %v7256_v13 = vpop.f32.mrf.mxu1  ;;  %7909 = vmatmul.mubr.bf16.gmra.mxu1 %v21848_v55  ;;  %v7149_v45 = vpop.f32.mrf.mxu0  ;;  %7959 = vmatprep.subr.bf16.mxu0 %v17145_v23  ;;  %v17149_v55 = vld [vmem:[#allocation7 + $0x1078] ss:$28 sps:$4 sm:$0xff]  }
 0x393   :  { %v19201_v11 = vadd.f32 %v7256_v13, %v7148_v53  ;;  %7918 = vmatprep.mubr.bf16.mxu1 %v21849_v9  ;;  %8067 = vmatpush2.bf16.msra.mxu1 %v17140_v63  ;;  %v7150_v54 = vadd.f32 %v7149_v45, %v19087_v36  ;;  %v17157_v53 = vld [vmem:[#allocation7 + $0x1044] ss:$28 sps:$4 sm:$0xff]   ;;  %v17152_v63 = vld [vmem:[#allocation7 + $0x13f8] ss:$28 sps:$4 sm:$0xff]  }
 0x394   :  { %v7258_v3 = vpop.f32.mrf.mxu1  ;;  %v7151_v8 = vpop.f32.mrf.mxu0  ;;  %8068 = vmatprep.subr.bf16.mxu1 %v17148_v15  ;;  %v21850_v15 = vld [vmem:[#allocation63_spill] sm:$0xff] }
 0x395   :  { %v19205_v12 = vadd.f32 %v7258_v3, %v7150_v54  ;;  %v7152_v28 = vadd.f32 %v7151_v8, %v19090_v4  ;;  %7960 = vmatpush2.bf16.msra.mxu0 %v17143_v48  ;;  %v17160_v54 = vld [vmem:[#allocation7 + $0x13c4] ss:$28 sps:$4 sm:$0xff]  }
 0x396   :  { %v7260_v23 = vpop.f32.mrf.mxu1  ;;  %v7153_v26 = vpop.f32.mrf.mxu0  ;;  %7961 = vmatprep.subr.bf16.mxu0 %v17151_v18  ;;  %v21851_v48 = vld [vmem:[#allocation73_spill] sm:$0xff]  ;;  %v17155_v18 = vld [vmem:[#allocation7 + $0x1040] ss:$28 sps:$4 sm:$0xff]  }
 0x397   :  { %v19208_v13 = vadd.f32 %v7260_v23, %v7152_v28  ;;  %8069 = vmatpush2.bf16.msra.mxu1 %v17146_v49  ;;  %v7154_v36 = vadd.f32 %v7153_v26, %v19094_v39  ;;  %v21852_v8 = vld [vmem:[#allocation64_spill] sm:$0xff]  ;;  %v17163_v39 = vld [vmem:[#allocation7 + $0x100c] ss:$28 sps:$4 sm:$0xff]  }
 0x398   :  { %v7262_v45 = vpop.f32.mrf.mxu1  ;;  %v7157_v9 = vpop.f32.mrf.mxu0  ;;  %7810 = vmatmul.mubr.bf16.gmra.mxu0 %v21850_v15  ;;  %8070 = vmatprep.subr.bf16.mxu1 %v17154_v59  ;;  %v21853_v23 = vld [vmem:[#allocation74_spill] sm:$0xff] }
 0x399   :  { %v19212_v3 = vadd.f32 %v7262_v45, %v7154_v36  ;;  %v7158_v4 = vadd.f32 %v7157_v9, %v19099_v41  ;;  %7962 = vmatpush2.bf16.msra.mxu0 %v17149_v55  ;;  %7819 = vmatprep.mubr.bf16.mxu0 %v21851_v48  ;;  %v17158_v36 = vld [vmem:[#allocation7 + $0x13c0] ss:$28 sps:$4 sm:$0xff]   ;;  %v17166_v55 = vld [vmem:[#allocation7 + $0x138c] ss:$28 sps:$4 sm:$0xff]  }
 0x39a   :  { %v7266_v28 = vpop.f32.mrf.mxu1  ;;  %7919 = vmatmul.mubr.bf16.gmra.mxu1 %v21852_v8  ;;  %v7159_v49 = vpop.f32.mrf.mxu0  ;;  %7963 = vmatprep.subr.bf16.mxu0 %v17157_v53  ;;  %v17161_v8 = vld [vmem:[#allocation7 + $0x1008] ss:$28 sps:$4 sm:$0xff]  }
 0x39b   :  { %v19217_v26 = vadd.f32 %v7266_v28, %v7158_v4  ;;  %7928 = vmatprep.mubr.bf16.mxu1 %v21853_v23  ;;  %8071 = vmatpush2.bf16.msra.mxu1 %v17152_v63  ;;  %v7160_v59 = vadd.f32 %v7159_v49, %v19103_v42  ;;  %v17169_v4 = vld [vmem:[#allocation7 + $0xfd4] ss:$28 sps:$4 sm:$0xff]   ;;  %v17164_v63 = vld [vmem:[#allocation7 + $0x1388] ss:$28 sps:$4 sm:$0xff]  }
 0x39c   :  { %v7268_v45 = vpop.f32.mrf.mxu1  ;;  %v7161_v41 = vpop.f32.mrf.mxu0  ;;  %8072 = vmatprep.subr.bf16.mxu1 %v17160_v54  ;;  %v21854_v54 = vld [vmem:[#allocation71_spill] sm:$0xff] }
 0x39d   :  { %v19221_v9 = vadd.f32 %v7268_v45, %v7160_v59  ;;  %v7162_v48 = vadd.f32 %v7161_v41, %v19106_v0  ;;  %7964 = vmatpush2.bf16.msra.mxu0 %v17155_v18  ;;  %v17172_v59 = vld [vmem:[#allocation7 + $0x1354] ss:$28 sps:$4 sm:$0xff]  }
 0x39e   :  { %v7270_v53 = vpop.f32.mrf.mxu1  ;;  %v7163_v15 = vpop.f32.mrf.mxu0  ;;  %7965 = vmatprep.subr.bf16.mxu0 %v17163_v39  ;;  %v17167_v18 = vld [vmem:[#allocation7 + $0xfd0] ss:$28 sps:$4 sm:$0xff]   ;;  %v21855_v39 = vld [vmem:[#allocation72_spill] sm:$0xff] }
 0x39f   :  { %v19224_v28 = vadd.f32 %v7270_v53, %v7162_v48  ;;  %8073 = vmatpush2.bf16.msra.mxu1 %v17158_v36  ;;  %v7164_v42 = vadd.f32 %v7163_v15, %v19110_v24  ;;  %v17173_v24 = vld [vmem:[#allocation7 + $0x360] ss:$28 sps:$4 sm:$0xff]  }
 0x3a0   :  { %v7272_v49 = vpop.f32.mrf.mxu1  ;;  %v7167_v23 = vpop.f32.mrf.mxu0  ;;  %7820 = vmatmul.mubr.bf16.gmra.mxu0 %v21854_v54  ;;  %8074 = vmatprep.subr.bf16.mxu1 %v17166_v55  ;;  %v17170_v55 = vld [vmem:[#allocation7 + $0x1350] ss:$28 sps:$4 sm:$0xff]  }
 0x3a1   :  { %v19228_v45 = vadd.f32 %v7272_v49, %v7164_v42  ;;  %v7168_v0 = vadd.f32 %v7167_v23, %v19115_v46  ;;  %7966 = vmatpush2.bf16.msra.mxu0 %v17161_v8  ;;  %7969 = vmatprep.mubr.bf16.mxu0 %v21766_v61  ;;  %v17175_v8 = vld [vmem:[#allocation7 + $0x6e0] ss:$28 sps:$4 sm:$0xff]  }
 0x3a2   :  { %v7276_v48 = vpop.f32.mrf.mxu1  ;;  %7929 = vmatmul.mubr.bf16.gmra.mxu1 %v21855_v39  ;;  %v7169_v36 = vpop.f32.mrf.mxu0  ;;  %7967 = vmatprep.subr.bf16.mxu0 %v17169_v4  ;;  %v17174_v42 = vld [vmem:[#allocation7 + $0x1a0] ss:$28 sps:$4 sm:$0xff]   ;;  %v17177_v4 = vld [vmem:[#allocation7 + $0x328] ss:$28 sps:$4 sm:$0xff]  }
 0x3a3   :  { %v19233_v15 = vadd.f32 %v7276_v48, %v7168_v0  ;;  %8075 = vmatpush2.bf16.msra.mxu1 %v17164_v63  ;;  %8078 = vmatprep.mubr.bf16.mxu1 %v21768_v22  ;;  %v7170_v41 = vadd.f32 %v7169_v36, %v19119_v38  ;;  %v17176_v0 = vld [vmem:[#allocation7 + $0x520] ss:$28 sps:$4 sm:$0xff]   ;;  %v17179_v38 = vld [vmem:[#allocation7 + $0x6a8] ss:$28 sps:$4 sm:$0xff]  }
 0x3a4   :  { %v7278_v53 = vpop.f32.mrf.mxu1  ;;  %v7171_v46 = vpop.f32.mrf.mxu0  ;;  %8076 = vmatprep.subr.bf16.mxu1 %v17172_v59  ;;  %v17178_v59 = vld [vmem:[#allocation7 + $0x168] ss:$28 sps:$4 sm:$0xff]  }
 0x3a5   :  { %v19237_v23 = vadd.f32 %v7278_v53, %v7170_v41  ;;  %7968 = vmatpush2.bf16.msra.mxu0 %v17167_v18  ;;  %v17183_v53 = vld [vmem:[#allocation7 + $0x670] ss:$28 sps:$4 sm:$0xff]  }
 0x3a6   :  { %v7280_v49 = vpop.f32.mrf.mxu1  ;;  %v7172_v39 = vpop.f32.mrf.mxu0  ;;  %15052 = vmatprep.subr.bf16.mxu0 %v17173_v24  ;;  %v17180_v24 = vld [vmem:[#allocation7 + $0x4e8] ss:$28 sps:$4 sm:$0xff]  }
 0x3a7   :  { %8077 = vmatpush2.bf16.msra.mxu1 %v17170_v55  ;;  %v17181_v39 = vld [vmem:[#allocation7 + $0x2f0] ss:$28 sps:$4 sm:$0xff]  }
 0x3a8   :  { %v7281_v63 = vpop.f32.mrf.mxu1  ;;  %v7317_v48 = vpop.f32.mrf.mxu0  ;;  %7970 = vmatmul.mubr.bf16.vlgmr.msra.gmra.mxu0 %v21769_v32  ;;  %15116 = vmatprep.subr.bf16.mxu1 %v17175_v8  ;;  %v17182_v8 = vld [vmem:[#allocation7 + $0x130] ss:$28 sps:$4 sm:$0xff]  }
 0x3a9   :  { %15053 = vmatpush3.bf16.msra.mxu0 %v17174_v42  ;;  %7977 = vmatprep.mubr.bf16.mxu0 %v21770_v60  ;;  %v7112_v42 = vadd.f32 %v19139_v47, %v19026_v33  ;;  %v21858_v47 = vld [vmem:[#allocation44_spill] sm:$0xff] }
 0x3aa   :  { %v7426_v36 = vpop.f32.mrf.mxu1  ;;  %8079 = vmatmul.mubr.bf16.vlgmr.msra.gmra.mxu1 %v21771_v30  ;;  %v7318_v18 = vpop.f32.mrf.mxu0  ;;  %15054 = vmatprep.subr.bf16.mxu0 %v17177_v4  ;;  %v17185_v4 = vld [vmem:[#allocation7 + $0x2b8] ss:$28 sps:$4 sm:$0xff]  }
 0x3ab   :  { %8086 = vmatprep.mubr.bf16.mxu1 %v21772_v35  ;;  %15117 = vmatpush3.bf16.msra.mxu1 %v17176_v0  ;;  %v17184_v36 = vld [vmem:[#allocation7 + $0x4b0] ss:$28 sps:$4 sm:$0xff]  }
 0x3ac   :  { %v7427_v41 = vpop.f32.mrf.mxu1  ;;  %v7319_v55 = vpop.f32.mrf.mxu0  ;;  %15118 = vmatprep.subr.bf16.mxu1 %v17179_v38 }
 0x3ad   :  { %v7320_v46 = vadd.f32 %v7319_v55, %v19126_v37  ;;  %15055 = vmatpush3.bf16.msra.mxu0 %v17178_v59  ;;  %v17187_v37 = vld [vmem:[#allocation7 + $0x638] ss:$28 sps:$4 sm:$0xff]   ;;  %v7221_v41 = vadd.f32 %v19143_v16, %v7112_v42  ;;  %v17191_v16 = vld [vmem:[#allocation7 + $0x600] ss:$28 sps:$4 sm:$0xff]  }
 0x3ae   :  { %v7428_v49 = vpop.f32.mrf.mxu1  ;;  %v7321_v63 = vpop.f32.mrf.mxu0  ;;  %15056 = vmatprep.subr.bf16.mxu0 %v17181_v39  ;;  %v17186_v39 = vld [vmem:[#allocation7 + $0xf8] ss:$28 sps:$4 sm:$0xff]  }
 0x3af   :  { %v19246_v48 = vadd.f32 %v7428_v49, %v7320_v46  ;;  %v7322_v0 = vadd.f32 %v7321_v63, %v19130_v31  ;;  %15119 = vmatpush3.bf16.msra.mxu1 %v17180_v24  ;;  %v21859_v31 = vld [vmem:[#allocation38_spill] sm:$0xff]  ;;  %v17189_v46 = vld [vmem:[#allocation7 + $0x280] ss:$28 sps:$4 sm:$0xff]   ;;  %v21861_v63 = vld [vmem:[#allocation45_spill] sm:$0xff] }
 0x3b0   :  { %v7430_v18 = vpop.f32.mrf.mxu1  ;;  %v7325_v38 = vpop.f32.mrf.mxu0  ;;  %7978 = vmatmul.mubr.bf16.gmra.mxu0 %v21774_v44  ;;  %15120 = vmatprep.subr.bf16.mxu1 %v17183_v53  ;;  %v7118_v53 = vadd.f32 %v19146_v10, %v19035_v51  ;;  %v17193_v51 = vld [vmem:[#allocation7 + $0x248] ss:$28 sps:$4 sm:$0xff]  }
 0x3b1   :  { %21856 = vst [vmem:[#allocation71_spill] sm:$0xff] %v19246_v48  ;;  %v19250_v59 = vadd.f32 %v7430_v18, %v7322_v0  ;;  %v7326_v33 = vadd.f32 %v7325_v38, %v19135_v6  ;;  %7987 = vmatprep.mubr.bf16.mxu0 %v21858_v47  ;;  %15057 = vmatpush3.bf16.msra.mxu0 %v17182_v8  ;;  %v17188_v8 = vld [vmem:[#allocation7 + $0x478] ss:$28 sps:$4 sm:$0xff]  }
 0x3b2   :  { %v7434_v55 = vpop.f32.mrf.mxu1  ;;  %8087 = vmatmul.mubr.bf16.gmra.mxu1 %v21859_v31  ;;  %v7327_v24 = vpop.f32.mrf.mxu0  ;;  %15058 = vmatprep.subr.bf16.mxu0 %v17185_v4  ;;  %v17190_v4 = vld [vmem:[#allocation7 + $0xc0] ss:$28 sps:$4 sm:$0xff]   ;;  %v7227_v10 = vadd.f32 %v19152_v1, %v7118_v53 }
 0x3b3   :  { %21857 = vst [vmem:[#allocation103_spill] sm:$0xff] %v19250_v59  ;;  %v19258_v49 = vadd.f32 %v7434_v55, %v7326_v33  ;;  %8096 = vmatprep.mubr.bf16.mxu1 %v21861_v63  ;;  %v7328_v6 = vadd.f32 %v7327_v24, %v19141_v43  ;;  %15121 = vmatpush3.bf16.msra.mxu1 %v17184_v36  ;;  %v17192_v36 = vld [vmem:[#allocation7 + $0x440] ss:$28 sps:$4 sm:$0xff]  }
 0x3b4   :  { %v7436_v0 = vpop.f32.mrf.mxu1  ;;  %v7329_v18 = vpop.f32.mrf.mxu0  ;;  %15122 = vmatprep.subr.bf16.mxu1 %v17187_v37  ;;  %v21866_v1 = vld [vmem:[#allocation52_spill] sm:$0xff] }
 0x3b5   :  { %21860 = vst [vmem:[#allocation44_spill] sm:$0xff] %v19258_v49  ;;  %v19262_v42 = vadd.f32 %v7436_v0, %v7328_v6  ;;  %v7330_v38 = vadd.f32 %v7329_v18, %v7221_v41  ;;  %15059 = vmatpush3.bf16.msra.mxu0 %v17186_v39  ;;  %v17195_v41 = vld [vmem:[#allocation7 + $0x5c8] ss:$28 sps:$4 sm:$0xff]   ;;  %v21871_v49 = vld [vmem:[#allocation43_spill] sm:$0xff] }
 0x3b6   :  { %v7438_v48 = vpop.f32.mrf.mxu1  ;;  %v7331_v59 = vpop.f32.mrf.mxu0  ;;  %15060 = vmatprep.subr.bf16.mxu0 %v17189_v46  ;;  %v21864_v39 = vld [vmem:[#allocation37_spill] sm:$0xff] }
 0x3b7   :  { %21862 = vst [vmem:[#allocation38_spill] sm:$0xff] %v19262_v42  ;;  %v19265_v33 = vadd.f32 %v7438_v48, %v7330_v38  ;;  %v7332_v43 = vadd.f32 %v7331_v59, %v19149_v56  ;;  %15123 = vmatpush3.bf16.msra.mxu1 %v17188_v8  ;;  %v21444_v24 = vmax.f32 %v21864_v39, 0.0  ;;  %v17194_v48 = vld [vmem:[#allocation7 + $0x88] ss:$28 sps:$4 sm:$0xff]   ;;  %v21867_v59 = vld [vmem:[#allocation46_spill] sm:$0xff] }
 0x3b8   :  { %v7440_v55 = vpop.f32.mrf.mxu1  ;;  %v7335_v37 = vpop.f32.mrf.mxu0  ;;  %7988 = vmatmul.mubr.bf16.gmra.mxu0 %v21782_v2  ;;  %15124 = vmatprep.subr.bf16.mxu1 %v17191_v16  ;;  %v17197_v8 = vld [vmem:[#allocation7 + $0x210] ss:$28 sps:$4 sm:$0xff]   ;;  %v21869_v16 = vld [vmem:[#allocation53_spill] sm:$0xff] }
 0x3b9   :  { %21863 = vst [vmem:[#allocation45_spill] sm:$0xff] %v19265_v33  ;;  %v21443_v6 = vmax.f32 %v19265_v33, 0.0  ;;  %v19271_v46 = vadd.f32 %v7440_v55, %v7332_v43  ;;  %v7336_v0 = vadd.f32 %v7335_v37, %v7227_v10  ;;  %7997 = vmatprep.mubr.bf16.mxu0 %v21866_v1  ;;  %15061 = vmatpush3.bf16.msra.mxu0 %v17190_v4  ;;  %v17196_v4 = vld [vmem:[#allocation7 + $0x408] ss:$28 sps:$4 sm:$0xff]   ;;  %v21870_v43 = vld [vmem:[#allocation35_spill] sm:$0xff] }
 0x3ba   :  { %v7444_v56 = vpop.f32.mrf.mxu1  ;;  %8097 = vmatmul.mubr.bf16.gmra.mxu1 %v21867_v59  ;;  %v7337_v53 = vpop.f32.mrf.mxu0  ;;  %15062 = vmatprep.subr.bf16.mxu0 %v17193_v51  ;;  %v17199_v51 = vld [vmem:[#allocation7 + $0x590] ss:$28 sps:$4 sm:$0xff]  }
 0x3bb   :  { %21865 = vst [vmem:[#allocation104_spill] sm:$0xff] %v19271_v46  ;;  %v19275_v18 = vadd.f32 %v7444_v56, %v7336_v0  ;;  %8106 = vmatprep.mubr.bf16.mxu1 %v21869_v16  ;;  %v7338_v38 = vadd.f32 %v7337_v53, %v19157_v58  ;;  %v16063_v10 = vpack.i.bf16 %v21443_v6, %v21444_v24  ;;  %v21447_v0 = vmax.f32 %v21871_v49, 0.0  ;;  %v21873_v53 = vld [vmem:[#allocation30_spill] sm:$0xff] }
 0x3bc   :  { %15125 = vmatpush3.bf16.msra.mxu1 %v17192_v36  ;;  %v7446_v37 = vpop.f32.mrf.mxu1  ;;  %v7339_v42 = vpop.f32.mrf.mxu0  ;;  %v21450_v36 = vmax.f32 %v21873_v53, 0.0  ;;  %v21884_v53 = vld [vmem:[#allocation59_spill] sm:$0xff] }
 0x3bd   :  { %21868 = vst [vmem:[#allocation52_spill] sm:$0xff] %v19275_v18  ;;  %15126 = vmatprep.subr.bf16.mxu1 %v17195_v41  ;;  %v21446_v56 = vmax.f32 %v19275_v18, 0.0  ;;  %v19286_v46 = vadd.f32 %v7446_v37, %v7338_v38  ;;  %v7340_v58 = vadd.f32 %v7339_v42, %v19160_v14  ;;  %16064 = vrot.lane.b32.xlu0 %v16063_v10, %s17808_s18  ;;  %v17198_v37 = vld [vmem:[#allocation7 + $0x50] ss:$28 sps:$4 sm:$0xff]   ;;  %v21875_v10 = vld [vmem:[#allocation51_spill] sm:$0xff] }
 0x3be   :  { %15063 = vmatpush3.bf16.msra.mxu0 %v17194_v48  ;;  %v7448_v6 = vpop.f32.mrf.mxu1  ;;  %v7341_v24 = vpop.f32.mrf.mxu0  ;;  %v21876_v48 = vmax.f32 %v21870_v43, 0.0  ;;  %v17230_v43 = vld [vmem:[#allocation7 + $0x750] ss:$28 sps:$4 sm:$0xff]  }
 0x3bf   :  { %21872 = vst [vmem:[#allocation46_spill] sm:$0xff] %v19286_v46  ;;  %15064 = vmatprep.subr.bf16.mxu0 %v17197_v8  ;;  %v19291_v55 = vadd.f32 %v7448_v6, %v7340_v58  ;;  %v7342_v41 = vadd.f32 %v7341_v24, %v19164_v29  ;;  %v16068_v38 = vpack.i.bf16 %v21446_v56, %v21447_v0  ;;  %v17200_v6 = vld [vmem:[#allocation7 + $0x3d0] ss:$28 sps:$4 sm:$0xff]   ;;  %v17201_v58 = vld [vmem:[#allocation7 + $0x1d8] ss:$28 sps:$4 sm:$0xff]  }
 0x3c0   :  { %15127 = vmatpush3.bf16.msra.mxu1 %v17196_v4  ;;  %v7450_v14 = vpop.f32.mrf.mxu1  ;;  %v7345_v42 = vpop.f32.mrf.mxu0  ;;  %7998 = vmatmul.mubr.bf16.gmra.mxu0 %v21875_v10  ;;  %v16073_v8 = vpack.i.bf16 %v21876_v48, %v21450_v36  ;;  %v17203_v4 = vld [vmem:[#allocation7 + $0x558] ss:$28 sps:$4 sm:$0xff]   ;;  %v21879_v0 = vld [vmem:[#allocation54_spill] sm:$0xff] }
 0x3c1   :  { %21874 = vst [vmem:[#allocation105_spill] sm:$0xff] %v19291_v55  ;;  %15128 = vmatprep.subr.bf16.mxu1 %v17199_v51  ;;  %v19303_v29 = vadd.f32 %v7450_v14, %v7342_v41  ;;  %v7346_v24 = vadd.f32 %v7345_v42, %v19169_v62  ;;  %v21878_v55 = vld [vmem:[#allocation60_spill] sm:$0xff]  ;;  %16069 = vrot.lane.b32.xlu1 %v16068_v38, %s17808_s18  ;;  %v21881_v51 = vld [vmem:[#allocation61_spill] sm:$0xff]  ;;  %v17202_v14 = vld [vmem:[#allocation7 + $0x18] ss:$28 sps:$4 sm:$0xff]  }
 0x3c2   :  { %8007 = vmatprep.mubr.bf16.mxu0 %v21878_v55  ;;  %v7454_v56 = vpop.f32.mrf.mxu1  ;;  %8107 = vmatmul.mubr.bf16.gmra.mxu1 %v21879_v0  ;;  %v7347_v18 = vpop.f32.mrf.mxu0  ;;  %v17204_v38 = vld [vmem:[#allocation7 + $0x398] ss:$28 sps:$4 sm:$0xff]  }
 0x3c3   :  { %21877 = vst [vmem:[#allocation106_spill] sm:$0xff] %v19303_v29  ;;  %16074 = vrot.lane.b32.xlu0 %v16073_v8, %s17808_s18  ;;  %v19310_v33 = vadd.f32 %v7454_v56, %v7346_v24  ;;  %8116 = vmatprep.mubr.bf16.mxu1 %v21881_v51  ;;  %v7348_v41 = vadd.f32 %v7347_v18, %v19173_v7  ;;  %v17205_v8 = vld [vmem:[#allocation7 + $0xa60] ss:$28 sps:$4 sm:$0xff]   ;;  %v17265_v46 = vld [vmem:[#allocation7 + $0xfd8] ss:$28 sps:$4 sm:$0xff]  }
 0x3c4   :  { %15065 = vmatpush3.bf16.msra.mxu0 %v17198_v37  ;;  %v7456_v62 = vpop.f32.mrf.mxu1  ;;  %v7349_v42 = vpop.f32.mrf.mxu0  ;;  %15129 = vmatpush3.bf16.msra.mxu1 %v17200_v6  ;;  %v17207_v24 = vld [vmem:[#allocation7 + $0xde0] ss:$28 sps:$4 sm:$0xff]  }
 0x3c5   :  { %21880 = vst [vmem:[#allocation107_spill] sm:$0xff] %v19310_v33  ;;  %15066 = vmatprep.subr.bf16.mxu0 %v17201_v58  ;;  %v19314_v48 = vadd.f32 %v7456_v62, %v7348_v41  ;;  %v7350_v36 = vadd.f32 %v7349_v42, %v19176_v20  ;;  %15130 = vmatprep.subr.bf16.mxu1 %v17203_v4  ;;  %v21886_v20 = vld [vmem:[#allocation68_spill] sm:$0xff]  ;;  %v21887_v41 = vld [vmem:[#allocation62_spill] sm:$0xff] }
 0x3c6   :  { %v7458_v29 = vpop.f32.mrf.mxu1  ;;  %v7351_v56 = vpop.f32.mrf.mxu0 }
 0x3c7   :  { %21882 = vst [vmem:[#allocation108_spill] sm:$0xff] %v19314_v48  ;;  %v19317_v33 = vadd.f32 %v7458_v29, %v7350_v36  ;;  %v7352_v7 = vadd.f32 %v7351_v56, %v19180_v19  ;;  %v21889_v19 = vld [vmem:[#allocation69_spill] sm:$0xff]  ;;  %v17222_v48 = vld [vmem:[#allocation7 + $0x7c0] ss:$28 sps:$4 sm:$0xff]  }
 0x3c8   :  { %15067 = vmatpush3.bf16.msra.mxu0 %v17202_v14  ;;  %v7460_v18 = vpop.f32.mrf.mxu1  ;;  %v7355_v37 = vpop.f32.mrf.mxu0  ;;  %15131 = vmatpush3.bf16.msra.mxu1 %v17204_v38 }
 0x3c9   :  { %21883 = vst [vmem:[#allocation109_spill] sm:$0xff] %v19317_v33  ;;  %8008 = vmatmul.mubr.bf16.gmra.mxu0 %v21884_v53  ;;  %v19321_v6 = vadd.f32 %v7460_v18, %v7352_v7  ;;  %v7356_v58 = vadd.f32 %v7355_v37, %v19185_v50  ;;  %15180 = vmatprep.subr.bf16.mxu0 %v17205_v8 }
 0x3ca   :  { %8017 = vmatprep.mubr.bf16.mxu0 %v21886_v20  ;;  %v7464_v4 = vpop.f32.mrf.mxu1  ;;  %8117 = vmatmul.mubr.bf16.gmra.mxu1 %v21887_v41  ;;  %v7357_v36 = vpop.f32.mrf.mxu0 }
 0x3cb   :  { %21885 = vst [vmem:[#allocation110_spill] sm:$0xff] %v19321_v6  ;;  %15244 = vmatprep.subr.bf16.mxu1 %v17207_v24  ;;  %v19326_v29 = vadd.f32 %v7464_v4, %v7356_v58  ;;  %8126 = vmatprep.mubr.bf16.mxu1 %v21889_v19  ;;  %v7358_v14 = vadd.f32 %v7357_v36, %v19189_v21  ;;  %v21892_v58 = vld [vmem:[#allocation67_spill] sm:$0xff] }
 0x3cc   :  { %v7466_v62 = vpop.f32.mrf.mxu1  ;;  %v7359_v42 = vpop.f32.mrf.mxu0  ;;  %v21894_v36 = vld [vmem:[#allocation79_spill] sm:$0xff] }
 0x3cd   :  { %21888 = vst [vmem:[#allocation111_spill] sm:$0xff] %v19326_v29  ;;  %v19330_v38 = vadd.f32 %v7466_v62, %v7358_v14  ;;  %v7360_v50 = vadd.f32 %v7359_v42, %v19192_v27  ;;  %v21895_v62 = vld [vmem:[#allocation70_spill] sm:$0xff] }
 0x3ce   :  { %v7468_v56 = vpop.f32.mrf.mxu1  ;;  %v7361_v7 = vpop.f32.mrf.mxu0 }
 0x3cf   :  { %21890 = vst [vmem:[#allocation112_spill] sm:$0xff] %v19330_v38  ;;  %v19333_v8 = vadd.f32 %v7468_v56, %v7360_v50  ;;  %v7362_v18 = vadd.f32 %v7361_v7, %v19196_v52  ;;  %v21897_v50 = vld [vmem:[#allocation80_spill] sm:$0xff] }
 0x3d0   :  { %v7470_v37 = vpop.f32.mrf.mxu1  ;;  %v7365_v24 = vpop.f32.mrf.mxu0 }
 0x3d1   :  { %21891 = vst [vmem:[#allocation113_spill] sm:$0xff] %v19333_v8  ;;  %8018 = vmatmul.mubr.bf16.gmra.mxu0 %v21892_v58  ;;  %v19337_v4 = vadd.f32 %v7470_v37, %v7362_v18  ;;  %v7366_v21 = vadd.f32 %v7365_v24, %v19201_v11 }
 0x3d2   :  { %8027 = vmatprep.mubr.bf16.mxu0 %v21894_v36  ;;  %v7474_v14 = vpop.f32.mrf.mxu1  ;;  %8127 = vmatmul.mubr.bf16.gmra.mxu1 %v21895_v62  ;;  %v7367_v27 = vpop.f32.mrf.mxu0 }
 0x3d3   :  { %21893 = vst [vmem:[#allocation114_spill] sm:$0xff] %v19337_v4  ;;  %v19342_v42 = vadd.f32 %v7474_v14, %v7366_v21  ;;  %8136 = vmatprep.mubr.bf16.mxu1 %v21897_v50  ;;  %v7368_v52 = vadd.f32 %v7367_v27, %v19205_v12  ;;  %v21901_v14 = vld [vmem:[#allocation77_spill] sm:$0xff] }
 0x3d4   :  { %v7476_v56 = vpop.f32.mrf.mxu1  ;;  %v7369_v7 = vpop.f32.mrf.mxu0 }
 0x3d5   :  { %21896 = vst [vmem:[#allocation115_spill] sm:$0xff] %v19342_v42  ;;  %v19346_v8 = vadd.f32 %v7476_v56, %v7368_v52  ;;  %v7370_v18 = vadd.f32 %v7369_v7, %v19208_v13  ;;  %v21902_v52 = vld [vmem:[#allocation82_spill] sm:$0xff]  ;;  %v21916_v42 = vld [vmem:[#allocation23_spill] sm:$0xff] }
 0x3d6   :  { %v7478_v37 = vpop.f32.mrf.mxu1  ;;  %v7371_v11 = vpop.f32.mrf.mxu0  ;;  %v21904_v7 = vld [vmem:[#allocation78_spill] sm:$0xff] }
 0x3d7   :  { %21898 = vst [vmem:[#allocation116_spill] sm:$0xff] %v19346_v8  ;;  %v19349_v24 = vadd.f32 %v7478_v37, %v7370_v18  ;;  %v7372_v4 = vadd.f32 %v7371_v11, %v19212_v3  ;;  %v17208_v8 = vld [vmem:[#allocation7 + $0xc20] ss:$28 sps:$4 sm:$0xff]  }
 0x3d8   :  { %v7480_v38 = vpop.f32.mrf.mxu1  ;;  %v7375_v33 = vpop.f32.mrf.mxu0 }
 0x3d9   :  { %21899 = vst [vmem:[#allocation117_spill] sm:$0xff] %v19349_v24  ;;  %8028 = vmatmul.mubr.bf16.gmra.mxu0 %v21813_v57  ;;  %v19353_v21 = vadd.f32 %v7480_v38, %v7372_v4  ;;  %v7376_v12 = vadd.f32 %v7375_v33, %v19217_v26 }
 0x3da   :  { %15036 = vmatprep.mubr.msk.bf16.mxu0 %vm901_vm3, %v21901_v14  ;;  %v7484_v27 = vpop.f32.mrf.mxu1  ;;  %8137 = vmatmul.mubr.bf16.gmra.mxu1 %v21902_v52  ;;  %v7377_v13 = vpop.f32.mrf.mxu0 }
 0x3db   :  { %21900 = vst [vmem:[#allocation118_spill] sm:$0xff] %v19353_v21  ;;  %v19359_v56 = vadd.f32 %v7484_v27, %v7376_v12  ;;  %15038 = vmatprep.mubr.msk.bf16.mxu1 %vm901_vm3, %v21904_v7  ;;  %v7378_v3 = vadd.f32 %v7377_v13, %v19221_v9  ;;  %v21907_v27 = vld [vmem:[#allocation75_spill] sm:$0xff]  ;;  %v21909_v13 = vld [vmem:[#allocation21_spill] sm:$0xff] }
 0x3dc   :  { %v7486_v18 = vpop.f32.mrf.mxu1  ;;  %v7379_v37 = vpop.f32.mrf.mxu0 }
 0x3dd   :  { %21903 = vst [vmem:[#allocation119_spill] sm:$0xff] %v19359_v56  ;;  %v19364_v38 = vadd.f32 %v7486_v18, %v7378_v3  ;;  %v7380_v26 = vadd.f32 %v7379_v37, %v19224_v28  ;;  %v21911_v18 = vld [vmem:[#allocation76_spill] sm:$0xff] }
 0x3de   :  { %v7488_v33 = vpop.f32.mrf.mxu1  ;;  %v7381_v4 = vpop.f32.mrf.mxu0 }
 0x3df   :  { %21905 = vst [vmem:[#allocation120_spill] sm:$0xff] %v19364_v38  ;;  %v19367_v11 = vadd.f32 %v7488_v33, %v7380_v26  ;;  %v7382_v24 = vadd.f32 %v7381_v4, %v19228_v45  ;;  %v21913_v45 = vld [vmem:[#allocation22_spill] sm:$0xff]  ;;  %v17206_v4 = vld [vmem:[#allocation7 + $0x8a0] ss:$28 sps:$4 sm:$0xff]   ;;  %v17209_v38 = vld [vmem:[#allocation7 + $0xa28] ss:$28 sps:$4 sm:$0xff]  }
 0x3e0   :  { %v7490_v21 = vpop.f32.mrf.mxu1  ;;  %v7385_v12 = vpop.f32.mrf.mxu0 }
 0x3e1   :  { %21906 = vst [vmem:[#allocation121_spill] sm:$0xff] %v19367_v11  ;;  %15037 = vmatmul.mubr.msk.bf16.gmra.mxu0 %vm901_vm3, %v21907_v27  ;;  %v19372_v56 = vadd.f32 %v7490_v21, %v7382_v24  ;;  %v7386_v9 = vadd.f32 %v7385_v12, %v19233_v15  ;;  %v21915_v12 = vld [vmem:[#allocation18_spill] sm:$0xff] }
 0x3e2   :  { %15041 = vmatprep.mubr.msk.bf16.mxu0 %vm18169_vm4, %v21909_v13  ;;  %v7494_v28 = vpop.f32.mrf.mxu1  ;;  %15039 = vmatmul.mubr.msk.bf16.gmra.mxu1 %vm901_vm3, %v21911_v18  ;;  %v7387_v37 = vpop.f32.mrf.mxu0  ;;  %v2240_v13 = vsub.s32 4, %v21915_v12 }
 0x3e3   :  { %21908 = vst [vmem:[#allocation122_spill] sm:$0xff] %v19372_v56  ;;  %v19380_v26 = vadd.f32 %v7494_v28, %v7386_v9  ;;  %15045 = vmatprep.mubr.msk.bf16.mxu1 %vm18169_vm4, %v21913_v45  ;;  %v7388_v24 = vadd.f32 %v7387_v37, %v19237_v23  ;;  %v2244_v9 = vsub.s32 5, %v21915_v12  ;;  %v17211_v23 = vld [vmem:[#allocation7 + $0xda8] ss:$28 sps:$4 sm:$0xff]  }
 0x3e4   :  { %v7496_v21 = vpop.f32.mrf.mxu1  ;;  %v7389_v33 = vpop.f32.mrf.mxu0  ;;  %v17648_v37 = vld [vmem:[#allocation8] sm:$0xff] }
 0x3e5   :  { %21912 = vst [vmem:[#allocation21_spill] sm:$0xff] %v19380_v26  ;;  %v19386_v15 = vadd.f32 %v7496_v21, %v7388_v24  ;;  %v19394_v45 = vrot.slane %v17648_v37, %v2240_v13  ;;  %v17210_v24 = vld [vmem:[#allocation7 + $0x868] ss:$28 sps:$4 sm:$0xff]   ;;  %v17215_v13 = vld [vmem:[#allocation7 + $0xd70] ss:$28 sps:$4 sm:$0xff]  }
 0x3e6   :  { %v7498_v56 = vpop.f32.mrf.mxu1  ;;  %v7390_v11 = vpop.f32.mrf.mxu0  ;;  %v17212_v33 = vld [vmem:[#allocation7 + $0xbe8] ss:$28 sps:$4 sm:$0xff]  }
 0x3e7   :  { %21914 = vst [vmem:[#allocation20_spill] sm:$0xff] %v19386_v15  ;;  %v21917_v11 = vld [vmem:[#allocation24_spill] sm:$0xff] }
 0x3e8   :  { %v7499_v28 = vpop.f32.mrf.mxu1  ;;  %v7535_v26 = vpop.f32.mrf.mxu0 }
 0x3e9   :  { %15043 = vmatmul.mubr.msk.bf16.vlgmr.msra.gmra.mxu0 %vm18169_vm4, %v21916_v42  ;;  %v17213_v26 = vld [vmem:[#allocation7 + $0x9f0] ss:$28 sps:$4 sm:$0xff]   ;;  %v19400_v42 = vrot.slane %v17648_v37, %v2244_v9 }
 0x3ea   :  { %15181 = vmatpush3.bf16.msra.mxu0 %v17206_v4  ;;  %8194 = vmatprep.mubr.bf16.mxu0 %v21766_v61  ;;  %v7644_v56 = vpop.f32.mrf.mxu1  ;;  %v7536_v21 = vpop.f32.mrf.mxu0 }
 0x3eb   :  { %15047 = vmatmul.mubr.msk.bf16.vlgmr.msra.gmra.mxu1 %vm18169_vm4, %v21917_v11  ;;  %15182 = vmatprep.subr.bf16.mxu0 %v17209_v38  ;;  %v17214_v56 = vld [vmem:[#allocation7 + $0x830] ss:$28 sps:$4 sm:$0xff]   ;;  %v17217_v11 = vld [vmem:[#allocation7 + $0x9b8] ss:$28 sps:$4 sm:$0xff]  }
 0x3ec   :  { %8289 = vmatprep.mubr.bf16.mxu1 %v21768_v22  ;;  %15245 = vmatpush3.bf16.msra.mxu1 %v17208_v8  ;;  %v7645_v4 = vpop.f32.mrf.mxu1  ;;  %v7537_v28 = vpop.f32.mrf.mxu0  ;;  %v17216_v8 = vld [vmem:[#allocation7 + $0xbb0] ss:$28 sps:$4 sm:$0xff]  }
 0x3ed   :  { %15246 = vmatprep.subr.bf16.mxu1 %v17211_v23  ;;  %v7538_v15 = vadd.f32 %v7537_v28, %v19394_v45  ;;  %v17219_v23 = vld [vmem:[#allocation7 + $0xd38] ss:$28 sps:$4 sm:$0xff]  }
 0x3ee   :  { %15183 = vmatpush3.bf16.msra.mxu0 %v17210_v24  ;;  %v7646_v29 = vpop.f32.mrf.mxu1  ;;  %v7539_v3 = vpop.f32.mrf.mxu0 }
 0x3ef   :  { %15184 = vmatprep.subr.bf16.mxu0 %v17213_v26  ;;  %v19403_v38 = vadd.f32 %v7646_v29, %v7538_v15  ;;  %v7540_v21 = vadd.f32 %v7539_v3, %v19400_v42  ;;  %v17218_v26 = vld [vmem:[#allocation7 + $0x7f8] ss:$28 sps:$4 sm:$0xff]  }
 0x3f0   :  { %15247 = vmatpush3.bf16.msra.mxu1 %v17212_v33  ;;  %v7648_v9 = vpop.f32.mrf.mxu1  ;;  %v7543_v37 = vpop.f32.mrf.mxu0  ;;  %v17221_v33 = vld [vmem:[#allocation7 + $0x980] ss:$28 sps:$4 sm:$0xff]   ;;  %v17220_v3 = vld [vmem:[#allocation7 + $0xb78] ss:$28 sps:$4 sm:$0xff]  }
 0x3f1   :  { %8195 = vmatmul.mubr.bf16.gmra.mxu0 %v21769_v32  ;;  %15248 = vmatprep.subr.bf16.mxu1 %v17215_v13  ;;  %v19407_v4 = vadd.f32 %v7648_v9, %v7540_v21  ;;  %v7544_v24 = vadd.f32 %v7543_v37, %v19394_v45  ;;  %v17223_v37 = vld [vmem:[#allocation7 + $0xd00] ss:$28 sps:$4 sm:$0xff]  }
 0x3f2   :  { %8202 = vmatprep.mubr.bf16.mxu0 %v21770_v60  ;;  %15185 = vmatpush3.bf16.msra.mxu0 %v17214_v56  ;;  %v7652_v29 = vpop.f32.mrf.mxu1  ;;  %v7545_v15 = vpop.f32.mrf.mxu0 }
 0x3f3   :  { %8290 = vmatmul.mubr.bf16.gmra.mxu1 %v21771_v30  ;;  %15186 = vmatprep.subr.bf16.mxu0 %v17217_v11  ;;  %v19412_v28 = vadd.f32 %v7652_v29, %v7544_v24  ;;  %v7546_v13 = vadd.f32 %v7545_v15, %v19400_v42  ;;  %v17225_v24 = vld [vmem:[#allocation7 + $0x948] ss:$28 sps:$4 sm:$0xff]  }
 0x3f4   :  { %8297 = vmatprep.mubr.bf16.mxu1 %v21772_v35  ;;  %15249 = vmatpush3.bf16.msra.mxu1 %v17216_v8  ;;  %v7654_v21 = vpop.f32.mrf.mxu1  ;;  %v7547_v9 = vpop.f32.mrf.mxu0  ;;  %v17224_v8 = vld [vmem:[#allocation7 + $0xb40] ss:$28 sps:$4 sm:$0xff]  }
 0x3f5   :  { %15250 = vmatprep.subr.bf16.mxu1 %v17219_v23  ;;  %v19416_v56 = vadd.f32 %v7654_v21, %v7546_v13  ;;  %v7548_v6 = vadd.f32 %v7547_v9, %v19394_v45  ;;  %v17227_v23 = vld [vmem:[#allocation7 + $0xcc8] ss:$28 sps:$4 sm:$0xff]  }
 0x3f6   :  { %15187 = vmatpush3.bf16.msra.mxu0 %v17218_v26  ;;  %v7656_v11 = vpop.f32.mrf.mxu1  ;;  %v7549_v12 = vpop.f32.mrf.mxu0 }
 0x3f7   :  { %15188 = vmatprep.subr.bf16.mxu0 %v17221_v33  ;;  %v19419_v29 = vadd.f32 %v7656_v11, %v7548_v6  ;;  %v7550_v15 = vadd.f32 %v7549_v12, %v19400_v42  ;;  %v17226_v33 = vld [vmem:[#allocation7 + $0x788] ss:$28 sps:$4 sm:$0xff]   ;;  %v17231_v11 = vld [vmem:[#allocation7 + $0xc90] ss:$28 sps:$4 sm:$0xff]  }
 0x3f8   :  { %15251 = vmatpush3.bf16.msra.mxu1 %v17220_v3  ;;  %v7658_v18 = vpop.f32.mrf.mxu1  ;;  %v7553_v27 = vpop.f32.mrf.mxu0  ;;  %v17229_v3 = vld [vmem:[#allocation7 + $0x910] ss:$28 sps:$4 sm:$0xff]  }
 0x3f9   :  { %8203 = vmatmul.mubr.bf16.gmra.mxu0 %v21774_v44  ;;  %15252 = vmatprep.subr.bf16.mxu1 %v17223_v37  ;;  %v19423_v13 = vadd.f32 %v7658_v18, %v7550_v15  ;;  %v7554_v26 = vadd.f32 %v7553_v27, %v19394_v45  ;;  %v17228_v18 = vld [vmem:[#allocation7 + $0xb08] ss:$28 sps:$4 sm:$0xff]  }
 0x3fa   :  { %8210 = vmatprep.mubr.bf16.mxu0 %v21858_v47  ;;  %15189 = vmatpush3.bf16.msra.mxu0 %v17222_v48  ;;  %v7662_v6 = vpop.f32.mrf.mxu1  ;;  %v7555_v12 = vpop.f32.mrf.mxu0 }
 0x3fb   :  { %8298 = vmatmul.mubr.bf16.gmra.mxu1 %v21859_v31  ;;  %15190 = vmatprep.subr.bf16.mxu0 %v17225_v24  ;;  %v19428_v21 = vadd.f32 %v7662_v6, %v7554_v26  ;;  %v7556_v9 = vadd.f32 %v7555_v12, %v19400_v42  ;;  %v17233_v26 = vld [vmem:[#allocation7 + $0x8d8] ss:$28 sps:$4 sm:$0xff]  }
 0x3fc   :  { %8305 = vmatprep.mubr.bf16.mxu1 %v21861_v63  ;;  %15253 = vmatpush3.bf16.msra.mxu1 %v17224_v8  ;;  %v7664_v37 = vpop.f32.mrf.mxu1  ;;  %v7557_v27 = vpop.f32.mrf.mxu0  ;;  %v17232_v8 = vld [vmem:[#allocation7 + $0xad0] ss:$28 sps:$4 sm:$0xff]  }
 0x3fd   :  { %15254 = vmatprep.subr.bf16.mxu1 %v17227_v23  ;;  %v19432_v48 = vadd.f32 %v7664_v37, %v7556_v9  ;;  %v7558_v15 = vadd.f32 %v7557_v27, %v19394_v45  ;;  %v17235_v23 = vld [vmem:[#allocation7 + $0xc58] ss:$28 sps:$4 sm:$0xff]  }
 0x3fe   :  { %15191 = vmatpush3.bf16.msra.mxu0 %v17226_v33  ;;  %v7666_v24 = vpop.f32.mrf.mxu1  ;;  %v7559_v7 = vpop.f32.mrf.mxu0 }
 0x3ff   :  { %15192 = vmatprep.subr.bf16.mxu0 %v17229_v3  ;;  %v19435_v6 = vadd.f32 %v7666_v24, %v7558_v15  ;;  %v7560_v12 = vadd.f32 %v7559_v7, %v19400_v42  ;;  %v17234_v3 = vld [vmem:[#allocation7 + $0x718] ss:$28 sps:$4 sm:$0xff]   ;;  %v17239_v24 = vld [vmem:[#allocation7 + $0x14e0] ss:$28 sps:$4 sm:$0xff]  }
 0x400   :  { %15255 = vmatpush3.bf16.msra.mxu1 %v17228_v18  ;;  %v7668_v39 = vpop.f32.mrf.mxu1  ;;  %v7563_v14 = vpop.f32.mrf.mxu0  ;;  %v17237_v18 = vld [vmem:[#allocation7 + $0x1160] ss:$28 sps:$4 sm:$0xff]  }
 0x401   :  { %8211 = vmatmul.mubr.bf16.gmra.mxu0 %v21782_v2  ;;  %15256 = vmatprep.subr.bf16.mxu1 %v17231_v11  ;;  %v19439_v9 = vadd.f32 %v7668_v39, %v7560_v12  ;;  %v7564_v33 = vadd.f32 %v7563_v14, %v19394_v45  ;;  %v17236_v39 = vld [vmem:[#allocation7 + $0xa98] ss:$28 sps:$4 sm:$0xff]  }
 0x402   :  { %8218 = vmatprep.mubr.bf16.mxu0 %v21866_v1  ;;  %15193 = vmatpush3.bf16.msra.mxu0 %v17230_v43  ;;  %v7672_v37 = vpop.f32.mrf.mxu1  ;;  %v7565_v7 = vpop.f32.mrf.mxu0 }
 0x403   :  { %8306 = vmatmul.mubr.bf16.gmra.mxu1 %v21867_v59  ;;  %15194 = vmatprep.subr.bf16.mxu0 %v17233_v26  ;;  %v19444_v27 = vadd.f32 %v7672_v37, %v7564_v33  ;;  %v7566_v11 = vadd.f32 %v7565_v7, %v19400_v42 }
 0x404   :  { %8313 = vmatprep.mubr.bf16.mxu1 %v21869_v16  ;;  %15257 = vmatpush3.bf16.msra.mxu1 %v17232_v8  ;;  %v7674_v15 = vpop.f32.mrf.mxu1  ;;  %v7567_v14 = vpop.f32.mrf.mxu0 }
 0x405   :  { %15258 = vmatprep.subr.bf16.mxu1 %v17235_v23  ;;  %v19448_v43 = vadd.f32 %v7674_v15, %v7566_v11  ;;  %v7568_v12 = vadd.f32 %v7567_v14, %v19394_v45 }
 0x406   :  { %15195 = vmatpush3.bf16.msra.mxu0 %v17234_v3  ;;  %v7676_v49 = vpop.f32.mrf.mxu1  ;;  %v7569_v26 = vpop.f32.mrf.mxu0 }
 0x407   :  { %15308 = vmatprep.subr.bf16.mxu0 %v17237_v18  ;;  %v19451_v33 = vadd.f32 %v7676_v49, %v7568_v12  ;;  %v7570_v37 = vadd.f32 %v7569_v26, %v19400_v42 }
 0x408   :  { %15259 = vmatpush3.bf16.msra.mxu1 %v17236_v39  ;;  %v7678_v7 = vpop.f32.mrf.mxu1  ;;  %v7573_v8 = vpop.f32.mrf.mxu0 }
 0x409   :  { %8219 = vmatmul.mubr.bf16.gmra.mxu0 %v21875_v10  ;;  %15372 = vmatprep.subr.bf16.mxu1 %v17239_v24  ;;  %v19455_v23 = vadd.f32 %v7678_v7, %v7570_v37  ;;  %v7574_v11 = vadd.f32 %v7573_v8, %v19394_v45 }
 0x40a   :  { %8226 = vmatprep.mubr.bf16.mxu0 %v21878_v55  ;;  %v7682_v3 = vpop.f32.mrf.mxu1  ;;  %v7575_v18 = vpop.f32.mrf.mxu0 }
 0x40b   :  { %8314 = vmatmul.mubr.bf16.gmra.mxu1 %v21879_v0  ;;  %v19460_v49 = vadd.f32 %v7682_v3, %v7574_v11  ;;  %v7576_v39 = vadd.f32 %v7575_v18, %v19400_v42 }
 0x40c   :  { %8321 = vmatprep.mubr.bf16.mxu1 %v21881_v51  ;;  %v7684_v15 = vpop.f32.mrf.mxu1  ;;  %v7577_v14 = vpop.f32.mrf.mxu0 }
 0x40d   :  { %v19464_v12 = vadd.f32 %v7684_v15, %v7576_v39  ;;  %v7578_v24 = vadd.f32 %v7577_v14, %v19394_v45 }
 0x40e   :  { %v7686_v26 = vpop.f32.mrf.mxu1  ;;  %v7579_v37 = vpop.f32.mrf.mxu0 }
 0x40f   :  { %v19467_v7 = vadd.f32 %v7686_v26, %v7578_v24  ;;  %v7580_v8 = vadd.f32 %v7579_v37, %v19400_v42 }
 0x410   :  { %v7688_v0 = vpop.f32.mrf.mxu1  ;;  %v7583_v55 = vpop.f32.mrf.mxu0 }
 0x411   :  { %8227 = vmatmul.mubr.bf16.gmra.mxu0 %v21884_v53  ;;  %v19471_v11 = vadd.f32 %v7688_v0, %v7580_v8  ;;  %v7584_v3 = vadd.f32 %v7583_v55, %v19394_v45 }
 0x412   :  { %8234 = vmatprep.mubr.bf16.mxu0 %v21886_v20  ;;  %v7692_v18 = vpop.f32.mrf.mxu1  ;;  %v7585_v39 = vpop.f32.mrf.mxu0 }
 0x413   :  { %8322 = vmatmul.mubr.bf16.gmra.mxu1 %v21887_v41  ;;  %v19476_v15 = vadd.f32 %v7692_v18, %v7584_v3  ;;  %v7586_v14 = vadd.f32 %v7585_v39, %v19400_v42 }
 0x414   :  { %8329 = vmatprep.mubr.bf16.mxu1 %v21889_v19  ;;  %v7694_v24 = vpop.f32.mrf.mxu1  ;;  %v7587_v26 = vpop.f32.mrf.mxu0 }
 0x415   :  { %v19480_v37 = vadd.f32 %v7694_v24, %v7586_v14  ;;  %v7588_v0 = vadd.f32 %v7587_v26, %v19394_v45 }
 0x416   :  { %v7696_v8 = vpop.f32.mrf.mxu1  ;;  %v7589_v55 = vpop.f32.mrf.mxu0 }
 0x417   :  { %v19483_v53 = vadd.f32 %v7696_v8, %v7588_v0  ;;  %v7590_v20 = vadd.f32 %v7589_v55, %v19400_v42 }
 0x418   :  { %v7698_v41 = vpop.f32.mrf.mxu1  ;;  %v7593_v51 = vpop.f32.mrf.mxu0 }
 0x419   :  { %8235 = vmatmul.mubr.bf16.gmra.mxu0 %v21892_v58  ;;  %v19487_v3 = vadd.f32 %v7698_v41, %v7590_v20  ;;  %v7594_v18 = vadd.f32 %v7593_v51, %v19394_v45 }
 0x41a   :  { %8242 = vmatprep.mubr.bf16.mxu0 %v21894_v36  ;;  %v7702_v39 = vpop.f32.mrf.mxu1  ;;  %v7595_v14 = vpop.f32.mrf.mxu0 }
 0x41b   :  { %8330 = vmatmul.mubr.bf16.gmra.mxu1 %v21895_v62  ;;  %v19492_v24 = vadd.f32 %v7702_v39, %v7594_v18  ;;  %v7596_v26 = vadd.f32 %v7595_v14, %v19400_v42  ;;  %v21918_v14 = vld [vmem:[#allocation19_spill] sm:$0xff] }
 0x41c   :  { %8337 = vmatprep.mubr.bf16.mxu1 %v21897_v50  ;;  %v7704_v0 = vpop.f32.mrf.mxu1  ;;  %v7597_v8 = vpop.f32.mrf.mxu0 }
 0x41d   :  { %v19496_v55 = vadd.f32 %v7704_v0, %v7596_v26  ;;  %v7598_v20 = vadd.f32 %v7597_v8, %v19394_v45 }
 0x41e   :  { %v7706_v41 = vpop.f32.mrf.mxu1  ;;  %v7599_v51 = vpop.f32.mrf.mxu0 }
 0x41f   :  { %v19499_v58 = vadd.f32 %v7706_v41, %v7598_v20  ;;  %v7600_v36 = vadd.f32 %v7599_v51, %v19400_v42 }
 0x420   :  { %v7708_v62 = vpop.f32.mrf.mxu1  ;;  %v7603_v19 = vpop.f32.mrf.mxu0 }
 0x421   :  { %8243 = vmatmul.mubr.bf16.gmra.mxu0 %v21813_v57  ;;  %v19503_v18 = vadd.f32 %v7708_v62, %v7600_v36  ;;  %v7604_v39 = vadd.f32 %v7603_v19, %v19394_v45  ;;  %v17238_v36 = vld [vmem:[#allocation7 + $0xfa0] ss:$28 sps:$4 sm:$0xff]   ;;  %v17241_v19 = vld [vmem:[#allocation7 + $0x1128] ss:$28 sps:$4 sm:$0xff]  }
 0x422   :  { %8377 = vmatprep.mubr.bf16.mxu0 %v21918_v14  ;;  %v7712_v26 = vpop.f32.mrf.mxu1  ;;  %v7605_v0 = vpop.f32.mrf.mxu0  ;;  %v17240_v45 = vld [vmem:[#allocation7 + $0x1320] ss:$28 sps:$4 sm:$0xff]  }
 0x423   :  { %8338 = vmatmul.mubr.bf16.gmra.mxu1 %v21902_v52  ;;  %v19508_v8 = vadd.f32 %v7712_v26, %v7604_v39  ;;  %v7606_v20 = vadd.f32 %v7605_v0, %v19400_v42  ;;  %v17243_v52 = vld [vmem:[#allocation7 + $0x14a8] ss:$28 sps:$4 sm:$0xff]   ;;  %v17245_v26 = vld [vmem:[#allocation7 + $0x10f0] ss:$28 sps:$4 sm:$0xff]  }
 0x424   :  { %8472 = vmatprep.mubr.bf16.mxu1 %v18166_v40  ;;  %v7714_v41 = vpop.f32.mrf.mxu1  ;;  %v7607_v51 = vpop.f32.mrf.mxu0  ;;  %v17242_v40 = vld [vmem:[#allocation7 + $0xf68] ss:$28 sps:$4 sm:$0xff]  }
 0x425   :  { %v19512_v50 = vadd.f32 %v7714_v41, %v7606_v20  ;;  %v17246_v41 = vld [vmem:[#allocation7 + $0xf30] ss:$28 sps:$4 sm:$0xff]  }
 0x426   :  { %v7716_v62 = vpop.f32.mrf.mxu1  ;;  %v7608_v57 = vpop.f32.mrf.mxu0 }
 0x427   :  { %v17244_v57 = vld [vmem:[#allocation7 + $0x12e8] ss:$28 sps:$4 sm:$0xff]  }
 0x428   :  { %v7717_v14 = vpop.f32.mrf.mxu1  ;;  %v7753_v10 = vpop.f32.mrf.mxu0 }
 0x429   :  { %8378 = vmatmul.mubr.bf16.vlgmr.msra.gmra.mxu0 %v18158_v34  ;;  %v17247_v10 = vld [vmem:[#allocation7 + $0x1470] ss:$28 sps:$4 sm:$0xff]   ;;  %v21919_v14 = vld [vmem:[#allocation25_spill] sm:$0xff] }
 0x42a   :  { %15309 = vmatpush3.bf16.msra.mxu0 %v17238_v36  ;;  %8384 = vmatprep.mubr.bf16.mxu0 %v18209_v5  ;;  %v7862_v39 = vpop.f32.mrf.mxu1  ;;  %v7754_v42 = vpop.f32.mrf.mxu0  ;;  %v17249_v36 = vld [vmem:[#allocation7 + $0x10b8] ss:$28 sps:$4 sm:$0xff]  }
 0x42b   :  { %8473 = vmatmul.mubr.bf16.vlgmr.msra.gmra.mxu1 %v18160_v17  ;;  %15310 = vmatprep.subr.bf16.mxu0 %v17241_v19  ;;  %v17250_v42 = vld [vmem:[#allocation7 + $0xef8] ss:$28 sps:$4 sm:$0xff]  }
 0x42c   :  { %8479 = vmatprep.mubr.bf16.mxu1 %v18211_v25  ;;  %15373 = vmatpush3.bf16.msra.mxu1 %v17240_v45  ;;  %v7863_v0 = vpop.f32.mrf.mxu1  ;;  %v7755_v20 = vpop.f32.mrf.mxu0  ;;  %v17248_v25 = vld [vmem:[#allocation7 + $0x12b0] ss:$28 sps:$4 sm:$0xff]  }
 0x42d   :  { %15374 = vmatprep.subr.bf16.mxu1 %v17243_v52  ;;  %v7756_v34 = vadd.f32 %v7755_v20, %v19403_v38  ;;  %v17251_v52 = vld [vmem:[#allocation7 + $0x1438] ss:$28 sps:$4 sm:$0xff]   ;;  %v21921_v0 = vld [vmem:[#allocation26_spill] sm:$0xff] }
 0x42e   :  { %15311 = vmatpush3.bf16.msra.mxu0 %v17242_v40  ;;  %v7864_v5 = vpop.f32.mrf.mxu1  ;;  %v7757_v51 = vpop.f32.mrf.mxu0  ;;  %v21920_v40 = vld [vmem:[#allocation33_spill] sm:$0xff] }
 0x42f   :  { %15312 = vmatprep.subr.bf16.mxu0 %v17245_v26  ;;  %v19519_v17 = vadd.f32 %v7864_v5, %v7756_v34  ;;  %v7758_v62 = vadd.f32 %v7757_v51, %v19407_v4  ;;  %v21922_v34 = vld [vmem:[#allocation34_spill] sm:$0xff]  ;;  %v17252_v5 = vld [vmem:[#allocation7 + $0x1278] ss:$28 sps:$4 sm:$0xff]  }
 0x430   :  { %15375 = vmatpush3.bf16.msra.mxu1 %v17244_v57  ;;  %v7866_v19 = vpop.f32.mrf.mxu1  ;;  %v7761_v45 = vpop.f32.mrf.mxu0  ;;  %v17253_v57 = vld [vmem:[#allocation7 + $0x1080] ss:$28 sps:$4 sm:$0xff]  }
 0x431   :  { %8385 = vmatmul.mubr.bf16.gmra.mxu0 %v21919_v14  ;;  %15376 = vmatprep.subr.bf16.mxu1 %v17247_v10  ;;  %v19523_v39 = vadd.f32 %v7866_v19, %v7758_v62  ;;  %v7762_v38 = vadd.f32 %v7761_v45, %v19412_v28  ;;  %v17254_v62 = vld [vmem:[#allocation7 + $0xec0] ss:$28 sps:$4 sm:$0xff]  }
 0x432   :  { %8392 = vmatprep.mubr.bf16.mxu0 %v21920_v40  ;;  %15313 = vmatpush3.bf16.msra.mxu0 %v17246_v41  ;;  %v7870_v26 = vpop.f32.mrf.mxu1  ;;  %v7763_v4 = vpop.f32.mrf.mxu0  ;;  %v17256_v14 = vld [vmem:[#allocation7 + $0x1240] ss:$28 sps:$4 sm:$0xff]   ;;  %v17257_v40 = vld [vmem:[#allocation7 + $0x1048] ss:$28 sps:$4 sm:$0xff]  }
 0x433   :  { %8480 = vmatmul.mubr.bf16.gmra.mxu1 %v21921_v0  ;;  %15314 = vmatprep.subr.bf16.mxu0 %v17249_v36  ;;  %v19528_v20 = vadd.f32 %v7870_v26, %v7762_v38  ;;  %v7764_v10 = vadd.f32 %v7763_v4, %v19416_v56  ;;  %v17255_v36 = vld [vmem:[#allocation7 + $0x1400] ss:$28 sps:$4 sm:$0xff]   ;;  %v21924_v0 = vld [vmem:[#allocation41_spill] sm:$0xff] }
 0x434   :  { %8487 = vmatprep.mubr.bf16.mxu1 %v21922_v34  ;;  %15377 = vmatpush3.bf16.msra.mxu1 %v17248_v25  ;;  %v7872_v51 = vpop.f32.mrf.mxu1  ;;  %v19534_v41 = vpop.f32.mrf.mxu0  ;;  %v21923_v25 = vld [vmem:[#allocation31_spill] sm:$0xff]  ;;  %v21925_v34 = vld [vmem:[#allocation32_spill] sm:$0xff] }
 0x435   :  { %15378 = vmatprep.subr.bf16.mxu1 %v17251_v52  ;;  %v19532_v28 = vadd.f32 %v7872_v51, %v7764_v10  ;;  %v17259_v52 = vld [vmem:[#allocation7 + $0x13c8] ss:$28 sps:$4 sm:$0xff]   ;;  %v17261_v10 = vld [vmem:[#allocation7 + $0x1010] ss:$28 sps:$4 sm:$0xff]  }
 0x436   :  { %15315 = vmatpush3.bf16.msra.mxu0 %v17250_v42  ;;  %v19536_v19 = vpop.f32.mrf.mxu1  ;;  %v7767_v45 = vpop.f32.mrf.mxu0  ;;  %v17258_v42 = vld [vmem:[#allocation7 + $0xe88] ss:$28 sps:$4 sm:$0xff]  }
 0x437   :  { %15316 = vmatprep.subr.bf16.mxu0 %v17253_v57  ;;  %v7768_v38 = vadd.f32 %v7767_v45, %v19423_v13  ;;  %v21926_v13 = vld [vmem:[#allocation42_spill] sm:$0xff]  ;;  %v17260_v51 = vld [vmem:[#allocation7 + $0x1208] ss:$28 sps:$4 sm:$0xff]  }
 0x438   :  { %15379 = vmatpush3.bf16.msra.mxu1 %v17252_v5  ;;  %v7876_v56 = vpop.f32.mrf.mxu1  ;;  %v19540_v26 = vpop.f32.mrf.mxu0 }
 0x439   :  { %8393 = vmatmul.mubr.bf16.gmra.mxu0 %v21923_v25  ;;  %v19543_v4 = vadd.f32 %v7876_v56, %v7768_v38  ;;  %15380 = vmatprep.subr.bf16.mxu1 %v17255_v36  ;;  %v17262_v38 = vld [vmem:[#allocation7 + $0xe50] ss:$28 sps:$4 sm:$0xff]  }
 0x43a   :  { %8400 = vmatprep.mubr.bf16.mxu0 %v21924_v0  ;;  %15317 = vmatpush3.bf16.msra.mxu0 %v17254_v62  ;;  %v19545_v57 = vpop.f32.mrf.mxu1  ;;  %v7773_v5 = vpop.f32.mrf.mxu0  ;;  %v17263_v62 = vld [vmem:[#allocation7 + $0x1390] ss:$28 sps:$4 sm:$0xff]  }
 0x43b   :  { %8488 = vmatmul.mubr.bf16.gmra.mxu1 %v21925_v34  ;;  %v7774_v45 = vadd.f32 %v7773_v5, %v19432_v48  ;;  %15318 = vmatprep.subr.bf16.mxu0 %v17257_v40 }
 0x43c   :  { %8495 = vmatprep.mubr.bf16.mxu1 %v21926_v13  ;;  %15381 = vmatpush3.bf16.msra.mxu1 %v17256_v14  ;;  %v7882_v25 = vpop.f32.mrf.mxu1  ;;  %v7775_v0 = vpop.f32.mrf.mxu0  ;;  %v17264_v14 = vld [vmem:[#allocation7 + $0x11d0] ss:$28 sps:$4 sm:$0xff]  }
 0x43d   :  { %15382 = vmatprep.subr.bf16.mxu1 %v17259_v52  ;;  %v19550_v56 = vadd.f32 %v7882_v25, %v7774_v45  ;;  %v7776_v34 = vadd.f32 %v7775_v0, %v19435_v6  ;;  %v21927_v52 = vld [vmem:[#allocation39_spill] sm:$0xff]  ;;  %v21928_v45 = vld [vmem:[#allocation49_spill] sm:$0xff]  ;;  %v21929_v0 = vld [vmem:[#allocation40_spill] sm:$0xff] }
 0x43e   :  { %15319 = vmatpush3.bf16.msra.mxu0 %v17258_v42  ;;  %v7884_v36 = vpop.f32.mrf.mxu1  ;;  %v7777_v13 = vpop.f32.mrf.mxu0  ;;  %v17267_v42 = vld [vmem:[#allocation7 + $0x1358] ss:$28 sps:$4 sm:$0xff]  }
 0x43f   :  { %15320 = vmatprep.subr.bf16.mxu0 %v17261_v10  ;;  %v19553_v16 = vadd.f32 %v7884_v36, %v7776_v34  ;;  %v7778_v48 = vadd.f32 %v7777_v13, %v19439_v9  ;;  %v17266_v6 = vld [vmem:[#allocation7 + $0xe18] ss:$28 sps:$4 sm:$0xff]   ;;  %v17269_v34 = vld [vmem:[#allocation10 + $0x218] sm:$0xff]   ;;  %v21930_v9 = vld [vmem:[#allocation50_spill] sm:$0xff] }
 0x440   :  { %15383 = vmatpush3.bf16.msra.mxu1 %v17260_v51  ;;  %v7886_v40 = vpop.f32.mrf.mxu1  ;;  %v7781_v5 = vpop.f32.mrf.mxu0 }
 0x441   :  { %8401 = vmatmul.mubr.bf16.gmra.mxu0 %v21927_v52  ;;  %15384 = vmatprep.subr.bf16.mxu1 %v17263_v62  ;;  %v19558_v25 = vadd.f32 %v7886_v40, %v7778_v48  ;;  %v7782_v10 = vadd.f32 %v7781_v5, %v19444_v27  ;;  %v17268_v62 = vld [vmem:[#allocation7 + $0x1198] ss:$28 sps:$4 sm:$0xff]  }
 0x442   :  { %8408 = vmatprep.mubr.bf16.mxu0 %v21928_v45  ;;  %15321 = vmatpush3.bf16.msra.mxu0 %v17262_v38  ;;  %v7890_v51 = vpop.f32.mrf.mxu1  ;;  %v7783_v36 = vpop.f32.mrf.mxu0 }
 0x443   :  { %8496 = vmatmul.mubr.bf16.gmra.mxu1 %v21929_v0  ;;  %15322 = vmatprep.subr.bf16.mxu0 %v17265_v46  ;;  %v19563_v13 = vadd.f32 %v7890_v51, %v7782_v10  ;;  %v7784_v52 = vadd.f32 %v7783_v36, %v19448_v43  ;;  %v21931_v51 = vld [vmem:[#allocation47_spill] sm:$0xff]  ;;  %v21932_v0 = vld [vmem:[#allocation57_spill] sm:$0xff] }
 0x444   :  { %8503 = vmatprep.mubr.bf16.mxu1 %v21930_v9  ;;  %15385 = vmatpush3.bf16.msra.mxu1 %v17264_v14  ;;  %v7892_v38 = vpop.f32.mrf.mxu1  ;;  %v7785_v48 = vpop.f32.mrf.mxu0 }
 0x445   :  { %15386 = vmatprep.subr.bf16.mxu1 %v17267_v42  ;;  %v19566_v40 = vadd.f32 %v7892_v38, %v7784_v52  ;;  %v7786_v27 = vadd.f32 %v7785_v48, %v19451_v33  ;;  %v21933_v33 = vld [vmem:[#allocation48_spill] sm:$0xff] }
 0x446   :  { %15323 = vmatpush3.bf16.msra.mxu0 %v17266_v6  ;;  %v7894_v5 = vpop.f32.mrf.mxu1  ;;  %v7787_v46 = vpop.f32.mrf.mxu0 }
 0x447   :  { %15436 = vmatprep.subr.bf16.mxu0 %v17269_v34  ;;  %v19569_v45 = vadd.f32 %v7894_v5, %v7786_v27  ;;  %v7788_v14 = vadd.f32 %v7787_v46, %v19455_v23  ;;  %v21934_v34 = vld [vmem:[#allocation58_spill] sm:$0xff] }
 0x448   :  { %15387 = vmatpush3.bf16.msra.mxu1 %v17268_v62  ;;  %v7896_v10 = vpop.f32.mrf.mxu1  ;;  %v7791_v43 = vpop.f32.mrf.mxu0 }
 0x449   :  { %8409 = vmatmul.mubr.bf16.gmra.mxu0 %v21931_v51  ;;  %v19574_v42 = vadd.f32 %v7896_v10, %v7788_v14  ;;  %v7792_v6 = vadd.f32 %v7791_v43, %v19460_v49  ;;  %v21935_v51 = vld [vmem:[#allocation55_spill] sm:$0xff] }
 0x44a   :  { %8416 = vmatprep.mubr.bf16.mxu0 %v21932_v0  ;;  %v7900_v9 = vpop.f32.mrf.mxu1  ;;  %v7793_v36 = vpop.f32.mrf.mxu0  ;;  %v21936_v0 = vld [vmem:[#allocation65_spill] sm:$0xff] }
 0x44b   :  { %8504 = vmatmul.mubr.bf16.gmra.mxu1 %v21933_v33  ;;  %v19579_v62 = vadd.f32 %v7900_v9, %v7792_v6  ;;  %v7794_v23 = vadd.f32 %v7793_v36, %v19464_v12  ;;  %v21937_v33 = vld [vmem:[#allocation56_spill] sm:$0xff] }
 0x44c   :  { %8511 = vmatprep.mubr.bf16.mxu1 %v21934_v34  ;;  %v7902_v52 = vpop.f32.mrf.mxu1  ;;  %v7795_v38 = vpop.f32.mrf.mxu0 }
 0x44d   :  { %v19582_v48 = vadd.f32 %v7902_v52, %v7794_v23  ;;  %v7796_v27 = vadd.f32 %v7795_v38, %v19467_v7  ;;  %v21938_v7 = vld [vmem:[#allocation66_spill] sm:$0xff] }
 0x44e   :  { %v7904_v5 = vpop.f32.mrf.mxu1  ;;  %v7797_v46 = vpop.f32.mrf.mxu0 }
 0x44f   :  { %v19585_v14 = vadd.f32 %v7904_v5, %v7796_v27  ;;  %v7798_v49 = vadd.f32 %v7797_v46, %v19471_v11 }
 0x450   :  { %v7906_v10 = vpop.f32.mrf.mxu1  ;;  %v7801_v43 = vpop.f32.mrf.mxu0 }
 0x451   :  { %8417 = vmatmul.mubr.bf16.gmra.mxu0 %v21935_v51  ;;  %v19590_v6 = vadd.f32 %v7906_v10, %v7798_v49  ;;  %v7802_v12 = vadd.f32 %v7801_v43, %v19476_v15  ;;  %v21939_v51 = vld [vmem:[#allocation63_spill] sm:$0xff] }
 0x452   :  { %8424 = vmatprep.mubr.bf16.mxu0 %v21936_v0  ;;  %v7910_v9 = vpop.f32.mrf.mxu1  ;;  %v7803_v34 = vpop.f32.mrf.mxu0  ;;  %v21940_v0 = vld [vmem:[#allocation73_spill] sm:$0xff] }
 0x453   :  { %8512 = vmatmul.mubr.bf16.gmra.mxu1 %v21937_v33  ;;  %v19595_v36 = vadd.f32 %v7910_v9, %v7802_v12  ;;  %v7804_v11 = vadd.f32 %v7803_v34, %v19480_v37  ;;  %v21942_v33 = vld [vmem:[#allocation64_spill] sm:$0xff] }
 0x454   :  { %8519 = vmatprep.mubr.bf16.mxu1 %v21938_v7  ;;  %v7912_v23 = vpop.f32.mrf.mxu1  ;;  %v7805_v52 = vpop.f32.mrf.mxu0 }
 0x455   :  { %v19598_v38 = vadd.f32 %v7912_v23, %v7804_v11  ;;  %v7806_v27 = vadd.f32 %v7805_v52, %v19483_v53  ;;  %v21943_v53 = vld [vmem:[#allocation74_spill] sm:$0xff] }
 0x456   :  { %v7914_v5 = vpop.f32.mrf.mxu1  ;;  %v7807_v46 = vpop.f32.mrf.mxu0 }
 0x457   :  { %v19601_v49 = vadd.f32 %v7914_v5, %v7806_v27  ;;  %v7808_v15 = vadd.f32 %v7807_v46, %v19487_v3  ;;  %v17285_v46 = vld [vmem:[#allocation10 + $0x298] sm:$0xff]  }
 0x458   :  { %v7916_v10 = vpop.f32.mrf.mxu1  ;;  %v7811_v43 = vpop.f32.mrf.mxu0  ;;  %15458 = vmatprep.subr.bf16.mxu1 %v17285_v46 }
 0x459   :  { %8425 = vmatmul.mubr.bf16.gmra.mxu0 %v21939_v51  ;;  %v19606_v12 = vadd.f32 %v7916_v10, %v7808_v15  ;;  %v7812_v37 = vadd.f32 %v7811_v43, %v19492_v24 }
 0x45a   :  { %8432 = vmatprep.mubr.bf16.mxu0 %v21940_v0  ;;  %v7920_v9 = vpop.f32.mrf.mxu1  ;;  %v7813_v7 = vpop.f32.mrf.mxu0 }
 0x45b   :  { %21941 = vst [vmem:[#allocation22_spill] sm:$0xff] %v19606_v12  ;;  %8520 = vmatmul.mubr.bf16.gmra.mxu1 %v21942_v33  ;;  %v19611_v34 = vadd.f32 %v7920_v9, %v7812_v37  ;;  %v7814_v3 = vadd.f32 %v7813_v7, %v19496_v55  ;;  %v17270_v7 = vld [vmem:[#allocation10 + $0x1d8] sm:$0xff]  }
 0x45c   :  { %8527 = vmatprep.mubr.bf16.mxu1 %v21943_v53  ;;  %v7922_v11 = vpop.f32.mrf.mxu1  ;;  %v7815_v23 = vpop.f32.mrf.mxu0 }
 0x45d   :  { %v19614_v52 = vadd.f32 %v7922_v11, %v7814_v3  ;;  %v7816_v27 = vadd.f32 %v7815_v23, %v19499_v58  ;;  %v21945_v58 = vld [vmem:[#allocation72_spill] sm:$0xff] }
 0x45e   :  { %v7924_v5 = vpop.f32.mrf.mxu1  ;;  %v7817_v15 = vpop.f32.mrf.mxu0  ;;  %v17271_v11 = vld [vmem:[#allocation10 + $0x210] sm:$0xff]  }
 0x45f   :  { %v19617_v24 = vadd.f32 %v7924_v5, %v7816_v27  ;;  %v7818_v10 = vadd.f32 %v7817_v15, %v19503_v18  ;;  %v17286_v27 = vld [vmem:[#allocation10 + $0x258] sm:$0xff]   ;;  %v17287_v5 = vld [vmem:[#allocation10 + $0x290] sm:$0xff]  }
 0x460   :  { %v7926_v51 = vpop.f32.mrf.mxu1  ;;  %v7821_v43 = vpop.f32.mrf.mxu0 }
 0x461   :  { %8433 = vmatmul.mubr.bf16.gmra.mxu0 %v21854_v54  ;;  %v19622_v55 = vadd.f32 %v7926_v51, %v7818_v10  ;;  %v7822_v0 = vadd.f32 %v7821_v43, %v19508_v8  ;;  %v17288_v51 = vld [vmem:[#allocation10 + $0x250] sm:$0xff]  }
 0x462   :  { %8567 = vmatprep.mubr.bf16.mxu0 %v21766_v61  ;;  %v7930_v37 = vpop.f32.mrf.mxu1  ;;  %v7823_v9 = vpop.f32.mrf.mxu0 }
 0x463   :  { %21944 = vst [vmem:[#allocation23_spill] sm:$0xff] %v19622_v55  ;;  %8528 = vmatmul.mubr.bf16.gmra.mxu1 %v21945_v58  ;;  %v19627_v33 = vadd.f32 %v7930_v37, %v7822_v0  ;;  %v7824_v18 = vadd.f32 %v7823_v9, %v19512_v50  ;;  %v17273_v50 = vld [vmem:[#allocation10 + $0x208] sm:$0xff]   ;;  %v17275_v9 = vld [vmem:[#allocation10 + $0x200] sm:$0xff]  }
 0x464   :  { %8662 = vmatprep.mubr.bf16.mxu1 %v21768_v22  ;;  %v7932_v53 = vpop.f32.mrf.mxu1  ;;  %v7825_v54 = vpop.f32.mrf.mxu0  ;;  %v17272_v22 = vld [vmem:[#allocation10 + $0x1d0] sm:$0xff]   ;;  %v17289_v0 = vld [vmem:[#allocation10 + $0x288] sm:$0xff]  }
 0x465   :  { %v19630_v3 = vadd.f32 %v7932_v53, %v7824_v18  ;;  %v17274_v37 = vld [vmem:[#allocation10 + $0x1c8] sm:$0xff]  }
 0x466   :  { %v7934_v61 = vpop.f32.mrf.mxu1  ;;  %v7826_v23 = vpop.f32.mrf.mxu0 }
 0x467   :  { %v17291_v61 = vld [vmem:[#allocation10 + $0x280] sm:$0xff]  }
 0x468   :  { %v7935_v8 = vpop.f32.mrf.mxu1  ;;  %v7971_v46 = vpop.f32.mrf.mxu0 }
 0x469   :  { %8568 = vmatmul.mubr.bf16.vlgmr.msra.gmra.mxu0 %v21769_v32 }
 0x46a   :  { %8574 = vmatprep.mubr.bf16.mxu0 %v21770_v60  ;;  %15437 = vmatpush3.bf16.msra.mxu0 %v17270_v7  ;;  %v8080_v15 = vpop.f32.mrf.mxu1  ;;  %v7972_v10 = vpop.f32.mrf.mxu0 }
 0x46b   :  { %8663 = vmatmul.mubr.bf16.vlgmr.msra.gmra.mxu1 %v21771_v30  ;;  %15438 = vmatprep.subr.bf16.mxu0 %v17271_v11  ;;  %v17290_v30 = vld [vmem:[#allocation10 + $0x248] sm:$0xff]   ;;  %v17278_v15 = vld [vmem:[#allocation10 + $0x1b8] sm:$0xff]  }
 0x46c   :  { %8669 = vmatprep.mubr.bf16.mxu1 %v21772_v35  ;;  %15459 = vmatpush3.bf16.msra.mxu1 %v17286_v27  ;;  %v8081_v43 = vpop.f32.mrf.mxu1  ;;  %v7973_v32 = vpop.f32.mrf.mxu0  ;;  %v7766_v35 = vadd.f32 %v19534_v41, %v19419_v29  ;;  %v17277_v29 = vld [vmem:[#allocation10 + $0x1f8] sm:$0xff]  }
 0x46d   :  { %15460 = vmatprep.subr.bf16.mxu1 %v17287_v5  ;;  %v7974_v60 = vadd.f32 %v7973_v32, %v19519_v17  ;;  %v17276_v17 = vld [vmem:[#allocation10 + $0x1c0] sm:$0xff]   ;;  %v17294_v43 = vld [vmem:[#allocation10 + $0x238] sm:$0xff]   ;;  %v17295_v32 = vld [vmem:[#allocation10 + $0x270] sm:$0xff]  }
 0x46e   :  { %15439 = vmatpush3.bf16.msra.mxu0 %v17272_v22  ;;  %v8082_v58 = vpop.f32.mrf.mxu1  ;;  %v7975_v18 = vpop.f32.mrf.mxu0  ;;  %v7875_v41 = vadd.f32 %v19536_v19, %v7766_v35  ;;  %v17293_v22 = vld [vmem:[#allocation10 + $0x278] sm:$0xff]  }
 0x46f   :  { %15440 = vmatprep.subr.bf16.mxu0 %v17273_v50  ;;  %v19639_v53 = vadd.f32 %v8082_v58, %v7974_v60  ;;  %v7976_v54 = vadd.f32 %v7975_v18, %v19523_v39  ;;  %v17280_v60 = vld [vmem:[#allocation10 + $0x1b0] sm:$0xff]  }
 0x470   :  { %15461 = vmatpush3.bf16.msra.mxu1 %v17288_v51  ;;  %v8084_v7 = vpop.f32.mrf.mxu1  ;;  %v7979_v11 = vpop.f32.mrf.mxu0  ;;  %v17279_v51 = vld [vmem:[#allocation10 + $0x1f0] sm:$0xff]  }
 0x471   :  { %21946 = vst [vmem:[#allocation24_spill] sm:$0xff] %v19639_v53  ;;  %8575 = vmatmul.mubr.bf16.gmra.mxu0 %v21774_v44  ;;  %15462 = vmatprep.subr.bf16.mxu1 %v17289_v0  ;;  %v19644_v23 = vadd.f32 %v8084_v7, %v7976_v54  ;;  %v7980_v27 = vadd.f32 %v7979_v11, %v19528_v20  ;;  %v17292_v44 = vld [vmem:[#allocation10 + $0x240] sm:$0xff]   ;;  %v21951_v58 = vld [vmem:[#allocation104_spill] sm:$0xff] }
 0x472   :  { %8582 = vmatprep.mubr.bf16.mxu0 %v21858_v47  ;;  %15441 = vmatpush3.bf16.msra.mxu0 %v17274_v37  ;;  %v8088_v8 = vpop.f32.mrf.mxu1  ;;  %v7981_v39 = vpop.f32.mrf.mxu0  ;;  %v7772_v47 = vadd.f32 %v19540_v26, %v19428_v21  ;;  %v17296_v7 = vld [vmem:[#allocation10 + $0x230] sm:$0xff]  }
 0x473   :  { %21947 = vst [vmem:[#allocation19_spill] sm:$0xff] %v19644_v23  ;;  %8670 = vmatmul.mubr.bf16.gmra.mxu1 %v21859_v31  ;;  %15442 = vmatprep.subr.bf16.mxu0 %v17275_v9  ;;  %v19652_v5 = vadd.f32 %v8088_v8, %v7980_v27  ;;  %v7982_v46 = vadd.f32 %v7981_v39, %v19532_v28  ;;  %v21494_v9 = vmax.f32 %v21951_v58, 0.0  ;;  %v17297_v27 = vld [vmem:[#allocation10 + $0x268] sm:$0xff]  }
 0x474   :  { %8677 = vmatprep.mubr.bf16.mxu1 %v21861_v63  ;;  %15463 = vmatpush3.bf16.msra.mxu1 %v17290_v30  ;;  %v8090_v20 = vpop.f32.mrf.mxu1  ;;  %v7983_v31 = vpop.f32.mrf.mxu0  ;;  %v7881_v21 = vadd.f32 %v19545_v57, %v7772_v47  ;;  %v17282_v8 = vld [vmem:[#allocation10 + $0x1a8] sm:$0xff]  }
 0x475   :  { %21948 = vst [vmem:[#allocation25_spill] sm:$0xff] %v19652_v5  ;;  %15464 = vmatprep.subr.bf16.mxu1 %v17291_v61  ;;  %v19655_v50 = vadd.f32 %v8090_v20, %v7982_v46  ;;  %v7984_v63 = vadd.f32 %v7983_v31, %v7875_v41  ;;  %v17283_v20 = vld [vmem:[#allocation10 + $0x1e0] sm:$0xff]  }
 0x476   :  { %15443 = vmatpush3.bf16.msra.mxu0 %v17276_v17  ;;  %v8092_v10 = vpop.f32.mrf.mxu1  ;;  %v7985_v19 = vpop.f32.mrf.mxu0 }
 0x477   :  { %21949 = vst [vmem:[#allocation33_spill] sm:$0xff] %v19655_v50  ;;  %15444 = vmatprep.subr.bf16.mxu0 %v17277_v29  ;;  %v19658_v26 = vadd.f32 %v8092_v10, %v7984_v63  ;;  %v7986_v28 = vadd.f32 %v7985_v19, %v19543_v4  ;;  %v17281_v4 = vld [vmem:[#allocation10 + $0x1e8] sm:$0xff]   ;;  %v21959_v19 = vld [vmem:[#allocation60_spill] sm:$0xff] }
 0x478   :  { %15465 = vmatpush3.bf16.msra.mxu1 %v17292_v44  ;;  %v8094_v0 = vpop.f32.mrf.mxu1  ;;  %v7989_v37 = vpop.f32.mrf.mxu0  ;;  %v21955_v29 = vld [vmem:[#allocation46_spill] sm:$0xff]  ;;  %v21958_v63 = vld [vmem:[#allocation51_spill] sm:$0xff] }
 0x479   :  { %21950 = vst [vmem:[#allocation26_spill] sm:$0xff] %v19658_v26  ;;  %8583 = vmatmul.mubr.bf16.gmra.mxu0 %v21782_v2  ;;  %15466 = vmatprep.subr.bf16.mxu1 %v17293_v22  ;;  %v21492_v18 = vmax.f32 %v19658_v26, 0.0  ;;  %v19665_v30 = vadd.f32 %v8094_v0, %v7986_v28  ;;  %v7990_v57 = vadd.f32 %v7989_v37, %v7881_v21  ;;  %v21953_v2 = vld [vmem:[#allocation53_spill] sm:$0xff]  ;;  %v21493_v39 = vmax.f32 %v21955_v29, 0.0 }
 0x47a   :  { %8590 = vmatprep.mubr.bf16.mxu0 %v21866_v1  ;;  %15445 = vmatpush3.bf16.msra.mxu0 %v17278_v15  ;;  %v8098_v35 = vpop.f32.mrf.mxu1  ;;  %v7991_v54 = vpop.f32.mrf.mxu0  ;;  %v17299_v21 = vld [vmem:[#allocation10 + $0x260] sm:$0xff]  }
 0x47b   :  { %21952 = vst [vmem:[#allocation34_spill] sm:$0xff] %v19665_v30  ;;  %8678 = vmatmul.mubr.bf16.gmra.mxu1 %v21867_v59  ;;  %15446 = vmatprep.subr.bf16.mxu0 %v17279_v51  ;;  %v19669_v1 = vadd.f32 %v8098_v35, %v7990_v57  ;;  %v7992_v61 = vadd.f32 %v7991_v54, %v19550_v56  ;;  %v21962_v37 = vld [vmem:[#allocation61_spill] sm:$0xff] }
 0x47c   :  { %8685 = vmatprep.mubr.bf16.mxu1 %v21953_v2  ;;  %15467 = vmatpush3.bf16.msra.mxu1 %v17294_v43  ;;  %v8100_v11 = vpop.f32.mrf.mxu1  ;;  %v16078_v17 = vpack.i.bf16 %v21492_v18, %v21494_v9  ;;  %v7993_v59 = vpop.f32.mrf.mxu0  ;;  %v17284_v43 = vld [vmem:[#allocation10 + $0x1a0] sm:$0xff]  }
 0x47d   :  { %21954 = vst [vmem:[#allocation31_spill] sm:$0xff] %v19669_v1  ;;  %15468 = vmatprep.subr.bf16.mxu1 %v17295_v32  ;;  %v21491_v44 = vmax.f32 %v19669_v1, 0.0  ;;  %v19678_v41 = vadd.f32 %v8100_v11, %v7992_v61  ;;  %v7994_v47 = vadd.f32 %v7993_v59, %v19553_v16  ;;  %v17298_v16 = vld [vmem:[#allocation10 + $0x228] sm:$0xff]   ;;  %v17300_v2 = vld [vmem:[#allocation10 + $0x220] sm:$0xff]  }
 0x47e   :  { %15447 = vmatpush3.bf16.msra.mxu0 %v17280_v60  ;;  %v8102_v56 = vpop.f32.mrf.mxu1  ;;  %16079 = vrot.lane.b32.xlu1 %v16078_v17, %s17808_s18  ;;  %v7995_v46 = vpop.f32.mrf.mxu0  ;;  %v21961_v32 = vld [vmem:[#allocation54_spill] sm:$0xff] }
 0x47f   :  { %21956 = vst [vmem:[#allocation41_spill] sm:$0xff] %v19678_v41  ;;  %15448 = vmatprep.subr.bf16.mxu0 %v17281_v4  ;;  %v19682_v22 = vadd.f32 %v8102_v56, %v7994_v47  ;;  %v7996_v31 = vadd.f32 %v7995_v46, %v19558_v25  ;;  %v16083_v10 = vpack.i.bf16 %v21491_v44, %v21493_v39  ;;  %v21967_v47 = vld [vmem:[#allocation68_spill] sm:$0xff]  ;;  %v21968_v56 = vmov 0.0  }
 0x480   :  { %15469 = vmatpush3.bf16.msra.mxu1 %v17296_v7  ;;  %v8104_v15 = vpop.f32.mrf.mxu1  ;;  %v7999_v51 = vpop.f32.mrf.mxu0 }
 0x481   :  { %21957 = vst [vmem:[#allocation32_spill] sm:$0xff] %v19682_v22  ;;  %8591 = vmatmul.mubr.bf16.gmra.mxu0 %v21958_v63  ;;  %15470 = vmatprep.subr.bf16.mxu1 %v17297_v27  ;;  %v19691_v28 = vadd.f32 %v8104_v15, %v7996_v31  ;;  %v8000_v25 = vadd.f32 %v7999_v51, %v19563_v13  ;;  %v21969_v31 = vld [vmem:[#allocation62_spill] sm:$0xff]  ;;  %v21970_v15 = vld [vmem:[#allocation69_spill] sm:$0xff]  ;;  %v19717_v51 = vpop.permute.xlu1 %16069 }
 0x482   :  { %8598 = vmatprep.mubr.bf16.mxu0 %v21959_v19  ;;  %15449 = vmatpush3.bf16.msra.mxu0 %v17282_v8  ;;  %v8108_v0 = vpop.f32.mrf.mxu1  ;;  %v8001_v60 = vpop.f32.mrf.mxu0  ;;  %v21966_v8 = vld [vmem:[#allocation59_spill] sm:$0xff] }
 0x483   :  { %21960 = vst [vmem:[#allocation42_spill] sm:$0xff] %v19691_v28  ;;  %8686 = vmatmul.mubr.bf16.gmra.mxu1 %v21961_v32  ;;  %16084 = vrot.lane.b32.xlu0 %v16083_v10, %s17808_s18  ;;  %v19697_v57 = vadd.f32 %v8108_v0, %v8000_v25  ;;  %v8002_v35 = vadd.f32 %v8001_v60, %v19566_v40  ;;  %v21495_v32 = vunpack.i.h.bf16 %v19717_v51 }
 0x484   :  { %8693 = vmatprep.mubr.bf16.mxu1 %v21962_v37  ;;  %15450 = vmatprep.subr.bf16.mxu0 %v17283_v20  ;;  %v8110_v4 = vpop.f32.mrf.mxu1  ;;  %v8003_v54 = vpop.f32.mrf.mxu0  ;;  %v16071_v37 = vunpack.i.l.bf16 %v19717_v51 }
 0x485   :  { %21963 = vst [vmem:[#allocation39_spill] sm:$0xff] %v19697_v57  ;;  %15471 = vmatpush3.bf16.msra.mxu1 %v17298_v16  ;;  %v19700_v13 = vadd.f32 %v8110_v4, %v8002_v35  ;;  %v8004_v7 = vadd.f32 %v8003_v54, %v19569_v45  ;;  %v21972_v4 = vld [vmem:[#allocation67_spill] sm:$0xff] }
 0x486   :  { %15451 = vmatpush3.bf16.msra.mxu0 %v17284_v43  ;;  %15472 = vmatprep.subr.bf16.mxu1 %v17299_v21  ;;  %v8112_v61 = vpop.f32.mrf.mxu1  ;;  %v8005_v11 = vpop.f32.mrf.mxu0  ;;  %v21973_v54 = vld [vmem:[#allocation79_spill] sm:$0xff] }
 0x487   :  { %21964 = vst [vmem:[#allocation49_spill] sm:$0xff] %v19700_v13  ;;  %v19703_v17 = vadd.f32 %v8112_v61, %v8004_v7  ;;  %v8006_v27 = vadd.f32 %v8005_v11, %v19574_v42  ;;  %v19719_v43 = vpop.permute.xlu0 %16064 }
 0x488   :  { %v8114_v59 = vpop.f32.mrf.mxu1  ;;  %v16066_v7 = vunpack.i.l.bf16 %v19719_v43 }
 0x489   :  { %21965 = vst [vmem:[#allocation40_spill] sm:$0xff] %v19703_v17  ;;  %8599 = vmatmul.mubr.bf16.gmra.mxu0 %v21966_v8  ;;  %15473 = vmatpush3.bf16.msra.mxu1 %v17300_v2  ;;  %v8009_v40 = vpop.f32.mrf.mxu0  ;;  %v19709_v46 = vadd.f32 %v8114_v59, %v8006_v27  ;;  %v21974_v27 = vld [vmem:[#allocation70_spill] sm:$0xff]  ;;  %v21975_v59 = vld [vmem:[#allocation80_spill] sm:$0xff]  ;;  %v9137_v8 = vsel %vm9117_vm5, %v16071_v37, %v21495_v32 }
 0x48a   :  { %8606 = vmatprep.mubr.bf16.mxu0 %v21967_v47  ;;  %15942 = vmatprep.subr.bf16.mxu1 %v21968_v56  ;;  %v8010_v20 = vadd.f32 %v8009_v40, %v19579_v62  ;;  %v8118_v45 = vpop.f32.mrf.mxu1 }
 0x48b   :  { %8694 = vmatmul.mubr.bf16.gmra.mxu1 %v21969_v31  ;;  %v8011_v63 = vpop.f32.mrf.mxu0  ;;  %v16075_v40 = vpop.permute.xlu0 %16074 }
 0x48c   :  { %8701 = vmatprep.mubr.bf16.mxu1 %v21970_v15  ;;  %v19714_v42 = vadd.f32 %v8118_v45, %v8010_v20  ;;  %v8012_v10 = vadd.f32 %v8011_v63, %v19582_v48  ;;  %v8120_v16 = vpop.f32.mrf.mxu1 }
 0x48d   :  { %v8013_v19 = vpop.f32.mrf.mxu0 }
 0x48e   :  { %21971 = vst [vmem:[#allocation50_spill] sm:$0xff] %v19714_v42  ;;  %v19721_v21 = vadd.f32 %v8120_v16, %v8012_v10  ;;  %v8014_v62 = vadd.f32 %v8013_v19, %v19585_v14  ;;  %v8122_v25 = vpop.f32.mrf.mxu1  ;;  %v21496_v14 = vunpack.i.h.bf16 %v19719_v43  ;;  %v16077_v16 = vunpack.i.h.bf16 %v16075_v40 }
 0x48f   :  { %v8015_v0 = vpop.f32.mrf.mxu0  ;;  %v16076_v19 = vunpack.i.l.bf16 %v16075_v40 }
 0x490   :  { %v19726_v60 = vadd.f32 %v8122_v25, %v8014_v62  ;;  %v19729_v48 = vadd.f32 %v8015_v0, %v19590_v6  ;;  %v19731_v35 = vpop.f32.mrf.mxu1  ;;  %v21977_v25 = vld [vmem:[#allocation43_spill] sm:$0xff] }
 0x491   :  { %8607 = vmatmul.mubr.bf16.gmra.mxu0 %v21972_v4  ;;  %v8019_v2 = vpop.f32.mrf.mxu0  ;;  %v21978_v0 = vmax.f32 %v21977_v25, 0.0 }
 0x492   :  { %8614 = vmatprep.mubr.bf16.mxu0 %v21973_v54  ;;  %v8020_v61 = vadd.f32 %v8019_v2, %v19595_v36  ;;  %v8128_v11 = vpop.f32.mrf.mxu1  ;;  %v9131_v36 = vsel %vm9117_vm5, %v16066_v7, %v21496_v14  ;;  %v21981_v54 = vld [vmem:[#allocation81_spill] sm:$0xff] }
 0x493   :  { %8702 = vmatmul.mubr.bf16.gmra.mxu1 %v21974_v27  ;;  %v8021_v6 = vpop.f32.mrf.mxu0  ;;  %v9322_v4 = vmax.f32 %v21978_v0, %v9137_v8  ;;  %v21983_v27 = vld [vmem:[#allocation37_spill] sm:$0xff]  ;;  %v9136_v8 = vsel %vm9117_vm5, %v16077_v16, %v16071_v37 }
 0x494   :  { %8709 = vmatprep.mubr.bf16.mxu1 %v21975_v59  ;;  %v19743_v47 = vadd.f32 %v8128_v11, %v8020_v61  ;;  %v8022_v20 = vadd.f32 %v8021_v6, %v19598_v38  ;;  %v8130_v45 = vpop.f32.mrf.mxu1  ;;  %v21982_v11 = vld [vmem:[#allocation77_spill] sm:$0xff] }
 0x495   :  { %v8023_v31 = vpop.f32.mrf.mxu0 }
 0x496   :  { %v19749_v15 = vadd.f32 %v8130_v45, %v8022_v20  ;;  %v8024_v63 = vadd.f32 %v8023_v31, %v19601_v49  ;;  %v8132_v10 = vpop.f32.mrf.mxu1  ;;  %v21984_v49 = vmax.f32 %v21983_v27, 0.0  ;;  %v21985_v20 = vld [vmem:[#allocation82_spill] sm:$0xff]  ;;  %v9130_v45 = vsel %vm9117_vm5, %v16076_v19, %v16066_v7 }
 0x497   :  { %v19752_v62 = vpop.f32.mrf.mxu0  ;;  %v21986_v31 = vld [vmem:[#allocation78_spill] sm:$0xff] }
 0x498   :  { %21976 = vst [vmem:[#allocation47_spill] sm:$0xff] %v19752_v62  ;;  %v19756_v2 = vadd.f32 %v8132_v10, %v8024_v63  ;;  %v19758_v38 = vpop.f32.mrf.mxu1  ;;  %v9315_v59 = vmax.f32 %v21984_v49, %v9131_v36  ;;  %v21990_v27 = vld [vmem:[#allocation30_spill] sm:$0xff] }
 0x499   :  { %21980 = vst [vmem:[#allocation48_spill] sm:$0xff] %v19758_v38  ;;  %8615 = vmatmul.mubr.bf16.gmra.mxu0 %v21981_v54  ;;  %v8029_v61 = vpop.f32.mrf.mxu0  ;;  %v21991_v49 = vmax.f32 %v21990_v27, 0.0 }
 0x49a   :  { %21979 = vst [vmem:[#allocation57_spill] sm:$0xff] %v19756_v2  ;;  %15048 = vmatprep.mubr.msk.bf16.mxu0 %vm901_vm3, %v21982_v11  ;;  %v8030_v6 = vadd.f32 %v8029_v61, %v19611_v34  ;;  %v8138_v40 = vpop.f32.mrf.mxu1  ;;  %v9517_v10 = vmax.f32 %v9315_v59, %v9322_v4  ;;  %v21988_v11 = vld [vmem:[#allocation35_spill] sm:$0xff] }
 0x49b   :  { %8710 = vmatmul.mubr.bf16.gmra.mxu1 %v21985_v20  ;;  %v8031_v63 = vpop.f32.mrf.mxu0  ;;  %v21989_v34 = vmax.f32 %v21988_v11, 0.0  ;;  %v9314_v20 = vmax.f32 %v21991_v49, %v9130_v45 }
 0x49c   :  { %15050 = vmatprep.mubr.msk.bf16.mxu1 %vm901_vm3, %v21986_v31  ;;  %v19771_v25 = vadd.f32 %v8138_v40, %v8030_v6  ;;  %v8032_v0 = vadd.f32 %v8031_v63, %v19614_v52  ;;  %v8140_v54 = vpop.f32.mrf.mxu1  ;;  %v9524_v4 = vpack.c.bf16 %v9517_v10, %v9517_v10  ;;  %v21996_v52 = vld [vmem:[#allocation75_spill] sm:$0xff]  ;;  %v21997_v63 = vld [vmem:[#allocation76_spill] sm:$0xff] }
 0x49d   :  { %v8033_v36 = vpop.f32.mrf.mxu0  ;;  %v9321_v61 = vmax.f32 %v21989_v34, %v9136_v8 }
 0x49e   :  { %21987 = vst [vmem:[#allocation58_spill] sm:$0xff] %v19771_v25  ;;  %v19778_v37 = vadd.f32 %v8140_v54, %v8032_v0  ;;  %v8034_v7 = vadd.f32 %v8033_v36, %v19617_v24  ;;  %v8142_v16 = vpop.f32.mrf.mxu1 }
 0x49f   :  { %v19781_v19 = vpop.f32.mrf.mxu0  ;;  %v9516_v8 = vmax.f32 %v9314_v20, %v9321_v61  ;;  %v22000_v20 = vld [vmem:[#allocation18_spill] sm:$0xff] }
 0x4a0   :  { %21992 = vst [vmem:[#allocation55_spill] sm:$0xff] %v19778_v37  ;;  %21993 = vst [vmem:[#allocation65_spill] sm:$0xff] %v19781_v19  ;;  %v19783_v59 = vadd.f32 %v8142_v16, %v8034_v7  ;;  %v19785_v6 = vpop.f32.mrf.mxu1  ;;  %v2248_v16 = vsub.s32 6, %v22000_v20 }
 0x4a1   :  { %21995 = vst [vmem:[#allocation66_spill] sm:$0xff] %v19785_v6  ;;  %15049 = vmatmul.mubr.msk.bf16.gmra.mxu0 %vm901_vm3, %v21996_v52  ;;  %v8039_v40 = vpop.f32.mrf.mxu0  ;;  %v9523_v11 = vpack.c.bf16 %v9516_v8, %v9516_v8 }
 0x4a2   :  { %21994 = vst [vmem:[#allocation56_spill] sm:$0xff] %v19783_v59  ;;  %9982 = vmatprep.mubr.bf16.mxu0 %v9524_v4  ;;  %v8040_v45 = vadd.f32 %v8039_v40, %v19627_v33  ;;  %v8148_v31 = vpop.f32.mrf.mxu1 }
 0x4a3   :  { %15051 = vmatmul.mubr.msk.bf16.gmra.mxu1 %vm901_vm3, %v21997_v63  ;;  %v8041_v24 = vpop.f32.mrf.mxu0 }
 0x4a4   :  { %v19792_v0 = vadd.f32 %v8148_v31, %v8040_v45  ;;  %v8042_v10 = vadd.f32 %v8041_v24, %v19630_v3  ;;  %v8150_v54 = vpop.f32.mrf.mxu1  ;;  %v17649_v31 = vld [vmem:[#allocation8] sm:$0xff] }
 0x4a5   :  { %v8043_v36 = vpop.f32.mrf.mxu0  ;;  %v19798_v63 = vrot.slane %v17649_v31, %v2248_v16 }
 0x4a6   :  { %21998 = vst [vmem:[#allocation63_spill] sm:$0xff] %v19792_v0  ;;  %v19795_v34 = vadd.f32 %v8150_v54, %v8042_v10  ;;  %v8152_v27 = vpop.f32.mrf.mxu1 }
 0x4a7   :  { %v8044_v49 = vpop.f32.mrf.mxu0 }
 0x4a8   :  { %21999 = vst [vmem:[#allocation73_spill] sm:$0xff] %v19795_v34  ;;  %v8153_v7 = vpop.f32.mrf.mxu1 }
 0x4a9   :  { %9983 = vmatmul.mubr.bf16.vlgmr.msra.gmra.mxu0 %v9523_v11  ;;  %v15068_v61 = vpop.f32.mrf.mxu0 }
 0x4ab   :  { %v15132_v33 = vpop.f32.mrf.mxu1  ;;  %v15069_v4 = vpop.f32.mrf.mxu0 }
 0x4ad   :  { %v15133_v52 = vpop.f32.mrf.mxu1  ;;  %v15071_v40 = vpop.f32.mrf.mxu0 }
 0x4af   :  { %v15135_v45 = vpop.f32.mrf.mxu1  ;;  %v15072_v3 = vpop.f32.mrf.mxu0 }
 0x4b0   :  { %v15073_v24 = vadd.f32 %v15072_v3, %v15071_v40 }
 0x4b1   :  { %v15136_v8 = vpop.f32.mrf.mxu1  ;;  %v15074_v10 = vpop.f32.mrf.mxu0 }
 0x4b2   :  { %v8192_v54 = vadd.f32 %v15073_v24, %v19798_v63  ;;  %v15137_v36 = vadd.f32 %v15136_v8, %v15135_v45 }
 0x4b3   :  { %v15138_v27 = vpop.f32.mrf.mxu1  ;;  %v15075_v11 = vpop.f32.mrf.mxu0 }
 0x4b4   :  { %v19801_v49 = vadd.f32 %v15137_v36, %v8192_v54  ;;  %v15076_v7 = vadd.f32 %v15075_v11, %v15074_v10 }
 0x4b5   :  { %v15139_v61 = vpop.f32.mrf.mxu1  ;;  %v15077_v20 = vpop.f32.mrf.mxu0 }
 0x4b6   :  { %v15140_v33 = vadd.f32 %v15139_v61, %v15138_v27  ;;  %v8197_v4 = vadd.f32 %v15076_v7, %v19798_v63 }
 0x4b7   :  { %v15141_v52 = vpop.f32.mrf.mxu1  ;;  %v15078_v16 = vpop.f32.mrf.mxu0 }
 0x4b8   :  { %v19804_v31 = vadd.f32 %v15140_v33, %v8197_v4  ;;  %v15079_v40 = vadd.f32 %v15078_v16, %v15077_v20 }
 0x4b9   :  { %v15142_v3 = vpop.f32.mrf.mxu1  ;;  %v15080_v44 = vpop.f32.mrf.mxu0 }
 0x4ba   :  { %v8200_v24 = vadd.f32 %v15079_v40, %v19798_v63  ;;  %v15143_v45 = vadd.f32 %v15142_v3, %v15141_v52 }
 0x4bb   :  { %v15144_v8 = vpop.f32.mrf.mxu1  ;;  %v15081_v18 = vpop.f32.mrf.mxu0 }
 0x4bc   :  { %v19807_v54 = vadd.f32 %v15143_v45, %v8200_v24  ;;  %v15082_v10 = vadd.f32 %v15081_v18, %v15080_v44 }
 0x4bd   :  { %v15145_v36 = vpop.f32.mrf.mxu1  ;;  %v15083_v11 = vpop.f32.mrf.mxu0 }
 0x4be   :  { %v15146_v27 = vadd.f32 %v15145_v36, %v15144_v8  ;;  %v8205_v7 = vadd.f32 %v15082_v10, %v19798_v63 }
 0x4bf   :  { %v15147_v61 = vpop.f32.mrf.mxu1  ;;  %v15084_v39 = vpop.f32.mrf.mxu0 }
 0x4c0   :  { %v19810_v33 = vadd.f32 %v15146_v27, %v8205_v7  ;;  %v15085_v20 = vadd.f32 %v15084_v39, %v15083_v11 }
 0x4c1   :  { %v15148_v4 = vpop.f32.mrf.mxu1  ;;  %v15086_v16 = vpop.f32.mrf.mxu0 }
 0x4c2   :  { %v8208_v40 = vadd.f32 %v15085_v20, %v19798_v63  ;;  %v15149_v52 = vadd.f32 %v15148_v4, %v15147_v61 }
 0x4c3   :  { %v15150_v3 = vpop.f32.mrf.mxu1  ;;  %v15087_v9 = vpop.f32.mrf.mxu0 }
 0x4c4   :  { %v19813_v24 = vadd.f32 %v15149_v52, %v8208_v40  ;;  %v15088_v18 = vadd.f32 %v15087_v9, %v15086_v16 }
 0x4c5   :  { %v15151_v44 = vpop.f32.mrf.mxu1  ;;  %v15089_v8 = vpop.f32.mrf.mxu0 }
 0x4c6   :  { %v15152_v45 = vadd.f32 %v15151_v44, %v15150_v3  ;;  %v8213_v10 = vadd.f32 %v15088_v18, %v19798_v63 }
 0x4c7   :  { %v15153_v36 = vpop.f32.mrf.mxu1  ;;  %v15090_v32 = vpop.f32.mrf.mxu0 }
 0x4c8   :  { %v19816_v27 = vadd.f32 %v15152_v45, %v8213_v10  ;;  %v15091_v39 = vadd.f32 %v15090_v32, %v15089_v8 }
 0x4c9   :  { %v15154_v11 = vpop.f32.mrf.mxu1  ;;  %v15092_v7 = vpop.f32.mrf.mxu0 }
 0x4ca   :  { %v8216_v20 = vadd.f32 %v15091_v39, %v19798_v63  ;;  %v15155_v61 = vadd.f32 %v15154_v11, %v15153_v36 }
 0x4cb   :  { %v15156_v4 = vpop.f32.mrf.mxu1  ;;  %v15093_v14 = vpop.f32.mrf.mxu0 }
 0x4cc   :  { %v19819_v40 = vadd.f32 %v15155_v61, %v8216_v20  ;;  %v15094_v9 = vadd.f32 %v15093_v14, %v15092_v7 }
 0x4cd   :  { %v15157_v16 = vpop.f32.mrf.mxu1  ;;  %v15095_v3 = vpop.f32.mrf.mxu0 }
 0x4ce   :  { %v15158_v52 = vadd.f32 %v15157_v16, %v15156_v4  ;;  %v8221_v18 = vadd.f32 %v15094_v9, %v19798_v63 }
 0x4cf   :  { %v15159_v44 = vpop.f32.mrf.mxu1  ;;  %v15096_v1 = vpop.f32.mrf.mxu0 }
 0x4d0   :  { %v19822_v45 = vadd.f32 %v15158_v52, %v8221_v18  ;;  %v15097_v32 = vadd.f32 %v15096_v1, %v15095_v3 }
 0x4d1   :  { %v15160_v8 = vpop.f32.mrf.mxu1  ;;  %v15098_v10 = vpop.f32.mrf.mxu0 }
 0x4d2   :  { %v8224_v39 = vadd.f32 %v15097_v32, %v19798_v63  ;;  %v15161_v36 = vadd.f32 %v15160_v8, %v15159_v44 }
 0x4d3   :  { %v15162_v11 = vpop.f32.mrf.mxu1  ;;  %v15099_v26 = vpop.f32.mrf.mxu0 }
 0x4d4   :  { %v19825_v20 = vadd.f32 %v15161_v36, %v8224_v39  ;;  %v15100_v14 = vadd.f32 %v15099_v26, %v15098_v10 }
 0x4d5   :  { %v15163_v7 = vpop.f32.mrf.mxu1  ;;  %v15101_v4 = vpop.f32.mrf.mxu0 }
 0x4d6   :  { %v15164_v61 = vadd.f32 %v15163_v7, %v15162_v11  ;;  %v8229_v9 = vadd.f32 %v15100_v14, %v19798_v63 }
 0x4d7   :  { %v15165_v16 = vpop.f32.mrf.mxu1  ;;  %v15102_v34 = vpop.f32.mrf.mxu0 }
 0x4d8   :  { %v19828_v52 = vadd.f32 %v15164_v61, %v8229_v9  ;;  %v15103_v1 = vadd.f32 %v15102_v34, %v15101_v4 }
 0x4d9   :  { %v15166_v3 = vpop.f32.mrf.mxu1  ;;  %v15104_v18 = vpop.f32.mrf.mxu0 }
 0x4da   :  { %v8232_v32 = vadd.f32 %v15103_v1, %v19798_v63  ;;  %v15167_v44 = vadd.f32 %v15166_v3, %v15165_v16 }
 0x4db   :  { %v15168_v8 = vpop.f32.mrf.mxu1  ;;  %v15105_v0 = vpop.f32.mrf.mxu0 }
 0x4dc   :  { %v19831_v39 = vadd.f32 %v15167_v44, %v8232_v32  ;;  %v15106_v26 = vadd.f32 %v15105_v0, %v15104_v18 }
 0x4dd   :  { %v15169_v10 = vpop.f32.mrf.mxu1  ;;  %v15107_v11 = vpop.f32.mrf.mxu0 }
 0x4de   :  { %v15170_v36 = vadd.f32 %v15169_v10, %v15168_v8  ;;  %v8237_v14 = vadd.f32 %v15106_v26, %v19798_v63 }
 0x4df   :  { %v15171_v7 = vpop.f32.mrf.mxu1  ;;  %v15108_v6 = vpop.f32.mrf.mxu0 }
 0x4e0   :  { %v19834_v61 = vadd.f32 %v15170_v36, %v8237_v14  ;;  %v15109_v34 = vadd.f32 %v15108_v6, %v15107_v11 }
 0x4e1   :  { %v15172_v4 = vpop.f32.mrf.mxu1  ;;  %v15110_v9 = vpop.f32.mrf.mxu0 }
 0x4e2   :  { %v8240_v1 = vadd.f32 %v15109_v34, %v19798_v63  ;;  %v15173_v16 = vadd.f32 %v15172_v4, %v15171_v7 }
 0x4e3   :  { %v15174_v3 = vpop.f32.mrf.mxu1  ;;  %v15111_v59 = vpop.f32.mrf.mxu0 }
 0x4e4   :  { %v19837_v32 = vadd.f32 %v15173_v16, %v8240_v1  ;;  %v15112_v0 = vadd.f32 %v15111_v59, %v15110_v9 }
 0x4e5   :  { %v15175_v18 = vpop.f32.mrf.mxu1  ;;  %v15113_v8 = vpop.f32.mrf.mxu0 }
 0x4e6   :  { %v15176_v44 = vadd.f32 %v15175_v18, %v15174_v3  ;;  %v8245_v26 = vadd.f32 %v15112_v0, %v19798_v63 }
 0x4e7   :  { %v15177_v10 = vpop.f32.mrf.mxu1  ;;  %v15114_v19 = vpop.f32.mrf.mxu0 }
 0x4e8   :  { %v19840_v36 = vadd.f32 %v15176_v44, %v8245_v26 }
 0x4e9   :  { %v15178_v6 = vpop.f32.mrf.mxu1  ;;  %v15196_v11 = vpop.f32.mrf.mxu0 }
 0x4eb   :  { %v15260_v14 = vpop.f32.mrf.mxu1  ;;  %v15197_v55 = vpop.f32.mrf.mxu0 }
 0x4ec   :  { %v22002_v55 = vunpack.i.h.bf16 %v19719_v43 }
 0x4ed   :  { %v15261_v34 = vpop.f32.mrf.mxu1  ;;  %v15199_v7 = vpop.f32.mrf.mxu0 }
 0x4ef   :  { %v15263_v4 = vpop.f32.mrf.mxu1  ;;  %v15200_v37 = vpop.f32.mrf.mxu0 }
 0x4f0   :  { %v15201_v1 = vadd.f32 %v15200_v37, %v15199_v7  ;;  %v19842_v59 = vpop.permute.xlu1 %16079 }
 0x4f1   :  { %v15264_v16 = vpop.f32.mrf.mxu1  ;;  %22001 = vst [vmem:[#allocation64_spill] sm:$0xff] %v19842_v59  ;;  %v21503_v9 = vunpack.i.h.bf16 %v19842_v59  ;;  %v16081_v63 = vunpack.i.l.bf16 %v19842_v59  ;;  %v15202_v3 = vpop.f32.mrf.mxu0 }
 0x4f2   :  { %v8382_v19 = vadd.f32 %v15201_v1, %v19801_v49  ;;  %v15265_v0 = vadd.f32 %v15264_v16, %v15263_v4  ;;  %v22004_v1 = vld [vmem:[#allocation45_spill] sm:$0xff] }
 0x4f3   :  { %v15266_v18 = vpop.f32.mrf.mxu1  ;;  %v15203_v44 = vpop.f32.mrf.mxu0  ;;  %v9132_v26 = vsel %vm9117_vm5, %v22002_v55, %v16081_v63  ;;  %v9133_v11 = vsel %vm9117_vm5, %v16081_v63, %v21503_v9  ;;  %v22005_v16 = vmax.f32 %v22004_v1, 0.0  ;;  %v22007_v55 = vld [vmem:[#allocation52_spill] sm:$0xff]  ;;  %v22009_v1 = vmax.f32 %v21951_v58, 0.0 }
 0x4f4   :  { %v19847_v8 = vadd.f32 %v15265_v0, %v8382_v19  ;;  %v15204_v37 = vadd.f32 %v15203_v44, %v15202_v3  ;;  %v22006_v19 = vunpack.i.h.bf16 %v19717_v51  ;;  %v22010_v51 = vmax.f32 %v21955_v29, 0.0 }
 0x4f5   :  { %v15267_v10 = vpop.f32.mrf.mxu1  ;;  %v19852_v6 = vpop.permute.xlu0 %16084  ;;  %v9316_v3 = vmax.f32 %v22005_v16, %v9132_v26  ;;  %v9317_v26 = vmax.f32 %v22009_v1, %v9133_v11 }
 0x4f6   :  { %22003 = vst [vmem:[#allocation74_spill] sm:$0xff] %v19852_v6  ;;  %v15268_v14 = vadd.f32 %v15267_v10, %v15266_v18  ;;  %v21505_v49 = vunpack.i.h.bf16 %v19852_v6  ;;  %v16086_v34 = vunpack.i.l.bf16 %v19852_v6  ;;  %v19859_v7 = vpop.f32.mrf.mxu0  ;;  %v8387_v4 = vadd.f32 %v15204_v37, %v19804_v31 }
 0x4f7   :  { %v19862_v43 = vpop.f32.mrf.mxu1  ;;  %v22008_v10 = vmax.f32 %v22007_v55, 0.0 }
 0x4f8   :  { %v9138_v0 = vsel %vm9117_vm5, %v22006_v19, %v16086_v34  ;;  %v9139_v63 = vsel %vm9117_vm5, %v16086_v34, %v21505_v49  ;;  %v19872_v18 = vpop.f32.mrf.mxu0  ;;  %v19874_v44 = vadd.f32 %v15268_v14, %v8387_v4 }
 0x4f9   :  { %v9323_v31 = vmax.f32 %v22008_v10, %v9138_v0  ;;  %v19878_v37 = vpop.f32.mrf.mxu1  ;;  %v9324_v16 = vmax.f32 %v22010_v51, %v9139_v63 }
 0x4fa   :  { %v19884_v19 = vpop.f32.mrf.mxu0 }
 0x4fb   :  { %v9518_v9 = vmax.f32 %v9316_v3, %v9323_v31  ;;  %v19886_v6 = vpop.f32.mrf.mxu1  ;;  %v9519_v34 = vmax.f32 %v9317_v26, %v9324_v16 }
 0x4fc   :  { %v19888_v49 = vpop.f32.mrf.mxu0 }
 0x4fd   :  { %v9525_v14 = vpack.c.bf16 %v9518_v9, %v9518_v9  ;;  %v19890_v4 = vpop.f32.mrf.mxu1  ;;  %v9526_v0 = vpack.c.bf16 %v9519_v34, %v9519_v34 }
 0x4fe   :  { %v15211_v55 = vpop.f32.mrf.mxu0 }
 0x4ff   :  { %v15275_v10 = vpop.f32.mrf.mxu1  ;;  %10022 = vmatprep.mubr.bf16.mxu1 %v9526_v0 }
 0x500   :  { %v15212_v58 = vpop.f32.mrf.mxu0  ;;  %10023 = vmatmul.mubr.bf16.vlgmr.msra.gmra.mxu1 %v9525_v14 }
 0x501   :  { %v15213_v11 = vadd.f32 %v15212_v58, %v15211_v55  ;;  %v15276_v29 = vpop.f32.mrf.mxu1  ;;  %15950 = vmatprep.mubr.msk.bf16.mxu1 %vm17813_vm6, %v21968_v56 }
 0x502   :  { %v15214_v63 = vpop.f32.mrf.mxu0  ;;  %v15277_v3 = vadd.f32 %v15276_v29, %v15275_v10 }
 0x503   :  { %v8398_v1 = vadd.f32 %v15213_v11, %v19813_v24  ;;  %v15278_v31 = vpop.f32.mrf.mxu1 }
 0x504   :  { %v15215_v51 = vpop.f32.mrf.mxu0 }
 0x505   :  { %v19893_v26 = vadd.f32 %v15277_v3, %v8398_v1  ;;  %v15216_v16 = vadd.f32 %v15215_v51, %v15214_v63  ;;  %v15279_v9 = vpop.f32.mrf.mxu1 }
 0x506   :  { %v15280_v59 = vadd.f32 %v15279_v9, %v15278_v31  ;;  %v15217_v38 = vpop.f32.mrf.mxu0 }
 0x507   :  { %v8403_v34 = vadd.f32 %v15216_v16, %v19816_v27  ;;  %v15281_v62 = vpop.f32.mrf.mxu1 }
 0x508   :  { %v15218_v0 = vpop.f32.mrf.mxu0 }
 0x509   :  { %v19896_v12 = vadd.f32 %v15280_v59, %v8403_v34  ;;  %v15219_v14 = vadd.f32 %v15218_v0, %v15217_v38  ;;  %v15282_v55 = vpop.f32.mrf.mxu1 }
 0x50a   :  { %v15283_v58 = vadd.f32 %v15282_v55, %v15281_v62  ;;  %v15220_v25 = vpop.f32.mrf.mxu0 }
 0x50b   :  { %v8406_v24 = vadd.f32 %v15219_v14, %v19819_v40  ;;  %v15284_v10 = vpop.f32.mrf.mxu1 }
 0x50c   :  { %v15221_v11 = vpop.f32.mrf.mxu0 }
 0x50d   :  { %v19899_v29 = vadd.f32 %v15283_v58, %v8406_v24  ;;  %v15222_v63 = vadd.f32 %v15221_v11, %v15220_v25  ;;  %v15285_v1 = vpop.f32.mrf.mxu1 }
 0x50e   :  { %v15286_v3 = vadd.f32 %v15285_v1, %v15284_v10  ;;  %v15223_v31 = vpop.f32.mrf.mxu0 }
 0x50f   :  { %v8411_v27 = vadd.f32 %v15222_v63, %v19822_v45  ;;  %v15287_v51 = vpop.f32.mrf.mxu1 }
 0x510   :  { %v15224_v16 = vpop.f32.mrf.mxu0 }
 0x511   :  { %v19902_v59 = vadd.f32 %v15286_v3, %v8411_v27  ;;  %v15225_v38 = vadd.f32 %v15224_v16, %v15223_v31  ;;  %v15288_v9 = vpop.f32.mrf.mxu1 }
 0x512   :  { %v15289_v62 = vadd.f32 %v15288_v9, %v15287_v51  ;;  %v15226_v34 = vpop.f32.mrf.mxu0  ;;  %v17302_v9 = vld [vmem:[#allocation10 + $0x2d8] sm:$0xff]  }
 0x513   :  { %v8414_v40 = vadd.f32 %v15225_v38, %v19825_v20  ;;  %v15290_v0 = vpop.f32.mrf.mxu1  ;;  %v17301_v38 = vld [vmem:[#allocation10 + $0x318] sm:$0xff]  }
 0x514   :  { %v15227_v14 = vpop.f32.mrf.mxu0  ;;  %15480 = vmatprep.subr.bf16.mxu0 %v17301_v38 }
 0x515   :  { %v19905_v55 = vadd.f32 %v15289_v62, %v8414_v40  ;;  %v15228_v25 = vadd.f32 %v15227_v14, %v15226_v34  ;;  %v15291_v58 = vpop.f32.mrf.mxu1  ;;  %v17303_v62 = vld [vmem:[#allocation10 + $0x310] sm:$0xff]   ;;  %15481 = vmatpush3.bf16.msra.mxu0 %v17302_v9 }
 0x516   :  { %v15292_v24 = vadd.f32 %v15291_v58, %v15290_v0  ;;  %v15229_v10 = vpop.f32.mrf.mxu0  ;;  %15482 = vmatprep.subr.bf16.mxu0 %v17303_v62 }
 0x517   :  { %v8419_v45 = vadd.f32 %v15228_v25, %v19828_v52  ;;  %v15293_v11 = vpop.f32.mrf.mxu1  ;;  %v17309_v52 = vld [vmem:[#allocation10 + $0x338] sm:$0xff]  }
 0x518   :  { %v15230_v63 = vpop.f32.mrf.mxu0  ;;  %15943 = vmatpush3.bf16.msra.mxu1 %v17309_v52 }
 0x519   :  { %v19908_v1 = vadd.f32 %v15292_v24, %v8419_v45  ;;  %v15231_v3 = vadd.f32 %v15230_v63, %v15229_v10  ;;  %v15294_v31 = vpop.f32.mrf.mxu1  ;;  %v17304_v24 = vld [vmem:[#allocation10 + $0x2d0] sm:$0xff]   ;;  %15944 = vmatprep.subr.bf16.mxu1 %v21968_v56 }
 0x51a   :  { %v15295_v27 = vadd.f32 %v15294_v31, %v15293_v11  ;;  %v15232_v51 = vpop.f32.mrf.mxu0  ;;  %15483 = vmatpush3.bf16.msra.mxu0 %v17304_v24  ;;  %v17310_v24 = vld [vmem:[#allocation10 + $0x2f8] sm:$0xff]  }
 0x51b   :  { %v8422_v20 = vadd.f32 %v15231_v3, %v19831_v39  ;;  %v15296_v16 = vpop.f32.mrf.mxu1  ;;  %v17305_v39 = vld [vmem:[#allocation10 + $0x308] sm:$0xff]  }
 0x51c   :  { %v15233_v34 = vpop.f32.mrf.mxu0  ;;  %15484 = vmatprep.subr.bf16.mxu0 %v17305_v39 }
 0x51d   :  { %v19911_v40 = vadd.f32 %v15295_v27, %v8422_v20  ;;  %v15234_v0 = vadd.f32 %v15233_v34, %v15232_v51  ;;  %v15297_v14 = vpop.f32.mrf.mxu1  ;;  %v17306_v20 = vld [vmem:[#allocation10 + $0x2c8] sm:$0xff]  }
 0x51e   :  { %v15298_v25 = vadd.f32 %v15297_v14, %v15296_v16  ;;  %v15235_v58 = vpop.f32.mrf.mxu0  ;;  %15485 = vmatpush3.bf16.msra.mxu0 %v17306_v20 }
 0x51f   :  { %v8427_v10 = vadd.f32 %v15234_v0, %v19834_v61  ;;  %v15299_v45 = vpop.f32.mrf.mxu1  ;;  %v17307_v61 = vld [vmem:[#allocation10 + $0x300] sm:$0xff]  }
 0x520   :  { %v15236_v11 = vpop.f32.mrf.mxu0  ;;  %15486 = vmatprep.subr.bf16.mxu0 %v17307_v61 }
 0x521   :  { %v19915_v63 = vadd.f32 %v15298_v25, %v8427_v10  ;;  %v15237_v3 = vadd.f32 %v15236_v11, %v15235_v58  ;;  %v15300_v31 = vpop.f32.mrf.mxu1  ;;  %v17308_v25 = vld [vmem:[#allocation10 + $0x2c0] sm:$0xff]  }
 0x522   :  { %v15301_v27 = vadd.f32 %v15300_v31, %v15299_v45  ;;  %v15238_v51 = vpop.f32.mrf.mxu0  ;;  %15487 = vmatpush3.bf16.msra.mxu0 %v17308_v25 }
 0x523   :  { %v8430_v16 = vadd.f32 %v15237_v3, %v19837_v32  ;;  %v15302_v38 = vpop.f32.mrf.mxu1  ;;  %v17311_v3 = vld [vmem:[#allocation10 + $0x2b8] sm:$0xff]   ;;  %15488 = vmatprep.subr.bf16.mxu0 %v17310_v24  ;;  %v17313_v24 = vld [vmem:[#allocation10 + $0x2f0] sm:$0xff]  }
 0x524   :  { %v15239_v9 = vpop.f32.mrf.mxu0 }
 0x525   :  { %v19918_v62 = vadd.f32 %v15301_v27, %v8430_v16  ;;  %v15240_v34 = vadd.f32 %v15239_v9, %v15238_v51  ;;  %v15303_v0 = vpop.f32.mrf.mxu1 }
 0x526   :  { %v15304_v14 = vadd.f32 %v15303_v0, %v15302_v38  ;;  %v15241_v52 = vpop.f32.mrf.mxu0  ;;  %15489 = vmatpush3.bf16.msra.mxu0 %v17311_v3  ;;  %v15207_v38 = vadd.f32 %v19872_v18, %v19859_v7  ;;  %v17314_v18 = vld [vmem:[#allocation10 + $0x2b0] sm:$0xff]  }
 0x527   :  { %v8435_v58 = vadd.f32 %v15240_v34, %v19840_v36  ;;  %v15305_v10 = vpop.f32.mrf.mxu1  ;;  %v15210_v52 = vadd.f32 %v19888_v49, %v19884_v19  ;;  %15490 = vmatprep.subr.bf16.mxu0 %v17313_v24  ;;  %v17315_v19 = vld [vmem:[#allocation10 + $0x328] sm:$0xff]  }
 0x528   :  { %v15242_v45 = vpop.f32.mrf.mxu0 }
 0x529   :  { %v19921_v11 = vadd.f32 %v15304_v14, %v8435_v58  ;;  %v15306_v32 = vpop.f32.mrf.mxu1  ;;  %v8390_v14 = vadd.f32 %v15207_v38, %v19807_v54  ;;  %v17312_v58 = vld [vmem:[#allocation10 + $0x330] sm:$0xff]   ;;  %v15271_v45 = vadd.f32 %v19878_v37, %v19862_v43  ;;  %v8395_v54 = vadd.f32 %v15210_v52, %v19810_v33 }
 0x52a   :  { %v15324_v39 = vpop.f32.mrf.mxu0  ;;  %15945 = vmatpush3.bf16.msra.mxu1 %v17312_v58  ;;  %15491 = vmatpush3.bf16.msra.mxu0 %v17314_v18  ;;  %v17317_v58 = vld [vmem:[#allocation10 + $0x2a8] sm:$0xff]  }
 0x52b   :  { %v15388_v31 = vpop.f32.mrf.mxu1  ;;  %15946 = vmatprep.subr.bf16.mxu1 %v21968_v56  ;;  %v8485_v39 = vadd.f32 %v15271_v45, %v8390_v14  ;;  %v17318_v45 = vld [vmem:[#allocation10 + $0x320] sm:$0xff]  }
 0x52c   :  { %v15325_v27 = vpop.f32.mrf.mxu0 }
 0x52d   :  { %v15389_v51 = vpop.f32.mrf.mxu1  ;;  %v17316_v27 = vld [vmem:[#allocation10 + $0x2e8] sm:$0xff]  }
 0x52e   :  { %v19923_v16 = vpop.f32.mrf.mxu0  ;;  %v15274_v51 = vadd.f32 %v19890_v4, %v19886_v6  ;;  %15947 = vmatpush3.bf16.msra.mxu1 %v17315_v19  ;;  %15492 = vmatprep.subr.bf16.mxu0 %v17316_v27  ;;  %v21508_v6 = vmax.f32 %v19665_v30, 0.0 }
 0x52f   :  { %v19925_v20 = vpop.f32.mrf.mxu1  ;;  %15948 = vmatprep.subr.bf16.mxu1 %v21968_v56  ;;  %15493 = vmatpush3.bf16.msra.mxu0 %v17317_v58  ;;  %v22011_v58 = vld [vmem:[#allocation103_spill] sm:$0xff] }
 0x530   :  { %v19927_v36 = vpop.f32.mrf.mxu0  ;;  %v8490_v14 = vadd.f32 %v15274_v51, %v8395_v54  ;;  %v21511_v54 = vmax.f32 %v19639_v53, 0.0 }
 0x531   :  { %v19931_v61 = vpop.f32.mrf.mxu1 }
 0x532   :  { %v15330_v9 = vpop.f32.mrf.mxu0  ;;  %15949 = vmatpush3.bf16.msra.mxu1 %v17318_v45  ;;  %v22012_v45 = vld [vmem:[#allocation44_spill] sm:$0xff] }
 0x533   :  { %v19933_v34 = vpop.f32.mrf.mxu1 }
 0x534   :  { %v15331_v0 = vpop.f32.mrf.mxu0 }
 0x535   :  { %v19938_v25 = vpop.f32.mrf.mxu1  ;;  %v15332_v27 = vadd.f32 %v15331_v0, %v15330_v9  ;;  %v21513_v9 = vmax.f32 %v19678_v41, 0.0  ;;  %v15329_v0 = vadd.f32 %v19927_v36, %v19923_v16  ;;  %v22023_v41 = vld [vmem:[#allocation28_spill] sm:$0xff] }
 0x536   :  { %v15333_v10 = vpop.f32.mrf.mxu0 }
 0x537   :  { %v15397_v7 = vpop.f32.mrf.mxu1 }
 0x538   :  { %v15334_v32 = vpop.f32.mrf.mxu0 }
 0x539   :  { %v15335_v3 = vadd.f32 %v15334_v32, %v15333_v10  ;;  %v15398_v49 = vpop.f32.mrf.mxu1  ;;  %v17319_v32 = vld [vmem:[#allocation10 + $0x2e0] sm:$0xff]  }
 0x53a   :  { %v15336_v31 = vpop.f32.mrf.mxu0  ;;  %v15399_v37 = vadd.f32 %v15398_v49, %v15397_v7  ;;  %v17320_v49 = vld [vmem:[#allocation10 + $0x2a0] sm:$0xff]   ;;  %15494 = vmatprep.subr.bf16.mxu0 %v17319_v32  ;;  %v15393_v32 = vadd.f32 %v19931_v61, %v19925_v20 }
 0x53b   :  { %v8580_v43 = vadd.f32 %v15335_v3, %v8485_v39  ;;  %v15400_v38 = vpop.f32.mrf.mxu1  ;;  %15495 = vmatpush3.bf16.msra.mxu0 %v17320_v49  ;;  %v8577_v49 = vadd.f32 %v15332_v27, %v19874_v44  ;;  %v8572_v44 = vadd.f32 %v15329_v0, %v19847_v8  ;;  %v15396_v27 = vadd.f32 %v19938_v25, %v19933_v34 }
 0x53c   :  { %v15337_v24 = vpop.f32.mrf.mxu0  ;;  %v22019_v25 = vmax.f32 %v22012_v45, 0.0 }
 0x53d   :  { %v19947_v33 = vadd.f32 %v15399_v37, %v8580_v43  ;;  %v15338_v52 = vadd.f32 %v15337_v24, %v15336_v31  ;;  %v15401_v10 = vpop.f32.mrf.mxu1  ;;  %v17321_v31 = vld [vmem:[#allocation10 + $0x78] sm:$0xff]   ;;  %v21512_v24 = vmax.f32 %v22011_v58, 0.0  ;;  %v20020_v61 = vadd.f32 %v15393_v32, %v8572_v44 }
 0x53e   :  { %v19949_v18 = vpop.f32.mrf.mxu0  ;;  %v15402_v39 = vadd.f32 %v15401_v10, %v15400_v38  ;;  %15507 = vmatprep.subr.bf16.mxu1 %v17321_v31  ;;  %v17323_v10 = vld [vmem:[#allocation10 + $0xf8] sm:$0xff]   ;;  %v22026_v44 = vmax.f32 %v22023_v41, 0.0 }
 0x53f   :  { %v21509_v4 = vmax.f32 %v19947_v33, 0.0  ;;  %v8585_v7 = vadd.f32 %v15338_v52, %v8490_v14  ;;  %v19953_v3 = vpop.f32.mrf.mxu1  ;;  %v16098_v16 = vpack.i.bf16 %v21511_v54, %v21512_v24  ;;  %15529 = vmatprep.subr.bf16.mxu0 %v17323_v10  ;;  %v22015_v54 = vld [vmem:[#allocation29_spill] sm:$0xff]  ;;  %v22016_v10 = vld [vmem:[#allocation36_spill] sm:$0xff]  ;;  %22024 = vst [vmem:[#allocation104_spill] sm:$0xff] %v20020_v61 }
 0x540   :  { %v15340_v19 = vpop.f32.mrf.mxu0 }
 0x541   :  { %v19956_v51 = vadd.f32 %v15402_v39, %v8585_v7  ;;  %v19958_v43 = vpop.f32.mrf.mxu1  ;;  %v16088_v37 = vpack.i.bf16 %v21509_v4, %v21508_v6  ;;  %v22013_v6 = vld [vmem:[#allocation71_spill] sm:$0xff]  ;;  %v22014_v39 = vld [vmem:[#allocation38_spill] sm:$0xff]  ;;  %v20004_v4 = vadd.f32 %v15396_v27, %v8577_v49  ;;  %v15341_v20 = vadd.f32 %v15340_v19, %v19949_v18  ;;  %v22028_v18 = vld [vmem:[#allocation105_spill] sm:$0xff] }
 0x542   :  { %v15342_v38 = vpop.f32.mrf.mxu0  ;;  %v22018_v34 = vmax.f32 %v22013_v6, 0.0  ;;  %v21528_v6 = vmax.f32 %v20020_v61, 0.0  ;;  %v22033_v19 = vld [vmem:[#allocation84_spill] sm:$0xff] }
 0x543   :  { %v21514_v14 = vmax.f32 %v19956_v51, 0.0  ;;  %v19971_v52 = vpop.f32.mrf.mxu1  ;;  %16089 = vrot.lane.b32.xlu1 %v16088_v37, %s17808_s18  ;;  %22017 = vst [vmem:[#allocation72_spill] sm:$0xff] %v20004_v4  ;;  %v22030_v45 = vmax.f32 %v20004_v4, 0.0  ;;  %v21534_v41 = vmax.f32 %v22033_v19, 0.0  ;;  %v22040_v4 = vld [vmem:[#allocation83_spill] sm:$0xff] }
 0x544   :  { %v15343_v7 = vpop.f32.mrf.mxu0  ;;  %v16108_v0 = vpack.i.bf16 %v22019_v25, %v22018_v34  ;;  %v22025_v34 = vmax.f32 %v22015_v54, 0.0  ;;  %v21535_v19 = vmax.f32 %v22040_v4, 0.0  ;;  %v22048_v4 = vld [vmem:[#allocation110_spill] sm:$0xff] }
 0x545   :  { %v19977_v31 = vpop.f32.mrf.mxu1  ;;  %v16093_v36 = vpack.i.bf16 %v21514_v14, %v21513_v9  ;;  %v22022_v9 = vld [vmem:[#allocation27_spill] sm:$0xff]  ;;  %v16123_v54 = vpack.i.bf16 %v22030_v45, %v21528_v6  ;;  %v22035_v45 = vld [vmem:[#allocation85_spill] sm:$0xff]  ;;  %v21536_v6 = vmax.f32 %v19682_v22, 0.0 }
 0x546   :  { %v19987_v37 = vpop.f32.mrf.mxu0  ;;  %v21521_v53 = vmax.f32 %v22022_v9, 0.0 }
 0x547   :  { %v19994_v56 = vpop.f32.mrf.mxu1  ;;  %16099 = vrot.lane.b32.xlu1 %v16098_v16, %s17808_s18  ;;  %16094 = vrot.lane.b32.xlu0 %v16093_v36, %s17808_s18  ;;  %v22020_v16 = vmax.f32 %v22014_v39, 0.0  ;;  %v22021_v36 = vmax.f32 %v19652_v5, 0.0  ;;  %v22034_v39 = vld [vmem:[#allocation86_spill] sm:$0xff] }
 0x548   :  { %v20000_v14 = vpop.f32.mrf.mxu0  ;;  %v16118_v25 = vpack.i.bf16 %v22025_v34, %v21521_v53  ;;  %v22029_v53 = vld [vmem:[#allocation107_spill] sm:$0xff] }
 0x549   :  { %v20006_v8 = vpop.f32.mrf.mxu1  ;;  %v16103_v24 = vpack.i.bf16 %v22021_v36, %v22020_v16 }
 0x54a   :  { %v20017_v58 = vpop.f32.mrf.mxu0 }
 0x54b   :  { %v20022_v49 = vpop.f32.mrf.mxu1  ;;  %16109 = vrot.lane.b32.xlu1 %v16108_v0, %s17808_s18  ;;  %16104 = vrot.lane.b32.xlu0 %v16103_v24, %s17808_s18  ;;  %v22027_v0 = vmax.f32 %v22016_v10, 0.0 }
 0x54c   :  { %v15349_v27 = vpop.f32.mrf.mxu0 }
 0x54d   :  { %v20033_v32 = vpop.f32.mrf.mxu1  ;;  %v16113_v5 = vpack.i.bf16 %v22027_v0, %v22026_v44  ;;  %v8588_v44 = vadd.f32 %v15341_v20, %v19893_v26  ;;  %v15344_v0 = vadd.f32 %v15343_v7, %v15342_v38  ;;  %v15405_v26 = vadd.f32 %v19958_v43, %v19953_v3 }
 0x54e   :  { %v20039_v24 = vpop.f32.mrf.mxu0  ;;  %v15350_v22 = vadd.f32 %v15349_v27, %v20017_v58  ;;  %v22049_v58 = vld [vmem:[#allocation111_spill] sm:$0xff]  ;;  %v22052_v27 = vld [vmem:[#allocation109_spill] sm:$0xff] }
 0x54f   :  { %v20043_v34 = vpop.f32.mrf.mxu1  ;;  %16114 = vrot.lane.b32.xlu0 %v16113_v5, %s17808_s18  ;;  %16119 = vrot.lane.b32.xlu1 %v16118_v25, %s17808_s18  ;;  %v22031_v5 = vmax.f32 %v19644_v23, 0.0  ;;  %v22032_v25 = vmax.f32 %v19655_v50, 0.0  ;;  %v20080_v30 = vadd.f32 %v15405_v26, %v8588_v44  ;;  %v8593_v3 = vadd.f32 %v15344_v0, %v19896_v12  ;;  %v22041_v50 = vld [vmem:[#allocation106_spill] sm:$0xff] }
 0x550   :  { %v20049_v36 = vpop.f32.mrf.mxu0 }
 0x551   :  { %v20052_v9 = vpop.f32.mrf.mxu1  ;;  %v16128_v10 = vpack.i.bf16 %v22032_v25, %v22031_v5  ;;  %v22036_v5 = vmax.f32 %v22028_v18, 0.0  ;;  %22037 = vst [vmem:[#allocation53_spill] sm:$0xff] %v20080_v30  ;;  %v21537_v18 = vmax.f32 %v22041_v50, 0.0 }
 0x552   :  { %v20063_v16 = vpop.f32.mrf.mxu0 }
 0x553   :  { %v20068_v38 = vpop.f32.mrf.mxu1  ;;  %16124 = vrot.lane.b32.xlu0 %v16123_v54, %s17808_s18  ;;  %16129 = vrot.lane.b32.xlu1 %v16128_v10, %s17808_s18  ;;  %v16133_v25 = vpack.i.bf16 %v22036_v5, %v21534_v41  ;;  %v22038_v54 = vmax.f32 %v22034_v39, 0.0  ;;  %v22039_v10 = vmax.f32 %v22029_v53, 0.0  ;;  %v15408_v5 = vadd.f32 %v19977_v31, %v19971_v52  ;;  %v22061_v39 = vld [vmem:[#allocation88_spill] sm:$0xff] }
 0x554   :  { %v20073_v20 = vpop.f32.mrf.mxu0  ;;  %v22043_v52 = vmax.f32 %v22035_v45, 0.0  ;;  %v22046_v53 = vmax.f32 %v19691_v28, 0.0  ;;  %v15411_v28 = vadd.f32 %v20006_v8, %v19994_v56  ;;  %v21557_v23 = vmax.f32 %v22061_v39, 0.0 }
 0x555   :  { %v20083_v43 = vpop.f32.mrf.mxu1  ;;  %v16138_v7 = vpack.i.bf16 %v22039_v10, %v22038_v54  ;;  %v20103_v54 = vadd.f32 %v15408_v5, %v8593_v3 }
 0x556   :  { %v20089_v61 = vpop.f32.mrf.mxu0  ;;  %v16143_v31 = vpack.i.bf16 %v22043_v52, %v21535_v19  ;;  %v22045_v52 = vmax.f32 %v19697_v57, 0.0  ;;  %v21550_v57 = vmax.f32 %v19700_v13, 0.0 }
 0x557   :  { %v20095_v44 = vpop.f32.mrf.mxu1  ;;  %16134 = vrot.lane.b32.xlu0 %v16133_v25, %s17808_s18  ;;  %16139 = vrot.lane.b32.xlu1 %v16138_v7, %s17808_s18  ;;  %22042 = vst [vmem:[#allocation46_spill] sm:$0xff] %v20103_v54  ;;  %v16148_v7 = vpack.i.bf16 %v21536_v6, %v21537_v18  ;;  %v22044_v25 = vld [vmem:[#allocation108_spill] sm:$0xff]  ;;  %v21549_v18 = vmax.f32 %v20103_v54, 0.0 }
 0x558   :  { %v20100_v0 = vpop.f32.mrf.mxu0  ;;  %v21544_v41 = vmax.f32 %v22044_v25, 0.0  ;;  %v22053_v25 = vld [vmem:[#allocation112_spill] sm:$0xff] }
 0x559   :  { %v20105_v10 = vpop.f32.mrf.mxu1 }
 0x55a   :  { %v20116_v12 = vpop.f32.mrf.mxu0  ;;  %v16153_v19 = vpack.i.bf16 %v22045_v52, %v21544_v41  ;;  %v15347_v52 = vadd.f32 %v20000_v14, %v19987_v37  ;;  %v16163_v14 = vpack.i.bf16 %v21549_v18, %v21550_v57  ;;  %v22050_v37 = vmax.f32 %v22048_v4, 0.0  ;;  %v22054_v18 = vld [vmem:[#allocation89_spill] sm:$0xff]  ;;  %v22060_v4 = vld [vmem:[#allocation87_spill] sm:$0xff] }
 0x55b   :  { %v20119_v3 = vpop.f32.mrf.mxu1  ;;  %16144 = vrot.lane.b32.xlu0 %v16143_v31, %s17808_s18  ;;  %16149 = vrot.lane.b32.xlu1 %v16148_v7, %s17808_s18  ;;  %v22047_v31 = vmax.f32 %v20080_v30, 0.0  ;;  %v21556_v54 = vmax.f32 %v22060_v4, 0.0 }
 0x55c   :  { %v20123_v5 = vpop.f32.mrf.mxu0 }
 0x55d   :  { %v20132_v26 = vpop.f32.mrf.mxu1  ;;  %v16158_v7 = vpack.i.bf16 %v22047_v31, %v22046_v53  ;;  %v8601_v31 = vadd.f32 %v15350_v22, %v19902_v59  ;;  %v8596_v22 = vadd.f32 %v15347_v52, %v19899_v29  ;;  %v15414_v59 = vadd.f32 %v20033_v32, %v20022_v49 }
 0x55e   :  { %v20138_v45 = vpop.f32.mrf.mxu0  ;;  %v22056_v49 = vmax.f32 %v22053_v25, 0.0  ;;  %v22057_v32 = vmax.f32 %v19714_v42, 0.0 }
 0x55f   :  { %v20144_v41 = vpop.f32.mrf.mxu1  ;;  %16154 = vrot.lane.b32.xlu0 %v16153_v19, %s17808_s18  ;;  %16159 = vrot.lane.b32.xlu1 %v16158_v7, %s17808_s18  ;;  %v22051_v19 = vmax.f32 %v19703_v17, 0.0  ;;  %v20180_v53 = vadd.f32 %v15414_v59, %v8601_v31  ;;  %v20194_v56 = vadd.f32 %v15411_v28, %v8596_v22  ;;  %v21561_v31 = vmax.f32 %v19721_v21, 0.0 }
 0x560   :  { %v20149_v6 = vpop.f32.mrf.mxu0  ;;  %v16173_v52 = vpack.i.bf16 %v22057_v32, %v22056_v49  ;;  %v15353_v32 = vadd.f32 %v20049_v36, %v20039_v24  ;;  %v22063_v22 = vmax.f32 %v22054_v18, 0.0  ;;  %v22064_v36 = vld [vmem:[#allocation113_spill] sm:$0xff]  ;;  %v22067_v24 = vld [vmem:[#allocation92_spill] sm:$0xff] }
 0x561   :  { %v20153_v50 = vpop.f32.mrf.mxu1  ;;  %v16168_v7 = vpack.i.bf16 %v22051_v19, %v22050_v37  ;;  %v22055_v37 = vld [vmem:[#allocation90_spill] sm:$0xff] }
 0x562   :  { %v20163_v30 = vpop.f32.mrf.mxu0 }
 0x563   :  { %v20170_v13 = vpop.f32.mrf.mxu1  ;;  %16164 = vrot.lane.b32.xlu0 %v16163_v14, %s17808_s18  ;;  %16169 = vrot.lane.b32.xlu1 %v16168_v7, %s17808_s18  ;;  %v22058_v14 = vmax.f32 %v22052_v27, 0.0  ;;  %v22059_v7 = vmax.f32 %v22049_v58, 0.0  ;;  %v22068_v27 = vld [vmem:[#allocation94_spill] sm:$0xff] }
 0x564   :  { %v20176_v17 = vpop.f32.mrf.mxu0  ;;  %v21572_v58 = vmax.f32 %v22068_v27, 0.0 }
 0x565   :  { %v20182_v29 = vpop.f32.mrf.mxu1  ;;  %v16178_v57 = vpack.i.bf16 %v22059_v7, %v22058_v14  ;;  %v22062_v14 = vmax.f32 %v22055_v37, 0.0 }
 0x566   :  { %v15369_v19 = vpop.f32.mrf.mxu0 }
 0x567   :  { %v15433_v8 = vpop.f32.mrf.mxu1  ;;  %16174 = vrot.lane.b32.xlu0 %v16173_v52, %s17808_s18  ;;  %16179 = vrot.lane.b32.xlu1 %v16178_v57, %s17808_s18  ;;  %v16183_v28 = vpack.i.bf16 %v22062_v14, %v21557_v23  ;;  %v16188_v52 = vpack.i.bf16 %v22063_v22, %v21556_v54  ;;  %v21563_v57 = vmax.f32 %v19709_v46, 0.0  ;;  %v8604_v22 = vadd.f32 %v15353_v32, %v19905_v55  ;;  %v22069_v55 = vld [vmem:[#allocation93_spill] sm:$0xff] }
 0x568   :  { %v15370_v59 = vpop.f32.mrf.mxu0  ;;  %v21562_v8 = vmax.f32 %v20194_v56, 0.0  ;;  %v15356_v54 = vadd.f32 %v20073_v20, %v20063_v16  ;;  %v21565_v16 = vmax.f32 %v22069_v55, 0.0 }
 0x569   :  { %v15434_v19 = vpop.f32.mrf.mxu1  ;;  %v22065_v59 = vld [vmem:[#allocation115_spill] sm:$0xff]  ;;  %v16198_v14 = vpack.i.bf16 %v21561_v31, %v21563_v57  ;;  %v15417_v31 = vadd.f32 %v20052_v9, %v20043_v34  ;;  %v20252_v57 = vadd.f32 %v19731_v35, %v19729_v48  ;;  %v22074_v35 = vld [vmem:[#allocation116_spill] sm:$0xff] }
 0x56a   :  { %v15452_v7 = vpop.f32.mrf.mxu0  ;;  %v21573_v19 = vmax.f32 %v22067_v24, 0.0  ;;  %v22071_v9 = vmax.f32 %v22065_v59, 0.0 }
 0x56b   :  { %16184 = vrot.lane.b32.xlu0 %v16183_v28, %s17808_s18  ;;  %16189 = vrot.lane.b32.xlu1 %v16188_v52, %s17808_s18  ;;  %v22066_v28 = vmax.f32 %v20180_v53, 0.0 }
 0x56c   :  { %v15453_v49 = vpop.f32.mrf.mxu0  ;;  %v16208_v34 = vpack.i.bf16 %v22071_v9, %v21572_v58  ;;  %v22081_v58 = vld [vmem:[#allocation47_spill] sm:$0xff] }
 0x56d   :  { %v20223_v23 = vadd.f32 %v15453_v49, %v15452_v7  ;;  %v16193_v52 = vpack.i.bf16 %v22066_v28, %v21562_v8  ;;  %v22070_v49 = vmax.f32 %v22064_v36, 0.0  ;;  %v21564_v7 = vmax.f32 %v19726_v60, 0.0  ;;  %v22073_v8 = vld [vmem:[#allocation114_spill] sm:$0xff] }
 0x56e   :  { %v15455_v42 = vpop.f32.mrf.mxu0  ;;  %v8609_v28 = vadd.f32 %v15356_v54, %v19908_v1  ;;  %v21566_v1 = vmax.f32 %v19743_v47, 0.0 }
 0x56f   :  { %16194 = vrot.lane.b32.xlu0 %v16193_v52, %s17808_s18  ;;  %16199 = vrot.lane.b32.xlu1 %v16198_v14, %s17808_s18  ;;  %v16203_v32 = vpack.i.bf16 %v22070_v49, %v21573_v19  ;;  %v20241_v42 = vadd.f32 %v15417_v31, %v8604_v22  ;;  %v22072_v14 = vld [vmem:[#allocation91_spill] sm:$0xff]  ;;  %v15420_v49 = vadd.f32 %v20083_v43, %v20068_v38  ;;  %v21571_v38 = vmax.f32 %v22074_v35, 0.0 }
 0x570   :  { %v15456_v20 = vpop.f32.mrf.mxu0  ;;  %v21567_v52 = vmax.f32 %v22072_v14, 0.0  ;;  %v21570_v43 = vmax.f32 %v20252_v57, 0.0 }
 0x571   :  { %v21568_v20 = vmax.f32 %v22073_v8, 0.0  ;;  %v21569_v54 = vmax.f32 %v20241_v42, 0.0  ;;  %v20260_v31 = vadd.f32 %v15420_v49, %v8609_v28  ;;  %v21576_v28 = vmax.f32 %v19756_v2, 0.0  ;;  %v22099_v2 = vld [vmem:[#allocation65_spill] sm:$0xff] }
 0x572   :  { %v16213_v22 = vpack.i.bf16 %v21565_v16, %v21567_v52  ;;  %v15359_v16 = vadd.f32 %v20100_v0, %v20089_v61  ;;  %v22078_v0 = vld [vmem:[#allocation117_spill] sm:$0xff] }
 0x573   :  { %16204 = vrot.lane.b32.xlu0 %v16203_v32, %s17808_s18  ;;  %16209 = vrot.lane.b32.xlu1 %v16208_v34, %s17808_s18  ;;  %v16218_v48 = vpack.i.bf16 %v21564_v7, %v21568_v20  ;;  %v16223_v32 = vpack.i.bf16 %v21566_v1, %v21571_v38  ;;  %v21574_v9 = vmax.f32 %v20260_v31, 0.0  ;;  %v15362_v34 = vadd.f32 %v20123_v5, %v20116_v12  ;;  %v22076_v1 = vld [vmem:[#allocation119_spill] sm:$0xff]  ;;  %v22077_v20 = vld [vmem:[#allocation58_spill] sm:$0xff] }
 0x574   :  { %v16228_v49 = vpack.i.bf16 %v21569_v54, %v21570_v43  ;;  %v21578_v12 = vmax.f32 %v22077_v20, 0.0  ;;  %v22079_v43 = vld [vmem:[#allocation120_spill] sm:$0xff]  ;;  %v22080_v38 = vld [vmem:[#allocation22_spill] sm:$0xff]  ;;  %v8612_v52 = vadd.f32 %v15359_v16, %v19911_v40  ;;  %v22087_v16 = vld [vmem:[#allocation95_spill] sm:$0xff] }
 0x575   :  { %v8617_v5 = vadd.f32 %v15362_v34, %v19915_v63  ;;  %v8026_v19 = vadd.f32 %v22081_v58, %v22080_v38  ;;  %v15426_v63 = vadd.f32 %v20132_v26, %v20119_v3  ;;  %v22082_v34 = vld [vmem:[#allocation97_spill] sm:$0xff]  ;;  %v22085_v26 = vmax.f32 %v22078_v0, 0.0  ;;  %v22088_v38 = vld [vmem:[#allocation96_spill] sm:$0xff]  ;;  %v22107_v20 = vld [vmem:[#allocation122_spill] sm:$0xff] }
 0x576   :  { %v22086_v3 = vmax.f32 %v22076_v1, 0.0 }
 0x577   :  { %16214 = vrot.lane.b32.xlu0 %v16213_v22, %s17808_s18  ;;  %16219 = vrot.lane.b32.xlu1 %v16218_v48, %s17808_s18  ;;  %v22075_v22 = vld [vmem:[#allocation118_spill] sm:$0xff]  ;;  %v21575_v48 = vmax.f32 %v19749_v15, 0.0 }
 0x578   :  { %v21577_v7 = vmax.f32 %v22075_v22, 0.0  ;;  %v16248_v58 = vpack.i.bf16 %v22086_v3, %v22085_v26 }
 0x579   :  { %v16233_v54 = vpack.i.bf16 %v21574_v9, %v21575_v48  ;;  %v22083_v48 = vld [vmem:[#allocation98_spill] sm:$0xff] }
 0x57a   :  { %v16238_v61 = vpack.i.bf16 %v21576_v28, %v21577_v7  ;;  %v15423_v7 = vadd.f32 %v20105_v10, %v20095_v44  ;;  %v22089_v28 = vld [vmem:[#allocation48_spill] sm:$0xff]  ;;  %v22091_v10 = vmax.f32 %v22082_v34, 0.0 }
 0x57b   :  { %16224 = vrot.lane.b32.xlu0 %v16223_v32, %s17808_s18  ;;  %16229 = vrot.lane.b32.xlu1 %v16228_v49, %s17808_s18  ;;  %v21580_v49 = vmax.f32 %v22079_v43, 0.0  ;;  %v20316_v32 = vadd.f32 %v15426_v63, %v8617_v5  ;;  %v20329_v9 = vadd.f32 %v22089_v28, %v8026_v19  ;;  %v22092_v63 = vld [vmem:[#allocation55_spill] sm:$0xff]  ;;  %v22093_v19 = vmax.f32 %v22083_v48, 0.0 }
 0x57c   :  { %v20331_v44 = vadd.f32 %v15423_v7, %v8612_v52  ;;  %v21585_v26 = vmax.f32 %v22092_v63, 0.0 }
 0x57d   :  { %22084 = vst [vmem:[#allocation51_spill] sm:$0xff] %v20316_v32  ;;  %v16243_v40 = vpack.i.bf16 %v21578_v12, %v21580_v49  ;;  %v21584_v3 = vmax.f32 %v20316_v32, 0.0  ;;  %v15365_v12 = vadd.f32 %v20149_v6, %v20138_v45  ;;  %v21586_v52 = vmax.f32 %v20329_v9, 0.0 }
 0x57e   :  { %22090 = vst [vmem:[#allocation60_spill] sm:$0xff] %v20331_v44  ;;  %v21583_v28 = vmax.f32 %v20331_v44, 0.0  ;;  %v15368_v6 = vadd.f32 %v20176_v17, %v20163_v30  ;;  %v15429_v30 = vadd.f32 %v20153_v50, %v20144_v41  ;;  %v22100_v17 = vld [vmem:[#allocation101_spill] sm:$0xff]  ;;  %v22108_v44 = vld [vmem:[#allocation66_spill] sm:$0xff] }
 0x57f   :  { %16234 = vrot.lane.b32.xlu0 %v16233_v54, %s17808_s18  ;;  %16239 = vrot.lane.b32.xlu1 %v16238_v61, %s17808_s18  ;;  %v21579_v54 = vmax.f32 %v22087_v16, 0.0  ;;  %v21581_v61 = vmax.f32 %v22088_v38, 0.0  ;;  %v8620_v49 = vadd.f32 %v15365_v12, %v19918_v62  ;;  %v21593_v12 = vmax.f32 %v22107_v20, 0.0  ;;  %v17329_v20 = vld [vmem:[#allocation10 + $0x68] sm:$0xff]  }
 0x580   :  { %v16263_v45 = vpack.i.bf16 %v21584_v3, %v21583_v28 }
 0x581   :  { %v16258_v5 = vpack.i.bf16 %v22091_v10, %v21579_v54  ;;  %v16253_v7 = vpack.i.bf16 %v22093_v19, %v21581_v61  ;;  %v22095_v10 = vld [vmem:[#allocation21_spill] sm:$0xff]  ;;  %v16268_v19 = vpack.i.bf16 %v21585_v26, %v21586_v52  ;;  %v22097_v61 = vld [vmem:[#allocation102_spill] sm:$0xff]  ;;  %v22098_v54 = vld [vmem:[#allocation23_spill] sm:$0xff] }
 0x582   :  { %v8036_v62 = vadd.f32 %v22099_v2, %v22098_v54  ;;  %v22102_v26 = vld [vmem:[#allocation56_spill] sm:$0xff]  ;;  %v8625_v2 = vadd.f32 %v15368_v6, %v19921_v11  ;;  %v22104_v54 = vmax.f32 %v22097_v61, 0.0  ;;  %v22105_v50 = vmax.f32 %v22095_v10, 0.0  ;;  %v22111_v6 = vld [vmem:[#allocation63_spill] sm:$0xff] }
 0x583   :  { %16244 = vrot.lane.b32.xlu0 %v16243_v40, %s17808_s18  ;;  %16249 = vrot.lane.b32.xlu1 %v16248_v58, %s17808_s18  ;;  %v22094_v40 = vld [vmem:[#allocation121_spill] sm:$0xff]  ;;  %v21590_v52 = vmax.f32 %v22102_v26, 0.0  ;;  %v20378_v58 = vadd.f32 %v15429_v30, %v8620_v49  ;;  %v22110_v11 = vmax.f32 %v22100_v17, 0.0  ;;  %v21591_v30 = vmax.f32 %v22111_v6, 0.0 }
 0x584   :  { %v22101_v28 = vmax.f32 %v22094_v40, 0.0  ;;  %v16278_v41 = vpack.i.bf16 %v22105_v50, %v22104_v54  ;;  %v22121_v40 = vld [vmem:[#allocation26_spill] sm:$0xff] }
 0x585   :  { %22103 = vst [vmem:[#allocation54_spill] sm:$0xff] %v20378_v58  ;;  %v21594_v54 = vmax.f32 %v20378_v58, 0.0  ;;  %v22119_v58 = vld [vmem:[#allocation74_spill] sm:$0xff] }
 0x587   :  { %16254 = vrot.lane.b32.xlu0 %v16253_v7, %s17808_s18  ;;  %16259 = vrot.lane.b32.xlu1 %v16258_v5, %s17808_s18  ;;  %v22096_v5 = vld [vmem:[#allocation100_spill] sm:$0xff] }
 0x588   :  { %v21597_v7 = vmax.f32 %v22096_v5, 0.0  ;;  %v20388_v5 = vadd.f32 %v22108_v44, %v8036_v62 }
 0x58a   :  { %v16273_v3 = vpack.i.bf16 %v22101_v28, %v21597_v7  ;;  %22109 = vst [vmem:[#allocation61_spill] sm:$0xff] %v20388_v5  ;;  %v15432_v28 = vadd.f32 %v20182_v29, %v20170_v13  ;;  %v16288_v13 = vpack.i.bf16 %v21590_v52, %v21593_v12  ;;  %v22113_v29 = vld [vmem:[#allocation20_spill] sm:$0xff] }
 0x58b   :  { %16264 = vrot.lane.b32.xlu0 %v16263_v45, %s17808_s18  ;;  %16269 = vrot.lane.b32.xlu1 %v16268_v19, %s17808_s18  ;;  %v22106_v45 = vld [vmem:[#allocation99_spill] sm:$0xff]  ;;  %v21596_v44 = vmax.f32 %v22113_v29, 0.0 }
 0x58c   :  { %v21592_v19 = vmax.f32 %v22106_v45, 0.0  ;;  %v20400_v50 = vadd.f32 %v15432_v28, %v8625_v2  ;;  %v22114_v28 = vld [vmem:[#allocation73_spill] sm:$0xff] }
 0x58d   :  { %v16293_v2 = vpack.i.bf16 %v21591_v30, %v21596_v44 }
 0x58e   :  { %v16283_v49 = vpack.i.bf16 %v22110_v11, %v21592_v19  ;;  %22112 = vst [vmem:[#allocation59_spill] sm:$0xff] %v20400_v50  ;;  %v21599_v62 = vmax.f32 %v20400_v50, 0.0  ;;  %v21600_v11 = vmax.f32 %v22114_v28, 0.0  ;;  %v22120_v50 = vunpack.i.h.bf16 %v22119_v58 }
 0x58f   :  { %16274 = vrot.lane.b32.xlu0 %v16273_v3, %s17808_s18  ;;  %16279 = vrot.lane.b32.xlu1 %v16278_v41, %s17808_s18  ;;  %v21595_v3 = vmax.f32 %v20388_v5, 0.0 }
 0x591   :  { %v16298_v41 = vpack.i.bf16 %v21594_v54, %v21595_v3  ;;  %v22115_v54 = vld [vmem:[#allocation64_spill] sm:$0xff] }
 0x592   :  { %v22116_v3 = vunpack.i.h.bf16 %v22115_v54 }
 0x593   :  { %16284 = vrot.lane.b32.xlu0 %v16283_v49, %s17808_s18  ;;  %16289 = vrot.lane.b32.xlu1 %v16288_v13, %s17808_s18  ;;  %v16303_v49 = vpack.i.bf16 %v21599_v62, %v21600_v11  ;;  %v22125_v62 = vld [vmem:[#allocation34_spill] sm:$0xff] }
 0x597   :  { %16294 = vrot.lane.b32.xlu0 %v16293_v2, %s17808_s18  ;;  %16299 = vrot.lane.b32.xlu1 %v16298_v41, %s17808_s18 }
 0x59b   :  { %16304 = vrot.lane.b32.xlu0 %v16303_v49, %s17808_s18  ;;  %v22117_v49 = vmax.f32 %v19947_v33, 0.0  ;;  %v22126_v33 = vmax.f32 %v22125_v62, 0.0 }
 0x5b5   :  { %v16090_v13 = vpop.permute.xlu1 %16089 }
 0x5b6   :  { %v16092_v52 = vunpack.i.h.bf16 %v16090_v13  ;;  %v16091_v30 = vunpack.i.l.bf16 %v16090_v13  ;;  %v22118_v13 = vmax.f32 %v19956_v51, 0.0 }
 0x5b8   :  { %v9134_v44 = vsel %vm9117_vm5, %v22116_v3, %v16091_v30  ;;  %v9135_v2 = vsel %vm9117_vm5, %v16091_v30, %v16092_v52  ;;  %v9320_v11 = vmax.f32 %v22117_v49, %v16092_v52  ;;  %v22122_v30 = vmax.f32 %v22121_v40, 0.0  ;;  %v22127_v49 = vld [vmem:[#allocation41_spill] sm:$0xff] }
 0x5b9   :  { %v20427_v19 = vpop.permute.xlu1 %16099  ;;  %v16095_v12 = vpop.permute.xlu0 %16094  ;;  %v9319_v52 = vmax.f32 %v22126_v33, %v9135_v2  ;;  %v22128_v51 = vmax.f32 %v22127_v49, 0.0  ;;  %v17325_v2 = vld [vmem:[#allocation10 + $0x70] sm:$0xff]  }
 0x5ba   :  { %v16097_v41 = vunpack.i.h.bf16 %v16095_v12  ;;  %v16096_v7 = vunpack.i.l.bf16 %v16095_v12  ;;  %v9318_v10 = vmax.f32 %v22122_v30, %v9134_v44  ;;  %v22123_v12 = vld [vmem:[#allocation31_spill] sm:$0xff] }
 0x5bb   :  { %v22124_v5 = vmax.f32 %v22123_v12, 0.0 }
 0x5bc   :  { %v9327_v6 = vmax.f32 %v22118_v13, %v16097_v41  ;;  %v9140_v54 = vsel %vm9117_vm5, %v22120_v50, %v16096_v7  ;;  %v9141_v3 = vsel %vm9117_vm5, %v16096_v7, %v16097_v41  ;;  %v22129_v50 = vunpack.i.h.bf16 %v20427_v19  ;;  %v17322_v41 = vld [vmem:[#allocation10 + $0x38] sm:$0xff]  }
 0x5bd   :  { %v9325_v26 = vmax.f32 %v22124_v5, %v9140_v54  ;;  %v20447_v28 = vpop.permute.xlu0 %16104  ;;  %v9326_v13 = vmax.f32 %v22128_v51, %v9141_v3  ;;  %v22130_v7 = vunpack.i.l.bf16 %v20427_v19  ;;  %v20467_v12 = vpop.permute.xlu1 %16109 }
 0x5be   :  { %v9522_v17 = vmax.f32 %v9320_v11, %v9327_v6  ;;  %v21609_v58 = vunpack.i.h.bf16 %v20447_v28  ;;  %v21610_v5 = vunpack.i.l.bf16 %v20447_v28  ;;  %v16111_v29 = vunpack.i.l.bf16 %v20467_v12 }
 0x5bf   :  { %v9121_v40 = vsel %vm9117_vm5, %v22130_v7, %v22129_v50  ;;  %v9520_v44 = vmax.f32 %v9318_v10, %v9325_v26  ;;  %v9521_v54 = vmax.f32 %v9319_v52, %v9326_v13  ;;  %v22131_v26 = vld [vmem:[#allocation103_spill] sm:$0xff]  ;;  %v17324_v13 = vld [vmem:[#allocation10 + $0xb8] sm:$0xff]   ;;  %v22133_v7 = vld [vmem:[#allocation38_spill] sm:$0xff] }
 0x5c0   :  { %v9529_v30 = vpack.c.bf16 %v9522_v17, %v9522_v17  ;;  %v15474_v62 = vpop.f32.mrf.mxu1  ;;  %v9127_v6 = vsel %vm9117_vm5, %v21610_v5, %v21609_v58  ;;  %v22132_v10 = vmax.f32 %v22131_v26, 0.0  ;;  %v17326_v50 = vld [vmem:[#allocation10 + $0x30] sm:$0xff]   ;;  %v22134_v58 = vmax.f32 %v22133_v7, 0.0 }
 0x5c1   :  { %v20465_v11 = vpop.permute.xlu0 %16114  ;;  %v9527_v3 = vpack.c.bf16 %v9520_v44, %v9520_v44  ;;  %v9528_v51 = vpack.c.bf16 %v9521_v54, %v9521_v54  ;;  %v17327_v44 = vld [vmem:[#allocation10 + $0xf0] sm:$0xff]   ;;  %v21614_v54 = vunpack.i.h.bf16 %v20467_v12 }
 0x5c2   :  { %v15475_v33 = vpop.f32.mrf.mxu1  ;;  %15951 = vmatmul.mubr.msk.bf16.vlgmr.msra.gmra.mxu1 %vm9117_vm5, %v9529_v30  ;;  %v9303_v52 = vmax.f32 %v22132_v10, %v9121_v40  ;;  %v16116_v17 = vunpack.i.l.bf16 %v20465_v11  ;;  %v9310_v5 = vmax.f32 %v22134_v58, %v9127_v6  ;;  %v16117_v30 = vunpack.i.h.bf16 %v20465_v11  ;;  %v17330_v6 = vld [vmem:[#allocation10 + $0x28] sm:$0xff]   ;;  %v22135_v26 = vld [vmem:[#allocation28_spill] sm:$0xff] }
 0x5c3   :  { %v15476_v49 = vadd.f32 %v15475_v33, %v15474_v62  ;;  %15508 = vmatpush3.bf16.msra.mxu1 %v17322_v41  ;;  %10062 = vmatprep.mubr.bf16.mxu0 %v9528_v51  ;;  %v17333_v33 = vld [vmem:[#allocation10 + $0x60] sm:$0xff]   ;;  %v22136_v10 = vmax.f32 %v22135_v26, 0.0 }
 0x5c4   :  { %v15477_v45 = vpop.f32.mrf.mxu1  ;;  %15509 = vmatprep.subr.bf16.mxu1 %v17325_v2  ;;  %v9401_v62 = vmax.f32 %v9303_v52, %v9310_v5  ;;  %10063 = vmatmul.mubr.bf16.vlgmr.msra.gmra.mxu0 %v9527_v3  ;;  %v17328_v2 = vld [vmem:[#allocation10 + $0xb0] sm:$0xff]   ;;  %v9125_v5 = vsel %vm9117_vm5, %v16117_v30, %v21614_v54  ;;  %v16120_v3 = vpop.permute.xlu1 %16119  ;;  %v17334_v51 = vld [vmem:[#allocation10 + $0x20] sm:$0xff]  }
 0x5c5   :  { %v20478_v40 = vadd.f32 %v15476_v49, %v20223_v23  ;;  %v9119_v45 = vsel %vm9117_vm5, %v16116_v17, %v16111_v29  ;;  %15530 = vmatpush3.bf16.msra.mxu0 %v17324_v13  ;;  %v17331_v23 = vld [vmem:[#allocation10 + $0xe8] sm:$0xff]   ;;  %v22137_v13 = vld [vmem:[#allocation36_spill] sm:$0xff]  ;;  %v20493_v54 = vpop.permute.xlu0 %16124 }
 0x5c6   :  { %v15478_v41 = vpop.f32.mrf.mxu1  ;;  %v9408_v58 = vpack.c.bf16 %v9401_v62, %v9401_v62  ;;  %15531 = vmatprep.subr.bf16.mxu0 %v17327_v44  ;;  %v9301_v52 = vmax.f32 %v22136_v10, %v9119_v45  ;;  %v17332_v49 = vld [vmem:[#allocation10 + $0xa8] sm:$0xff]   ;;  %v17337_v44 = vld [vmem:[#allocation10 + $0x58] sm:$0xff]   ;;  %v16122_v10 = vunpack.i.h.bf16 %v16120_v3 }
 0x5c7   :  { %15510 = vmatpush3.bf16.msra.mxu1 %v17326_v50  ;;  %v22138_v50 = vmax.f32 %v22137_v13, 0.0  ;;  %v17336_v41 = vld [vmem:[#allocation10 + $0xa0] sm:$0xff]   ;;  %v17342_v13 = vld [vmem:[#allocation10 + $0x10] sm:$0xff]  }
 0x5c8   :  { %15511 = vmatprep.subr.bf16.mxu1 %v17329_v20  ;;  %10497 = vmatprep.mubr.bf16.mxu0 %v9408_v58  ;;  %v17335_v20 = vld [vmem:[#allocation10 + $0xe0] sm:$0xff]   ;;  %v17338_v58 = vld [vmem:[#allocation10 + $0x18] sm:$0xff]   ;;  %v20495_v26 = vpop.permute.xlu1 %16129 }
 0x5c9   :  { %15532 = vmatpush3.bf16.msra.mxu0 %v17328_v2  ;;  %v9308_v7 = vmax.f32 %v22138_v50, %v9125_v5  ;;  %v17339_v2 = vld [vmem:[#allocation10 + $0xd8] sm:$0xff]   ;;  %v16121_v5 = vunpack.i.l.bf16 %v16120_v3  ;;  %v17343_v50 = vld [vmem:[#allocation10 + $0xd0] sm:$0xff]  }
 0x5ca   :  { %15533 = vmatprep.subr.bf16.mxu0 %v17331_v23  ;;  %v21618_v23 = vunpack.i.h.bf16 %v20493_v54 }
 0x5cb   :  { %15512 = vmatpush3.bf16.msra.mxu1 %v17330_v6  ;;  %v9399_v62 = vmax.f32 %v9301_v52, %v9308_v7  ;;  %v17341_v6 = vld [vmem:[#allocation10 + $0x50] sm:$0xff]   ;;  %v21615_v52 = vunpack.i.h.bf16 %v20495_v26  ;;  %v17345_v7 = vld [vmem:[#allocation10 + $0x48] sm:$0xff]   ;;  %v9118_v3 = vsel %vm9117_vm5, %v16121_v5, %v16116_v17  ;;  %v17349_v5 = vld [vmem:[#allocation10 + $0x40] sm:$0xff]  }
 0x5cc   :  { %15513 = vmatprep.subr.bf16.mxu1 %v17333_v33  ;;  %v21617_v33 = vunpack.i.l.bf16 %v20493_v54  ;;  %v22141_v17 = vld [vmem:[#allocation27_spill] sm:$0xff] }
 0x5cd   :  { %15534 = vmatpush3.bf16.msra.mxu0 %v17332_v49  ;;  %v9406_v45 = vpack.c.bf16 %v9399_v62, %v9399_v62  ;;  %v21616_v49 = vunpack.i.l.bf16 %v20495_v26 }
 0x5ce   :  { %15535 = vmatprep.subr.bf16.mxu0 %v17335_v20  ;;  %v9124_v20 = vsel %vm9117_vm5, %v16122_v10, %v16117_v30  ;;  %v17346_v30 = vld [vmem:[#allocation10 + $0x8] sm:$0xff]  }
 0x5cf   :  { %15514 = vmatpush3.bf16.msra.mxu1 %v17334_v51  ;;  %10457 = vmatprep.mubr.bf16.mxu1 %v9406_v45  ;;  %v17340_v51 = vld [vmem:[#allocation10 + $0x98] sm:$0xff]   ;;  %v9123_v62 = vsel %vm9117_vm5, %v21616_v49, %v21617_v33  ;;  %v17347_v10 = vld [vmem:[#allocation10 + $0xc8] sm:$0xff]   ;;  %v17350_v33 = vld [vmem:[#allocation10] sm:$0xff]  }
 0x5d0   :  { %15515 = vmatprep.subr.bf16.mxu1 %v17337_v44  ;;  %v9129_v44 = vsel %vm9117_vm5, %v21615_v52, %v21618_v23  ;;  %v22143_v52 = vunpack.i.l.bf16 %v20427_v19  ;;  %v22150_v23 = vld [vmem:[#allocation71_spill] sm:$0xff] }
 0x5d1   :  { %15536 = vmatpush3.bf16.msra.mxu0 %v17336_v41  ;;  %v17344_v41 = vld [vmem:[#allocation10 + $0x90] sm:$0xff]   ;;  %v22151_v61 = vmax.f32 %v22150_v23, 0.0  ;;  %v20537_v23 = vpop.permute.xlu0 %16134 }
 0x5d2   :  { %15537 = vmatprep.subr.bf16.mxu0 %v17339_v2  ;;  %v22142_v2 = vmax.f32 %v22141_v17, 0.0  ;;  %v9120_v49 = vsel %vm9117_vm5, %v16111_v29, %v22143_v52  ;;  %v22152_v29 = vld [vmem:[#allocation44_spill] sm:$0xff] }
 0x5d3   :  { %15516 = vmatpush3.bf16.msra.mxu1 %v17338_v58  ;;  %v22139_v58 = vld [vmem:[#allocation29_spill] sm:$0xff]  ;;  %v9302_v32 = vmax.f32 %v22151_v61, %v9120_v49  ;;  %v22153_v52 = vmax.f32 %v22152_v29, 0.0  ;;  %v20539_v49 = vpop.permute.xlu1 %16139  ;;  %v17361_v29 = vld [vmem:[#allocation10 + $0x188] sm:$0xff]  }
 0x5d4   :  { %15517 = vmatprep.subr.bf16.mxu1 %v17341_v6  ;;  %v22140_v11 = vmax.f32 %v22139_v58, 0.0  ;;  %v9300_v6 = vmax.f32 %v22142_v2, %v9118_v3  ;;  %v22148_v3 = vld [vmem:[#allocation33_spill] sm:$0xff]  ;;  %v17348_v2 = vld [vmem:[#allocation10 + $0x88] sm:$0xff]  }
 0x5d5   :  { %15538 = vmatpush3.bf16.msra.mxu0 %v17340_v51  ;;  %v22144_v51 = vunpack.i.l.bf16 %v20447_v28 }
 0x5d6   :  { %v9307_v45 = vmax.f32 %v22140_v11, %v9124_v20  ;;  %15539 = vmatprep.subr.bf16.mxu0 %v17343_v50  ;;  %v22146_v20 = vld [vmem:[#allocation19_spill] sm:$0xff]  ;;  %v22149_v50 = vmax.f32 %v22148_v3, 0.0  ;;  %v17362_v3 = vld [vmem:[#allocation10 + $0x160] sm:$0xff]  }
 0x5d7   :  { %15518 = vmatpush3.bf16.msra.mxu1 %v17342_v13  ;;  %v22145_v13 = vunpack.i.h.bf16 %v20467_v12  ;;  %v22147_v11 = vmax.f32 %v22146_v20, 0.0  ;;  %v17351_v12 = vld [vmem:[#allocation10 + $0xc0] sm:$0xff]   ;;  %v17356_v20 = vld [vmem:[#allocation10 + $0x170] sm:$0xff]  }
 0x5d8   :  { %15519 = vmatprep.subr.bf16.mxu1 %v17345_v7  ;;  %v9312_v7 = vmax.f32 %v22149_v50, %v9129_v44  ;;  %v9398_v1 = vmax.f32 %v9300_v6, %v9307_v45  ;;  %v17354_v44 = vld [vmem:[#allocation10 + $0x138] sm:$0xff]   ;;  %v17357_v6 = vld [vmem:[#allocation10 + $0x130] sm:$0xff]  }
 0x5d9   :  { %v9126_v58 = vsel %vm9117_vm5, %v22145_v13, %v22144_v51  ;;  %v9305_v17 = vmax.f32 %v22147_v11, %v9123_v62  ;;  %15540 = vmatpush3.bf16.msra.mxu0 %v17344_v41  ;;  %v17353_v51 = vld [vmem:[#allocation10 + $0x178] sm:$0xff]   ;;  %v17352_v62 = vld [vmem:[#allocation10 + $0x80] sm:$0xff]   ;;  %v17358_v11 = vld [vmem:[#allocation10 + $0x190] sm:$0xff]  }
 0x5da   :  { %v9309_v0 = vmax.f32 %v22153_v52, %v9126_v58  ;;  %15541 = vmatprep.subr.bf16.mxu0 %v17347_v10  ;;  %v17355_v45 = vld [vmem:[#allocation10 + $0x198] sm:$0xff]   ;;  %v16141_v58 = vunpack.i.l.bf16 %v20539_v49  ;;  %v17363_v52 = vld [vmem:[#allocation10 + $0x120] sm:$0xff]  }
 0x5db   :  { %15520 = vmatpush3.bf16.msra.mxu1 %v17346_v30  ;;  %v9403_v13 = vmax.f32 %v9305_v17, %v9312_v7  ;;  %v9405_v30 = vpack.c.bf16 %v9398_v1, %v9398_v1  ;;  %v21623_v1 = vunpack.i.h.bf16 %v20537_v23  ;;  %v17360_v17 = vld [vmem:[#allocation10 + $0x128] sm:$0xff]  }
 0x5dc   :  { %15521 = vmatprep.subr.bf16.mxu1 %v17349_v5  ;;  %v9400_v41 = vmax.f32 %v9302_v32, %v9309_v0  ;;  %v17359_v5 = vld [vmem:[#allocation10 + $0x168] sm:$0xff]   ;;  %v16136_v0 = vunpack.i.l.bf16 %v20537_v23  ;;  %v21625_v32 = vunpack.i.h.bf16 %v20539_v49 }
 0x5dd   :  { %15542 = vmatpush3.bf16.msra.mxu0 %v17348_v2  ;;  %v9410_v61 = vpack.c.bf16 %v9403_v13, %v9403_v13  ;;  %v20559_v2 = vpop.permute.xlu0 %16144 }
 0x5de   :  { %15543 = vmatprep.subr.bf16.mxu0 %v17351_v12  ;;  %v9407_v10 = vpack.c.bf16 %v9400_v41, %v9400_v41  ;;  %v9143_v50 = vsel %vm9117_vm5, %v16136_v0, %v21623_v1  ;;  %v9149_v7 = vsel %vm9117_vm5, %v16141_v58, %v21625_v32  ;;  %v22155_v12 = vunpack.i.h.bf16 %v20493_v54  ;;  %v22159_v41 = vld [vmem:[#allocation104_spill] sm:$0xff]  ;;  %v17364_v1 = vld [vmem:[#allocation10 + $0x180] sm:$0xff]  }
 0x5df   :  { %15522 = vmatpush3.bf16.msra.mxu1 %v17350_v33  ;;  %v22154_v33 = vmov 0.0  }
 0x5e0   :  { %15551 = vmatprep.subr.bf16.mxu1 %v17353_v51  ;;  %v22156_v51 = vld [vmem:[#allocation72_spill] sm:$0xff] }
 0x5e1   :  { %15544 = vmatpush3.bf16.msra.mxu0 %v17352_v62  ;;  %v22157_v13 = vmax.f32 %v22156_v51, 0.0  ;;  %v17366_v51 = vld [vmem:[#allocation10 + $0x118] sm:$0xff]  }
 0x5e2   :  { %10458 = vmatmul.mubr.bf16.vlgmr.msra.gmra.mxu1 %v9405_v30  ;;  %15954 = vmatprep.subr.bf16.mxu0 %v22154_v33  ;;  %v22160_v30 = vmax.f32 %v22159_v41, 0.0  ;;  %v20577_v41 = vpop.permute.xlu1 %16149 }
 0x5e3   :  { %15552 = vmatpush3.bf16.msra.mxu1 %v17354_v44  ;;  %10537 = vmatprep.mubr.bf16.mxu1 %v9410_v61  ;;  %v9313_v62 = vmax.f32 %v22157_v13, %v22155_v12  ;;  %v22158_v44 = vunpack.i.l.bf16 %v20493_v54  ;;  %v17365_v61 = vld [vmem:[#allocation10 + $0x158] sm:$0xff]   ;;  %v20574_v13 = vpop.permute.xlu0 %16154 }
 0x5e4   :  { %15553 = vmatprep.subr.bf16.mxu1 %v17356_v20  ;;  %10498 = vmatmul.mubr.bf16.vlgmr.msra.gmra.mxu0 %v9407_v10  ;;  %v17367_v54 = vld [vmem:[#allocation10 + $0x3b8] sm:$0xff]  }
 0x5e5   :  { %15955 = vmatpush3.bf16.msra.mxu0 %v17355_v45  ;;  %15962 = vmatprep.mubr.msk.bf16.mxu0 %vm17813_vm6, %v22154_v33  ;;  %v9306_v20 = vmax.f32 %v22160_v30, %v22158_v44  ;;  %v22161_v45 = vld [vmem:[#allocation84_spill] sm:$0xff]  ;;  %v16156_v30 = vunpack.i.l.bf16 %v20574_v13 }
 0x5e6   :  { %15956 = vmatprep.subr.bf16.mxu0 %v22154_v33  ;;  %v17369_v44 = vld [vmem:[#allocation10 + $0x150] sm:$0xff]  }
 0x5e7   :  { %15554 = vmatpush3.bf16.msra.mxu1 %v17357_v6  ;;  %v22162_v6 = vmax.f32 %v22161_v45, 0.0  ;;  %v9404_v12 = vmax.f32 %v9306_v20, %v9313_v62  ;;  %v17371_v62 = vld [vmem:[#allocation10 + $0x3b0] sm:$0xff]   ;;  %v21626_v20 = vunpack.i.h.bf16 %v20577_v41 }
 0x5e8   :  { %15555 = vmatprep.subr.bf16.mxu1 %v17359_v5  ;;  %v22163_v5 = vld [vmem:[#allocation86_spill] sm:$0xff] }
 0x5e9   :  { %15957 = vmatpush3.bf16.msra.mxu0 %v17358_v11  ;;  %v9329_v10 = vmax.f32 %v22162_v6, %v9143_v50  ;;  %v22164_v11 = vmax.f32 %v22163_v5, 0.0  ;;  %v21624_v50 = vunpack.i.h.bf16 %v20574_v13  ;;  %v17373_v6 = vld [vmem:[#allocation10 + $0x148] sm:$0xff]   ;;  %v22166_v5 = vunpack.i.h.bf16 %v20447_v28 }
 0x5ea   :  { %15958 = vmatprep.subr.bf16.mxu0 %v22154_v33  ;;  %v17374_v28 = vld [vmem:[#allocation10 + $0x108] sm:$0xff]  }
 0x5eb   :  { %15556 = vmatpush3.bf16.msra.mxu1 %v17360_v17  ;;  %v9336_v17 = vmax.f32 %v22164_v11, %v9149_v7  ;;  %v17368_v7 = vld [vmem:[#allocation10 + $0x378] sm:$0xff]  }
 0x5ec   :  { %15557 = vmatprep.subr.bf16.mxu1 %v17362_v3 }
 0x5ed   :  { %15959 = vmatpush3.bf16.msra.mxu0 %v17361_v29  ;;  %v10586_v3 = vmax.f32 %v9329_v10, %v9336_v17  ;;  %v9411_v29 = vpack.c.bf16 %v9404_v12, %v9404_v12  ;;  %v22165_v10 = vunpack.i.h.bf16 %v20495_v26  ;;  %v22168_v17 = vunpack.i.h.bf16 %v20427_v19  ;;  %v22171_v19 = vld [vmem:[#allocation24_spill] sm:$0xff] }
 0x5ee   :  { %15960 = vmatprep.subr.bf16.mxu0 %v22154_v33  ;;  %v9151_v12 = vsel %vm9117_vm5, %v16156_v30, %v21624_v50  ;;  %v17381_v50 = vld [vmem:[#allocation10 + $0x438] sm:$0xff]  }
 0x5ef   :  { %15558 = vmatpush3.bf16.msra.mxu1 %v17363_v52  ;;  %v17370_v52 = vld [vmem:[#allocation10 + $0x110] sm:$0xff]   ;;  %v10593_v45 = vpack.c.bf16 %v10586_v3, %v10586_v3  ;;  %v9128_v11 = vsel %vm9117_vm5, %v22166_v5, %v22165_v10  ;;  %v22172_v10 = vmax.f32 %v22171_v19, 0.0 }
 0x5f0   :  { %15559 = vmatprep.subr.bf16.mxu1 %v17365_v61  ;;  %v16151_v61 = vunpack.i.l.bf16 %v20577_v41 }
 0x5f1   :  { %15961 = vmatpush3.bf16.msra.mxu0 %v17364_v1  ;;  %v22167_v1 = vunpack.i.l.bf16 %v20495_v26 }
 0x5f2   :  { %15578 = vmatprep.subr.bf16.mxu0 %v17367_v54  ;;  %v17372_v54 = vld [vmem:[#allocation10 + $0x370] sm:$0xff]  }
 0x5f3   :  { %15560 = vmatpush3.bf16.msra.mxu1 %v17366_v51  ;;  %v9122_v51 = vsel %vm9117_vm5, %v22168_v17, %v22167_v1  ;;  %v17375_v1 = vld [vmem:[#allocation10 + $0x3a8] sm:$0xff]  }
 0x5f4   :  { %15561 = vmatprep.subr.bf16.mxu1 %v17369_v44  ;;  %15963 = vmatmul.mubr.msk.bf16.vlgmr.msra.gmra.mxu0 %vm9117_vm5, %v9411_v29  ;;  %v22169_v44 = vld [vmem:[#allocation25_spill] sm:$0xff]  ;;  %v9304_v5 = vmax.f32 %v22172_v10, %v9122_v51  ;;  %v9145_v29 = vsel %vm9117_vm5, %v16151_v61, %v21626_v20 }
 0x5f5   :  { %15579 = vmatpush3.bf16.msra.mxu0 %v17368_v7  ;;  %11051 = vmatprep.mubr.bf16.mxu0 %v10593_v45  ;;  %v22170_v26 = vmax.f32 %v22169_v44, 0.0  ;;  %v17377_v7 = vld [vmem:[#allocation10 + $0x140] sm:$0xff]   ;;  %v22173_v45 = vld [vmem:[#allocation108_spill] sm:$0xff] }
 0x5f6   :  { %15580 = vmatprep.subr.bf16.mxu0 %v17371_v62  ;;  %v22174_v17 = vmax.f32 %v22173_v45, 0.0  ;;  %v17376_v62 = vld [vmem:[#allocation10 + $0x368] sm:$0xff]   ;;  %v17378_v44 = vld [vmem:[#allocation10 + $0x100] sm:$0xff]   ;;  %v17382_v20 = vld [vmem:[#allocation10 + $0x3f8] sm:$0xff]  }
 0x5f7   :  { %15562 = vmatpush3.bf16.msra.mxu1 %v17370_v52  ;;  %v9311_v3 = vmax.f32 %v22170_v26, %v9128_v11  ;;  %v17379_v11 = vld [vmem:[#allocation10 + $0x3a0] sm:$0xff]  }
 0x5f8   :  { %15563 = vmatprep.subr.bf16.mxu1 %v17373_v6  ;;  %v9338_v52 = vmax.f32 %v22174_v17, %v9151_v12  ;;  %v22175_v26 = vld [vmem:[#allocation106_spill] sm:$0xff]  ;;  %v17383_v12 = vld [vmem:[#allocation10 + $0x398] sm:$0xff]   ;;  %v20612_v17 = vpop.permute.xlu0 %16164 }
 0x5f9   :  { %15581 = vmatpush3.bf16.msra.mxu0 %v17372_v54  ;;  %v22176_v19 = vmax.f32 %v22175_v26, 0.0  ;;  %v9402_v10 = vmax.f32 %v9304_v5, %v9311_v3  ;;  %v17380_v6 = vld [vmem:[#allocation10 + $0x360] sm:$0xff]   ;;  %v17385_v54 = vld [vmem:[#allocation10 + $0x430] sm:$0xff]   ;;  %v17390_v26 = vld [vmem:[#allocation10 + $0x3e8] sm:$0xff]  }
 0x5fa   :  { %15582 = vmatprep.subr.bf16.mxu0 %v17375_v1  ;;  %v17386_v3 = vld [vmem:[#allocation10 + $0x3f0] sm:$0xff]   ;;  %v16147_v1 = vunpack.i.h.bf16 %v20559_v2 }
 0x5fb   :  { %15564 = vmatpush3.bf16.msra.mxu1 %v17374_v28  ;;  %v9331_v51 = vmax.f32 %v22176_v19, %v9145_v29  ;;  %v9409_v45 = vpack.c.bf16 %v9402_v10, %v9402_v10  ;;  %v17384_v29 = vld [vmem:[#allocation10 + $0x358] sm:$0xff]   ;;  %v17387_v5 = vld [vmem:[#allocation10 + $0x390] sm:$0xff]   ;;  %v17391_v19 = vld [vmem:[#allocation10 + $0x388] sm:$0xff]  }
 0x5fc   :  { %15565 = vmatprep.subr.bf16.mxu1 %v17377_v7  ;;  %v16146_v7 = vunpack.i.l.bf16 %v20559_v2  ;;  %v17393_v10 = vld [vmem:[#allocation10 + $0x420] sm:$0xff]  }
 0x5fd   :  { %v10588_v32 = vmax.f32 %v9331_v51, %v9338_v52  ;;  %15583 = vmatpush3.bf16.msra.mxu0 %v17376_v62  ;;  %v20616_v52 = vpop.permute.xlu1 %16159  ;;  %v21627_v62 = vunpack.i.l.bf16 %v20612_v17  ;;  %v9148_v51 = vsel %vm9117_vm5, %v16147_v1, %v16141_v58  ;;  %v17395_v1 = vld [vmem:[#allocation10 + $0x380] sm:$0xff]  }
 0x5fe   :  { %15584 = vmatprep.subr.bf16.mxu0 %v17379_v11  ;;  %v21629_v11 = vunpack.i.l.bf16 %v20616_v52  ;;  %v9142_v2 = vsel %vm9117_vm5, %v16146_v7, %v16136_v0  ;;  %v17397_v7 = vld [vmem:[#allocation10 + $0x418] sm:$0xff]  }
 0x5ff   :  { %15566 = vmatpush3.bf16.msra.mxu1 %v17378_v44  ;;  %v10595_v28 = vpack.c.bf16 %v10588_v32, %v10588_v32  ;;  %v21628_v32 = vunpack.i.h.bf16 %v20612_v17  ;;  %v17388_v44 = vld [vmem:[#allocation10 + $0x350] sm:$0xff]  }
 0x600   :  { %15600 = vmatprep.subr.bf16.mxu1 %v17381_v50  ;;  %v17389_v50 = vld [vmem:[#allocation10 + $0x428] sm:$0xff]  }
 0x601   :  { %15585 = vmatpush3.bf16.msra.mxu0 %v17380_v6  ;;  %v9153_v6 = vsel %vm9117_vm5, %v21627_v62, %v21628_v32  ;;  %v17399_v32 = vld [vmem:[#allocation10 + $0x4b8] sm:$0xff]  }
 0x602   :  { %10538 = vmatmul.mubr.bf16.vlgmr.msra.gmra.mxu1 %v9409_v45  ;;  %15586 = vmatprep.subr.bf16.mxu0 %v17383_v12  ;;  %v17392_v45 = vld [vmem:[#allocation10 + $0x348] sm:$0xff]  }
 0x603   :  { %15601 = vmatpush3.bf16.msra.mxu1 %v17382_v20  ;;  %11091 = vmatprep.mubr.bf16.mxu1 %v10595_v28  ;;  %v16162_v20 = vunpack.i.h.bf16 %v20616_v52  ;;  %v22177_v12 = vld [vmem:[#allocation83_spill] sm:$0xff] }
 0x604   :  { %15602 = vmatprep.subr.bf16.mxu1 %v17385_v54  ;;  %v22178_v54 = vmax.f32 %v22177_v12, 0.0  ;;  %v22183_v12 = vld [vmem:[#allocation42_spill] sm:$0xff] }
 0x605   :  { %15587 = vmatpush3.bf16.msra.mxu0 %v17384_v29  ;;  %v22179_v29 = vld [vmem:[#allocation85_spill] sm:$0xff]  ;;  %v9147_v58 = vsel %vm9117_vm5, %v21629_v11, %v16162_v20 }
 0x606   :  { %15588 = vmatprep.subr.bf16.mxu0 %v17387_v5  ;;  %v9328_v28 = vmax.f32 %v22178_v54, %v9142_v2  ;;  %v17394_v5 = vld [vmem:[#allocation10 + $0x3e0] sm:$0xff]   ;;  %v22184_v54 = vmax.f32 %v22183_v12, 0.0  ;;  %v17400_v11 = vld [vmem:[#allocation10 + $0x478] sm:$0xff]  }
 0x607   :  { %15603 = vmatpush3.bf16.msra.mxu1 %v17386_v3  ;;  %v22180_v3 = vmax.f32 %v22179_v29, 0.0  ;;  %v17396_v2 = vld [vmem:[#allocation10 + $0x340] sm:$0xff]  }
 0x608   :  { %15604 = vmatprep.subr.bf16.mxu1 %v17389_v50  ;;  %v22181_v50 = vld [vmem:[#allocation49_spill] sm:$0xff] }
 0x609   :  { %15589 = vmatpush3.bf16.msra.mxu0 %v17388_v44  ;;  %v9335_v0 = vmax.f32 %v22180_v3, %v9148_v51  ;;  %v22182_v44 = vmax.f32 %v22181_v50, 0.0  ;;  %v9333_v51 = vmax.f32 %v22184_v54, %v9147_v58  ;;  %v17398_v3 = vld [vmem:[#allocation10 + $0x3d8] sm:$0xff]   ;;  %v17402_v50 = vld [vmem:[#allocation10 + $0x3d0] sm:$0xff]   ;;  %v22186_v58 = vunpack.i.h.bf16 %v20537_v23  ;;  %v17410_v23 = vld [vmem:[#allocation10 + $0x3c0] sm:$0xff]  }
 0x60a   :  { %15590 = vmatprep.subr.bf16.mxu0 %v17391_v19  ;;  %v17401_v19 = vld [vmem:[#allocation10 + $0x410] sm:$0xff]  }
 0x60b   :  { %15605 = vmatpush3.bf16.msra.mxu1 %v17390_v26  ;;  %v9340_v62 = vmax.f32 %v22182_v44, %v9153_v6  ;;  %v10585_v29 = vmax.f32 %v9328_v28, %v9335_v0  ;;  %v17403_v6 = vld [vmem:[#allocation10 + $0x4b0] sm:$0xff]   ;;  %v17405_v44 = vld [vmem:[#allocation10 + $0x408] sm:$0xff]   ;;  %v22185_v28 = vunpack.i.h.bf16 %v20539_v49  ;;  %v17409_v49 = vld [vmem:[#allocation10 + $0x400] sm:$0xff]  }
 0x60c   :  { %15606 = vmatprep.subr.bf16.mxu1 %v17393_v10 }
 0x60d   :  { %15591 = vmatpush3.bf16.msra.mxu0 %v17392_v45  ;;  %v10590_v26 = vmax.f32 %v9333_v51, %v9340_v62  ;;  %v10592_v10 = vpack.c.bf16 %v10585_v29, %v10585_v29  ;;  %v9150_v0 = vsel %vm9117_vm5, %v22185_v28, %v16156_v30  ;;  %v17404_v62 = vld [vmem:[#allocation10 + $0x470] sm:$0xff]   ;;  %v20658_v30 = vpop.permute.xlu0 %16174  ;;  %v17408_v29 = vld [vmem:[#allocation10 + $0x468] sm:$0xff]  }
 0x60e   :  { %15592 = vmatprep.subr.bf16.mxu0 %v17395_v1  ;;  %v17407_v1 = vld [vmem:[#allocation10 + $0x4a8] sm:$0xff]  }
 0x60f   :  { %15607 = vmatpush3.bf16.msra.mxu1 %v17394_v5  ;;  %v10597_v45 = vpack.c.bf16 %v10590_v26, %v10590_v26  ;;  %v17406_v5 = vld [vmem:[#allocation10 + $0x3c8] sm:$0xff]  }
 0x610   :  { %15608 = vmatprep.subr.bf16.mxu1 %v17397_v7  ;;  %v22187_v7 = vld [vmem:[#allocation107_spill] sm:$0xff] }
 0x611   :  { %15593 = vmatpush3.bf16.msra.mxu0 %v17396_v2  ;;  %v22188_v2 = vmax.f32 %v22187_v7, 0.0  ;;  %v21633_v7 = vunpack.i.h.bf16 %v20658_v30 }
 0x612   :  { %15622 = vmatprep.subr.bf16.mxu0 %v17399_v32  ;;  %v9144_v32 = vsel %vm9117_vm5, %v22186_v58, %v16151_v61  ;;  %v17411_v61 = vld [vmem:[#allocation10 + $0x4a0] sm:$0xff]   ;;  %v17416_v58 = vld [vmem:[#allocation10 + $0x4d0] sm:$0xff]  }
 0x613   :  { %15609 = vmatpush3.bf16.msra.mxu1 %v17398_v3  ;;  %v9337_v12 = vmax.f32 %v22188_v2, %v9150_v0  ;;  %v20662_v3 = vpop.permute.xlu1 %16169  ;;  %v21634_v2 = vunpack.i.l.bf16 %v20658_v30 }
 0x614   :  { %15610 = vmatprep.subr.bf16.mxu1 %v17401_v19  ;;  %11052 = vmatmul.mubr.bf16.vlgmr.msra.gmra.mxu0 %v10592_v10  ;;  %v17412_v19 = vld [vmem:[#allocation10 + $0x460] sm:$0xff]   ;;  %v20664_v10 = vpop.permute.xlu0 %16184 }
 0x615   :  { %15623 = vmatpush3.bf16.msra.mxu0 %v17400_v11  ;;  %11131 = vmatprep.mubr.bf16.mxu0 %v10597_v45  ;;  %v22189_v11 = vld [vmem:[#allocation105_spill] sm:$0xff]  ;;  %v16187_v28 = vunpack.i.h.bf16 %v20664_v10  ;;  %v21632_v0 = vunpack.i.l.bf16 %v20664_v10 }
 0x616   :  { %15624 = vmatprep.subr.bf16.mxu0 %v17403_v6  ;;  %v22190_v54 = vmax.f32 %v22189_v11, 0.0  ;;  %v17414_v6 = vld [vmem:[#allocation10 + $0x498] sm:$0xff]   ;;  %v17418_v11 = vld [vmem:[#allocation10 + $0x450] sm:$0xff]  }
 0x617   :  { %15611 = vmatpush3.bf16.msra.mxu1 %v17402_v50  ;;  %v17413_v50 = vld [vmem:[#allocation10 + $0x4d8] sm:$0xff]  }
 0x618   :  { %15612 = vmatprep.subr.bf16.mxu1 %v17405_v44  ;;  %v9330_v51 = vmax.f32 %v22190_v54, %v9144_v32  ;;  %v20667_v44 = vpop.permute.xlu1 %16179  ;;  %v17417_v32 = vld [vmem:[#allocation10 + $0x490] sm:$0xff]   ;;  %v21635_v54 = vunpack.i.h.bf16 %v20662_v3 }
 0x619   :  { %15625 = vmatpush3.bf16.msra.mxu0 %v17404_v62  ;;  %v17415_v62 = vld [vmem:[#allocation10 + $0x458] sm:$0xff]  }
 0x61a   :  { %15626 = vmatprep.subr.bf16.mxu0 %v17407_v1  ;;  %v10587_v26 = vmax.f32 %v9330_v51, %v9337_v12  ;;  %v21630_v1 = vunpack.i.l.bf16 %v20667_v44  ;;  %v16171_v51 = vunpack.i.l.bf16 %v20662_v3 }
 0x61b   :  { %15613 = vmatpush3.bf16.msra.mxu1 %v17406_v5  ;;  %v21631_v5 = vunpack.i.h.bf16 %v20667_v44 }
 0x61c   :  { %15614 = vmatprep.subr.bf16.mxu1 %v17409_v49  ;;  %v10594_v45 = vpack.c.bf16 %v10587_v26, %v10587_v26  ;;  %v9155_v12 = vsel %vm9117_vm5, %v21632_v0, %v21630_v1  ;;  %v22192_v26 = vld [vmem:[#allocation46_spill] sm:$0xff] }
 0x61d   :  { %15627 = vmatpush3.bf16.msra.mxu0 %v17408_v29  ;;  %v9161_v49 = vsel %vm9117_vm5, %v16187_v28, %v21631_v5  ;;  %v17419_v29 = vld [vmem:[#allocation10 + $0x4c8] sm:$0xff]  }
 0x61e   :  { %15628 = vmatprep.subr.bf16.mxu0 %v17411_v61  ;;  %v22191_v61 = vunpack.i.h.bf16 %v20612_v17  ;;  %v17421_v0 = vld [vmem:[#allocation10 + $0x448] sm:$0xff]  }
 0x61f   :  { %15615 = vmatpush3.bf16.msra.mxu1 %v17410_v23  ;;  %v17420_v23 = vld [vmem:[#allocation10 + $0x488] sm:$0xff]  }
 0x620   :  { %15966 = vmatprep.subr.bf16.mxu1 %v22154_v33 }
 0x621   :  { %15629 = vmatpush3.bf16.msra.mxu0 %v17412_v19  ;;  %v22193_v19 = vmax.f32 %v22192_v26, 0.0  ;;  %v22197_v26 = vmax.f32 %v22055_v37, 0.0  ;;  %v9157_v37 = vsel %vm9117_vm5, %v16171_v51, %v21635_v54  ;;  %v17429_v54 = vld [vmem:[#allocation10 + $0x550] sm:$0xff]  }
 0x622   :  { %11092 = vmatmul.mubr.bf16.vlgmr.msra.gmra.mxu1 %v10594_v45  ;;  %15630 = vmatprep.subr.bf16.mxu0 %v17414_v6  ;;  %v22194_v6 = vunpack.i.l.bf16 %v20612_v17  ;;  %v22195_v45 = vunpack.i.h.bf16 %v20574_v13  ;;  %v22198_v17 = vld [vmem:[#allocation53_spill] sm:$0xff] }
 0x623   :  { %15967 = vmatpush3.bf16.msra.mxu1 %v17413_v50  ;;  %15974 = vmatprep.mubr.msk.bf16.mxu1 %vm17813_vm6, %v22154_v33  ;;  %v9341_v50 = vmax.f32 %v22193_v19, %v22191_v61  ;;  %v9350_v61 = vmax.f32 %v22197_v26, %v9161_v49  ;;  %v22199_v13 = vmax.f32 %v22198_v17, 0.0  ;;  %v22204_v49 = vmax.f32 %v22053_v25, 0.0  ;;  %v17424_v26 = vld [vmem:[#allocation10 + $0x440] sm:$0xff]  }
 0x624   :  { %15968 = vmatprep.subr.bf16.mxu1 %v22154_v33  ;;  %v22207_v17 = vld [vmem:[#allocation110_spill] sm:$0xff] }
 0x625   :  { %15631 = vmatpush3.bf16.msra.mxu0 %v17415_v62  ;;  %v9152_v62 = vsel %vm9117_vm5, %v22195_v45, %v22194_v6  ;;  %v9334_v19 = vmax.f32 %v22199_v13, %v16162_v20  ;;  %v22200_v6 = vunpack.i.l.bf16 %v20616_v52  ;;  %v22201_v45 = vunpack.i.h.bf16 %v20577_v41  ;;  %v17422_v20 = vld [vmem:[#allocation10 + $0x4c0] sm:$0xff]   ;;  %v17425_v41 = vld [vmem:[#allocation10 + $0x558] sm:$0xff]  }
 0x626   :  { %15632 = vmatprep.subr.bf16.mxu0 %v17417_v32  ;;  %v22196_v32 = vmax.f32 %v22061_v39, 0.0  ;;  %v22208_v13 = vmax.f32 %v22207_v17, 0.0  ;;  %v17443_v17 = vld [vmem:[#allocation10 + $0x5b8] sm:$0xff]  }
 0x627   :  { %15969 = vmatpush3.bf16.msra.mxu1 %v17416_v58  ;;  %v9163_v58 = vsel %vm9117_vm5, %v21634_v2, %v21633_v7  ;;  %v9146_v5 = vsel %vm9117_vm5, %v22201_v45, %v22200_v6  ;;  %v22202_v7 = vld [vmem:[#allocation39_spill] sm:$0xff]  ;;  %v10591_v52 = vmax.f32 %v9334_v19, %v9341_v50  ;;  %v17427_v19 = vld [vmem:[#allocation10 + $0x5d8] sm:$0xff]  }
 0x628   :  { %15970 = vmatprep.subr.bf16.mxu1 %v22154_v33  ;;  %v9343_v1 = vmax.f32 %v22196_v32, %v9155_v12  ;;  %v22203_v2 = vmax.f32 %v22202_v7, 0.0  ;;  %v17423_v12 = vld [vmem:[#allocation10 + $0x480] sm:$0xff]   ;;  %v22205_v32 = vld [vmem:[#allocation32_spill] sm:$0xff]  ;;  %v9345_v6 = vmax.f32 %v22208_v13, %v9157_v37 }
 0x629   :  { %15633 = vmatpush3.bf16.msra.mxu0 %v17418_v11  ;;  %v9352_v11 = vmax.f32 %v22204_v49, %v9163_v58  ;;  %v22206_v7 = vmax.f32 %v22205_v32, 0.0  ;;  %v10598_v50 = vpack.c.bf16 %v10591_v52, %v10591_v52  ;;  %v17431_v58 = vld [vmem:[#allocation10 + $0x5d0] sm:$0xff]   ;;  %v17437_v52 = vld [vmem:[#allocation10 + $0x540] sm:$0xff]   ;;  %v17436_v49 = vld [vmem:[#allocation10 + $0x588] sm:$0xff]  }
 0x62a   :  { %v9339_v39 = vmax.f32 %v22203_v2, %v9152_v62  ;;  %15634 = vmatprep.subr.bf16.mxu0 %v17420_v23  ;;  %v11181_v62 = vmax.f32 %v9343_v1, %v9350_v61  ;;  %v17426_v23 = vld [vmem:[#allocation10 + $0x518] sm:$0xff]   ;;  %v17432_v37 = vld [vmem:[#allocation10 + $0x590] sm:$0xff]   ;;  %v17439_v32 = vld [vmem:[#allocation10 + $0x5c0] sm:$0xff]  }
 0x62b   :  { %15971 = vmatpush3.bf16.msra.mxu1 %v17419_v29  ;;  %v9332_v2 = vmax.f32 %v22206_v7, %v9146_v5  ;;  %v11183_v45 = vmax.f32 %v9345_v6, %v9352_v11  ;;  %v17428_v5 = vld [vmem:[#allocation10 + $0x598] sm:$0xff]   ;;  %v17438_v11 = vld [vmem:[#allocation10 + $0x500] sm:$0xff]   ;;  %v17445_v13 = vld [vmem:[#allocation10 + $0x530] sm:$0xff]  }
 0x62c   :  { %15972 = vmatprep.subr.bf16.mxu1 %v22154_v33  ;;  %v11188_v25 = vpack.c.bf16 %v11181_v62, %v11181_v62  ;;  %v17440_v7 = vld [vmem:[#allocation10 + $0x580] sm:$0xff]  }
 0x62d   :  { %15635 = vmatpush3.bf16.msra.mxu0 %v17421_v0  ;;  %v10589_v29 = vmax.f32 %v9332_v2, %v9339_v39  ;;  %v17430_v0 = vld [vmem:[#allocation10 + $0x510] sm:$0xff]   ;;  %v11190_v61 = vpack.c.bf16 %v11183_v45, %v11183_v45  ;;  %v17433_v39 = vld [vmem:[#allocation10 + $0x548] sm:$0xff]   ;;  %v20733_v2 = vpop.permute.xlu0 %16194 }
 0x62e   :  { %15636 = vmatprep.subr.bf16.mxu0 %v17423_v12  ;;  %v17435_v12 = vld [vmem:[#allocation10 + $0x5c8] sm:$0xff]  }
 0x62f   :  { %15973 = vmatpush3.bf16.msra.mxu1 %v17422_v20  ;;  %v10596_v1 = vpack.c.bf16 %v10589_v29, %v10589_v29  ;;  %v17434_v20 = vld [vmem:[#allocation10 + $0x508] sm:$0xff]  }
 0x630   :  { %15649 = vmatprep.subr.bf16.mxu1 %v17425_v41  ;;  %v16190_v41 = vpop.permute.xlu1 %16189 }
 0x631   :  { %15637 = vmatpush3.bf16.msra.mxu0 %v17424_v26  ;;  %v17442_v26 = vld [vmem:[#allocation10 + $0x4f8] sm:$0xff]   ;;  %v16192_v6 = vunpack.i.h.bf16 %v16190_v41  ;;  %v16191_v29 = vunpack.i.l.bf16 %v16190_v41  ;;  %v22211_v41 = vunpack.i.h.bf16 %v20667_v44 }
 0x632   :  { %15975 = vmatmul.mubr.msk.bf16.vlgmr.msra.gmra.mxu1 %vm9117_vm5, %v10598_v50  ;;  %15671 = vmatprep.subr.bf16.mxu0 %v17427_v19  ;;  %v16196_v50 = vunpack.i.l.bf16 %v20733_v2 }
 0x633   :  { %15650 = vmatpush3.bf16.msra.mxu1 %v17426_v23  ;;  %11646 = vmatprep.mubr.bf16.mxu1 %v11188_v25  ;;  %v16197_v23 = vunpack.i.h.bf16 %v20733_v2  ;;  %v17444_v25 = vld [vmem:[#allocation10 + $0x578] sm:$0xff]  }
 0x634   :  { %15651 = vmatprep.subr.bf16.mxu1 %v17429_v54  ;;  %11132 = vmatmul.mubr.bf16.vlgmr.msra.gmra.mxu0 %v10596_v1  ;;  %v17441_v54 = vld [vmem:[#allocation10 + $0x538] sm:$0xff]   ;;  %v20735_v62 = vpop.permute.xlu1 %16199  ;;  %v17447_v1 = vld [vmem:[#allocation10 + $0x5b0] sm:$0xff]  }
 0x635   :  { %15672 = vmatpush3.bf16.msra.mxu0 %v17428_v5  ;;  %11686 = vmatprep.mubr.bf16.mxu0 %v11190_v61  ;;  %v16202_v19 = vunpack.i.h.bf16 %v20735_v62  ;;  %v16201_v45 = vunpack.i.l.bf16 %v20735_v62  ;;  %v17446_v5 = vld [vmem:[#allocation10 + $0x4f0] sm:$0xff]   ;;  %v22209_v61 = vunpack.i.l.bf16 %v20664_v10  ;;  %v17451_v10 = vld [vmem:[#allocation10 + $0x5a8] sm:$0xff]   ;;  %v17471_v2 = vld [vmem:[#allocation10 + $0x6f8] sm:$0xff]  }
 0x636   :  { %15673 = vmatprep.subr.bf16.mxu0 %v17431_v58  ;;  %v9160_v58 = vsel %vm9117_vm5, %v16192_v6, %v16187_v28  ;;  %v17450_v28 = vld [vmem:[#allocation10 + $0x4e8] sm:$0xff]   ;;  %v22215_v6 = vmax.f32 %v19709_v46, 0.0 }
 0x637   :  { %15652 = vmatpush3.bf16.msra.mxu1 %v17430_v0  ;;  %v17449_v0 = vld [vmem:[#allocation10 + $0x528] sm:$0xff]  }
 0x638   :  { %15653 = vmatprep.subr.bf16.mxu1 %v17433_v39  ;;  %v9154_v39 = vsel %vm9117_vm5, %v16191_v29, %v22209_v61  ;;  %v22217_v61 = vld [vmem:[#allocation111_spill] sm:$0xff]  ;;  %v22227_v62 = vld [vmem:[#allocation50_spill] sm:$0xff] }
 0x639   :  { %15674 = vmatpush3.bf16.msra.mxu0 %v17432_v37  ;;  %v9165_v37 = vsel %vm9117_vm5, %v16202_v19, %v16197_v23 }
 0x63a   :  { %15675 = vmatprep.subr.bf16.mxu0 %v17435_v12  ;;  %v17448_v12 = vld [vmem:[#allocation10 + $0x570] sm:$0xff]  }
 0x63b   :  { %15654 = vmatpush3.bf16.msra.mxu1 %v17434_v20  ;;  %v9159_v20 = vsel %vm9117_vm5, %v16201_v45, %v16196_v50 }
 0x63c   :  { %15655 = vmatprep.subr.bf16.mxu1 %v17437_v52  ;;  %v22210_v52 = vunpack.i.l.bf16 %v20658_v30  ;;  %v9347_v29 = vmax.f32 %v22215_v6, %v9159_v20  ;;  %v17456_v20 = vld [vmem:[#allocation10 + $0x560] sm:$0xff]  }
 0x63d   :  { %15676 = vmatpush3.bf16.msra.mxu0 %v17436_v49 }
 0x63e   :  { %15677 = vmatprep.subr.bf16.mxu0 %v17439_v32  ;;  %v9162_v49 = vsel %vm9117_vm5, %v22211_v41, %v22210_v52 }
 0x63f   :  { %15656 = vmatpush3.bf16.msra.mxu1 %v17438_v11  ;;  %v22212_v11 = vunpack.i.l.bf16 %v20667_v44  ;;  %v22218_v44 = vmax.f32 %v22217_v61, 0.0 }
 0x640   :  { %15657 = vmatprep.subr.bf16.mxu1 %v17441_v54  ;;  %v22213_v54 = vmax.f32 %v22054_v18, 0.0 }
 0x641   :  { %15678 = vmatpush3.bf16.msra.mxu0 %v17440_v7  ;;  %v9156_v32 = vsel %vm9117_vm5, %v22212_v11, %v16171_v51  ;;  %v9351_v52 = vmax.f32 %v22218_v44, %v9162_v49  ;;  %v22219_v51 = vld [vmem:[#allocation109_spill] sm:$0xff]  ;;  %v17460_v49 = vld [vmem:[#allocation10 + $0x650] sm:$0xff]  }
 0x642   :  { %15679 = vmatprep.subr.bf16.mxu0 %v17443_v17  ;;  %v9349_v7 = vmax.f32 %v22213_v54, %v9160_v58  ;;  %v22220_v41 = vmax.f32 %v22219_v51, 0.0  ;;  %v17455_v58 = vld [vmem:[#allocation10 + $0x5a0] sm:$0xff]   ;;  %v20779_v54 = vpop.permute.xlu0 %16204  ;;  %v17465_v51 = vld [vmem:[#allocation10 + $0x668] sm:$0xff]  }
 0x643   :  { %15658 = vmatpush3.bf16.msra.mxu1 %v17442_v26  ;;  %v22214_v26 = vmax.f32 %v22060_v4, 0.0  ;;  %v17454_v4 = vld [vmem:[#allocation10 + $0x4e0] sm:$0xff]  }
 0x644   :  { %15659 = vmatprep.subr.bf16.mxu1 %v17445_v13  ;;  %v17453_v13 = vld [vmem:[#allocation10 + $0x520] sm:$0xff]   ;;  %v9344_v18 = vmax.f32 %v22220_v41, %v9156_v32  ;;  %v22221_v41 = vmax.f32 %v20180_v53, 0.0 }
 0x645   :  { %15680 = vmatpush3.bf16.msra.mxu0 %v17444_v25  ;;  %v9342_v17 = vmax.f32 %v22214_v26, %v9154_v39  ;;  %v22216_v25 = vmax.f32 %v19721_v21, 0.0  ;;  %v17457_v39 = vld [vmem:[#allocation10 + $0x658] sm:$0xff]   ;;  %v17463_v26 = vld [vmem:[#allocation10 + $0x648] sm:$0xff]   ;;  %v17468_v53 = vld [vmem:[#allocation10 + $0x660] sm:$0xff]  }
 0x646   :  { %15681 = vmatprep.subr.bf16.mxu0 %v17447_v1  ;;  %v17452_v1 = vld [vmem:[#allocation10 + $0x568] sm:$0xff]   ;;  %v11182_v21 = vmax.f32 %v9344_v18, %v9351_v52  ;;  %v20801_v52 = vpop.permute.xlu0 %16214  ;;  %v9355_v18 = vmax.f32 %v22221_v41, %v16197_v23  ;;  %v22226_v41 = vunpack.i.h.bf16 %v20662_v3 }
 0x647   :  { %15660 = vmatpush3.bf16.msra.mxu1 %v17446_v5  ;;  %v9354_v5 = vmax.f32 %v22216_v25, %v9165_v37  ;;  %v17458_v37 = vld [vmem:[#allocation10 + $0x618] sm:$0xff]   ;;  %v17462_v25 = vld [vmem:[#allocation10 + $0x670] sm:$0xff]  }
 0x648   :  { %15661 = vmatprep.subr.bf16.mxu1 %v17449_v0  ;;  %v11180_v0 = vmax.f32 %v9342_v17, %v9349_v7  ;;  %v11189_v32 = vpack.c.bf16 %v11182_v21, %v11182_v21  ;;  %v17461_v7 = vld [vmem:[#allocation10 + $0x610] sm:$0xff]   ;;  %v16207_v17 = vunpack.i.h.bf16 %v20779_v54  ;;  %v22224_v21 = vmax.f32 %v22068_v27, 0.0 }
 0x649   :  { %15682 = vmatpush3.bf16.msra.mxu0 %v17448_v12  ;;  %v11185_v46 = vmax.f32 %v9347_v29, %v9354_v5  ;;  %v17464_v5 = vld [vmem:[#allocation10 + $0x608] sm:$0xff]  }
 0x64a   :  { %15683 = vmatprep.subr.bf16.mxu0 %v17451_v10  ;;  %v11187_v12 = vpack.c.bf16 %v11180_v0, %v11180_v0  ;;  %v17459_v10 = vld [vmem:[#allocation10 + $0x678] sm:$0xff]   ;;  %v17467_v0 = vld [vmem:[#allocation10 + $0x600] sm:$0xff]  }
 0x64b   :  { %15662 = vmatpush3.bf16.msra.mxu1 %v17450_v28  ;;  %v11192_v11 = vpack.c.bf16 %v11185_v46, %v11185_v46  ;;  %v20781_v28 = vpop.permute.xlu1 %16209  ;;  %v22223_v46 = vmax.f32 %v22067_v24, 0.0 }
 0x64c   :  { %15663 = vmatprep.subr.bf16.mxu1 %v17453_v13  ;;  %v16206_v13 = vunpack.i.l.bf16 %v20779_v54  ;;  %v16212_v6 = vunpack.i.h.bf16 %v20781_v28  ;;  %v16211_v29 = vunpack.i.l.bf16 %v20781_v28  ;;  %v17511_v28 = vld [vmem:[#allocation10 + $0x7e8] sm:$0xff]  }
 0x64d   :  { %15684 = vmatpush3.bf16.msra.mxu0 %v17452_v1  ;;  %v17466_v1 = vld [vmem:[#allocation10 + $0x640] sm:$0xff]  }
 0x64e   :  { %15685 = vmatprep.subr.bf16.mxu0 %v17455_v58  ;;  %v9167_v61 = vsel %vm9117_vm5, %v16206_v13, %v16207_v17  ;;  %v9173_v44 = vsel %vm9117_vm5, %v16211_v29, %v16212_v6 }
 0x64f   :  { %15664 = vmatpush3.bf16.msra.mxu1 %v17454_v4  ;;  %v22222_v4 = vmax.f32 %v20194_v56, 0.0  ;;  %v17470_v56 = vld [vmem:[#allocation10 + $0x5f8] sm:$0xff]  }
 0x650   :  { %15693 = vmatprep.subr.bf16.mxu1 %v17457_v39  ;;  %v17469_v39 = vld [vmem:[#allocation10 + $0x638] sm:$0xff]  }
 0x651   :  { %15686 = vmatpush3.bf16.msra.mxu0 %v17456_v20  ;;  %v9348_v58 = vmax.f32 %v22222_v4, %v16196_v50  ;;  %v9357_v20 = vmax.f32 %v22223_v46, %v9167_v61  ;;  %v17477_v61 = vld [vmem:[#allocation10 + $0x628] sm:$0xff]  }
 0x652   :  { %11647 = vmatmul.mubr.bf16.vlgmr.msra.gmra.mxu1 %v11187_v12  ;;  %15978 = vmatprep.subr.bf16.mxu0 %v22154_v33  ;;  %v20816_v12 = vpop.permute.xlu0 %16224 }
 0x653   :  { %15694 = vmatpush3.bf16.msra.mxu1 %v17458_v37  ;;  %11726 = vmatprep.mubr.bf16.mxu1 %v11192_v11  ;;  %v9364_v37 = vmax.f32 %v22224_v21, %v9173_v44  ;;  %v11186_v23 = vmax.f32 %v9348_v58, %v9355_v18  ;;  %v20819_v11 = vpop.permute.xlu1 %16219  ;;  %v16227_v24 = vunpack.i.h.bf16 %v20816_v12  ;;  %v16226_v27 = vunpack.i.l.bf16 %v20816_v12  ;;  %v17476_v58 = vld [vmem:[#allocation10 + $0x6b0] sm:$0xff]   ;;  %v17481_v21 = vld [vmem:[#allocation10 + $0x620] sm:$0xff]  }
 0x654   :  { %15695 = vmatprep.subr.bf16.mxu1 %v17460_v49  ;;  %11687 = vmatmul.mubr.bf16.vlgmr.msra.gmra.mxu0 %v11189_v32  ;;  %v17473_v49 = vld [vmem:[#allocation10 + $0x630] sm:$0xff]   ;;  %v22225_v44 = vunpack.i.h.bf16 %v20658_v30  ;;  %v9158_v18 = vsel %vm9117_vm5, %v22226_v41, %v16201_v45  ;;  %v17478_v30 = vld [vmem:[#allocation10 + $0x5e8] sm:$0xff]   ;;  %v22242_v12 = vmax.f32 %v20241_v42, 0.0  ;;  %v17526_v42 = vld [vmem:[#allocation10 + $0x800] sm:$0xff]  }
 0x655   :  { %15979 = vmatpush3.bf16.msra.mxu0 %v17459_v10  ;;  %15986 = vmatprep.mubr.msk.bf16.mxu0 %vm17813_vm6, %v22154_v33  ;;  %v11776_v50 = vmax.f32 %v9357_v20, %v9364_v37  ;;  %v17472_v10 = vld [vmem:[#allocation10 + $0x6b8] sm:$0xff]   ;;  %v11193_v32 = vpack.c.bf16 %v11186_v23, %v11186_v23  ;;  %v9175_v4 = vsel %vm9117_vm5, %v16226_v27, %v16227_v24  ;;  %v22231_v37 = vmax.f32 %v22074_v35, 0.0  ;;  %v17480_v23 = vld [vmem:[#allocation10 + $0x6a8] sm:$0xff]  }
 0x656   :  { %15980 = vmatprep.subr.bf16.mxu0 %v22154_v33  ;;  %v20854_v41 = vpop.permute.xlu0 %16234 }
 0x657   :  { %15696 = vmatpush3.bf16.msra.mxu1 %v17461_v7  ;;  %v17474_v7 = vld [vmem:[#allocation10 + $0x5f0] sm:$0xff]  }
 0x658   :  { %15697 = vmatprep.subr.bf16.mxu1 %v17463_v26  ;;  %v17475_v26 = vld [vmem:[#allocation10 + $0x6f0] sm:$0xff]  }
 0x659   :  { %15981 = vmatpush3.bf16.msra.mxu0 %v17462_v25  ;;  %v16222_v25 = vunpack.i.h.bf16 %v20819_v11 }
 0x65a   :  { %15982 = vmatprep.subr.bf16.mxu0 %v22154_v33 }
 0x65b   :  { %15698 = vmatpush3.bf16.msra.mxu1 %v17464_v5  ;;  %v16221_v5 = vunpack.i.l.bf16 %v20819_v11  ;;  %v17529_v11 = vld [vmem:[#allocation10 + $0x898] sm:$0xff]  }
 0x65c   :  { %15699 = vmatprep.subr.bf16.mxu1 %v17466_v1  ;;  %v11783_v1 = vpack.c.bf16 %v11776_v50, %v11776_v50  ;;  %v22232_v50 = vmax.f32 %v22073_v8, 0.0  ;;  %v17488_v8 = vld [vmem:[#allocation10 + $0x698] sm:$0xff]  }
 0x65d   :  { %15983 = vmatpush3.bf16.msra.mxu0 %v17465_v51  ;;  %v9164_v51 = vsel %vm9117_vm5, %v22225_v44, %v16202_v19  ;;  %v17479_v19 = vld [vmem:[#allocation10 + $0x6e8] sm:$0xff]   ;;  %v9169_v20 = vsel %vm9117_vm5, %v16221_v5, %v16222_v25  ;;  %v17489_v44 = vld [vmem:[#allocation10 + $0x770] sm:$0xff]  }
 0x65e   :  { %15984 = vmatprep.subr.bf16.mxu0 %v22154_v33 }
 0x65f   :  { %15700 = vmatpush3.bf16.msra.mxu1 %v17467_v0  ;;  %v22228_v0 = vmax.f32 %v22227_v62, 0.0  ;;  %v17493_v62 = vld [vmem:[#allocation10 + $0x768] sm:$0xff]  }
 0x660   :  { %15701 = vmatprep.subr.bf16.mxu1 %v17469_v39  ;;  %v22229_v39 = vld [vmem:[#allocation40_spill] sm:$0xff] }
 0x661   :  { %15985 = vmatpush3.bf16.msra.mxu0 %v17468_v53  ;;  %v9353_v3 = vmax.f32 %v22228_v0, %v9164_v51  ;;  %v22230_v45 = vmax.f32 %v22229_v39, 0.0  ;;  %v9366_v53 = vmax.f32 %v22231_v37, %v9175_v4  ;;  %v17491_v4 = vld [vmem:[#allocation10 + $0x6d0] sm:$0xff]   ;;  %v16237_v0 = vunpack.i.h.bf16 %v20854_v41 }
 0x662   :  { %15720 = vmatprep.subr.bf16.mxu0 %v17471_v2  ;;  %v17483_v2 = vld [vmem:[#allocation10 + $0x6e0] sm:$0xff]   ;;  %v17492_v39 = vld [vmem:[#allocation10 + $0x690] sm:$0xff]  }
 0x663   :  { %15702 = vmatpush3.bf16.msra.mxu1 %v17470_v56  ;;  %v9346_v46 = vmax.f32 %v22230_v45, %v9158_v18  ;;  %v17482_v56 = vld [vmem:[#allocation10 + $0x5e0] sm:$0xff]   ;;  %v17490_v18 = vld [vmem:[#allocation10 + $0x730] sm:$0xff]  }
 0x664   :  { %15703 = vmatprep.subr.bf16.mxu1 %v17473_v49  ;;  %15987 = vmatmul.mubr.msk.bf16.vlgmr.msra.gmra.mxu0 %vm9117_vm5, %v11193_v32  ;;  %v9359_v49 = vmax.f32 %v22232_v50, %v9169_v20  ;;  %v17485_v32 = vld [vmem:[#allocation10 + $0x778] sm:$0xff]   ;;  %v17494_v20 = vld [vmem:[#allocation10 + $0x728] sm:$0xff]  }
 0x665   :  { %15721 = vmatpush3.bf16.msra.mxu0 %v17472_v10  ;;  %12241 = vmatprep.mubr.bf16.mxu0 %v11783_v1  ;;  %v11184_v10 = vmax.f32 %v9346_v46, %v9353_v3  ;;  %v17486_v1 = vld [vmem:[#allocation10 + $0x738] sm:$0xff]   ;;  %v16236_v3 = vunpack.i.l.bf16 %v20854_v41 }
 0x666   :  { %15722 = vmatprep.subr.bf16.mxu0 %v17475_v26  ;;  %v17484_v26 = vld [vmem:[#allocation10 + $0x6a0] sm:$0xff]  }
 0x667   :  { %15704 = vmatpush3.bf16.msra.mxu1 %v17474_v7  ;;  %v11778_v7 = vmax.f32 %v9359_v49, %v9366_v53  ;;  %v11191_v35 = vpack.c.bf16 %v11184_v10, %v11184_v10  ;;  %v17497_v53 = vld [vmem:[#allocation10 + $0x760] sm:$0xff]   ;;  %v22234_v49 = vmax.f32 %v22069_v55, 0.0  ;;  %v22236_v55 = vmax.f32 %v20252_v57, 0.0  ;;  %v17509_v57 = vld [vmem:[#allocation10 + $0x748] sm:$0xff]  }
 0x668   :  { %15705 = vmatprep.subr.bf16.mxu1 %v17477_v61  ;;  %v17487_v61 = vld [vmem:[#allocation10 + $0x6d8] sm:$0xff]   ;;  %v17498_v10 = vld [vmem:[#allocation10 + $0x720] sm:$0xff]  }
 0x669   :  { %15723 = vmatpush3.bf16.msra.mxu0 %v17476_v58  ;;  %v11785_v51 = vpack.c.bf16 %v11778_v7, %v11778_v7  ;;  %v16217_v58 = vunpack.i.h.bf16 %v20801_v52  ;;  %v17501_v7 = vld [vmem:[#allocation10 + $0x758] sm:$0xff]  }
 0x66a   :  { %15724 = vmatprep.subr.bf16.mxu0 %v17479_v19  ;;  %v20858_v19 = vpop.permute.xlu1 %16229 }
 0x66b   :  { %15706 = vmatpush3.bf16.msra.mxu1 %v17478_v30  ;;  %v16216_v30 = vunpack.i.l.bf16 %v20801_v52  ;;  %v16232_v45 = vunpack.i.h.bf16 %v20858_v19  ;;  %v16231_v46 = vunpack.i.l.bf16 %v20858_v19  ;;  %v9172_v37 = vsel %vm9117_vm5, %v16217_v58, %v16211_v29  ;;  %v17504_v58 = vld [vmem:[#allocation10 + $0x7b8] sm:$0xff]  }
 0x66c   :  { %15707 = vmatprep.subr.bf16.mxu1 %v17481_v21  ;;  %v17495_v21 = vld [vmem:[#allocation10 + $0x6c8] sm:$0xff]  }
 0x66d   :  { %15725 = vmatpush3.bf16.msra.mxu0 %v17480_v23  ;;  %v9166_v52 = vsel %vm9117_vm5, %v16216_v30, %v16206_v13  ;;  %v9177_v23 = vsel %vm9117_vm5, %v16236_v3, %v16237_v0  ;;  %v9363_v13 = vmax.f32 %v22234_v49, %v9172_v37  ;;  %v9171_v29 = vsel %vm9117_vm5, %v16231_v46, %v16232_v45 }
 0x66e   :  { %15726 = vmatprep.subr.bf16.mxu0 %v17483_v2  ;;  %v22233_v2 = vmax.f32 %v22072_v14, 0.0  ;;  %v17500_v14 = vld [vmem:[#allocation10 + $0x680] sm:$0xff]   ;;  %v9362_v41 = vmax.f32 %v22242_v12, %v16232_v45 }
 0x66f   :  { %15708 = vmatpush3.bf16.msra.mxu1 %v17482_v56  ;;  %v17496_v56 = vld [vmem:[#allocation10 + $0x688] sm:$0xff]   ;;  %v17527_v45 = vld [vmem:[#allocation10 + $0x7c0] sm:$0xff]  }
 0x670   :  { %15742 = vmatprep.subr.bf16.mxu1 %v17485_v32  ;;  %v9356_v50 = vmax.f32 %v22233_v2, %v9166_v52  ;;  %v17499_v32 = vld [vmem:[#allocation10 + $0x6c0] sm:$0xff]  }
 0x671   :  { %15727 = vmatpush3.bf16.msra.mxu0 %v17484_v26  ;;  %v22235_v26 = vmax.f32 %v19749_v15, 0.0 }
 0x672   :  { %11727 = vmatmul.mubr.bf16.vlgmr.msra.gmra.mxu1 %v11191_v35  ;;  %15728 = vmatprep.subr.bf16.mxu0 %v17487_v61  ;;  %v9361_v35 = vmax.f32 %v22236_v55, %v9171_v29  ;;  %v11775_v61 = vmax.f32 %v9356_v50, %v9363_v13  ;;  %v17510_v50 = vld [vmem:[#allocation10 + $0x708] sm:$0xff]   ;;  %v17513_v13 = vld [vmem:[#allocation10 + $0x740] sm:$0xff]   ;;  %v20900_v29 = vpop.permute.xlu0 %16244 }
 0x673   :  { %15743 = vmatpush3.bf16.msra.mxu1 %v17486_v1  ;;  %12281 = vmatprep.mubr.bf16.mxu1 %v11785_v51  ;;  %v9368_v1 = vmax.f32 %v22235_v26, %v9177_v23  ;;  %v17503_v51 = vld [vmem:[#allocation10 + $0x7f8] sm:$0xff]   ;;  %v9168_v23 = vsel %vm9117_vm5, %v16207_v17, %v16221_v5  ;;  %v17512_v5 = vld [vmem:[#allocation10 + $0x7a8] sm:$0xff]  }
 0x674   :  { %15744 = vmatprep.subr.bf16.mxu1 %v17489_v44  ;;  %v17502_v44 = vld [vmem:[#allocation10 + $0x718] sm:$0xff]   ;;  %v11782_v30 = vpack.c.bf16 %v11775_v61, %v11775_v61 }
 0x675   :  { %15729 = vmatpush3.bf16.msra.mxu0 %v17488_v8  ;;  %v11780_v8 = vmax.f32 %v9361_v35, %v9368_v1  ;;  %v17515_v1 = vld [vmem:[#allocation10 + $0x7e0] sm:$0xff]  }
 0x676   :  { %15730 = vmatprep.subr.bf16.mxu0 %v17491_v4  ;;  %v17516_v35 = vld [vmem:[#allocation10 + $0x7a0] sm:$0xff]   ;;  %v20909_v61 = vpop.permute.xlu0 %16254 }
 0x677   :  { %15745 = vmatpush3.bf16.msra.mxu1 %v17490_v18  ;;  %v17505_v18 = vld [vmem:[#allocation10 + $0x750] sm:$0xff]  }
 0x678   :  { %15746 = vmatprep.subr.bf16.mxu1 %v17493_v62  ;;  %v17506_v62 = vld [vmem:[#allocation10 + $0x710] sm:$0xff]  }
 0x679   :  { %15731 = vmatpush3.bf16.msra.mxu0 %v17492_v39  ;;  %v17507_v39 = vld [vmem:[#allocation10 + $0x7f0] sm:$0xff]  }
 0x67a   :  { %15732 = vmatprep.subr.bf16.mxu0 %v17495_v21  ;;  %v9174_v21 = vsel %vm9117_vm5, %v16212_v6, %v16226_v27  ;;  %v22237_v6 = vmax.f32 %v22065_v59, 0.0  ;;  %v17514_v59 = vld [vmem:[#allocation10 + $0x700] sm:$0xff]  }
 0x67b   :  { %15747 = vmatpush3.bf16.msra.mxu1 %v17494_v20  ;;  %v11787_v20 = vpack.c.bf16 %v11780_v8, %v11780_v8  ;;  %v16257_v8 = vunpack.i.h.bf16 %v20909_v61 }
 0x67c   :  { %15748 = vmatprep.subr.bf16.mxu1 %v17497_v53  ;;  %v17508_v53 = vld [vmem:[#allocation10 + $0x7b0] sm:$0xff]   ;;  %v9365_v27 = vmax.f32 %v22237_v6, %v9174_v21 }
 0x67d   :  { %15733 = vmatpush3.bf16.msra.mxu0 %v17496_v56 }
 0x67e   :  { %15734 = vmatprep.subr.bf16.mxu0 %v17499_v32  ;;  %v22238_v32 = vmax.f32 %v22064_v36, 0.0  ;;  %v17517_v36 = vld [vmem:[#allocation10 + $0x818] sm:$0xff]  }
 0x67f   :  { %15749 = vmatpush3.bf16.msra.mxu1 %v17498_v10 }
 0x680   :  { %15750 = vmatprep.subr.bf16.mxu1 %v17501_v7  ;;  %v9358_v54 = vmax.f32 %v22238_v32, %v9168_v23  ;;  %v20905_v7 = vpop.permute.xlu1 %16239  ;;  %v17523_v23 = vld [vmem:[#allocation10 + $0x808] sm:$0xff]  }
 0x681   :  { %15735 = vmatpush3.bf16.msra.mxu0 %v17500_v14 }
 0x682   :  { %v10104_v4 = vpop.f32.mrf.mxu1  ;;  %15764 = vmatprep.subr.bf16.mxu0 %v17503_v51  ;;  %v11777_v14 = vmax.f32 %v9358_v54, %v9365_v27  ;;  %v22240_v27 = vmax.f32 %v22088_v38, 0.0  ;;  %v17528_v54 = vld [vmem:[#allocation10 + $0x780] sm:$0xff]  }
 0x683   :  { %15751 = vmatpush3.bf16.msra.mxu1 %v17502_v44 }
 0x684   :  { %v15952_v15 = vpop.f32.mrf.mxu1  ;;  %15752 = vmatprep.subr.bf16.mxu1 %v17505_v18  ;;  %12242 = vmatmul.mubr.bf16.vlgmr.msra.gmra.mxu0 %v11782_v30  ;;  %v15496_v52 = vpop.f32.mrf.mxu0  ;;  %v11784_v44 = vpack.c.bf16 %v11777_v14, %v11777_v14  ;;  %v16256_v18 = vunpack.i.l.bf16 %v20909_v61  ;;  %v17521_v30 = vld [vmem:[#allocation10 + $0x7d0] sm:$0xff]   ;;  %v17531_v14 = vld [vmem:[#allocation10 + $0x918] sm:$0xff]   ;;  %v17554_v61 = vld [vmem:[#allocation10 + $0x828] sm:$0xff]  }
 0x685   :  { %15765 = vmatpush3.bf16.msra.mxu0 %v17504_v58  ;;  %12321 = vmatprep.mubr.bf16.mxu0 %v11787_v20  ;;  %v20912_v51 = vpop.permute.xlu1 %16249  ;;  %v17520_v58 = vld [vmem:[#allocation10 + $0x810] sm:$0xff]   ;;  %v16246_v20 = vunpack.i.l.bf16 %v20900_v29 }
 0x686   :  { %v10107_v37 = vpop.f32.mrf.mxu1  ;;  %v15497_v56 = vpop.f32.mrf.mxu0  ;;  %15766 = vmatprep.subr.bf16.mxu0 %v17507_v39  ;;  %v16252_v15 = vunpack.i.h.bf16 %v20912_v51  ;;  %v16247_v39 = vunpack.i.h.bf16 %v20900_v29  ;;  %v17580_v29 = vld [vmem:[#allocation10 + $0x9f0] sm:$0xff]  }
 0x687   :  { %15753 = vmatpush3.bf16.msra.mxu1 %v17506_v62  ;;  %v15498_v49 = vadd.f32 %v15497_v56, %v15496_v52  ;;  %v16251_v62 = vunpack.i.l.bf16 %v20912_v51  ;;  %v17522_v52 = vld [vmem:[#allocation10 + $0x790] sm:$0xff]   ;;  %v16242_v37 = vunpack.i.h.bf16 %v20905_v7  ;;  %v17524_v56 = vld [vmem:[#allocation10 + $0x7c8] sm:$0xff]  }
 0x688   :  { %v15953_v2 = vpop.f32.mrf.mxu1  ;;  %15754 = vmatprep.subr.bf16.mxu1 %v17509_v57  ;;  %v15499_v10 = vpop.f32.mrf.mxu0  ;;  %v9185_v21 = vsel %vm9117_vm5, %v16257_v8, %v16252_v15  ;;  %v9187_v6 = vsel %vm9117_vm5, %v16246_v20, %v16247_v39  ;;  %v22251_v51 = vld [vmem:[#allocation119_spill] sm:$0xff] }
 0x689   :  { %v10065_v17 = vadd.f32 %v15498_v49, %v20478_v40  ;;  %15767 = vmatpush3.bf16.msra.mxu0 %v17508_v53  ;;  %v17518_v40 = vld [vmem:[#allocation10 + $0x7d8] sm:$0xff]   ;;  %v9179_v57 = vsel %vm9117_vm5, %v16256_v18, %v16251_v62  ;;  %v16241_v53 = vunpack.i.l.bf16 %v20905_v7  ;;  %v22239_v2 = vmax.f32 %v20260_v31, 0.0  ;;  %v22263_v7 = vld [vmem:[#allocation58_spill] sm:$0xff] }
 0x68a   :  { %v15500_v26 = vpop.f32.mrf.mxu0  ;;  %15768 = vmatprep.subr.bf16.mxu0 %v17511_v28  ;;  %v9176_v28 = vsel %vm9117_vm5, %v16227_v24, %v16236_v3  ;;  %v9371_v49 = vmax.f32 %v22240_v27, %v9179_v57  ;;  %v22241_v31 = vmax.f32 %v22083_v48, 0.0  ;;  %v9170_v24 = vsel %vm9117_vm5, %v16222_v25, %v16231_v46  ;;  %v17525_v3 = vld [vmem:[#allocation10 + $0x788] sm:$0xff]  }
 0x68b   :  { %15755 = vmatpush3.bf16.msra.mxu1 %v17510_v50  ;;  %v20907_v55 = vadd.f32 %v10104_v4, %v10065_v17  ;;  %v17519_v4 = vld [vmem:[#allocation10 + $0x798] sm:$0xff]   ;;  %v9369_v50 = vmax.f32 %v22239_v2, %v16237_v0  ;;  %v9181_v48 = vsel %vm9117_vm5, %v16241_v53, %v16242_v37  ;;  %v22244_v25 = vmax.f32 %v22079_v43, 0.0  ;;  %v17536_v2 = vld [vmem:[#allocation10 + $0x8d0] sm:$0xff]   ;;  %v17539_v27 = vld [vmem:[#allocation10 + $0x908] sm:$0xff]  }
 0x68c   :  { %15756 = vmatprep.subr.bf16.mxu1 %v17513_v13  ;;  %v9378_v0 = vmax.f32 %v22241_v31, %v9185_v21  ;;  %v22243_v13 = vmax.f32 %v19743_v47, 0.0  ;;  %v22245_v47 = vmax.f32 %v19726_v60, 0.0  ;;  %v22246_v17 = vmax.f32 %v22075_v22, 0.0  ;;  %v17532_v60 = vld [vmem:[#allocation10 + $0x8d8] sm:$0xff]   ;;  %v17537_v21 = vld [vmem:[#allocation10 + $0x888] sm:$0xff]   ;;  %v17541_v31 = vld [vmem:[#allocation10 + $0x880] sm:$0xff]  }
 0x68d   :  { %15769 = vmatpush3.bf16.msra.mxu0 %v17512_v5  ;;  %v11781_v19 = vmax.f32 %v9362_v41, %v9369_v50  ;;  %v9380_v46 = vmax.f32 %v22244_v25, %v9187_v6  ;;  %v17538_v6 = vld [vmem:[#allocation10 + $0x848] sm:$0xff]   ;;  %v17549_v25 = vld [vmem:[#allocation10 + $0x870] sm:$0xff]  }
 0x68e   :  { %15770 = vmatprep.subr.bf16.mxu0 %v17515_v1  ;;  %v9367_v38 = vmax.f32 %v22243_v13, %v9176_v28  ;;  %v9360_v10 = vmax.f32 %v22245_v47, %v9170_v24  ;;  %v12371_v32 = vmax.f32 %v9371_v49, %v9378_v0  ;;  %v9373_v5 = vmax.f32 %v22246_v17, %v9181_v48  ;;  %v16260_v0 = vpop.permute.xlu1 %16259  ;;  %v17540_v24 = vld [vmem:[#allocation10 + $0x8c8] sm:$0xff]   ;;  %v17543_v13 = vld [vmem:[#allocation10 + $0x900] sm:$0xff]  }
 0x68f   :  { %15757 = vmatpush3.bf16.msra.mxu1 %v17514_v59  ;;  %v17530_v59 = vld [vmem:[#allocation10 + $0x858] sm:$0xff]   ;;  %v11788_v1 = vpack.c.bf16 %v11781_v19, %v11781_v19  ;;  %v17544_v48 = vld [vmem:[#allocation10 + $0x8c0] sm:$0xff]   ;;  %v16261_v47 = vunpack.i.l.bf16 %v16260_v0 }
 0x690   :  { %15990 = vmatprep.subr.bf16.mxu1 %v22154_v33  ;;  %v11779_v26 = vmax.f32 %v9360_v10, %v9367_v38  ;;  %v17545_v38 = vld [vmem:[#allocation10 + $0x878] sm:$0xff]  }
 0x691   :  { %15771 = vmatpush3.bf16.msra.mxu0 %v17516_v35  ;;  %v12373_v35 = vmax.f32 %v9373_v5, %v9380_v46  ;;  %v17546_v19 = vld [vmem:[#allocation10 + $0x838] sm:$0xff]   ;;  %v16262_v46 = vunpack.i.h.bf16 %v16260_v0 }
 0x692   :  { %12282 = vmatmul.mubr.bf16.vlgmr.msra.gmra.mxu1 %v11784_v44  ;;  %15772 = vmatprep.subr.bf16.mxu0 %v17518_v40  ;;  %v12378_v40 = vpack.c.bf16 %v12371_v32, %v12371_v32  ;;  %v11786_v44 = vpack.c.bf16 %v11779_v26, %v11779_v26  ;;  %v17548_v5 = vld [vmem:[#allocation10 + $0x8b8] sm:$0xff]   ;;  %v17550_v26 = vld [vmem:[#allocation10 + $0x830] sm:$0xff]  }
 0x693   :  { %15991 = vmatpush3.bf16.msra.mxu1 %v17517_v36  ;;  %15998 = vmatprep.mubr.msk.bf16.mxu1 %vm17813_vm6, %v22154_v33  ;;  %v17533_v36 = vld [vmem:[#allocation10 + $0x890] sm:$0xff]   ;;  %v12380_v57 = vpack.c.bf16 %v12373_v35, %v12373_v35  ;;  %v9178_v35 = vsel %vm9117_vm5, %v16261_v47, %v16256_v18  ;;  %v17555_v18 = vld [vmem:[#allocation10 + $0x8e8] sm:$0xff]  }
 0x694   :  { %15992 = vmatprep.subr.bf16.mxu1 %v22154_v33 }
 0x695   :  { %15773 = vmatpush3.bf16.msra.mxu0 %v17519_v4  ;;  %v17534_v4 = vld [vmem:[#allocation10 + $0x850] sm:$0xff]  }
 0x696   :  { %15774 = vmatprep.subr.bf16.mxu0 %v17521_v30 }
 0x697   :  { %15993 = vmatpush3.bf16.msra.mxu1 %v17520_v58  ;;  %v17535_v58 = vld [vmem:[#allocation10 + $0x910] sm:$0xff]  }
 0x698   :  { %15994 = vmatprep.subr.bf16.mxu1 %v22154_v33 }
 0x699   :  { %15775 = vmatpush3.bf16.msra.mxu0 %v17522_v52 }
 0x69a   :  { %15776 = vmatprep.subr.bf16.mxu0 %v17524_v56 }
 0x69b   :  { %15995 = vmatpush3.bf16.msra.mxu1 %v17523_v23 }
 0x69c   :  { %15996 = vmatprep.subr.bf16.mxu1 %v22154_v33 }
 0x69d   :  { %15777 = vmatpush3.bf16.msra.mxu0 %v17525_v3 }
 0x69e   :  { %15778 = vmatprep.subr.bf16.mxu0 %v17527_v45  ;;  %v20983_v45 = vpop.permute.xlu1 %16269 }
 0x69f   :  { %15997 = vmatpush3.bf16.msra.mxu1 %v17526_v42  ;;  %v20981_v42 = vpop.permute.xlu0 %16264  ;;  %v16271_v17 = vunpack.i.l.bf16 %v20983_v45 }
 0x6a0   :  { %15791 = vmatprep.subr.bf16.mxu1 %v17529_v11  ;;  %v17547_v11 = vld [vmem:[#allocation10 + $0x8f8] sm:$0xff]   ;;  %v16267_v10 = vunpack.i.h.bf16 %v20981_v42  ;;  %v16266_v32 = vunpack.i.l.bf16 %v20981_v42 }
 0x6a1   :  { %15779 = vmatpush3.bf16.msra.mxu0 %v17528_v54  ;;  %v16272_v54 = vunpack.i.h.bf16 %v20983_v45  ;;  %v17574_v42 = vld [vmem:[#allocation10 + $0x938] sm:$0xff]   ;;  %v17583_v45 = vld [vmem:[#allocation10 + $0xa28] sm:$0xff]  }
 0x6a2   :  { %v15523_v43 = vpop.f32.mrf.mxu1  ;;  %15999 = vmatmul.mubr.msk.bf16.vlgmr.msra.gmra.mxu1 %vm9117_vm5, %v11788_v1  ;;  %15813 = vmatprep.subr.bf16.mxu0 %v17531_v14  ;;  %v17553_v1 = vld [vmem:[#allocation10 + $0x868] sm:$0xff]   ;;  %v9184_v14 = vsel %vm9117_vm5, %v16262_v46, %v16257_v8  ;;  %v17552_v8 = vld [vmem:[#allocation10 + $0x8b0] sm:$0xff]  }
 0x6a3   :  { %15792 = vmatpush3.bf16.msra.mxu1 %v17530_v59  ;;  %12836 = vmatprep.mubr.bf16.mxu1 %v12378_v40  ;;  %v17551_v59 = vld [vmem:[#allocation10 + $0x8f0] sm:$0xff]   ;;  %v9183_v40 = vsel %vm9117_vm5, %v16271_v17, %v16266_v32 }
 0x6a4   :  { %v15524_v22 = vpop.f32.mrf.mxu1  ;;  %15793 = vmatprep.subr.bf16.mxu1 %v17533_v36  ;;  %v15545_v52 = vpop.f32.mrf.mxu0  ;;  %12322 = vmatmul.mubr.bf16.vlgmr.msra.gmra.mxu0 %v11786_v44  ;;  %v9186_v44 = vsel %vm9117_vm5, %v16252_v15, %v16246_v20  ;;  %v22250_v15 = vmax.f32 %v22092_v63, 0.0  ;;  %v17560_v63 = vld [vmem:[#allocation10 + $0x8a0] sm:$0xff]  }
 0x6a5   :  { %v15525_v30 = vadd.f32 %v15524_v22, %v15523_v43  ;;  %15814 = vmatpush3.bf16.msra.mxu0 %v17532_v60  ;;  %12876 = vmatprep.mubr.bf16.mxu0 %v12380_v57  ;;  %v9189_v43 = vsel %vm9117_vm5, %v16272_v54, %v16267_v10  ;;  %v9180_v22 = vsel %vm9117_vm5, %v16251_v62, %v16241_v53  ;;  %v22253_v53 = vld [vmem:[#allocation117_spill] sm:$0xff] }
 0x6a6   :  { %v15526_v23 = vpop.f32.mrf.mxu1  ;;  %v15546_v50 = vpop.f32.mrf.mxu0  ;;  %15815 = vmatprep.subr.bf16.mxu0 %v17535_v58  ;;  %v9382_v20 = vmax.f32 %v22250_v15, %v9189_v43  ;;  %v17566_v43 = vld [vmem:[#allocation10 + $0x9b0] sm:$0xff]   ;;  %v17573_v15 = vld [vmem:[#allocation10 + $0x978] sm:$0xff]  }
 0x6a7   :  { %v10460_v56 = vadd.f32 %v15525_v30, %v20907_v55  ;;  %15794 = vmatpush3.bf16.msra.mxu1 %v17534_v4  ;;  %v15547_v49 = vadd.f32 %v15546_v50, %v15545_v52  ;;  %v17542_v55 = vld [vmem:[#allocation10 + $0x840] sm:$0xff]   ;;  %v22247_v4 = vmax.f32 %v22082_v34, 0.0  ;;  %v22248_v30 = vmax.f32 %v22087_v16, 0.0 }
 0x6a8   :  { %v15527_v28 = vpop.f32.mrf.mxu1  ;;  %15795 = vmatprep.subr.bf16.mxu1 %v17537_v21  ;;  %v15548_v12 = vpop.f32.mrf.mxu0  ;;  %v17557_v21 = vld [vmem:[#allocation10 + $0x860] sm:$0xff]   ;;  %v22249_v23 = vmax.f32 %v20329_v9, 0.0  ;;  %v22252_v50 = vmax.f32 %v22251_v51, 0.0  ;;  %v22254_v34 = vmax.f32 %v22253_v53, 0.0  ;;  %v17561_v9 = vld [vmem:[#allocation10 + $0x998] sm:$0xff]  }
 0x6a9   :  { %v20979_v41 = vadd.f32 %v15547_v49, %v10460_v56  ;;  %15816 = vmatpush3.bf16.msra.mxu0 %v17536_v2  ;;  %v9377_v58 = vmax.f32 %v22247_v4, %v9184_v14  ;;  %v9370_v57 = vmax.f32 %v22248_v30, %v9178_v35  ;;  %v17556_v2 = vld [vmem:[#allocation10 + $0x8a8] sm:$0xff]   ;;  %v17558_v16 = vld [vmem:[#allocation10 + $0x820] sm:$0xff]   ;;  %v17562_v12 = vld [vmem:[#allocation10 + $0x958] sm:$0xff]  }
 0x6aa   :  { %v15549_v3 = vpop.f32.mrf.mxu0  ;;  %15817 = vmatprep.subr.bf16.mxu0 %v17539_v27  ;;  %v9375_v56 = vmax.f32 %v22249_v23, %v9183_v40  ;;  %v9379_v62 = vmax.f32 %v22252_v50, %v9186_v44  ;;  %v9372_v28 = vmax.f32 %v22254_v34, %v9180_v22  ;;  %v17559_v27 = vld [vmem:[#allocation10 + $0x8e0] sm:$0xff]   ;;  %v17569_v4 = vld [vmem:[#allocation10 + $0x9a8] sm:$0xff]  }
 0x6ab   :  { %15796 = vmatpush3.bf16.msra.mxu1 %v17538_v6  ;;  %v12370_v49 = vmax.f32 %v9370_v57, %v9377_v58  ;;  %v17564_v3 = vld [vmem:[#allocation10 + $0x990] sm:$0xff]   ;;  %v22261_v51 = vld [vmem:[#allocation102_spill] sm:$0xff] }
 0x6ac   :  { %15797 = vmatprep.subr.bf16.mxu1 %v17541_v31  ;;  %v12375_v31 = vmax.f32 %v9375_v56, %v9382_v20  ;;  %v12372_v0 = vmax.f32 %v9372_v28, %v9379_v62  ;;  %v22255_v58 = vld [vmem:[#allocation51_spill] sm:$0xff]  ;;  %v17571_v56 = vld [vmem:[#allocation10 + $0x940] sm:$0xff]   ;;  %v22262_v50 = vmax.f32 %v22261_v51, 0.0  ;;  %v17591_v51 = vld [vmem:[#allocation10 + $0xa18] sm:$0xff]  }
 0x6ad   :  { %15818 = vmatpush3.bf16.msra.mxu0 %v17540_v24  ;;  %v12377_v24 = vpack.c.bf16 %v12370_v49, %v12370_v49  ;;  %v22256_v30 = vmax.f32 %v22255_v58, 0.0  ;;  %v17572_v53 = vld [vmem:[#allocation10 + $0x9a0] sm:$0xff]  }
 0x6ae   :  { %15819 = vmatprep.subr.bf16.mxu0 %v17543_v13  ;;  %v12382_v13 = vpack.c.bf16 %v12375_v31, %v12375_v31  ;;  %v17586_v58 = vld [vmem:[#allocation10 + $0x920] sm:$0xff]  }
 0x6af   :  { %15798 = vmatpush3.bf16.msra.mxu1 %v17542_v55  ;;  %v21029_v55 = vpop.permute.xlu0 %16274  ;;  %v9383_v57 = vmax.f32 %v22256_v30, %v16267_v10  ;;  %v17587_v30 = vld [vmem:[#allocation10 + $0xa20] sm:$0xff]  }
 0x6b0   :  { %15799 = vmatprep.subr.bf16.mxu1 %v17545_v38  ;;  %v21031_v38 = vpop.permute.xlu1 %16279  ;;  %v16277_v46 = vunpack.i.h.bf16 %v21029_v55 }
 0x6b1   :  { %15820 = vmatpush3.bf16.msra.mxu0 %v17544_v48 }
 0x6b2   :  { %15821 = vmatprep.subr.bf16.mxu0 %v17547_v11  ;;  %v12379_v11 = vpack.c.bf16 %v12372_v0, %v12372_v0  ;;  %v17579_v0 = vld [vmem:[#allocation10 + $0xa30] sm:$0xff]  }
 0x6b3   :  { %15800 = vmatpush3.bf16.msra.mxu1 %v17546_v19  ;;  %v17563_v19 = vld [vmem:[#allocation10 + $0x9b8] sm:$0xff]  }
 0x6b4   :  { %15801 = vmatprep.subr.bf16.mxu1 %v17549_v25  ;;  %v20995_v36 = vpop.f32.mrf.mxu0  ;;  %v17565_v25 = vld [vmem:[#allocation10 + $0x950] sm:$0xff]  }
 0x6b5   :  { %15822 = vmatpush3.bf16.msra.mxu0 %v17548_v5  ;;  %v17567_v5 = vld [vmem:[#allocation10 + $0x988] sm:$0xff]  }
 0x6b6   :  { %v15964_v60 = vpop.f32.mrf.mxu0  ;;  %15823 = vmatprep.subr.bf16.mxu0 %v17551_v59  ;;  %v16282_v59 = vunpack.i.h.bf16 %v21031_v38 }
 0x6b7   :  { %15802 = vmatpush3.bf16.msra.mxu1 %v17550_v26  ;;  %v16276_v26 = vunpack.i.l.bf16 %v21029_v55 }
 0x6b8   :  { %15803 = vmatprep.subr.bf16.mxu1 %v17553_v1  ;;  %v10582_v52 = vpop.f32.mrf.mxu0  ;;  %v16281_v1 = vunpack.i.l.bf16 %v21031_v38  ;;  %v22279_v38 = vld [vmem:[#allocation21_spill] sm:$0xff] }
 0x6b9   :  { %15824 = vmatpush3.bf16.msra.mxu0 %v17552_v8  ;;  %v17568_v8 = vld [vmem:[#allocation10 + $0x948] sm:$0xff]  }
 0x6ba   :  { %v15965_v6 = vpop.f32.mrf.mxu0  ;;  %15825 = vmatprep.subr.bf16.mxu0 %v17555_v18  ;;  %v9191_v18 = vsel %vm9117_vm5, %v16276_v26, %v16277_v46  ;;  %v9197_v44 = vsel %vm9117_vm5, %v16281_v1, %v16282_v59 }
 0x6bb   :  { %15804 = vmatpush3.bf16.msra.mxu1 %v17554_v61  ;;  %v17570_v61 = vld [vmem:[#allocation10 + $0x980] sm:$0xff]   ;;  %v9392_v62 = vmax.f32 %v22262_v50, %v9197_v44  ;;  %v17577_v6 = vld [vmem:[#allocation10 + $0x970] sm:$0xff]   ;;  %v17584_v44 = vld [vmem:[#allocation10 + $0x9e8] sm:$0xff]  }
 0x6bc   :  { %15805 = vmatprep.subr.bf16.mxu1 %v17557_v21  ;;  %v22257_v21 = vld [vmem:[#allocation60_spill] sm:$0xff] }
 0x6bd   :  { %15826 = vmatpush3.bf16.msra.mxu0 %v17556_v2  ;;  %v22258_v52 = vmax.f32 %v22257_v21, 0.0  ;;  %v17593_v50 = vld [vmem:[#allocation10 + $0xab0] sm:$0xff]  }
 0x6be   :  { %15827 = vmatprep.subr.bf16.mxu0 %v17559_v27 }
 0x6bf   :  { %15806 = vmatpush3.bf16.msra.mxu1 %v17558_v16  ;;  %v9376_v23 = vmax.f32 %v22258_v52, %v16266_v32  ;;  %v17575_v32 = vld [vmem:[#allocation10 + $0xa38] sm:$0xff]   ;;  %v21073_v16 = vpop.permute.xlu1 %16289 }
 0x6c0   :  { %15835 = vmatprep.subr.bf16.mxu1 %v17561_v9  ;;  %v17576_v9 = vld [vmem:[#allocation10 + $0x9f8] sm:$0xff]  }
 0x6c1   :  { %15828 = vmatpush3.bf16.msra.mxu0 %v17560_v63  ;;  %v12376_v10 = vmax.f32 %v9376_v23, %v9383_v57  ;;  %v17578_v63 = vld [vmem:[#allocation10 + $0x930] sm:$0xff]   ;;  %v22269_v57 = vld [vmem:[#allocation122_spill] sm:$0xff] }
 0x6c2   :  { %v15567_v48 = vpop.f32.mrf.mxu1  ;;  %12837 = vmatmul.mubr.bf16.vlgmr.msra.gmra.mxu1 %v12377_v24  ;;  %16002 = vmatprep.subr.bf16.mxu0 %v22154_v33  ;;  %v16291_v24 = vunpack.i.l.bf16 %v21073_v16  ;;  %v22270_v21 = vmax.f32 %v22269_v57, 0.0 }
 0x6c3   :  { %15836 = vmatpush3.bf16.msra.mxu1 %v17562_v12  ;;  %12916 = vmatprep.mubr.bf16.mxu1 %v12382_v13  ;;  %v12383_v31 = vpack.c.bf16 %v12376_v10, %v12376_v10  ;;  %v16292_v12 = vunpack.i.h.bf16 %v21073_v16  ;;  %v17581_v13 = vld [vmem:[#allocation10 + $0x968] sm:$0xff]  }
 0x6c4   :  { %v15568_v47 = vpop.f32.mrf.mxu1  ;;  %15837 = vmatprep.subr.bf16.mxu1 %v17564_v3  ;;  %12877 = vmatmul.mubr.bf16.vlgmr.msra.gmra.mxu0 %v12379_v11 }
 0x6c5   :  { %v15569_v14 = vadd.f32 %v15568_v47, %v15567_v48  ;;  %16003 = vmatpush3.bf16.msra.mxu0 %v17563_v19  ;;  %16010 = vmatprep.mubr.msk.bf16.mxu0 %vm17813_vm6, %v22154_v33  ;;  %v9188_v48 = vsel %vm9117_vm5, %v16247_v39, %v16272_v54  ;;  %v9182_v19 = vsel %vm9117_vm5, %v16242_v37, %v16271_v17  ;;  %v17582_v39 = vld [vmem:[#allocation10 + $0x928] sm:$0xff]   ;;  %v22264_v54 = vmax.f32 %v22263_v7, 0.0  ;;  %v22265_v17 = vld [vmem:[#allocation57_spill] sm:$0xff] }
 0x6c6   :  { %v15570_v35 = vpop.f32.mrf.mxu1  ;;  %16004 = vmatprep.subr.bf16.mxu0 %v22154_v33 }
 0x6c7   :  { %v10540_v40 = vadd.f32 %v15569_v14, %v20979_v41  ;;  %15838 = vmatpush3.bf16.msra.mxu1 %v17565_v25  ;;  %v21052_v41 = vpop.permute.xlu0 %16284  ;;  %v9381_v37 = vmax.f32 %v22264_v54, %v9188_v48  ;;  %v9193_v35 = vsel %vm9117_vm5, %v16291_v24, %v16292_v12 }
 0x6c8   :  { %v15571_v60 = vpop.f32.mrf.mxu1  ;;  %15839 = vmatprep.subr.bf16.mxu1 %v17567_v5  ;;  %v22266_v5 = vmax.f32 %v22265_v17, 0.0  ;;  %v9387_v52 = vmax.f32 %v22270_v21, %v9193_v35 }
 0x6c9   :  { %v21055_v22 = vadd.f32 %v20995_v36, %v10540_v40  ;;  %16005 = vmatpush3.bf16.msra.mxu0 %v17566_v43  ;;  %v22259_v36 = vld [vmem:[#allocation100_spill] sm:$0xff]  ;;  %v17585_v40 = vld [vmem:[#allocation10 + $0x960] sm:$0xff]  }
 0x6ca   :  { %16006 = vmatprep.subr.bf16.mxu0 %v22154_v33  ;;  %v22260_v20 = vmax.f32 %v22259_v36, 0.0  ;;  %v9374_v14 = vmax.f32 %v22266_v5, %v9182_v19  ;;  %v22267_v60 = vld [vmem:[#allocation20_spill] sm:$0xff]  ;;  %v17588_v36 = vld [vmem:[#allocation10 + $0x9e0] sm:$0xff]   ;;  %v17600_v5 = vld [vmem:[#allocation10 + $0x9c8] sm:$0xff]  }
 0x6cb   :  { %15840 = vmatpush3.bf16.msra.mxu1 %v17568_v8  ;;  %v21070_v34 = vpop.permute.xlu0 %16294 }
 0x6cc   :  { %15841 = vmatprep.subr.bf16.mxu1 %v17570_v61  ;;  %v9385_v2 = vmax.f32 %v22260_v20, %v9191_v18  ;;  %v16297_v27 = vunpack.i.h.bf16 %v21070_v34  ;;  %v16296_v49 = vunpack.i.l.bf16 %v21070_v34  ;;  %v22268_v61 = vmax.f32 %v22267_v60, 0.0  ;;  %v17590_v20 = vld [vmem:[#allocation10 + $0xa78] sm:$0xff]   ;;  %v17602_v60 = vld [vmem:[#allocation10 + $0xa60] sm:$0xff]  }
 0x6cd   :  { %16007 = vmatpush3.bf16.msra.mxu0 %v17569_v4  ;;  %v12374_v23 = vmax.f32 %v9374_v14, %v9381_v37  ;;  %v17601_v37 = vld [vmem:[#allocation10 + $0xaa0] sm:$0xff]   ;;  %v22271_v14 = vld [vmem:[#allocation99_spill] sm:$0xff] }
 0x6ce   :  { %16008 = vmatprep.subr.bf16.mxu0 %v22154_v33  ;;  %v12966_v28 = vmax.f32 %v9385_v2, %v9392_v62  ;;  %v9199_v25 = vsel %vm9117_vm5, %v16296_v49, %v16297_v27  ;;  %v22272_v35 = vmax.f32 %v22271_v14, 0.0  ;;  %v17618_v14 = vld [vmem:[#allocation10 + $0xa40] sm:$0xff]  }
 0x6cf   :  { %15842 = vmatpush3.bf16.msra.mxu1 %v17571_v56  ;;  %v9394_v18 = vmax.f32 %v22268_v61, %v9199_v25  ;;  %v17589_v56 = vld [vmem:[#allocation10 + $0xab8] sm:$0xff]   ;;  %v12381_v2 = vpack.c.bf16 %v12374_v23, %v12374_v23  ;;  %v17603_v61 = vld [vmem:[#allocation10 + $0xa00] sm:$0xff]  }
 0x6d0   :  { %15843 = vmatprep.subr.bf16.mxu1 %v17573_v15  ;;  %v12973_v3 = vpack.c.bf16 %v12966_v28, %v12966_v28  ;;  %v17595_v28 = vld [vmem:[#allocation10 + $0xa10] sm:$0xff]  }
 0x6d1   :  { %16009 = vmatpush3.bf16.msra.mxu0 %v17572_v53  ;;  %v12968_v15 = vmax.f32 %v9387_v52, %v9394_v18  ;;  %v21108_v53 = vpop.permute.xlu0 %16304  ;;  %v22275_v18 = vld [vmem:[#allocation73_spill] sm:$0xff] }
 0x6d2   :  { %15862 = vmatprep.subr.bf16.mxu0 %v17575_v32  ;;  %v17594_v32 = vld [vmem:[#allocation10 + $0xa70] sm:$0xff]   ;;  %v17604_v52 = vld [vmem:[#allocation10 + $0x9c0] sm:$0xff]  }
 0x6d3   :  { %15844 = vmatpush3.bf16.msra.mxu1 %v17574_v42  ;;  %v12975_v62 = vpack.c.bf16 %v12968_v15, %v12968_v15  ;;  %v17592_v42 = vld [vmem:[#allocation10 + $0x9d8] sm:$0xff]  }
 0x6d4   :  { %15845 = vmatprep.subr.bf16.mxu1 %v17577_v6  ;;  %v15594_v11 = vpop.f32.mrf.mxu0  ;;  %16011 = vmatmul.mubr.msk.bf16.vlgmr.msra.gmra.mxu0 %vm9117_vm5, %v12383_v31  ;;  %v16287_v6 = vunpack.i.h.bf16 %v21052_v41  ;;  %v21112_v31 = vpop.permute.xlu1 %16299  ;;  %v17607_v15 = vld [vmem:[#allocation10 + $0xb38] sm:$0xff]  }
 0x6d5   :  { %15863 = vmatpush3.bf16.msra.mxu0 %v17576_v9  ;;  %13431 = vmatprep.mubr.bf16.mxu0 %v12973_v3  ;;  %v16286_v9 = vunpack.i.l.bf16 %v21052_v41  ;;  %v16307_v3 = vunpack.i.h.bf16 %v21108_v53  ;;  %v16302_v25 = vunpack.i.h.bf16 %v21112_v31  ;;  %v17598_v41 = vld [vmem:[#allocation10 + $0xa68] sm:$0xff]  }
 0x6d6   :  { %v15595_v47 = vpop.f32.mrf.mxu0  ;;  %15864 = vmatprep.subr.bf16.mxu0 %v17579_v0  ;;  %v17597_v0 = vld [vmem:[#allocation10 + $0xaa8] sm:$0xff]   ;;  %v9196_v7 = vsel %vm9117_vm5, %v16287_v6, %v16281_v1  ;;  %v9198_v6 = vsel %vm9117_vm5, %v16282_v59, %v16296_v49 }
 0x6d7   :  { %15846 = vmatpush3.bf16.msra.mxu1 %v17578_v63  ;;  %v15596_v43 = vadd.f32 %v15595_v47, %v15594_v11  ;;  %v17596_v11 = vld [vmem:[#allocation10 + $0x9d0] sm:$0xff]  }
 0x6d8   :  { %15847 = vmatprep.subr.bf16.mxu1 %v17581_v13  ;;  %v15597_v8 = vpop.f32.mrf.mxu0  ;;  %v16306_v13 = vunpack.i.l.bf16 %v21108_v53  ;;  %v22287_v53 = vld [vmem:[#allocation63_spill] sm:$0xff] }
 0x6d9   :  { %15865 = vmatpush3.bf16.msra.mxu0 %v17580_v29  ;;  %v16301_v29 = vunpack.i.l.bf16 %v21112_v31  ;;  %v17632_v31 = vld [vmem:[#allocation10 + $0xac0] sm:$0xff]  }
 0x6da   :  { %v15598_v4 = vpop.f32.mrf.mxu0  ;;  %15866 = vmatprep.subr.bf16.mxu0 %v17583_v45  ;;  %v9190_v45 = vsel %vm9117_vm5, %v16286_v9, %v16276_v26  ;;  %v9201_v17 = vsel %vm9117_vm5, %v16306_v13, %v16307_v3 }
 0x6db   :  { %15848 = vmatpush3.bf16.msra.mxu1 %v17582_v39  ;;  %v17599_v39 = vld [vmem:[#allocation10 + $0xa08] sm:$0xff]   ;;  %v9195_v1 = vsel %vm9117_vm5, %v16301_v29, %v16302_v25 }
 0x6dc   :  { %15849 = vmatprep.subr.bf16.mxu1 %v17585_v40  ;;  %v22273_v40 = vld [vmem:[#allocation101_spill] sm:$0xff] }
 0x6dd   :  { %15867 = vmatpush3.bf16.msra.mxu0 %v17584_v44  ;;  %v22274_v26 = vmax.f32 %v22273_v40, 0.0  ;;  %v22276_v44 = vmax.f32 %v22275_v18, 0.0  ;;  %v17624_v18 = vld [vmem:[#allocation10 + $0xb50] sm:$0xff]  }
 0x6de   :  { %15868 = vmatprep.subr.bf16.mxu0 %v17587_v30  ;;  %v22277_v30 = vld [vmem:[#allocation61_spill] sm:$0xff] }
 0x6df   :  { %15850 = vmatpush3.bf16.msra.mxu1 %v17586_v58  ;;  %v9391_v8 = vmax.f32 %v22274_v26, %v9196_v7  ;;  %v9396_v4 = vmax.f32 %v22276_v44, %v9201_v17  ;;  %v17605_v58 = vld [vmem:[#allocation10 + $0xa98] sm:$0xff]   ;;  %v22278_v57 = vmax.f32 %v22277_v30, 0.0  ;;  %v17617_v7 = vld [vmem:[#allocation10 + $0xa80] sm:$0xff]   ;;  %v17625_v44 = vld [vmem:[#allocation10 + $0xb10] sm:$0xff]  }
 0x6e0   :  { %15884 = vmatprep.subr.bf16.mxu1 %v17589_v56  ;;  %v17606_v56 = vld [vmem:[#allocation10 + $0xa58] sm:$0xff]   ;;  %v22283_v30 = vld [vmem:[#allocation59_spill] sm:$0xff] }
 0x6e1   :  { %15869 = vmatpush3.bf16.msra.mxu0 %v17588_v36  ;;  %v9389_v21 = vmax.f32 %v22278_v57, %v9195_v1  ;;  %v17621_v1 = vld [vmem:[#allocation10 + $0xb58] sm:$0xff]   ;;  %v22284_v57 = vmax.f32 %v22283_v30, 0.0 }
 0x6e2   :  { %v15616_v10 = vpop.f32.mrf.mxu1  ;;  %12917 = vmatmul.mubr.bf16.vlgmr.msra.gmra.mxu1 %v12381_v2  ;;  %15870 = vmatprep.subr.bf16.mxu0 %v17591_v51  ;;  %v17608_v51 = vld [vmem:[#allocation10 + $0xaf8] sm:$0xff]  }
 0x6e3   :  { %15885 = vmatpush3.bf16.msra.mxu1 %v17590_v20  ;;  %13471 = vmatprep.mubr.bf16.mxu1 %v12975_v62  ;;  %v12970_v36 = vmax.f32 %v9389_v21, %v9396_v4  ;;  %v17609_v20 = vld [vmem:[#allocation10 + $0xa90] sm:$0xff]   ;;  %v17627_v4 = vld [vmem:[#allocation10 + $0xb48] sm:$0xff]   ;;  %v9397_v21 = vmax.f32 %v22284_v57, %v16307_v3 }
 0x6e4   :  { %v15617_v63 = vpop.f32.mrf.mxu1  ;;  %15886 = vmatprep.subr.bf16.mxu1 %v17593_v50  ;;  %v17610_v62 = vld [vmem:[#allocation10 + $0xa50] sm:$0xff]   ;;  %v17629_v3 = vld [vmem:[#allocation10 + $0xac8] sm:$0xff]  }
 0x6e5   :  { %v15618_v48 = vadd.f32 %v15617_v63, %v15616_v10  ;;  %15871 = vmatpush3.bf16.msra.mxu0 %v17592_v42  ;;  %v17611_v10 = vld [vmem:[#allocation10 + $0xb30] sm:$0xff]  }
 0x6e6   :  { %v15619_v19 = vpop.f32.mrf.mxu1  ;;  %15872 = vmatprep.subr.bf16.mxu0 %v17595_v28  ;;  %v17613_v28 = vld [vmem:[#allocation10 + $0xa88] sm:$0xff]  }
 0x6e7   :  { %v21118_v47 = vadd.f32 %v15618_v48, %v15596_v43  ;;  %15887 = vmatpush3.bf16.msra.mxu1 %v17594_v32  ;;  %v9384_v43 = vmax.f32 %v22272_v35, %v9190_v45  ;;  %v12977_v32 = vpack.c.bf16 %v12970_v36, %v12970_v36  ;;  %v9192_v48 = vsel %vm9117_vm5, %v16277_v46, %v16291_v24  ;;  %v17616_v46 = vld [vmem:[#allocation10 + $0xae8] sm:$0xff]   ;;  %v17619_v35 = vld [vmem:[#allocation10 + $0xb20] sm:$0xff]  }
 0x6e8   :  { %v15620_v54 = vpop.f32.mrf.mxu1  ;;  %15888 = vmatprep.subr.bf16.mxu1 %v17597_v0  ;;  %v17612_v0 = vld [vmem:[#allocation10 + $0xaf0] sm:$0xff]   ;;  %v9194_v36 = vsel %vm9117_vm5, %v16292_v12, %v16301_v29 }
 0x6e9   :  { %15873 = vmatpush3.bf16.msra.mxu0 %v17596_v11  ;;  %v12965_v23 = vmax.f32 %v9384_v43, %v9391_v8  ;;  %v17614_v11 = vld [vmem:[#allocation10 + $0xa48] sm:$0xff]   ;;  %v17620_v8 = vld [vmem:[#allocation10 + $0xae0] sm:$0xff]  }
 0x6ea   :  { %15874 = vmatprep.subr.bf16.mxu0 %v17599_v39  ;;  %v22280_v39 = vmax.f32 %v22279_v38, 0.0 }
 0x6eb   :  { %15889 = vmatpush3.bf16.msra.mxu1 %v17598_v41  ;;  %v12972_v50 = vpack.c.bf16 %v12965_v23, %v12965_v23  ;;  %v17615_v41 = vld [vmem:[#allocation10 + $0xb28] sm:$0xff]  }
 0x6ec   :  { %15890 = vmatprep.subr.bf16.mxu1 %v17601_v37  ;;  %v9393_v59 = vmax.f32 %v22280_v39, %v9198_v6  ;;  %v22281_v37 = vld [vmem:[#allocation121_spill] sm:$0xff]  ;;  %v22285_v23 = vld [vmem:[#allocation54_spill] sm:$0xff] }
 0x6ed   :  { %15875 = vmatpush3.bf16.msra.mxu0 %v17600_v5  ;;  %v22282_v17 = vmax.f32 %v22281_v37, 0.0 }
 0x6ee   :  { %15876 = vmatprep.subr.bf16.mxu0 %v17603_v61  ;;  %v17623_v61 = vld [vmem:[#allocation10 + $0xad8] sm:$0xff]  }
 0x6ef   :  { %15891 = vmatpush3.bf16.msra.mxu1 %v17602_v60  ;;  %v9386_v5 = vmax.f32 %v22282_v17, %v9192_v48  ;;  %v17622_v60 = vld [vmem:[#allocation10 + $0xb18] sm:$0xff]  }
 0x6f0   :  { %15892 = vmatprep.subr.bf16.mxu1 %v17605_v58  ;;  %v17628_v58 = vld [vmem:[#allocation10 + $0xb08] sm:$0xff]  }
 0x6f1   :  { %15877 = vmatpush3.bf16.msra.mxu0 %v17604_v52  ;;  %v12967_v43 = vmax.f32 %v9386_v5, %v9393_v59  ;;  %v9200_v52 = vsel %vm9117_vm5, %v16297_v27, %v16306_v13  ;;  %v17630_v27 = vld [vmem:[#allocation10 + $0xb40] sm:$0xff]  }
 0x6f2   :  { %v11173_v2 = vpop.f32.mrf.mxu1  ;;  %15906 = vmatprep.subr.bf16.mxu0 %v17607_v15  ;;  %v17631_v13 = vld [vmem:[#allocation10 + $0xb00] sm:$0xff]  }
 0x6f3   :  { %15893 = vmatpush3.bf16.msra.mxu1 %v17606_v56  ;;  %v22286_v56 = vmax.f32 %v22285_v23, 0.0 }
 0x6f4   :  { %v15976_v42 = vpop.f32.mrf.mxu1  ;;  %15894 = vmatprep.subr.bf16.mxu1 %v17609_v20  ;;  %v15638_v9 = vpop.f32.mrf.mxu0  ;;  %13432 = vmatmul.mubr.bf16.vlgmr.msra.gmra.mxu0 %v12972_v50  ;;  %v22288_v20 = vmax.f32 %v22287_v53, 0.0 }
 0x6f5   :  { %15907 = vmatpush3.bf16.msra.mxu0 %v17608_v51  ;;  %13511 = vmatprep.mubr.bf16.mxu0 %v12977_v32  ;;  %v9390_v15 = vmax.f32 %v22286_v56, %v16302_v25  ;;  %v22289_v51 = vld [vmem:[#allocation56_spill] sm:$0xff] }
 0x6f6   :  { %v11176_v63 = vpop.f32.mrf.mxu1  ;;  %v15639_v19 = vpop.f32.mrf.mxu0  ;;  %15908 = vmatprep.subr.bf16.mxu0 %v17611_v10  ;;  %v9395_v34 = vmax.f32 %v22288_v20, %v9200_v52  ;;  %v22290_v25 = vmax.f32 %v22289_v51, 0.0 }
 0x6f7   :  { %15895 = vmatpush3.bf16.msra.mxu1 %v17610_v62  ;;  %v15640_v49 = vadd.f32 %v15639_v19, %v15638_v9 }
 0x6f8   :  { %v15977_v45 = vpop.f32.mrf.mxu1  ;;  %15896 = vmatprep.subr.bf16.mxu1 %v17613_v28  ;;  %v15641_v54 = vpop.f32.mrf.mxu0  ;;  %v9388_v50 = vmax.f32 %v22290_v25, %v9194_v36 }
 0x6f9   :  { %v11134_v55 = vadd.f32 %v15640_v49, %v21118_v47  ;;  %15909 = vmatpush3.bf16.msra.mxu0 %v17612_v0  ;;  %v12974_v47 = vpack.c.bf16 %v12967_v43, %v12967_v43  ;;  %v17634_v43 = vld [vmem:[%s21236_s7 + $0x30] sm:$0xff]  }
 0x6fa   :  { %v15642_v24 = vpop.f32.mrf.mxu0  ;;  %15910 = vmatprep.subr.bf16.mxu0 %v17615_v41  ;;  %v12969_v16 = vmax.f32 %v9388_v50, %v9395_v34 }
 0x6fb   :  { %15897 = vmatpush3.bf16.msra.mxu1 %v17614_v11  ;;  %v11174_v40 = vadd.f32 %v11173_v2, %v11134_v55  ;;  %v12971_v2 = vmax.f32 %v9390_v15, %v9397_v21  ;;  %v17633_v24 = vld [vmem:[%s21236_s7 + $0x38] sm:$0xff]   ;;  %v17638_v21 = vld [vmem:[%s21236_s7 + $0x10] sm:$0xff]  }
 0x6fc   :  { %15898 = vmatprep.subr.bf16.mxu1 %v17617_v7  ;;  %v12976_v62 = vpack.c.bf16 %v12969_v16, %v12969_v16 }
 0x6fd   :  { %v21160_v26 = vadd.f32 %v11174_v40, %v21055_v22  ;;  %15911 = vmatpush3.bf16.msra.mxu0 %v17616_v46  ;;  %v17626_v22 = vld [vmem:[#allocation10 + $0xad0] sm:$0xff]   ;;  %v12978_v12 = vpack.c.bf16 %v12971_v2, %v12971_v2 }
 0x6fe   :  { %15912 = vmatprep.subr.bf16.mxu0 %v17619_v35 }
 0x6ff   :  { %15899 = vmatpush3.bf16.msra.mxu1 %v17618_v14 }
 0x700   :  { %16014 = vmatprep.subr.bf16.mxu1 %v22154_v33 }
 0x701   :  { %15913 = vmatpush3.bf16.msra.mxu0 %v17620_v8 }
 0x702   :  { %13472 = vmatmul.mubr.bf16.vlgmr.msra.gmra.mxu1 %v12974_v47  ;;  %15914 = vmatprep.subr.bf16.mxu0 %v17622_v60 }
 0x703   :  { %16015 = vmatpush3.bf16.msra.mxu1 %v17621_v1  ;;  %16022 = vmatprep.mubr.msk.bf16.mxu1 %vm17813_vm6, %v22154_v33  ;;  %v17636_v1 = vld [vmem:[%s21236_s7 + $0x20] sm:$0xff]  }
 0x704   :  { %16016 = vmatprep.subr.bf16.mxu1 %v22154_v33 }
 0x705   :  { %15915 = vmatpush3.bf16.msra.mxu0 %v17623_v61 }
 0x706   :  { %15916 = vmatprep.subr.bf16.mxu0 %v17625_v44 }
 0x707   :  { %16017 = vmatpush3.bf16.msra.mxu1 %v17624_v18 }
 0x708   :  { %16018 = vmatprep.subr.bf16.mxu1 %v22154_v33 }
 0x709   :  { %15917 = vmatpush3.bf16.msra.mxu0 %v17626_v22 }
 0x70a   :  { %15918 = vmatprep.subr.bf16.mxu0 %v17628_v58  ;;  %v17637_v58 = vld [vmem:[%s21236_s7 + $0x18] sm:$0xff]  }
 0x70b   :  { %16019 = vmatpush3.bf16.msra.mxu1 %v17627_v4 }
 0x70c   :  { %16020 = vmatprep.subr.bf16.mxu1 %v22154_v33 }
 0x70d   :  { %15919 = vmatpush3.bf16.msra.mxu0 %v17629_v3  ;;  %v17639_v3 = vld [vmem:[%s21236_s7 + $0x8] sm:$0xff]  }
 0x70e   :  { %15920 = vmatprep.subr.bf16.mxu0 %v17631_v13 }
 0x70f   :  { %16021 = vmatpush3.bf16.msra.mxu1 %v17630_v27  ;;  %v17640_v27 = vld [vmem:[%s21236_s7] sm:$0xff]  }
 0x710   :  { %16026 = vmatprep.subr.bf16.mxu1 %v22154_v33 }
 0x711   :  { %15921 = vmatpush3.bf16.msra.mxu0 %v17632_v31 }
 0x712   :  { %v15665_v29 = vpop.f32.mrf.mxu1  ;;  %16023 = vmatmul.mubr.msk.bf16.vlgmr.msra.gmra.mxu1 %vm9117_vm5, %v12978_v12 }
 0x713   :  { %16042 = vmatprep.mubr.msk.bf16.mxu1 %vm17813_vm6, %v22154_v33  ;;  %16027 = vmatpush3.bf16.msra.mxu1 %v17633_v24 }
 0x714   :  { %v15666_v10 = vpop.f32.mrf.mxu1  ;;  %v15687_v32 = vpop.f32.mrf.mxu0  ;;  %13512 = vmatmul.mubr.bf16.vlgmr.msra.gmra.mxu0 %v12976_v62  ;;  %16028 = vmatprep.subr.bf16.mxu1 %v22154_v33 }
 0x715   :  { %v15667_v42 = vadd.f32 %v15666_v10, %v15665_v29 }
 0x716   :  { %v15668_v28 = vpop.f32.mrf.mxu1  ;;  %v15688_v6 = vpop.f32.mrf.mxu0 }
 0x717   :  { %v15689_v9 = vadd.f32 %v15688_v6, %v15687_v32  ;;  %16029 = vmatpush3.bf16.msra.mxu1 %v17634_v43 }
 0x718   :  { %v15669_v63 = vpop.f32.mrf.mxu1  ;;  %v15690_v0 = vpop.f32.mrf.mxu0  ;;  %16030 = vmatprep.subr.bf16.mxu1 %v22154_v33 }
 0x719   :  { %v11689_v48 = vadd.f32 %v15689_v9, %v15667_v42 }
 0x71a   :  { %v15691_v19 = vpop.f32.mrf.mxu0 }
 0x724   :  { %v11768_v11 = vpop.f32.mrf.mxu0 }
 0x726   :  { %v15988_v41 = vpop.f32.mrf.mxu0 }
 0x728   :  { %v11771_v38 = vpop.f32.mrf.mxu0 }
 0x72a   :  { %v15989_v39 = vpop.f32.mrf.mxu0 }
 0x732   :  { %v15709_v59 = vpop.f32.mrf.mxu1 }
 0x734   :  { %v15710_v49 = vpop.f32.mrf.mxu1 }
 0x735   :  { %v15711_v45 = vadd.f32 %v15710_v49, %v15709_v59 }
 0x736   :  { %v15712_v7 = vpop.f32.mrf.mxu1 }
 0x737   :  { %v11729_v54 = vadd.f32 %v15711_v45, %v11689_v48 }
 0x738   :  { %v15713_v37 = vpop.f32.mrf.mxu1 }
 0x739   :  { %v11769_v17 = vadd.f32 %v11768_v11, %v11729_v54 }
 0x73b   :  { %v11774_v5 = vadd.f32 %v11769_v17, %v21160_v26  ;;  %v17635_v26 = vld [vmem:[%s21236_s7 + $0x28] sm:$0xff]  }
 0x73c   :  { %16031 = vmatpush3.bf16.msra.mxu1 %v17635_v26 }
 0x73d   :  { %16032 = vmatprep.subr.bf16.mxu1 %v22154_v33 }
 0x740   :  { %16033 = vmatpush3.bf16.msra.mxu1 %v17636_v1 }
 0x741   :  { %16034 = vmatprep.subr.bf16.mxu1 %v22154_v33 }
 0x744   :  { %v15736_v55 = vpop.f32.mrf.mxu0  ;;  %16035 = vmatpush3.bf16.msra.mxu1 %v17637_v58  ;;  %v17814_v58 = vmov 0  }
 0x745   :  { %16036 = vmatprep.subr.bf16.mxu1 %v22154_v33  ;;  %16308 = vset.pattern.permute.xlu0 %v17814_v58 }
 0x746   :  { %v15737_v46 = vpop.f32.mrf.mxu0 }
 0x747   :  { %v15738_v14 = vadd.f32 %v15737_v46, %v15736_v55 }
 0x748   :  { %v15739_v35 = vpop.f32.mrf.mxu0  ;;  %16037 = vmatpush3.bf16.msra.mxu1 %v17638_v21 }
 0x749   :  { %16038 = vmatprep.subr.bf16.mxu1 %v22154_v33 }
 0x74a   :  { %v15740_v40 = vpop.f32.mrf.mxu0 }
 0x74c   :  { %16039 = vmatpush3.bf16.msra.mxu1 %v17639_v3 }
 0x74d   :  { %16040 = vmatprep.subr.bf16.mxu1 %v22154_v33 }
 0x750   :  { %16041 = vmatpush3.bf16.msra.mxu1 %v17640_v27 }
 0x752   :  { %v15758_v8 = vpop.f32.mrf.mxu1 }
 0x754   :  { %v15759_v60 = vpop.f32.mrf.mxu1 }
 0x755   :  { %v15760_v47 = vadd.f32 %v15759_v60, %v15758_v8 }
 0x756   :  { %v15761_v61 = vpop.f32.mrf.mxu1 }
 0x757   :  { %v12284_v18 = vadd.f32 %v15760_v47, %v15738_v14  ;;  %v14930_v61 = vld [vmem:[#allocation11] ss:$0 sm:$0xff] }
 0x758   :  { %v15762_v44 = vpop.f32.mrf.mxu1 }
 0x762   :  { %v12363_v22 = vpop.f32.mrf.mxu1 }
 0x764   :  { %v16000_v4 = vpop.f32.mrf.mxu1  ;;  %v15780_v30 = vpop.f32.mrf.mxu0 }
 0x766   :  { %v12366_v57 = vpop.f32.mrf.mxu1  ;;  %v15781_v52 = vpop.f32.mrf.mxu0 }
 0x767   :  { %v15782_v23 = vadd.f32 %v15781_v52, %v15780_v30  ;;  %v14931_v30 = vld [vmem:[#allocation13] ss:$0 sm:$0xff] }
 0x768   :  { %v16001_v56 = vpop.f32.mrf.mxu1  ;;  %v15783_v15 = vpop.f32.mrf.mxu0 }
 0x769   :  { %v12324_v36 = vadd.f32 %v15782_v23, %v12284_v18 }
 0x76a   :  { %v15784_v53 = vpop.f32.mrf.mxu0 }
 0x76b   :  { %v12364_v20 = vadd.f32 %v12363_v22, %v12324_v36 }
 0x76d   :  { %v12369_v34 = vadd.f32 %v12364_v20, %v11774_v5 }
 0x782   :  { %v15807_v13 = vpop.f32.mrf.mxu1 }
 0x784   :  { %v15808_v2 = vpop.f32.mrf.mxu1  ;;  %v15829_v25 = vpop.f32.mrf.mxu0 }
 0x785   :  { %v15809_v51 = vadd.f32 %v15808_v2, %v15807_v13 }
 0x786   :  { %v15810_v50 = vpop.f32.mrf.mxu1  ;;  %v15830_v31 = vpop.f32.mrf.mxu0 }
 0x787   :  { %v15831_v16 = vadd.f32 %v15830_v31, %v15829_v25 }
 0x788   :  { %v15811_v12 = vpop.f32.mrf.mxu1  ;;  %v15832_v29 = vpop.f32.mrf.mxu0 }
 0x789   :  { %v12879_v62 = vadd.f32 %v15831_v16, %v15809_v51 }
 0x78a   :  { %v15833_v10 = vpop.f32.mrf.mxu0 }
 0x794   :  { %v12958_v42 = vpop.f32.mrf.mxu0 }
 0x796   :  { %v16012_v32 = vpop.f32.mrf.mxu0 }
 0x798   :  { %v12961_v28 = vpop.f32.mrf.mxu0 }
 0x79a   :  { %v16013_v6 = vpop.f32.mrf.mxu0 }
 0x7a2   :  { %v15851_v9 = vpop.f32.mrf.mxu1 }
 0x7a4   :  { %v15852_v63 = vpop.f32.mrf.mxu1 }
 0x7a5   :  { %v15853_v0 = vadd.f32 %v15852_v63, %v15851_v9 }
 0x7a6   :  { %v15854_v33 = vpop.f32.mrf.mxu1 }
 0x7a7   :  { %v12919_v48 = vadd.f32 %v15853_v0, %v12879_v62 }
 0x7a8   :  { %v15855_v19 = vpop.f32.mrf.mxu1 }
 0x7a9   :  { %v12959_v11 = vadd.f32 %v12958_v42, %v12919_v48 }
 0x7ab   :  { %v12964_v41 = vadd.f32 %v12959_v11, %v12369_v34 }
 0x7b4   :  { %v15878_v38 = vpop.f32.mrf.mxu0 }
 0x7b6   :  { %v15879_v39 = vpop.f32.mrf.mxu0 }
 0x7b7   :  { %v15880_v24 = vadd.f32 %v15879_v39, %v15878_v38 }
 0x7b8   :  { %v15881_v59 = vpop.f32.mrf.mxu0 }
 0x7ba   :  { %v15882_v49 = vpop.f32.mrf.mxu0 }
 0x7c2   :  { %v15900_v45 = vpop.f32.mrf.mxu1 }
 0x7c4   :  { %v15901_v7 = vpop.f32.mrf.mxu1 }
 0x7c5   :  { %v15902_v5 = vadd.f32 %v15901_v7, %v15900_v45 }
 0x7c6   :  { %v15903_v54 = vpop.f32.mrf.mxu1 }
 0x7c7   :  { %v13474_v43 = vadd.f32 %v15902_v5, %v15880_v24 }
 0x7c8   :  { %v15904_v37 = vpop.f32.mrf.mxu1 }
 0x7d2   :  { %v13553_v17 = vpop.f32.mrf.mxu1 }
 0x7d4   :  { %v16024_v55 = vpop.f32.mrf.mxu1  ;;  %v15922_v46 = vpop.f32.mrf.mxu0 }
 0x7d6   :  { %v13556_v14 = vpop.f32.mrf.mxu1  ;;  %v15923_v35 = vpop.f32.mrf.mxu0 }
 0x7d7   :  { %v15924_v40 = vadd.f32 %v15923_v35, %v15922_v46 }
 0x7d8   :  { %v16025_v26 = vpop.f32.mrf.mxu1  ;;  %v15925_v8 = vpop.f32.mrf.mxu0 }
 0x7d9   :  { %v13514_v1 = vadd.f32 %v15924_v40, %v13474_v43 }
 0x7da   :  { %v15926_v60 = vpop.f32.mrf.mxu0 }
 0x7db   :  { %v13554_v47 = vadd.f32 %v13553_v17, %v13514_v1 }
 0x7dd   :  { %v13559_v18 = vadd.f32 %v13554_v47, %v12964_v41 }
 0x7df   :  { %v13567_v44 = vadd.f32 %v14930_v61, %v13559_v18 }
 0x7e1   :  { %v13568_v22 = vmax.f32 %v13567_v44, 0.0 }
 0x7e3   :  { %v13569_v4 = vpack.c.bf16 %v13568_v22, %v13568_v22 }
 0x7e5   :  { %16043 = vmatmul.mubr.bf16.vlgmr.msra.gmra.mxu1 %v13569_v4 }
 0x8a5   :  { %v13675_v57 = vpop.f32.mrf.mxu1 }
 0x8a6   :  { %v13676_v21 = vadd.f32 %v14931_v30, %v13675_v57 }
 0x8a7   :  { %v16044_v52 = vpop.f32.mrf.mxu1 }
 0x8a8   :  { %13682 = vst.msk [vmem:[%s21238_s9] sm:$0xff] %vm13681_vm7, %v13676_v21 }
 0x8a9   :  { %v13678_v23 = vpop.f32.mrf.mxu1 }
 0x8ab   :  { %v16045_v56 = vpop.f32.mrf.mxu1 }
 0x8ac   :  { %13687 = vsyncpa [#allocation4], 1 }
 0x8ad   :  { %13688 = vsyncpa [#allocation6], 1 }
 0x8ae   :  { %13689 = vsyncpa [#allocation9], 1 }
 0x8af   :  { %13690 = vsyncpa [#allocation12], 1 }

</bundles_post_ra>
